<compile_context>
chip_gen: v5e
topology: v5e:2x2
jax: 0.10.0
libtpu: 0.0.40
codegen_flags: <defaults>
</compile_context>

<pallas_src>
import numpy as np
import jax
import jax.numpy as jnp
from jax.experimental import pallas as pl
from jax.experimental.pallas import tpu as pltpu

_VMEM = pl.BlockSpec(memory_space=pltpu.MemorySpace.VMEM)


# --------------------------- packed-constant layout ---------------------------

def _layout(blocks):
    offs, r = {}, 0
    for name, nr, nc in blocks:
        offs[name] = (r, nr, nc)
        r += ((nr + 7) // 8) * 8          # each block starts on an 8-row boundary
    return offs, r


_MAIN_W = 400                             # conv weights + fc1 weight
_MAIN_BLOCKS = [
    ('wl1', 8, 392), ('wl2', 16, 200), ('wc1', 16, 200), ('wc2', 24, 400),
    ('wf1', 56, 384),
]
_SEL_W = 144                              # pool selections, small weights, biases
_SEL_BLOCKS = [
    ('sl1', 581, 121), ('sm1', 639, 144), ('sl2', 61, 9), ('sm2', 79, 16),
    ('w1l', 32, 144), ('wf2', 10, 56), ('w2', 6, 32), ('cs3', 24, 32),
    ('bl1', 8, 1), ('bl2', 16, 1), ('bc1', 16, 1), ('bc2', 24, 1),
    ('b1l', 32, 1), ('b2', 6, 1), ('bf1', 56, 1), ('bf2', 10, 1),
]
_MAIN_OFFS, _MAIN_ROWS = _layout(_MAIN_BLOCKS)
_SEL_OFFS, _SEL_ROWS = _layout(_SEL_BLOCKS)


# --------------------------------- the kernel --------------------------------

def _net2_kernel(x_cf_ref, x_rows_ref, base_ref, cmain_ref, csel_ref, o_ref):
    f32 = jnp.float32

    def mweight(name):
        r, nr, nc = _MAIN_OFFS[name]
        return cmain_ref[r:r + nr, 0:nc]

    def sblock(name):
        r, nr, nc = _SEL_OFFS[name]
        return csel_ref[r:r + nr, 0:nc]

    def conv(x, wname, bname, W, k):
        # 'Valid' stride-1 conv on a channels-flat (Cin_p, H*W) image as ONE
        # im2col matmul.  Valid output lanes are q = y*W + x (x < Wo); other
        # lanes hold garbage that the next pool selection never reads.
        C, HW = x.shape
        H = HW // W
        Ho, Wo = H - k + 1, W - k + 1
        L = (Ho - 1) * W + Wo
        stack = jnp.concatenate(
            [x[:, i * W + j:i * W + j + L] for i in range(k) for j in range(k)],
            axis=0)                                            # (k*k*Cin_p, L)
        return (jnp.dot(mweight(wname), stack, preferred_element_type=f32)
                + sblock(bname))                               # (Cout_p, L)

    def pool2_relu(y, W, sname):
        # 2x2 / stride-2 max-pool (floor) + lane compaction + ReLU.  ReLU is
        # applied after the 0/1 one-hot selection matmul (exact commutation).
        r, nr, nc = _SEL_OFFS[sname]
        L = y.shape[1]
        hm = jnp.maximum(y[:, :L - 1], y[:, 1:])
        vm = jnp.maximum(hm[:, :L - 1 - W], hm[:, W:])         # (C_p, L-1-W)
        full = jnp.dot(vm, csel_ref[r:r + nr, :],              # full-width RHS:
                       preferred_element_type=f32)             # padded cols are 0
        return jnp.maximum(full[:, :nc], 0.0)                  # (C_p, M)

    def flatten_cols(p):
        # (C_p, M) -> (M*C_p, 1) column, index m*C_p + c, at value level
        # (no scratch round-trip); matches the m-major FC weight packing.
        C_p, M = p.shape
        return jnp.concatenate([p[:, m:m + 1] for m in range(M)], axis=0)

    # ---------------- localization branch ----------------
    x_cf = x_cf_ref[...]                                       # (8, 784)
    l1 = conv(x_cf, 'wl1', 'bl1', W=28, k=7)                   # (8, 610)
    p1 = pool2_relu(l1, 28, 'sl1')                             # (8, 121)
    l2 = conv(p1, 'wl2', 'bl2', W=11, k=5)                     # (16, 73)
    p2 = pool2_relu(l2, 11, 'sl2')                             # (16, 9)
    xs_col = flatten_cols(p2)                                  # (144, 1)
    h_loc = jnp.maximum(
        jnp.dot(sblock('w1l'), xs_col, preferred_element_type=f32)
        + sblock('b1l'), 0.0)                                  # (32, 1)
    theta = (jnp.dot(sblock('w2'), h_loc, preferred_element_type=f32)
             + sblock('b2'))                                   # (6, 1)

    # ------------- affine grid (align_corners=False) -------------
    prod = theta * base_ref[0:6, :]                            # (6, 784)
    gx = prod[0:1, :] + prod[1:2, :] + prod[2:3, :]            # (1, 784)
    gy = prod[3:4, :] + prod[4:5, :] + prod[5:6, :]            # (1, 784)

    # ---- bilinear grid_sample (zeros padding, gather-free, per channel) ----
    ix = ((gx + 1.0) * 28.0 - 1.0) * 0.5
    iy = ((gy + 1.0) * 28.0 - 1.0) * 0.5
    ix0 = jnp.floor(ix)
    iy0 = jnp.floor(iy)
    wx1 = ix - ix0
    wy1 = iy - iy0
    rows = jax.lax.broadcasted_iota(jnp.int32, (32, 784), 0).astype(f32)
    # exact one-hot corner weights; out-of-range corners match no row -> 0
    wxt = (jnp.where(rows == ix0, 1.0 - wx1, 0.0)
           + jnp.where(rows == ix0 + 1.0, wx1, 0.0))           # (32, 784)
    wyt = (jnp.where(rows == iy0, 1.0 - wy1, 0.0)
           + jnp.where(rows == iy0 + 1.0, wy1, 0.0))           # (32, 784)

    cs_r0, _, _ = _SEL_OFFS['cs3']
    sampled = jnp.zeros((8, 784), f32)
    for c in range(3):                                         # real channels only
        t_c = jnp.dot(x_rows_ref[c * 32:(c + 1) * 32, :], wxt,
                      preferred_element_type=f32)              # (32, 784)
        cs_c = csel_ref[cs_r0 + 8 * c:cs_r0 + 8 * (c + 1), 0:32]
        sampled = sampled + jnp.dot(cs_c, t_c * wyt,
                                    preferred_element_type=f32)  # -> row c

    # ---------------- main branch ----------------
    c1 = conv(sampled, 'wc1', 'bc1', W=28, k=5)                # (16, 668)
    q1 = pool2_relu(c1, 28, 'sm1')                             # (16, 144)
    c2 = conv(q1, 'wc2', 'bc2', W=12, k=5)                     # (24, 92)
    # TODO(synk): conv2_drop (Dropout2d) and F.dropout are identity (eval mode).
    q2 = pool2_relu(c2, 12, 'sm2')                             # (24, 16)
    xm_col = flatten_cols(q2)                                  # (384, 1)
    h = jnp.maximum(
        jnp.dot(mweight('wf1'), xm_col, preferred_element_type=f32)
        + sblock('bf1'), 0.0)                                  # (56, 1)
    logits = (jnp.dot(sblock('wf2'), h, preferred_element_type=f32)
              + sblock('bf2'))                                 # (10, 1)

    # log_softmax over the 10 classes (sublane axis)
    m = jnp.max(logits, axis=0, keepdims=True)
    s = logits - m
    lse = jnp.log(jnp.sum(jnp.exp(s), axis=0, keepdims=True))
    o_ref[...] = s - lse


# ------------------------------ host-side packing ----------------------------

def _pack_conv_full(w, b, cin_p, cout_p):
    """(Cout,Cin,k,k),(Cout,) -> ((Cout_p, k*k*Cin_p), (Cout_p, 1)), zero padded.
    Column index (i*k + j)*Cin_p + c matches the in-kernel im2col stack order."""
    w = np.asarray(w, np.float32)
    b = np.asarray(b, np.float32)
    cout, cin, kh, kw = w.shape
    wp = np.zeros((cout_p, cin_p, kh, kw), np.float32)
    wp[:cout, :cin] = w
    wfull = np.transpose(wp, (0, 2, 3, 1)).reshape(cout_p, kh * kw * cin_p)
    bp = np.zeros((cout_p, 1), np.float32)
    bp[:cout, 0] = b
    return wfull, bp


def _pack_fc_flat(w, b, C, M, c_p, out_p):
    """(out, C*M) [o, c*M+m] -> (out_p, M*c_p) [o, m*c_p+c], zero padded."""
    w = np.asarray(w, np.float32)
    out = w.shape[0]
    w3 = np.zeros((out_p, c_p, M), np.float32)
    w3[:out, :C, :] = w.reshape(out, C, M)
    wperm = np.transpose(w3, (0, 2, 1)).reshape(out_p, M * c_p)
    bp = np.zeros((out_p, 1), np.float32)
    bp[:out, 0] = np.asarray(b, np.float32)
    return wperm, bp


def _pool_sel(W, Ho, Wo):
    """0/1 selection matrix: source lane (2y)*W + 2x -> packed lane y*Wp + x."""
    Hp, Wp = Ho // 2, Wo // 2
    vm_w = (Ho - 1) * W + Wo - 1 - W
    s = np.zeros((vm_w, Hp * Wp), np.float32)
    for y in range(Hp):
        for x in range(Wp):
            s[(2 * y) * W + 2 * x, y * Wp + x] = 1.0
    return s


def _pack_buffer(blocks, offs, rows, width, arrays):
    buf = np.zeros((rows, width), np.float32)
    for name, nr, nc in blocks:
        a = np.asarray(arrays[name], np.float32)
        assert a.shape == (nr, nc), (name, a.shape, (nr, nc))
        r = offs[name][0]
        buf[r:r + nr, :nc] = a
    return buf


def pack_params(params):
    """All layout permutations / constants, done once on the host."""
    main_arrays, sel_arrays = {}, {}

    main_arrays['wl1'], sel_arrays['bl1'] = _pack_conv_full(
        params['loc_conv1_w'], params['loc_conv1_b'], 8, 8)
    main_arrays['wl2'], sel_arrays['bl2'] = _pack_conv_full(
        params['loc_conv2_w'], params['loc_conv2_b'], 8, 16)
    main_arrays['wc1'], sel_arrays['bc1'] = _pack_conv_full(
        params['conv1_w'], params['conv1_b'], 8, 16)
    main_arrays['wc2'], sel_arrays['bc2'] = _pack_conv_full(
        params['conv2_w'], params['conv2_b'], 16, 24)
    sel_arrays['w1l'], sel_arrays['b1l'] = _pack_fc_flat(
        params['fc_loc1_w'], params['fc_loc1_b'], C=10, M=9, c_p=16, out_p=32)
    main_arrays['wf1'], sel_arrays['bf1'] = _pack_fc_flat(
        params['fc1_w'], params['fc1_b'], C=20, M=16, c_p=24, out_p=56)

    sel_arrays['w2'] = np.asarray(params['fc_loc2_w'], np.float32)       # (6, 32)
    sel_arrays['b2'] = np.asarray(params['fc_loc2_b'], np.float32).reshape(6, 1)
    wf2 = np.zeros((10, 56), np.float32)
    wf2[:, :50] = np.asarray(params['fc2_w'], np.float32)
    sel_arrays['wf2'] = wf2
    sel_arrays['bf2'] = np.asarray(params['fc2_b'], np.float32).reshape(10, 1)

    sel_arrays['sl1'] = _pool_sel(28, 22, 22)    # (581, 121)
    sel_arrays['sl2'] = _pool_sel(11, 7, 7)      # (61, 9)
    sel_arrays['sm1'] = _pool_sel(28, 24, 24)    # (639, 144)
    sel_arrays['sm2'] = _pool_sel(12, 8, 8)      # (79, 16)

    cs3 = np.zeros((24, 32), np.float32)         # per-channel row-sum/placement
    for c in range(3):
        cs3[c * 8 + c, 0:28] = 1.0
    sel_arrays['cs3'] = cs3

    # duplicated affine-grid basis [x; y; 1; x; y; 1] (align_corners=False)
    coord = (2.0 * np.arange(28, dtype=np.float32) + 1.0) / 28.0 - 1.0
    xn = np.tile(coord[None, :], (28, 1)).reshape(-1)    # x = q % 28
    yn = np.tile(coord[:, None], (1, 28)).reshape(-1)    # y = q // 28
    ones = np.ones(784, np.float32)
    basebuf = np.zeros((8, 784), np.float32)
    basebuf[:6] = np.stack([xn, yn, ones, xn, yn, ones], axis=0)

    return {
        'base': jnp.asarray(basebuf),
        'cmain': jnp.asarray(_pack_buffer(_MAIN_BLOCKS, _MAIN_OFFS, _MAIN_ROWS,
                                          _MAIN_W, main_arrays)),
        'csel': jnp.asarray(_pack_buffer(_SEL_BLOCKS, _SEL_OFFS, _SEL_ROWS,
                                         _SEL_W, sel_arrays)),
    }


# ------------------------------- parameters ----------------------------------

def init_params(key):
    def conv_init(k, cout, cin, ksz):
        k1, k2 = jax.random.split(k)
        bound = 1.0 / (cin * ksz * ksz) ** 0.5
        w = jax.random.uniform(k1, (cout, cin, ksz, ksz), jnp.float32, -bound, bound)
        b = jax.random.uniform(k2, (cout,), jnp.float32, -bound, bound)
        return w, b

    def lin_init(k, out_f, in_f):
        k1, k2 = jax.random.split(k)
        bound = 1.0 / in_f ** 0.5
        w = jax.random.uniform(k1, (out_f, in_f), jnp.float32, -bound, bound)
        b = jax.random.uniform(k2, (out_f,), jnp.float32, -bound, bound)
        return w, b

    keys = jax.random.split(key, 8)
    p = {}
    p['conv1_w'], p['conv1_b'] = conv_init(keys[0], 10, 3, 5)
    p['conv2_w'], p['conv2_b'] = conv_init(keys[1], 20, 10, 5)
    p['fc1_w'], p['fc1_b'] = lin_init(keys[2], 50, 320)
    p['fc2_w'], p['fc2_b'] = lin_init(keys[3], 10, 50)
    p['loc_conv1_w'], p['loc_conv1_b'] = conv_init(keys[4], 8, 3, 7)
    p['loc_conv2_w'], p['loc_conv2_b'] = conv_init(keys[5], 10, 8, 5)
    p['fc_loc1_w'], p['fc_loc1_b'] = lin_init(keys[6], 32, 90)
    # fc_loc[2]: weight zeroed, bias = identity affine transform (as in __init__)
    p['fc_loc2_w'] = jnp.zeros((6, 32), jnp.float32)
    p['fc_loc2_b'] = jnp.array([1.0, 0.0, 0.0, 0.0, 1.0, 0.0], jnp.float32)
    return p


# --------------------------------- forward -----------------------------------

def net2_forward(packed, x):
    n, c, h, w = x.shape
    assert (n, c, h, w) == (1, 3, 28, 28), "Net2 requires a (1, 3, 28, 28) input"
    x_img = x.reshape(3, 28, 28).astype(jnp.float32)
    # channels-flat layout (padded to 8 channels), lane q = y*28 + x
    x_cf = jnp.zeros((8, 784), jnp.float32).at[:3].set(x_img.reshape(3, 784))
    # (c*32 + y, x) layout (zero-padded to 32x32) for the bilinear sampler
    x_rows = jnp.pad(x_img, ((0, 0), (0, 4), (0, 4))).reshape(96, 32)

    out = pl.pallas_call(
        _net2_kernel,
        out_shape=jax.ShapeDtypeStruct((10, 1), jnp.float32),
        in_specs=[_VMEM] * 5,
        out_specs=_VMEM,
    )(x_cf, x_rows, packed['base'], packed['cmain'], packed['csel'])
    return out.reshape(1, 10)


# -------------------------- pure-JAX reference check --------------------------

def _ref_forward_identity_theta(params, x):
    # With fc_loc[2] at its constructor value (zero weight, identity bias) the
    # STN resample is exactly the identity, so the full forward reduces to the
    # main branch applied directly to x.
    def conv(h, w, b):
        y = jax.lax.conv_general_dilated(
            h, w, (1, 1), 'VALID', dimension_numbers=('NCHW', 'OIHW', 'NCHW'))
        return y + b.reshape(1, -1, 1, 1)

    def pool2(h):
        return jax.lax.reduce_window(h, -jnp.inf, jax.lax.max,
                                     (1, 1, 2, 2), (1, 1, 2, 2), 'VALID')

    h = jax.nn.relu(pool2(conv(x, params['conv1_w'], params['conv1_b'])))
    h = jax.nn.relu(pool2(conv(h, params['conv2_w'], params['conv2_b'])))
    h = h.reshape(1, 320)
    h = jax.nn.relu(h @ params['fc1_w'].T + params['fc1_b'])
    h = h @ params['fc2_w'].T + params['fc2_b']
    return jax.nn.log_softmax(h, axis=1)


# ----------------------------------- main -------------------------------------

if __name__ == "__main__":
    key = jax.random.PRNGKey(0)
    k_params, k_x = jax.random.split(key)
    params = init_params(k_params)
    packed = pack_params(params)
    x = jax.random.normal(k_x, (1, 3, 28, 28), jnp.float32)

    fwd = jax.jit(net2_forward)
    out = jax.block_until_ready(fwd(packed, x))

    assert out.shape == (1, 10)
    assert bool(jnp.all(jnp.isfinite(out)))
    # log_softmax rows should exponentiate-sum to ~1
    assert jnp.allclose(jnp.sum(jnp.exp(out), axis=1), 1.0, atol=1e-3)
    # with the constructor's identity theta, the kernel must match the plain
    # main-branch reference on the raw input
    ref = _ref_forward_identity_theta(params, x)
    assert jnp.allclose(out, ref, atol=1e-2, rtol=1e-2), (np.asarray(out),
                                                          np.asarray(ref))
    print("KERNEL_OK")
</pallas_src>

<mosaic_0001>
module attributes {stable_mosaic.version = 11 : i64} {
  func.func @_net2_kernel(%arg0: memref<8x784xf32, #tpu.memory_space<vmem>>, %arg1: memref<96x32xf32, #tpu.memory_space<vmem>>, %arg2: memref<8x784xf32, #tpu.memory_space<vmem>>, %arg3: memref<120x400xf32, #tpu.memory_space<vmem>>, %arg4: memref<1624x144xf32, #tpu.memory_space<vmem>>, %arg5: memref<10x1xf32, #tpu.memory_space<vmem>>) attributes {dimension_semantics = [], scalar_prefetch = 0 : i64, scratch_operands = 0 : i64, tpu.core_type = #tpu.core_type<tc>} {
    %c0 = arith.constant 0 : index
    %c0_0 = arith.constant 0 : index
    %0 = vector.load %arg0[%c0, %c0_0] : memref<8x784xf32, #tpu.memory_space<vmem>>, vector<8x784xf32>
    %1 = vector.extract_strided_slice %0 {offsets = [0, 0], sizes = [8, 610], strides = [1, 1]} : vector<8x784xf32> to vector<8x610xf32>
    %2 = vector.extract_strided_slice %0 {offsets = [0, 1], sizes = [8, 610], strides = [1, 1]} : vector<8x784xf32> to vector<8x610xf32>
    %3 = vector.extract_strided_slice %0 {offsets = [0, 2], sizes = [8, 610], strides = [1, 1]} : vector<8x784xf32> to vector<8x610xf32>
    %4 = vector.extract_strided_slice %0 {offsets = [0, 3], sizes = [8, 610], strides = [1, 1]} : vector<8x784xf32> to vector<8x610xf32>
    %5 = vector.extract_strided_slice %0 {offsets = [0, 4], sizes = [8, 610], strides = [1, 1]} : vector<8x784xf32> to vector<8x610xf32>
    %6 = vector.extract_strided_slice %0 {offsets = [0, 5], sizes = [8, 610], strides = [1, 1]} : vector<8x784xf32> to vector<8x610xf32>
    %7 = vector.extract_strided_slice %0 {offsets = [0, 6], sizes = [8, 610], strides = [1, 1]} : vector<8x784xf32> to vector<8x610xf32>
    %8 = vector.extract_strided_slice %0 {offsets = [0, 28], sizes = [8, 610], strides = [1, 1]} : vector<8x784xf32> to vector<8x610xf32>
    %9 = vector.extract_strided_slice %0 {offsets = [0, 29], sizes = [8, 610], strides = [1, 1]} : vector<8x784xf32> to vector<8x610xf32>
    %10 = vector.extract_strided_slice %0 {offsets = [0, 30], sizes = [8, 610], strides = [1, 1]} : vector<8x784xf32> to vector<8x610xf32>
    %11 = vector.extract_strided_slice %0 {offsets = [0, 31], sizes = [8, 610], strides = [1, 1]} : vector<8x784xf32> to vector<8x610xf32>
    %12 = vector.extract_strided_slice %0 {offsets = [0, 32], sizes = [8, 610], strides = [1, 1]} : vector<8x784xf32> to vector<8x610xf32>
    %13 = vector.extract_strided_slice %0 {offsets = [0, 33], sizes = [8, 610], strides = [1, 1]} : vector<8x784xf32> to vector<8x610xf32>
    %14 = vector.extract_strided_slice %0 {offsets = [0, 34], sizes = [8, 610], strides = [1, 1]} : vector<8x784xf32> to vector<8x610xf32>
    %15 = vector.extract_strided_slice %0 {offsets = [0, 56], sizes = [8, 610], strides = [1, 1]} : vector<8x784xf32> to vector<8x610xf32>
    %16 = vector.extract_strided_slice %0 {offsets = [0, 57], sizes = [8, 610], strides = [1, 1]} : vector<8x784xf32> to vector<8x610xf32>
    %17 = vector.extract_strided_slice %0 {offsets = [0, 58], sizes = [8, 610], strides = [1, 1]} : vector<8x784xf32> to vector<8x610xf32>
    %18 = vector.extract_strided_slice %0 {offsets = [0, 59], sizes = [8, 610], strides = [1, 1]} : vector<8x784xf32> to vector<8x610xf32>
    %19 = vector.extract_strided_slice %0 {offsets = [0, 60], sizes = [8, 610], strides = [1, 1]} : vector<8x784xf32> to vector<8x610xf32>
    %20 = vector.extract_strided_slice %0 {offsets = [0, 61], sizes = [8, 610], strides = [1, 1]} : vector<8x784xf32> to vector<8x610xf32>
    %21 = vector.extract_strided_slice %0 {offsets = [0, 62], sizes = [8, 610], strides = [1, 1]} : vector<8x784xf32> to vector<8x610xf32>
    %22 = vector.extract_strided_slice %0 {offsets = [0, 84], sizes = [8, 610], strides = [1, 1]} : vector<8x784xf32> to vector<8x610xf32>
    %23 = vector.extract_strided_slice %0 {offsets = [0, 85], sizes = [8, 610], strides = [1, 1]} : vector<8x784xf32> to vector<8x610xf32>
    %24 = vector.extract_strided_slice %0 {offsets = [0, 86], sizes = [8, 610], strides = [1, 1]} : vector<8x784xf32> to vector<8x610xf32>
    %25 = vector.extract_strided_slice %0 {offsets = [0, 87], sizes = [8, 610], strides = [1, 1]} : vector<8x784xf32> to vector<8x610xf32>
    %26 = vector.extract_strided_slice %0 {offsets = [0, 88], sizes = [8, 610], strides = [1, 1]} : vector<8x784xf32> to vector<8x610xf32>
    %27 = vector.extract_strided_slice %0 {offsets = [0, 89], sizes = [8, 610], strides = [1, 1]} : vector<8x784xf32> to vector<8x610xf32>
    %28 = vector.extract_strided_slice %0 {offsets = [0, 90], sizes = [8, 610], strides = [1, 1]} : vector<8x784xf32> to vector<8x610xf32>
    %29 = vector.extract_strided_slice %0 {offsets = [0, 112], sizes = [8, 610], strides = [1, 1]} : vector<8x784xf32> to vector<8x610xf32>
    %30 = vector.extract_strided_slice %0 {offsets = [0, 113], sizes = [8, 610], strides = [1, 1]} : vector<8x784xf32> to vector<8x610xf32>
    %31 = vector.extract_strided_slice %0 {offsets = [0, 114], sizes = [8, 610], strides = [1, 1]} : vector<8x784xf32> to vector<8x610xf32>
    %32 = vector.extract_strided_slice %0 {offsets = [0, 115], sizes = [8, 610], strides = [1, 1]} : vector<8x784xf32> to vector<8x610xf32>
    %33 = vector.extract_strided_slice %0 {offsets = [0, 116], sizes = [8, 610], strides = [1, 1]} : vector<8x784xf32> to vector<8x610xf32>
    %34 = vector.extract_strided_slice %0 {offsets = [0, 117], sizes = [8, 610], strides = [1, 1]} : vector<8x784xf32> to vector<8x610xf32>
    %35 = vector.extract_strided_slice %0 {offsets = [0, 118], sizes = [8, 610], strides = [1, 1]} : vector<8x784xf32> to vector<8x610xf32>
    %36 = vector.extract_strided_slice %0 {offsets = [0, 140], sizes = [8, 610], strides = [1, 1]} : vector<8x784xf32> to vector<8x610xf32>
    %37 = vector.extract_strided_slice %0 {offsets = [0, 141], sizes = [8, 610], strides = [1, 1]} : vector<8x784xf32> to vector<8x610xf32>
    %38 = vector.extract_strided_slice %0 {offsets = [0, 142], sizes = [8, 610], strides = [1, 1]} : vector<8x784xf32> to vector<8x610xf32>
    %39 = vector.extract_strided_slice %0 {offsets = [0, 143], sizes = [8, 610], strides = [1, 1]} : vector<8x784xf32> to vector<8x610xf32>
    %40 = vector.extract_strided_slice %0 {offsets = [0, 144], sizes = [8, 610], strides = [1, 1]} : vector<8x784xf32> to vector<8x610xf32>
    %41 = vector.extract_strided_slice %0 {offsets = [0, 145], sizes = [8, 610], strides = [1, 1]} : vector<8x784xf32> to vector<8x610xf32>
    %42 = vector.extract_strided_slice %0 {offsets = [0, 146], sizes = [8, 610], strides = [1, 1]} : vector<8x784xf32> to vector<8x610xf32>
    %43 = vector.extract_strided_slice %0 {offsets = [0, 168], sizes = [8, 610], strides = [1, 1]} : vector<8x784xf32> to vector<8x610xf32>
    %44 = vector.extract_strided_slice %0 {offsets = [0, 169], sizes = [8, 610], strides = [1, 1]} : vector<8x784xf32> to vector<8x610xf32>
    %45 = vector.extract_strided_slice %0 {offsets = [0, 170], sizes = [8, 610], strides = [1, 1]} : vector<8x784xf32> to vector<8x610xf32>
    %46 = vector.extract_strided_slice %0 {offsets = [0, 171], sizes = [8, 610], strides = [1, 1]} : vector<8x784xf32> to vector<8x610xf32>
    %47 = vector.extract_strided_slice %0 {offsets = [0, 172], sizes = [8, 610], strides = [1, 1]} : vector<8x784xf32> to vector<8x610xf32>
    %48 = vector.extract_strided_slice %0 {offsets = [0, 173], sizes = [8, 610], strides = [1, 1]} : vector<8x784xf32> to vector<8x610xf32>
    %49 = vector.extract_strided_slice %0 {offsets = [0, 174], sizes = [8, 610], strides = [1, 1]} : vector<8x784xf32> to vector<8x610xf32>
    %50 = tpu.concatenate %1, %2, %3, %4, %5, %6, %7, %8, %9, %10, %11, %12, %13, %14, %15, %16 in 0 : vector<8x610xf32>, vector<8x610xf32>, vector<8x610xf32>, vector<8x610xf32>, vector<8x610xf32>, vector<8x610xf32>, vector<8x610xf32>, vector<8x610xf32>, vector<8x610xf32>, vector<8x610xf32>, vector<8x610xf32>, vector<8x610xf32>, vector<8x610xf32>, vector<8x610xf32>, vector<8x610xf32>, vector<8x610xf32> -> vector<128x610xf32>
    %51 = tpu.concatenate %17, %18, %19, %20, %21, %22, %23, %24, %25, %26, %27, %28, %29, %30, %31, %32 in 0 : vector<8x610xf32>, vector<8x610xf32>, vector<8x610xf32>, vector<8x610xf32>, vector<8x610xf32>, vector<8x610xf32>, vector<8x610xf32>, vector<8x610xf32>, vector<8x610xf32>, vector<8x610xf32>, vector<8x610xf32>, vector<8x610xf32>, vector<8x610xf32>, vector<8x610xf32>, vector<8x610xf32>, vector<8x610xf32> -> vector<128x610xf32>
    %52 = tpu.concatenate %33, %34, %35, %36, %37, %38, %39, %40, %41, %42, %43, %44, %45, %46, %47, %48 in 0 : vector<8x610xf32>, vector<8x610xf32>, vector<8x610xf32>, vector<8x610xf32>, vector<8x610xf32>, vector<8x610xf32>, vector<8x610xf32>, vector<8x610xf32>, vector<8x610xf32>, vector<8x610xf32>, vector<8x610xf32>, vector<8x610xf32>, vector<8x610xf32>, vector<8x610xf32>, vector<8x610xf32>, vector<8x610xf32> -> vector<128x610xf32>
    %53 = tpu.concatenate %50, %51, %52, %49 in 0 : vector<128x610xf32>, vector<128x610xf32>, vector<128x610xf32>, vector<8x610xf32> -> vector<392x610xf32>
    %c0_1 = arith.constant 0 : index
    %c0_2 = arith.constant 0 : index
    %54 = vector.load %arg3[%c0_1, %c0_2] : memref<120x400xf32, #tpu.memory_space<vmem>>, vector<8x392xf32>
    %cst = arith.constant dense<0.000000e+00> : vector<8x610xf32>
    %55 = tpu.matmul %54, %53, %cst {dimension_numbers = #tpu.dot_dimension_numbers<[1], [0], [0], [1], [0, 0, 1, 1], [], []>} : vector<8x392xf32>, vector<392x610xf32>, vector<8x610xf32> -> vector<8x610xf32>
    %c1448 = arith.constant 1448 : index
    %c0_3 = arith.constant 0 : index
    %56 = vector.load %arg4[%c1448, %c0_3] : memref<1624x144xf32, #tpu.memory_space<vmem>>, vector<8x1xf32>
    %57 = vector.broadcast %56 : vector<8x1xf32> to vector<8x610xf32>
    %58 = arith.addf %55, %57 : vector<8x610xf32>
    %59 = vector.extract_strided_slice %58 {offsets = [0, 0], sizes = [8, 609], strides = [1, 1]} : vector<8x610xf32> to vector<8x609xf32>
    %60 = vector.extract_strided_slice %58 {offsets = [0, 1], sizes = [8, 609], strides = [1, 1]} : vector<8x610xf32> to vector<8x609xf32>
    %61 = arith.maximumf %59, %60 : vector<8x609xf32>
    %62 = vector.extract_strided_slice %61 {offsets = [0, 0], sizes = [8, 581], strides = [1, 1]} : vector<8x609xf32> to vector<8x581xf32>
    %63 = vector.extract_strided_slice %61 {offsets = [0, 28], sizes = [8, 581], strides = [1, 1]} : vector<8x609xf32> to vector<8x581xf32>
    %64 = arith.maximumf %62, %63 : vector<8x581xf32>
    %c0_4 = arith.constant 0 : index
    %c0_5 = arith.constant 0 : index
    %65 = vector.load %arg4[%c0_4, %c0_5] : memref<1624x144xf32, #tpu.memory_space<vmem>>, vector<581x144xf32>
    %cst_6 = arith.constant dense<0.000000e+00> : vector<8x144xf32>
    %66 = tpu.matmul %64, %65, %cst_6 {dimension_numbers = #tpu.dot_dimension_numbers<[1], [0], [0], [1], [0, 0, 1, 1], [], []>} : vector<8x581xf32>, vector<581x144xf32>, vector<8x144xf32> -> vector<8x144xf32>
    %67 = vector.extract_strided_slice %66 {offsets = [0, 0], sizes = [8, 121], strides = [1, 1]} : vector<8x144xf32> to vector<8x121xf32>
    %cst_7 = arith.constant 0.000000e+00 : f32
    %68 = vector.broadcast %cst_7 : f32 to vector<8x121xf32>
    %69 = arith.maximumf %67, %68 : vector<8x121xf32>
    %70 = vector.extract_strided_slice %69 {offsets = [0, 0], sizes = [8, 73], strides = [1, 1]} : vector<8x121xf32> to vector<8x73xf32>
    %71 = vector.extract_strided_slice %69 {offsets = [0, 1], sizes = [8, 73], strides = [1, 1]} : vector<8x121xf32> to vector<8x73xf32>
    %72 = vector.extract_strided_slice %69 {offsets = [0, 2], sizes = [8, 73], strides = [1, 1]} : vector<8x121xf32> to vector<8x73xf32>
    %73 = vector.extract_strided_slice %69 {offsets = [0, 3], sizes = [8, 73], strides = [1, 1]} : vector<8x121xf32> to vector<8x73xf32>
    %74 = vector.extract_strided_slice %69 {offsets = [0, 4], sizes = [8, 73], strides = [1, 1]} : vector<8x121xf32> to vector<8x73xf32>
    %75 = vector.extract_strided_slice %69 {offsets = [0, 11], sizes = [8, 73], strides = [1, 1]} : vector<8x121xf32> to vector<8x73xf32>
    %76 = vector.extract_strided_slice %69 {offsets = [0, 12], sizes = [8, 73], strides = [1, 1]} : vector<8x121xf32> to vector<8x73xf32>
    %77 = vector.extract_strided_slice %69 {offsets = [0, 13], sizes = [8, 73], strides = [1, 1]} : vector<8x121xf32> to vector<8x73xf32>
    %78 = vector.extract_strided_slice %69 {offsets = [0, 14], sizes = [8, 73], strides = [1, 1]} : vector<8x121xf32> to vector<8x73xf32>
    %79 = vector.extract_strided_slice %69 {offsets = [0, 15], sizes = [8, 73], strides = [1, 1]} : vector<8x121xf32> to vector<8x73xf32>
    %80 = vector.extract_strided_slice %69 {offsets = [0, 22], sizes = [8, 73], strides = [1, 1]} : vector<8x121xf32> to vector<8x73xf32>
    %81 = vector.extract_strided_slice %69 {offsets = [0, 23], sizes = [8, 73], strides = [1, 1]} : vector<8x121xf32> to vector<8x73xf32>
    %82 = vector.extract_strided_slice %69 {offsets = [0, 24], sizes = [8, 73], strides = [1, 1]} : vector<8x121xf32> to vector<8x73xf32>
    %83 = vector.extract_strided_slice %69 {offsets = [0, 25], sizes = [8, 73], strides = [1, 1]} : vector<8x121xf32> to vector<8x73xf32>
    %84 = vector.extract_strided_slice %69 {offsets = [0, 26], sizes = [8, 73], strides = [1, 1]} : vector<8x121xf32> to vector<8x73xf32>
    %85 = vector.extract_strided_slice %69 {offsets = [0, 33], sizes = [8, 73], strides = [1, 1]} : vector<8x121xf32> to vector<8x73xf32>
    %86 = vector.extract_strided_slice %69 {offsets = [0, 34], sizes = [8, 73], strides = [1, 1]} : vector<8x121xf32> to vector<8x73xf32>
    %87 = vector.extract_strided_slice %69 {offsets = [0, 35], sizes = [8, 73], strides = [1, 1]} : vector<8x121xf32> to vector<8x73xf32>
    %88 = vector.extract_strided_slice %69 {offsets = [0, 36], sizes = [8, 73], strides = [1, 1]} : vector<8x121xf32> to vector<8x73xf32>
    %89 = vector.extract_strided_slice %69 {offsets = [0, 37], sizes = [8, 73], strides = [1, 1]} : vector<8x121xf32> to vector<8x73xf32>
    %90 = vector.extract_strided_slice %69 {offsets = [0, 44], sizes = [8, 73], strides = [1, 1]} : vector<8x121xf32> to vector<8x73xf32>
    %91 = vector.extract_strided_slice %69 {offsets = [0, 45], sizes = [8, 73], strides = [1, 1]} : vector<8x121xf32> to vector<8x73xf32>
    %92 = vector.extract_strided_slice %69 {offsets = [0, 46], sizes = [8, 73], strides = [1, 1]} : vector<8x121xf32> to vector<8x73xf32>
    %93 = vector.extract_strided_slice %69 {offsets = [0, 47], sizes = [8, 73], strides = [1, 1]} : vector<8x121xf32> to vector<8x73xf32>
    %94 = vector.extract_strided_slice %69 {offsets = [0, 48], sizes = [8, 73], strides = [1, 1]} : vector<8x121xf32> to vector<8x73xf32>
    %95 = tpu.concatenate %70, %71, %72, %73, %74, %75, %76, %77, %78, %79, %80, %81, %82, %83, %84, %85 in 0 : vector<8x73xf32>, vector<8x73xf32>, vector<8x73xf32>, vector<8x73xf32>, vector<8x73xf32>, vector<8x73xf32>, vector<8x73xf32>, vector<8x73xf32>, vector<8x73xf32>, vector<8x73xf32>, vector<8x73xf32>, vector<8x73xf32>, vector<8x73xf32>, vector<8x73xf32>, vector<8x73xf32>, vector<8x73xf32> -> vector<128x73xf32>
    %96 = tpu.concatenate %86, %87, %88, %89, %90, %91, %92, %93, %94 in 0 : vector<8x73xf32>, vector<8x73xf32>, vector<8x73xf32>, vector<8x73xf32>, vector<8x73xf32>, vector<8x73xf32>, vector<8x73xf32>, vector<8x73xf32>, vector<8x73xf32> -> vector<72x73xf32>
    %97 = tpu.concatenate %95, %96 in 0 : vector<128x73xf32>, vector<72x73xf32> -> vector<200x73xf32>
    %c8 = arith.constant 8 : index
    %c0_8 = arith.constant 0 : index
    %98 = vector.load %arg3[%c8, %c0_8] : memref<120x400xf32, #tpu.memory_space<vmem>>, vector<16x200xf32>
    %cst_9 = arith.constant dense<0.000000e+00> : vector<16x73xf32>
    %99 = tpu.matmul %98, %97, %cst_9 {dimension_numbers = #tpu.dot_dimension_numbers<[1], [0], [0], [1], [0, 0, 1, 1], [], []>} : vector<16x200xf32>, vector<200x73xf32>, vector<16x73xf32> -> vector<16x73xf32>
    %c1456 = arith.constant 1456 : index
    %c0_10 = arith.constant 0 : index
    %100 = vector.load %arg4[%c1456, %c0_10] : memref<1624x144xf32, #tpu.memory_space<vmem>>, vector<16x1xf32>
    %101 = vector.broadcast %100 : vector<16x1xf32> to vector<16x73xf32>
    %102 = arith.addf %99, %101 : vector<16x73xf32>
    %103 = vector.extract_strided_slice %102 {offsets = [0, 0], sizes = [16, 72], strides = [1, 1]} : vector<16x73xf32> to vector<16x72xf32>
    %104 = vector.extract_strided_slice %102 {offsets = [0, 1], sizes = [16, 72], strides = [1, 1]} : vector<16x73xf32> to vector<16x72xf32>
    %105 = arith.maximumf %103, %104 : vector<16x72xf32>
    %106 = vector.extract_strided_slice %105 {offsets = [0, 0], sizes = [16, 61], strides = [1, 1]} : vector<16x72xf32> to vector<16x61xf32>
    %107 = vector.extract_strided_slice %105 {offsets = [0, 11], sizes = [16, 61], strides = [1, 1]} : vector<16x72xf32> to vector<16x61xf32>
    %108 = arith.maximumf %106, %107 : vector<16x61xf32>
    %c1224 = arith.constant 1224 : index
    %c0_11 = arith.constant 0 : index
    %109 = vector.load %arg4[%c1224, %c0_11] : memref<1624x144xf32, #tpu.memory_space<vmem>>, vector<61x144xf32>
    %cst_12 = arith.constant dense<0.000000e+00> : vector<16x144xf32>
    %110 = tpu.matmul %108, %109, %cst_12 {dimension_numbers = #tpu.dot_dimension_numbers<[1], [0], [0], [1], [0, 0, 1, 1], [], []>} : vector<16x61xf32>, vector<61x144xf32>, vector<16x144xf32> -> vector<16x144xf32>
    %111 = vector.extract_strided_slice %110 {offsets = [0, 0], sizes = [16, 9], strides = [1, 1]} : vector<16x144xf32> to vector<16x9xf32>
    %cst_13 = arith.constant 0.000000e+00 : f32
    %112 = vector.broadcast %cst_13 : f32 to vector<16x9xf32>
    %113 = arith.maximumf %111, %112 : vector<16x9xf32>
    %114 = vector.extract_strided_slice %113 {offsets = [0, 0], sizes = [16, 1], strides = [1, 1]} : vector<16x9xf32> to vector<16x1xf32>
    %115 = vector.extract_strided_slice %113 {offsets = [0, 1], sizes = [16, 1], strides = [1, 1]} : vector<16x9xf32> to vector<16x1xf32>
    %116 = vector.extract_strided_slice %113 {offsets = [0, 2], sizes = [16, 1], strides = [1, 1]} : vector<16x9xf32> to vector<16x1xf32>
    %117 = vector.extract_strided_slice %113 {offsets = [0, 3], sizes = [16, 1], strides = [1, 1]} : vector<16x9xf32> to vector<16x1xf32>
    %118 = vector.extract_strided_slice %113 {offsets = [0, 4], sizes = [16, 1], strides = [1, 1]} : vector<16x9xf32> to vector<16x1xf32>
    %119 = vector.extract_strided_slice %113 {offsets = [0, 5], sizes = [16, 1], strides = [1, 1]} : vector<16x9xf32> to vector<16x1xf32>
    %120 = vector.extract_strided_slice %113 {offsets = [0, 6], sizes = [16, 1], strides = [1, 1]} : vector<16x9xf32> to vector<16x1xf32>
    %121 = vector.extract_strided_slice %113 {offsets = [0, 7], sizes = [16, 1], strides = [1, 1]} : vector<16x9xf32> to vector<16x1xf32>
    %122 = vector.extract_strided_slice %113 {offsets = [0, 8], sizes = [16, 1], strides = [1, 1]} : vector<16x9xf32> to vector<16x1xf32>
    %123 = tpu.concatenate %114, %115, %116, %117, %118, %119, %120, %121, %122 in 0 : vector<16x1xf32>, vector<16x1xf32>, vector<16x1xf32>, vector<16x1xf32>, vector<16x1xf32>, vector<16x1xf32>, vector<16x1xf32>, vector<16x1xf32>, vector<16x1xf32> -> vector<144x1xf32>
    %c1368 = arith.constant 1368 : index
    %c0_14 = arith.constant 0 : index
    %124 = vector.load %arg4[%c1368, %c0_14] : memref<1624x144xf32, #tpu.memory_space<vmem>>, vector<32x144xf32>
    %cst_15 = arith.constant dense<0.000000e+00> : vector<32x1xf32>
    %125 = tpu.matmul %124, %123, %cst_15 {dimension_numbers = #tpu.dot_dimension_numbers<[1], [0], [0], [1], [0, 0, 1, 1], [], []>} : vector<32x144xf32>, vector<144x1xf32>, vector<32x1xf32> -> vector<32x1xf32>
    %c1512 = arith.constant 1512 : index
    %c0_16 = arith.constant 0 : index
    %126 = vector.load %arg4[%c1512, %c0_16] : memref<1624x144xf32, #tpu.memory_space<vmem>>, vector<32x1xf32>
    %127 = arith.addf %125, %126 : vector<32x1xf32>
    %cst_17 = arith.constant 0.000000e+00 : f32
    %128 = vector.broadcast %cst_17 : f32 to vector<32x1xf32>
    %129 = arith.maximumf %127, %128 : vector<32x1xf32>
    %c1416 = arith.constant 1416 : index
    %c0_18 = arith.constant 0 : index
    %130 = vector.load %arg4[%c1416, %c0_18] : memref<1624x144xf32, #tpu.memory_space<vmem>>, vector<6x32xf32>
    %cst_19 = arith.constant dense<0.000000e+00> : vector<6x1xf32>
    %131 = tpu.matmul %130, %129, %cst_19 {dimension_numbers = #tpu.dot_dimension_numbers<[1], [0], [0], [1], [0, 0, 1, 1], [], []>} : vector<6x32xf32>, vector<32x1xf32>, vector<6x1xf32> -> vector<6x1xf32>
    %c1544 = arith.constant 1544 : index
    %c0_20 = arith.constant 0 : index
    %132 = vector.load %arg4[%c1544, %c0_20] : memref<1624x144xf32, #tpu.memory_space<vmem>>, vector<6x1xf32>
    %133 = arith.addf %131, %132 : vector<6x1xf32>
    %c0_21 = arith.constant 0 : index
    %c0_22 = arith.constant 0 : index
    %134 = vector.load %arg2[%c0_21, %c0_22] : memref<8x784xf32, #tpu.memory_space<vmem>>, vector<6x784xf32>
    %135 = vector.broadcast %133 : vector<6x1xf32> to vector<6x784xf32>
    %136 = arith.mulf %135, %134 : vector<6x784xf32>
    %137 = vector.extract_strided_slice %136 {offsets = [0, 0], sizes = [1, 784], strides = [1, 1]} : vector<6x784xf32> to vector<1x784xf32>
    %138 = vector.extract_strided_slice %136 {offsets = [1, 0], sizes = [1, 784], strides = [1, 1]} : vector<6x784xf32> to vector<1x784xf32>
    %139 = arith.addf %137, %138 : vector<1x784xf32>
    %140 = vector.extract_strided_slice %136 {offsets = [2, 0], sizes = [1, 784], strides = [1, 1]} : vector<6x784xf32> to vector<1x784xf32>
    %141 = arith.addf %139, %140 : vector<1x784xf32>
    %142 = vector.extract_strided_slice %136 {offsets = [3, 0], sizes = [1, 784], strides = [1, 1]} : vector<6x784xf32> to vector<1x784xf32>
    %143 = vector.extract_strided_slice %136 {offsets = [4, 0], sizes = [1, 784], strides = [1, 1]} : vector<6x784xf32> to vector<1x784xf32>
    %144 = arith.addf %142, %143 : vector<1x784xf32>
    %145 = vector.extract_strided_slice %136 {offsets = [5, 0], sizes = [1, 784], strides = [1, 1]} : vector<6x784xf32> to vector<1x784xf32>
    %146 = arith.addf %144, %145 : vector<1x784xf32>
    %cst_23 = arith.constant 1.000000e+00 : f32
    %147 = vector.broadcast %cst_23 : f32 to vector<1x784xf32>
    %148 = arith.addf %141, %147 : vector<1x784xf32>
    %cst_24 = arith.constant 2.800000e+01 : f32
    %149 = vector.broadcast %cst_24 : f32 to vector<1x784xf32>
    %150 = arith.mulf %148, %149 : vector<1x784xf32>
    %cst_25 = arith.constant 1.000000e+00 : f32
    %151 = vector.broadcast %cst_25 : f32 to vector<1x784xf32>
    %152 = arith.subf %150, %151 : vector<1x784xf32>
    %cst_26 = arith.constant 5.000000e-01 : f32
    %153 = vector.broadcast %cst_26 : f32 to vector<1x784xf32>
    %154 = arith.mulf %152, %153 : vector<1x784xf32>
    %cst_27 = arith.constant 1.000000e+00 : f32
    %155 = vector.broadcast %cst_27 : f32 to vector<1x784xf32>
    %156 = arith.addf %146, %155 : vector<1x784xf32>
    %cst_28 = arith.constant 2.800000e+01 : f32
    %157 = vector.broadcast %cst_28 : f32 to vector<1x784xf32>
    %158 = arith.mulf %156, %157 : vector<1x784xf32>
    %cst_29 = arith.constant 1.000000e+00 : f32
    %159 = vector.broadcast %cst_29 : f32 to vector<1x784xf32>
    %160 = arith.subf %158, %159 : vector<1x784xf32>
    %cst_30 = arith.constant 5.000000e-01 : f32
    %161 = vector.broadcast %cst_30 : f32 to vector<1x784xf32>
    %162 = arith.mulf %160, %161 : vector<1x784xf32>
    %163 = math.floor %154 : vector<1x784xf32>
    %164 = math.floor %162 : vector<1x784xf32>
    %165 = arith.subf %154, %163 : vector<1x784xf32>
    %166 = arith.subf %162, %164 : vector<1x784xf32>
    %167 = tpu.iota {dimensions = array<i32: 0>} : vector<32x784xi32>
    %168 = arith.sitofp %167 : vector<32x784xi32> to vector<32x784xf32>
    %169 = vector.broadcast %163 : vector<1x784xf32> to vector<32x784xf32>
    %170 = arith.cmpf oeq, %168, %169 : vector<32x784xf32>
    %cst_31 = arith.constant 1.000000e+00 : f32
    %171 = vector.broadcast %cst_31 : f32 to vector<1x784xf32>
    %172 = arith.subf %171, %165 : vector<1x784xf32>
    %cst_32 = arith.constant 0.000000e+00 : f32
    %173 = vector.shape_cast %172 : vector<1x784xf32> to vector<1x784xf32>
    %174 = vector.broadcast %173 : vector<1x784xf32> to vector<32x784xf32>
    %175 = vector.broadcast %cst_32 : f32 to vector<32x784xf32>
    %176 = arith.select %170, %174, %175 : vector<32x784xi1>, vector<32x784xf32>
    %cst_33 = arith.constant 1.000000e+00 : f32
    %177 = vector.broadcast %cst_33 : f32 to vector<1x784xf32>
    %178 = arith.addf %163, %177 : vector<1x784xf32>
    %179 = vector.broadcast %178 : vector<1x784xf32> to vector<32x784xf32>
    %180 = arith.cmpf oeq, %168, %179 : vector<32x784xf32>
    %cst_34 = arith.constant 0.000000e+00 : f32
    %181 = vector.shape_cast %165 : vector<1x784xf32> to vector<1x784xf32>
    %182 = vector.broadcast %181 : vector<1x784xf32> to vector<32x784xf32>
    %183 = vector.broadcast %cst_34 : f32 to vector<32x784xf32>
    %184 = arith.select %180, %182, %183 : vector<32x784xi1>, vector<32x784xf32>
    %185 = arith.addf %176, %184 : vector<32x784xf32>
    %186 = vector.broadcast %164 : vector<1x784xf32> to vector<32x784xf32>
    %187 = arith.cmpf oeq, %168, %186 : vector<32x784xf32>
    %cst_35 = arith.constant 1.000000e+00 : f32
    %188 = vector.broadcast %cst_35 : f32 to vector<1x784xf32>
    %189 = arith.subf %188, %166 : vector<1x784xf32>
    %cst_36 = arith.constant 0.000000e+00 : f32
    %190 = vector.shape_cast %189 : vector<1x784xf32> to vector<1x784xf32>
    %191 = vector.broadcast %190 : vector<1x784xf32> to vector<32x784xf32>
    %192 = vector.broadcast %cst_36 : f32 to vector<32x784xf32>
    %193 = arith.select %187, %191, %192 : vector<32x784xi1>, vector<32x784xf32>
    %cst_37 = arith.constant 1.000000e+00 : f32
    %194 = vector.broadcast %cst_37 : f32 to vector<1x784xf32>
    %195 = arith.addf %164, %194 : vector<1x784xf32>
    %196 = vector.broadcast %195 : vector<1x784xf32> to vector<32x784xf32>
    %197 = arith.cmpf oeq, %168, %196 : vector<32x784xf32>
    %cst_38 = arith.constant 0.000000e+00 : f32
    %198 = vector.shape_cast %166 : vector<1x784xf32> to vector<1x784xf32>
    %199 = vector.broadcast %198 : vector<1x784xf32> to vector<32x784xf32>
    %200 = vector.broadcast %cst_38 : f32 to vector<32x784xf32>
    %201 = arith.select %197, %199, %200 : vector<32x784xi1>, vector<32x784xf32>
    %202 = arith.addf %193, %201 : vector<32x784xf32>
    %cst_39 = arith.constant 0.000000e+00 : f32
    %203 = vector.broadcast %cst_39 : f32 to vector<8x784xf32>
    %c0_40 = arith.constant 0 : index
    %c0_41 = arith.constant 0 : index
    %204 = vector.load %arg1[%c0_40, %c0_41] : memref<96x32xf32, #tpu.memory_space<vmem>>, vector<32x32xf32>
    %cst_42 = arith.constant dense<0.000000e+00> : vector<32x784xf32>
    %205 = tpu.matmul %204, %185, %cst_42 {dimension_numbers = #tpu.dot_dimension_numbers<[1], [0], [0], [1], [0, 0, 1, 1], [], []>} : vector<32x32xf32>, vector<32x784xf32>, vector<32x784xf32> -> vector<32x784xf32>
    %c1424 = arith.constant 1424 : index
    %c0_43 = arith.constant 0 : index
    %206 = vector.load %arg4[%c1424, %c0_43] : memref<1624x144xf32, #tpu.memory_space<vmem>>, vector<8x32xf32>
    %207 = arith.mulf %205, %202 : vector<32x784xf32>
    %cst_44 = arith.constant dense<0.000000e+00> : vector<8x784xf32>
    %208 = tpu.matmul %206, %207, %cst_44 {dimension_numbers = #tpu.dot_dimension_numbers<[1], [0], [0], [1], [0, 0, 1, 1], [], []>} : vector<8x32xf32>, vector<32x784xf32>, vector<8x784xf32> -> vector<8x784xf32>
    %209 = arith.addf %203, %208 : vector<8x784xf32>
    %c32 = arith.constant 32 : index
    %c0_45 = arith.constant 0 : index
    %210 = vector.load %arg1[%c32, %c0_45] : memref<96x32xf32, #tpu.memory_space<vmem>>, vector<32x32xf32>
    %cst_46 = arith.constant dense<0.000000e+00> : vector<32x784xf32>
    %211 = tpu.matmul %210, %185, %cst_46 {dimension_numbers = #tpu.dot_dimension_numbers<[1], [0], [0], [1], [0, 0, 1, 1], [], []>} : vector<32x32xf32>, vector<32x784xf32>, vector<32x784xf32> -> vector<32x784xf32>
    %c1432 = arith.constant 1432 : index
    %c0_47 = arith.constant 0 : index
    %212 = vector.load %arg4[%c1432, %c0_47] : memref<1624x144xf32, #tpu.memory_space<vmem>>, vector<8x32xf32>
    %213 = arith.mulf %211, %202 : vector<32x784xf32>
    %cst_48 = arith.constant dense<0.000000e+00> : vector<8x784xf32>
    %214 = tpu.matmul %212, %213, %cst_48 {dimension_numbers = #tpu.dot_dimension_numbers<[1], [0], [0], [1], [0, 0, 1, 1], [], []>} : vector<8x32xf32>, vector<32x784xf32>, vector<8x784xf32> -> vector<8x784xf32>
    %215 = arith.addf %209, %214 : vector<8x784xf32>
    %c64 = arith.constant 64 : index
    %c0_49 = arith.constant 0 : index
    %216 = vector.load %arg1[%c64, %c0_49] : memref<96x32xf32, #tpu.memory_space<vmem>>, vector<32x32xf32>
    %cst_50 = arith.constant dense<0.000000e+00> : vector<32x784xf32>
    %217 = tpu.matmul %216, %185, %cst_50 {dimension_numbers = #tpu.dot_dimension_numbers<[1], [0], [0], [1], [0, 0, 1, 1], [], []>} : vector<32x32xf32>, vector<32x784xf32>, vector<32x784xf32> -> vector<32x784xf32>
    %c1440 = arith.constant 1440 : index
    %c0_51 = arith.constant 0 : index
    %218 = vector.load %arg4[%c1440, %c0_51] : memref<1624x144xf32, #tpu.memory_space<vmem>>, vector<8x32xf32>
    %219 = arith.mulf %217, %202 : vector<32x784xf32>
    %cst_52 = arith.constant dense<0.000000e+00> : vector<8x784xf32>
    %220 = tpu.matmul %218, %219, %cst_52 {dimension_numbers = #tpu.dot_dimension_numbers<[1], [0], [0], [1], [0, 0, 1, 1], [], []>} : vector<8x32xf32>, vector<32x784xf32>, vector<8x784xf32> -> vector<8x784xf32>
    %221 = arith.addf %215, %220 : vector<8x784xf32>
    %222 = vector.extract_strided_slice %221 {offsets = [0, 0], sizes = [8, 668], strides = [1, 1]} : vector<8x784xf32> to vector<8x668xf32>
    %223 = vector.extract_strided_slice %221 {offsets = [0, 1], sizes = [8, 668], strides = [1, 1]} : vector<8x784xf32> to vector<8x668xf32>
    %224 = vector.extract_strided_slice %221 {offsets = [0, 2], sizes = [8, 668], strides = [1, 1]} : vector<8x784xf32> to vector<8x668xf32>
    %225 = vector.extract_strided_slice %221 {offsets = [0, 3], sizes = [8, 668], strides = [1, 1]} : vector<8x784xf32> to vector<8x668xf32>
    %226 = vector.extract_strided_slice %221 {offsets = [0, 4], sizes = [8, 668], strides = [1, 1]} : vector<8x784xf32> to vector<8x668xf32>
    %227 = vector.extract_strided_slice %221 {offsets = [0, 28], sizes = [8, 668], strides = [1, 1]} : vector<8x784xf32> to vector<8x668xf32>
    %228 = vector.extract_strided_slice %221 {offsets = [0, 29], sizes = [8, 668], strides = [1, 1]} : vector<8x784xf32> to vector<8x668xf32>
    %229 = vector.extract_strided_slice %221 {offsets = [0, 30], sizes = [8, 668], strides = [1, 1]} : vector<8x784xf32> to vector<8x668xf32>
    %230 = vector.extract_strided_slice %221 {offsets = [0, 31], sizes = [8, 668], strides = [1, 1]} : vector<8x784xf32> to vector<8x668xf32>
    %231 = vector.extract_strided_slice %221 {offsets = [0, 32], sizes = [8, 668], strides = [1, 1]} : vector<8x784xf32> to vector<8x668xf32>
    %232 = vector.extract_strided_slice %221 {offsets = [0, 56], sizes = [8, 668], strides = [1, 1]} : vector<8x784xf32> to vector<8x668xf32>
    %233 = vector.extract_strided_slice %221 {offsets = [0, 57], sizes = [8, 668], strides = [1, 1]} : vector<8x784xf32> to vector<8x668xf32>
    %234 = vector.extract_strided_slice %221 {offsets = [0, 58], sizes = [8, 668], strides = [1, 1]} : vector<8x784xf32> to vector<8x668xf32>
    %235 = vector.extract_strided_slice %221 {offsets = [0, 59], sizes = [8, 668], strides = [1, 1]} : vector<8x784xf32> to vector<8x668xf32>
    %236 = vector.extract_strided_slice %221 {offsets = [0, 60], sizes = [8, 668], strides = [1, 1]} : vector<8x784xf32> to vector<8x668xf32>
    %237 = vector.extract_strided_slice %221 {offsets = [0, 84], sizes = [8, 668], strides = [1, 1]} : vector<8x784xf32> to vector<8x668xf32>
    %238 = vector.extract_strided_slice %221 {offsets = [0, 85], sizes = [8, 668], strides = [1, 1]} : vector<8x784xf32> to vector<8x668xf32>
    %239 = vector.extract_strided_slice %221 {offsets = [0, 86], sizes = [8, 668], strides = [1, 1]} : vector<8x784xf32> to vector<8x668xf32>
    %240 = vector.extract_strided_slice %221 {offsets = [0, 87], sizes = [8, 668], strides = [1, 1]} : vector<8x784xf32> to vector<8x668xf32>
    %241 = vector.extract_strided_slice %221 {offsets = [0, 88], sizes = [8, 668], strides = [1, 1]} : vector<8x784xf32> to vector<8x668xf32>
    %242 = vector.extract_strided_slice %221 {offsets = [0, 112], sizes = [8, 668], strides = [1, 1]} : vector<8x784xf32> to vector<8x668xf32>
    %243 = vector.extract_strided_slice %221 {offsets = [0, 113], sizes = [8, 668], strides = [1, 1]} : vector<8x784xf32> to vector<8x668xf32>
    %244 = vector.extract_strided_slice %221 {offsets = [0, 114], sizes = [8, 668], strides = [1, 1]} : vector<8x784xf32> to vector<8x668xf32>
    %245 = vector.extract_strided_slice %221 {offsets = [0, 115], sizes = [8, 668], strides = [1, 1]} : vector<8x784xf32> to vector<8x668xf32>
    %246 = vector.extract_strided_slice %221 {offsets = [0, 116], sizes = [8, 668], strides = [1, 1]} : vector<8x784xf32> to vector<8x668xf32>
    %247 = tpu.concatenate %222, %223, %224, %225, %226, %227, %228, %229, %230, %231, %232, %233, %234, %235, %236, %237 in 0 : vector<8x668xf32>, vector<8x668xf32>, vector<8x668xf32>, vector<8x668xf32>, vector<8x668xf32>, vector<8x668xf32>, vector<8x668xf32>, vector<8x668xf32>, vector<8x668xf32>, vector<8x668xf32>, vector<8x668xf32>, vector<8x668xf32>, vector<8x668xf32>, vector<8x668xf32>, vector<8x668xf32>, vector<8x668xf32> -> vector<128x668xf32>
    %248 = tpu.concatenate %238, %239, %240, %241, %242, %243, %244, %245, %246 in 0 : vector<8x668xf32>, vector<8x668xf32>, vector<8x668xf32>, vector<8x668xf32>, vector<8x668xf32>, vector<8x668xf32>, vector<8x668xf32>, vector<8x668xf32>, vector<8x668xf32> -> vector<72x668xf32>
    %249 = tpu.concatenate %247, %248 in 0 : vector<128x668xf32>, vector<72x668xf32> -> vector<200x668xf32>
    %c24 = arith.constant 24 : index
    %c0_53 = arith.constant 0 : index
    %250 = vector.load %arg3[%c24, %c0_53] : memref<120x400xf32, #tpu.memory_space<vmem>>, vector<16x200xf32>
    %cst_54 = arith.constant dense<0.000000e+00> : vector<16x668xf32>
    %251 = tpu.matmul %250, %249, %cst_54 {dimension_numbers = #tpu.dot_dimension_numbers<[1], [0], [0], [1], [0, 0, 1, 1], [], []>} : vector<16x200xf32>, vector<200x668xf32>, vector<16x668xf32> -> vector<16x668xf32>
    %c1472 = arith.constant 1472 : index
    %c0_55 = arith.constant 0 : index
    %252 = vector.load %arg4[%c1472, %c0_55] : memref<1624x144xf32, #tpu.memory_space<vmem>>, vector<16x1xf32>
    %253 = vector.broadcast %252 : vector<16x1xf32> to vector<16x668xf32>
    %254 = arith.addf %251, %253 : vector<16x668xf32>
    %255 = vector.extract_strided_slice %254 {offsets = [0, 0], sizes = [16, 667], strides = [1, 1]} : vector<16x668xf32> to vector<16x667xf32>
    %256 = vector.extract_strided_slice %254 {offsets = [0, 1], sizes = [16, 667], strides = [1, 1]} : vector<16x668xf32> to vector<16x667xf32>
    %257 = arith.maximumf %255, %256 : vector<16x667xf32>
    %258 = vector.extract_strided_slice %257 {offsets = [0, 0], sizes = [16, 639], strides = [1, 1]} : vector<16x667xf32> to vector<16x639xf32>
    %259 = vector.extract_strided_slice %257 {offsets = [0, 28], sizes = [16, 639], strides = [1, 1]} : vector<16x667xf32> to vector<16x639xf32>
    %260 = arith.maximumf %258, %259 : vector<16x639xf32>
    %c584 = arith.constant 584 : index
    %c0_56 = arith.constant 0 : index
    %261 = vector.load %arg4[%c584, %c0_56] : memref<1624x144xf32, #tpu.memory_space<vmem>>, vector<639x144xf32>
    %cst_57 = arith.constant dense<0.000000e+00> : vector<16x144xf32>
    %262 = tpu.matmul %260, %261, %cst_57 {dimension_numbers = #tpu.dot_dimension_numbers<[1], [0], [0], [1], [0, 0, 1, 1], [], []>} : vector<16x639xf32>, vector<639x144xf32>, vector<16x144xf32> -> vector<16x144xf32>
    %cst_58 = arith.constant 0.000000e+00 : f32
    %263 = vector.broadcast %cst_58 : f32 to vector<16x144xf32>
    %264 = arith.maximumf %262, %263 : vector<16x144xf32>
    %265 = vector.extract_strided_slice %264 {offsets = [0, 0], sizes = [16, 92], strides = [1, 1]} : vector<16x144xf32> to vector<16x92xf32>
    %266 = vector.extract_strided_slice %264 {offsets = [0, 1], sizes = [16, 92], strides = [1, 1]} : vector<16x144xf32> to vector<16x92xf32>
    %267 = vector.extract_strided_slice %264 {offsets = [0, 2], sizes = [16, 92], strides = [1, 1]} : vector<16x144xf32> to vector<16x92xf32>
    %268 = vector.extract_strided_slice %264 {offsets = [0, 3], sizes = [16, 92], strides = [1, 1]} : vector<16x144xf32> to vector<16x92xf32>
    %269 = vector.extract_strided_slice %264 {offsets = [0, 4], sizes = [16, 92], strides = [1, 1]} : vector<16x144xf32> to vector<16x92xf32>
    %270 = vector.extract_strided_slice %264 {offsets = [0, 12], sizes = [16, 92], strides = [1, 1]} : vector<16x144xf32> to vector<16x92xf32>
    %271 = vector.extract_strided_slice %264 {offsets = [0, 13], sizes = [16, 92], strides = [1, 1]} : vector<16x144xf32> to vector<16x92xf32>
    %272 = vector.extract_strided_slice %264 {offsets = [0, 14], sizes = [16, 92], strides = [1, 1]} : vector<16x144xf32> to vector<16x92xf32>
    %273 = vector.extract_strided_slice %264 {offsets = [0, 15], sizes = [16, 92], strides = [1, 1]} : vector<16x144xf32> to vector<16x92xf32>
    %274 = vector.extract_strided_slice %264 {offsets = [0, 16], sizes = [16, 92], strides = [1, 1]} : vector<16x144xf32> to vector<16x92xf32>
    %275 = vector.extract_strided_slice %264 {offsets = [0, 24], sizes = [16, 92], strides = [1, 1]} : vector<16x144xf32> to vector<16x92xf32>
    %276 = vector.extract_strided_slice %264 {offsets = [0, 25], sizes = [16, 92], strides = [1, 1]} : vector<16x144xf32> to vector<16x92xf32>
    %277 = vector.extract_strided_slice %264 {offsets = [0, 26], sizes = [16, 92], strides = [1, 1]} : vector<16x144xf32> to vector<16x92xf32>
    %278 = vector.extract_strided_slice %264 {offsets = [0, 27], sizes = [16, 92], strides = [1, 1]} : vector<16x144xf32> to vector<16x92xf32>
    %279 = vector.extract_strided_slice %264 {offsets = [0, 28], sizes = [16, 92], strides = [1, 1]} : vector<16x144xf32> to vector<16x92xf32>
    %280 = vector.extract_strided_slice %264 {offsets = [0, 36], sizes = [16, 92], strides = [1, 1]} : vector<16x144xf32> to vector<16x92xf32>
    %281 = vector.extract_strided_slice %264 {offsets = [0, 37], sizes = [16, 92], strides = [1, 1]} : vector<16x144xf32> to vector<16x92xf32>
    %282 = vector.extract_strided_slice %264 {offsets = [0, 38], sizes = [16, 92], strides = [1, 1]} : vector<16x144xf32> to vector<16x92xf32>
    %283 = vector.extract_strided_slice %264 {offsets = [0, 39], sizes = [16, 92], strides = [1, 1]} : vector<16x144xf32> to vector<16x92xf32>
    %284 = vector.extract_strided_slice %264 {offsets = [0, 40], sizes = [16, 92], strides = [1, 1]} : vector<16x144xf32> to vector<16x92xf32>
    %285 = vector.extract_strided_slice %264 {offsets = [0, 48], sizes = [16, 92], strides = [1, 1]} : vector<16x144xf32> to vector<16x92xf32>
    %286 = vector.extract_strided_slice %264 {offsets = [0, 49], sizes = [16, 92], strides = [1, 1]} : vector<16x144xf32> to vector<16x92xf32>
    %287 = vector.extract_strided_slice %264 {offsets = [0, 50], sizes = [16, 92], strides = [1, 1]} : vector<16x144xf32> to vector<16x92xf32>
    %288 = vector.extract_strided_slice %264 {offsets = [0, 51], sizes = [16, 92], strides = [1, 1]} : vector<16x144xf32> to vector<16x92xf32>
    %289 = vector.extract_strided_slice %264 {offsets = [0, 52], sizes = [16, 92], strides = [1, 1]} : vector<16x144xf32> to vector<16x92xf32>
    %290 = tpu.concatenate %265, %266, %267, %268, %269, %270, %271, %272, %273, %274, %275, %276, %277, %278, %279, %280 in 0 : vector<16x92xf32>, vector<16x92xf32>, vector<16x92xf32>, vector<16x92xf32>, vector<16x92xf32>, vector<16x92xf32>, vector<16x92xf32>, vector<16x92xf32>, vector<16x92xf32>, vector<16x92xf32>, vector<16x92xf32>, vector<16x92xf32>, vector<16x92xf32>, vector<16x92xf32>, vector<16x92xf32>, vector<16x92xf32> -> vector<256x92xf32>
    %291 = tpu.concatenate %281, %282, %283, %284, %285, %286, %287, %288, %289 in 0 : vector<16x92xf32>, vector<16x92xf32>, vector<16x92xf32>, vector<16x92xf32>, vector<16x92xf32>, vector<16x92xf32>, vector<16x92xf32>, vector<16x92xf32>, vector<16x92xf32> -> vector<144x92xf32>
    %292 = tpu.concatenate %290, %291 in 0 : vector<256x92xf32>, vector<144x92xf32> -> vector<400x92xf32>
    %c40 = arith.constant 40 : index
    %c0_59 = arith.constant 0 : index
    %293 = vector.load %arg3[%c40, %c0_59] : memref<120x400xf32, #tpu.memory_space<vmem>>, vector<24x400xf32>
    %cst_60 = arith.constant dense<0.000000e+00> : vector<24x92xf32>
    %294 = tpu.matmul %293, %292, %cst_60 {dimension_numbers = #tpu.dot_dimension_numbers<[1], [0], [0], [1], [0, 0, 1, 1], [], []>} : vector<24x400xf32>, vector<400x92xf32>, vector<24x92xf32> -> vector<24x92xf32>
    %c1488 = arith.constant 1488 : index
    %c0_61 = arith.constant 0 : index
    %295 = vector.load %arg4[%c1488, %c0_61] : memref<1624x144xf32, #tpu.memory_space<vmem>>, vector<24x1xf32>
    %296 = vector.broadcast %295 : vector<24x1xf32> to vector<24x92xf32>
    %297 = arith.addf %294, %296 : vector<24x92xf32>
    %298 = vector.extract_strided_slice %297 {offsets = [0, 0], sizes = [24, 91], strides = [1, 1]} : vector<24x92xf32> to vector<24x91xf32>
    %299 = vector.extract_strided_slice %297 {offsets = [0, 1], sizes = [24, 91], strides = [1, 1]} : vector<24x92xf32> to vector<24x91xf32>
    %300 = arith.maximumf %298, %299 : vector<24x91xf32>
    %301 = vector.extract_strided_slice %300 {offsets = [0, 0], sizes = [24, 79], strides = [1, 1]} : vector<24x91xf32> to vector<24x79xf32>
    %302 = vector.extract_strided_slice %300 {offsets = [0, 12], sizes = [24, 79], strides = [1, 1]} : vector<24x91xf32> to vector<24x79xf32>
    %303 = arith.maximumf %301, %302 : vector<24x79xf32>
    %c1288 = arith.constant 1288 : index
    %c0_62 = arith.constant 0 : index
    %304 = vector.load %arg4[%c1288, %c0_62] : memref<1624x144xf32, #tpu.memory_space<vmem>>, vector<79x144xf32>
    %cst_63 = arith.constant dense<0.000000e+00> : vector<24x144xf32>
    %305 = tpu.matmul %303, %304, %cst_63 {dimension_numbers = #tpu.dot_dimension_numbers<[1], [0], [0], [1], [0, 0, 1, 1], [], []>} : vector<24x79xf32>, vector<79x144xf32>, vector<24x144xf32> -> vector<24x144xf32>
    %306 = vector.extract_strided_slice %305 {offsets = [0, 0], sizes = [24, 16], strides = [1, 1]} : vector<24x144xf32> to vector<24x16xf32>
    %cst_64 = arith.constant 0.000000e+00 : f32
    %307 = vector.broadcast %cst_64 : f32 to vector<24x16xf32>
    %308 = arith.maximumf %306, %307 : vector<24x16xf32>
    %309 = vector.extract_strided_slice %308 {offsets = [0, 0], sizes = [24, 1], strides = [1, 1]} : vector<24x16xf32> to vector<24x1xf32>
    %310 = vector.extract_strided_slice %308 {offsets = [0, 1], sizes = [24, 1], strides = [1, 1]} : vector<24x16xf32> to vector<24x1xf32>
    %311 = vector.extract_strided_slice %308 {offsets = [0, 2], sizes = [24, 1], strides = [1, 1]} : vector<24x16xf32> to vector<24x1xf32>
    %312 = vector.extract_strided_slice %308 {offsets = [0, 3], sizes = [24, 1], strides = [1, 1]} : vector<24x16xf32> to vector<24x1xf32>
    %313 = vector.extract_strided_slice %308 {offsets = [0, 4], sizes = [24, 1], strides = [1, 1]} : vector<24x16xf32> to vector<24x1xf32>
    %314 = vector.extract_strided_slice %308 {offsets = [0, 5], sizes = [24, 1], strides = [1, 1]} : vector<24x16xf32> to vector<24x1xf32>
    %315 = vector.extract_strided_slice %308 {offsets = [0, 6], sizes = [24, 1], strides = [1, 1]} : vector<24x16xf32> to vector<24x1xf32>
    %316 = vector.extract_strided_slice %308 {offsets = [0, 7], sizes = [24, 1], strides = [1, 1]} : vector<24x16xf32> to vector<24x1xf32>
    %317 = vector.extract_strided_slice %308 {offsets = [0, 8], sizes = [24, 1], strides = [1, 1]} : vector<24x16xf32> to vector<24x1xf32>
    %318 = vector.extract_strided_slice %308 {offsets = [0, 9], sizes = [24, 1], strides = [1, 1]} : vector<24x16xf32> to vector<24x1xf32>
    %319 = vector.extract_strided_slice %308 {offsets = [0, 10], sizes = [24, 1], strides = [1, 1]} : vector<24x16xf32> to vector<24x1xf32>
    %320 = vector.extract_strided_slice %308 {offsets = [0, 11], sizes = [24, 1], strides = [1, 1]} : vector<24x16xf32> to vector<24x1xf32>
    %321 = vector.extract_strided_slice %308 {offsets = [0, 12], sizes = [24, 1], strides = [1, 1]} : vector<24x16xf32> to vector<24x1xf32>
    %322 = vector.extract_strided_slice %308 {offsets = [0, 13], sizes = [24, 1], strides = [1, 1]} : vector<24x16xf32> to vector<24x1xf32>
    %323 = vector.extract_strided_slice %308 {offsets = [0, 14], sizes = [24, 1], strides = [1, 1]} : vector<24x16xf32> to vector<24x1xf32>
    %324 = vector.extract_strided_slice %308 {offsets = [0, 15], sizes = [24, 1], strides = [1, 1]} : vector<24x16xf32> to vector<24x1xf32>
    %325 = tpu.concatenate %309, %310, %311, %312, %313, %314, %315, %316, %317, %318, %319, %320, %321, %322, %323, %324 in 0 : vector<24x1xf32>, vector<24x1xf32>, vector<24x1xf32>, vector<24x1xf32>, vector<24x1xf32>, vector<24x1xf32>, vector<24x1xf32>, vector<24x1xf32>, vector<24x1xf32>, vector<24x1xf32>, vector<24x1xf32>, vector<24x1xf32>, vector<24x1xf32>, vector<24x1xf32>, vector<24x1xf32>, vector<24x1xf32> -> vector<384x1xf32>
    %c64_65 = arith.constant 64 : index
    %c0_66 = arith.constant 0 : index
    %326 = vector.load %arg3[%c64_65, %c0_66] : memref<120x400xf32, #tpu.memory_space<vmem>>, vector<56x384xf32>
    %cst_67 = arith.constant dense<0.000000e+00> : vector<56x1xf32>
    %327 = tpu.matmul %326, %325, %cst_67 {dimension_numbers = #tpu.dot_dimension_numbers<[1], [0], [0], [1], [0, 0, 1, 1], [], []>} : vector<56x384xf32>, vector<384x1xf32>, vector<56x1xf32> -> vector<56x1xf32>
    %c1552 = arith.constant 1552 : index
    %c0_68 = arith.constant 0 : index
    %328 = vector.load %arg4[%c1552, %c0_68] : memref<1624x144xf32, #tpu.memory_space<vmem>>, vector<56x1xf32>
    %329 = arith.addf %327, %328 : vector<56x1xf32>
    %cst_69 = arith.constant 0.000000e+00 : f32
    %330 = vector.broadcast %cst_69 : f32 to vector<56x1xf32>
    %331 = arith.maximumf %329, %330 : vector<56x1xf32>
    %c1400 = arith.constant 1400 : index
    %c0_70 = arith.constant 0 : index
    %332 = vector.load %arg4[%c1400, %c0_70] : memref<1624x144xf32, #tpu.memory_space<vmem>>, vector<10x56xf32>
    %cst_71 = arith.constant dense<0.000000e+00> : vector<10x1xf32>
    %333 = tpu.matmul %332, %331, %cst_71 {dimension_numbers = #tpu.dot_dimension_numbers<[1], [0], [0], [1], [0, 0, 1, 1], [], []>} : vector<10x56xf32>, vector<56x1xf32>, vector<10x1xf32> -> vector<10x1xf32>
    %c1608 = arith.constant 1608 : index
    %c0_72 = arith.constant 0 : index
    %334 = vector.load %arg4[%c1608, %c0_72] : memref<1624x144xf32, #tpu.memory_space<vmem>>, vector<10x1xf32>
    %335 = arith.addf %333, %334 : vector<10x1xf32>
    %cst_73 = arith.constant dense<0xFF800000> : vector<1xf32>
    %336 = vector.multi_reduction <maximumf>, %335, %cst_73 [0] : vector<10x1xf32> to vector<1xf32>
    %337 = vector.shape_cast %336 : vector<1xf32> to vector<1x1xf32>
    %338 = vector.broadcast %337 : vector<1x1xf32> to vector<10x1xf32>
    %339 = arith.subf %335, %338 : vector<10x1xf32>
    %340 = math.exp %339 : vector<10x1xf32>
    %cst_74 = arith.constant dense<0.000000e+00> : vector<1xf32>
    %341 = vector.multi_reduction <add>, %340, %cst_74 [0] : vector<10x1xf32> to vector<1xf32>
    %342 = vector.shape_cast %341 : vector<1xf32> to vector<1x1xf32>
    %343 = math.log %342 : vector<1x1xf32>
    %344 = vector.broadcast %343 : vector<1x1xf32> to vector<10x1xf32>
    %345 = arith.subf %339, %344 : vector<10x1xf32>
    %c0_75 = arith.constant 0 : index
    %c0_76 = arith.constant 0 : index
    %346 = vector.load %arg5[%c0_75, %c0_76] : memref<10x1xf32, #tpu.memory_space<vmem>>, vector<10x1xf32>
    tpu.vector_store %arg5[%c0_75, %c0_76], %345 {strides = array<i32>} : memref<10x1xf32, #tpu.memory_space<vmem>>, vector<10x1xf32>,
    return
  }
}

</mosaic_0001>

<bundles_post_ra>
// kernel: net2_forward.1
= control target key start
LH: loop header
LB: loop body
LE: loop exit
PB: predicated region body
PF: predicated region fallthrough
CT: control target
= control target key end

     0   :  { %s8002_s22 = smov 75   ;;  %s8003_s23 = smov 73   ;;  %vm505_vm0 = vcmask 613376   ;;  %vm340_vm1 = vcmask 580608   ;;  %vm487_vm2 = vcmask 621568   ;;  %vm317_vm3 = vcmask 588800   ;;  %s14162_s0 = inlined_call_operand.vmem [shape: f32[8,784], index: 0, kind: input, shape index: {}]   ;;  %s14163_s3 = inlined_call_operand.vmem [shape: f32[120,400], index: 3, kind: input, shape index: {}]   ;;  %s14164_s4 = inlined_call_operand.vmem [shape: f32[1624,144], index: 4, kind: input, shape index: {}]   ;;  %s14165_s2 = inlined_call_operand.vmem [shape: f32[8,784], index: 2, kind: input, shape index: {}]   ;;  %s14166_s1 = inlined_call_operand.vmem [shape: f32[96,32], index: 1, kind: input, shape index: {}]   ;;  %s14167_s5 = inlined_call_operand.vmem [shape: f32[10,1], index: 5, kind: output, shape index: {}]  }
   0x1   :  { %v21_v0 = vld [vmem:[%s14162_s0 + $0x8] sm:$0xff]  ;;  %v22_v1 = vld [vmem:[%s14162_s0 + $0x10] sm:$0xff]  ;;  %s14369_s24 = smov 71   ;;  %s8005_s25 = smov 76   ;;  %v8112_v3 = vld [vmem:[%s14162_s0 + $0x18] sm:$0xff]  ;;  %vm14231_vm4 = vcmask 596992  }
   0x2   :  { %v8083_v2 = vpack.i.bf16 %v22_v1, %v21_v0  ;;  %s8006_s26 = smov 74   ;;  %s14367_s27 = smov 72   ;;  %v8117_v4 = vld [vmem:[%s14162_s0] sm:$0xff]  ;;  %v8120_v5 = vpack.i.bf16 %v8112_v3, %v22_v1  ;;  %v8149_v9 = vld [vmem:[%s14162_s0 + $0x28] sm:$0xff]  ;;  %vm14315_vm5 = vcmask 809984   ;;  %vm202_vm6 = vcmask 801792  }
   0x3   :  { %s8008_s28 = smov 100   ;;  %s8009_s29 = smov 99   ;;  %v8123_v6 = vpack.i.bf16 %v21_v0, %v8117_v4  ;;  %v8134_v7 = vld [vmem:[%s14162_s0 + $0x20] sm:$0xff]  ;;  %v8153_v10 = vpack.i.bf16 %v8149_v9, %v8117_v4  ;;  %v8178_v12 = vpack.i.bf16 %v8149_v9, %v21_v0  ;;  %vm14208_vm7 = vcmask 605184  }
   0x4   :  { %6423 = vrot.lane.b32.xlu2 %v8083_v2, %s8002_s22  ;;  %6413 = vrot.lane.b32.xlu1 %v8083_v2, %s8003_s23  ;;  %s8010_s30 = smov 98   ;;  %s14378_s6 = smov 103   ;;  %v8138_v8 = vpack.i.bf16 %v8134_v7, %v8112_v3  ;;  %v8169_v11 = vpack.i.bf16 %v8117_v4, %v8134_v7  ;;  %v8334_v63 = vpack.i.bf16 %v8149_v9, %v8134_v7  ;;  %vm454_vm8 = vcmask 850944  }
   0x5   :  { %6403 = vrot.lane.b32.xlu0 %v8083_v2, %s14369_s24  ;;  %s8012_s7 = smov 102   ;;  %s14373_s8 = smov 101   ;;  %vm469_vm9 = vcmask 842752   ;;  %vm162_vm10 = vcmask 818176   ;;  %vm14258_vm11 = vcmask 826368   ;;  %vm14259_vm12 = vcmask 1031168  }
   0x6   :  { %s8014_s13 = smov 126   ;;  %s14377_s14 = smov 104   ;;  %vm375_vm13 = vcmask 834560   ;;  %vm14275_vm14 = vcmask 1039360   ;;  %vm14281_vm15 = vcmask 97280  }
   0x7   :  { %s8016_s17 = smov 127   ;;  %s14188_s20 = smov 96  }
   0x8   :  { %s8018_s21 = smov 97   ;;  %s8019_s9 = smov 94  }
   0x9   :  { %s8020_s10 = smov 95   ;;  %s8021_s11 = smov 12  }
   0xa   :  { %s8022_s12 = smov 124   ;;  %s8023_s15 = smov 125  }
   0xb   :  { %s14379_s16 = smov 122   ;;  %s14982_s18 = smov 72  }
   0xc   :  { %6428 = vrot.lane.b32.xlu2 %v8083_v2, %s8005_s25  ;;  %6418 = vrot.lane.b32.xlu1 %v8083_v2, %s8006_s26  ;;  %s8042_s19 = smov 43  }
   0xd   :  { %6408 = vrot.lane.b32.xlu0 %v8083_v2, %s14367_s27 }
  0x14   :  { %6443 = vrot.lane.b32.xlu2 %v8083_v2, %s8008_s28  ;;  %6438 = vrot.lane.b32.xlu1 %v8083_v2, %s8009_s29 }
  0x15   :  { %6433 = vrot.lane.b32.xlu0 %v8083_v2, %s8010_s30 }
  0x1c   :  { %6458 = vrot.lane.b32.xlu2 %v8083_v2, %s14378_s6  ;;  %6453 = vrot.lane.b32.xlu1 %v8083_v2, %s8012_s7 }
  0x1d   :  { %6448 = vrot.lane.b32.xlu0 %v8083_v2, %s14373_s8 }
  0x24   :  { %6473 = vrot.lane.b32.xlu2 %v8120_v5, %s8014_s13  ;;  %6468 = vrot.lane.b32.xlu1 %v8123_v6, %s8014_s13 }
  0x25   :  { %6463 = vrot.lane.b32.xlu0 %v8083_v2, %s14377_s14 }
  0x2c   :  { %6488 = vrot.lane.b32.xlu2 %v8138_v8, %s14369_s24  ;;  %6483 = vrot.lane.b32.xlu1 %v8120_v5, %s8016_s17 }
  0x2d   :  { %6478 = vrot.lane.b32.xlu0 %v8123_v6, %s8016_s17 }
  0x34   :  { %6503 = vrot.lane.b32.xlu2 %v8138_v8, %s8003_s23  ;;  %6498 = vrot.lane.b32.xlu1 %v8153_v10, %s14369_s24 }
  0x35   :  { %6493 = vrot.lane.b32.xlu0 %v8138_v8, %s14367_s27 }
  0x3c   :  { %6518 = vrot.lane.b32.xlu2 %v8120_v5, %s14188_s20  ;;  %6513 = vrot.lane.b32.xlu1 %v8138_v8, %s8006_s26 }
  0x3d   :  { %6508 = vrot.lane.b32.xlu0 %v8153_v10, %s14367_s27 }
  0x44   :  { %6543 = vrot.lane.b32.xlu2 %v8153_v10, %s8006_s26  ;;  %6528 = vrot.lane.b32.xlu1 %v8153_v10, %s8003_s23 }
  0x45   :  { %6523 = vrot.lane.b32.xlu0 %v8169_v11, %s14188_s20 }
  0x4c   :  { %6553 = vrot.lane.b32.xlu2 %v8178_v12, %s14188_s20  ;;  %6538 = vrot.lane.b32.xlu1 %v8169_v11, %s8018_s21  ;;  %s8025_s20 = smov 123  }
  0x4d   :  { %6533 = vrot.lane.b32.xlu0 %v8120_v5, %s8018_s21 }
  0x54   :  { %6563 = vrot.lane.b32.xlu2 %v8178_v12, %s8018_s21  ;;  %6548 = vrot.lane.b32.xlu1 %v8138_v8, %s8010_s30 }
  0x55   :  { %6578 = vrot.lane.b32.xlu0 %v8083_v2, %s8019_s9 }
  0x5c   :  { %6573 = vrot.lane.b32.xlu2 %v8153_v10, %s8010_s30  ;;  %6558 = vrot.lane.b32.xlu1 %v8138_v8, %s8009_s29 }
  0x5d   :  { %6588 = vrot.lane.b32.xlu0 %v8083_v2, %s8020_s10 }
  0x5e   :  { %v8198_v13 = vpop.permute.xlu2 %6423 }
  0x5f   :  { %v14170_v15 = vunpack.i.h.bf16 %v8198_v13  ;;  %v6425_v16 = vunpack.i.l.bf16 %v8198_v13 }
  0x61   :  { %v506_v17 = vsel %vm505_vm0, %v6425_v16, %v14170_v15 }
  0x62   :  { %v6622_v19 = vpack.i.bf16 %v506_v17, %v6425_v16 }
  0x64   :  { %6583 = vrot.lane.b32.xlu2 %v8153_v10, %s8009_s29  ;;  %6568 = vrot.lane.b32.xlu1 %v8138_v8, %s8008_s28 }
  0x66   :  { %v8204_v14 = vpop.permute.xlu2 %6428 }
  0x67   :  { %v14169_v25 = vunpack.i.h.bf16 %v8204_v14  ;;  %v6430_v26 = vunpack.i.l.bf16 %v8204_v14 }
  0x69   :  { %v488_v31 = vsel %vm487_vm2, %v6430_v26, %v14169_v25 }
  0x6a   :  { %v6632_v35 = vpack.i.bf16 %v488_v31, %v6430_v26 }
  0x6c   :  { %6593 = vrot.lane.b32.xlu1 %v8138_v8, %s14373_s8 }
  0x6e   :  { %v8213_v18 = vpop.permute.xlu2 %6443 }
  0x74   :  { %6623 = vrot.lane.b32.xlu1 %v6622_v19, %s8021_s11 }
  0x76   :  { %v8216_v20 = vpop.permute.xlu2 %6458  ;;  %v8218_v21 = vpop.permute.xlu1 %6413 }
  0x77   :  { %14477 = vst [vmem:[#allocation2_spill] sm:$0xff] %v8216_v20  ;;  %v8220_v22 = vpop.permute.xlu0 %6403  ;;  %v6416_v36 = vunpack.i.h.bf16 %v8218_v21  ;;  %v8254_v37 = vunpack.i.l.bf16 %v8218_v21  ;;  %v14172_v25 = vunpack.i.h.bf16 %v8216_v20  ;;  %v6460_v15 = vunpack.i.l.bf16 %v8216_v20 }
  0x78   :  { %v14179_v23 = vunpack.i.h.bf16 %v8220_v22  ;;  %v8224_v24 = vunpack.i.l.bf16 %v8220_v22  ;;  %v14174_v21 = vunpack.i.h.bf16 %v8213_v18 }
  0x79   :  { %v8276_v42 = vsel %vm14231_vm4, %v8254_v37, %v6416_v36 }
  0x7a   :  { %v8232_v27 = vsel %vm340_vm1, %v8224_v24, %v14179_v23  ;;  %v6607_v48 = vpack.i.bf16 %v8276_v42, %v8254_v37 }
  0x7b   :  { %v6597_v28 = vpack.i.bf16 %v8232_v27, %v8224_v24 }
  0x7c   :  { %6628 = vrot.lane.b32.xlu1 %v8138_v8, %s8012_s7 }
  0x7d   :  { %6598 = vrot.lane.b32.xlu2 %v6597_v28, %s8021_s11 }
  0x7e   :  { %v8239_v29 = vpop.permute.xlu2 %6473  ;;  %v8241_v30 = vpop.permute.xlu1 %6418 }
  0x7f   :  { %v8246_v32 = vpop.permute.xlu0 %6408  ;;  %v6421_v50 = vunpack.i.h.bf16 %v8241_v30  ;;  %v6420_v51 = vunpack.i.l.bf16 %v8241_v30 }
  0x80   :  { %v14175_v33 = vunpack.i.h.bf16 %v8246_v32  ;;  %v8250_v34 = vunpack.i.l.bf16 %v8246_v32 }
  0x81   :  { %v8316_v57 = vsel %vm14208_vm7, %v6420_v51, %v6421_v50 }
  0x82   :  { %v8260_v38 = vsel %vm317_vm3, %v8250_v34, %v14175_v33  ;;  %v6612_v59 = vpack.i.bf16 %v8316_v57, %v6420_v51 }
  0x83   :  { %v6602_v39 = vpack.i.bf16 %v8260_v38, %v8250_v34 }
  0x84   :  { %6648 = vrot.lane.b32.xlu1 %v8169_v11, %s8022_s12 }
  0x85   :  { %6633 = vrot.lane.b32.xlu2 %v6632_v35, %s8021_s11  ;;  %6603 = vrot.lane.b32.xlu0 %v6602_v39, %s8021_s11 }
  0x86   :  { %v8268_v40 = vpop.permute.xlu2 %6488  ;;  %v8270_v41 = vpop.permute.xlu1 %6438 }
  0x87   :  { %14478 = vst [vmem:[#allocation3_spill] sm:$0xff] %v8268_v40  ;;  %v14171_v43 = vunpack.i.h.bf16 %v8270_v41  ;;  %v8280_v44 = vunpack.i.l.bf16 %v8270_v41  ;;  %v8282_v45 = vpop.permute.xlu0 %6433 }
  0x88   :  { %v14173_v46 = vunpack.i.h.bf16 %v8282_v45  ;;  %v8286_v47 = vunpack.i.l.bf16 %v8282_v45 }
  0x89   :  { %v8294_v49 = vsel %vm14315_vm5, %v8280_v44, %v14171_v43 }
  0x8a   :  { %v8302_v52 = vsel %vm202_vm6, %v8286_v47, %v14173_v46  ;;  %v6662_v53 = vpack.i.bf16 %v8294_v49, %v8280_v44 }
  0x8b   :  { %v6637_v54 = vpack.i.bf16 %v8302_v52, %v8286_v47 }
  0x8c   :  { %6663 = vrot.lane.b32.xlu1 %v6662_v53, %s8021_s11 }
  0x8d   :  { %6638 = vrot.lane.b32.xlu2 %v6637_v54, %s8021_s11  ;;  %6608 = vrot.lane.b32.xlu0 %v6607_v48, %s8021_s11 }
  0x8e   :  { %v8311_v55 = vpop.permute.xlu2 %6503  ;;  %v8313_v56 = vpop.permute.xlu1 %6453 }
  0x8f   :  { %v8318_v58 = vpop.permute.xlu0 %6448 }
  0x90   :  { %v14178_v46 = vunpack.i.h.bf16 %v8318_v58 }
  0x94   :  { %6678 = vrot.lane.b32.xlu1 %v8153_v10, %s8012_s7 }
  0x95   :  { %6653 = vrot.lane.b32.xlu2 %v8153_v10, %s14373_s8  ;;  %6613 = vrot.lane.b32.xlu0 %v6612_v59, %s8021_s11  ;;  %s8029_s8 = smov 116  }
  0x96   :  { %v8326_v60 = vpop.permute.xlu2 %6518  ;;  %v8328_v61 = vpop.permute.xlu1 %6468 }
  0x97   :  { %v8330_v62 = vpop.permute.xlu0 %6463  ;;  %v6470_v33 = vunpack.i.l.bf16 %v8328_v61 }
  0x98   :  { %14479 = vst [vmem:[#allocation4_spill] sm:$0xff] %v8330_v62  ;;  %v14168_v31 = vunpack.i.h.bf16 %v8330_v62  ;;  %v6465_v35 = vunpack.i.l.bf16 %v8330_v62 }
  0x9c   :  { %6693 = vrot.lane.b32.xlu1 %v8334_v63, %s8014_s13 }
  0x9d   :  { %6668 = vrot.lane.b32.xlu2 %v8120_v5, %s8023_s15  ;;  %6618 = vrot.lane.b32.xlu0 %v8153_v10, %s8008_s28 }
  0x9e   :  { %v6544_v0 = vpop.permute.xlu2 %6543  ;;  %v8342_v1 = vpop.permute.xlu1 %6483 }
  0x9f   :  { %v6545_v16 = vunpack.i.l.bf16 %v6544_v0  ;;  %v8344_v17 = vpop.permute.xlu0 %6478  ;;  %v8421_v43 = vunpack.i.h.bf16 %v6544_v0 }
  0xa0   :  { %v6480_v23 = vunpack.i.l.bf16 %v8344_v17 }
  0xa1   :  { %v8347_v19 = vsel %vm14208_vm7, %v6545_v16, %v6420_v51  ;;  %14484 = vst [vmem:[#allocation9_spill] sm:$0xff] %v8421_v43 }
  0xa4   :  { %6708 = vrot.lane.b32.xlu1 %v8334_v63, %s8016_s17 }
  0xa5   :  { %6683 = vrot.lane.b32.xlu2 %v8138_v8, %s8005_s25  ;;  %6643 = vrot.lane.b32.xlu0 %v8120_v5, %s8022_s12  ;;  %v6505_v5 = vunpack.i.l.bf16 %v8311_v55 }
  0xa6   :  { %v8357_v10 = vpop.permute.xlu1 %6498  ;;  %v8385_v16 = vpop.permute.xlu2 %6553 }
  0xa7   :  { %14480 = vst [vmem:[#allocation5_spill] sm:$0xff] %v8357_v10  ;;  %v8359_v28 = vpop.permute.xlu0 %6493  ;;  %v6500_v30 = vunpack.i.l.bf16 %v8357_v10 }
  0xa8   :  { %14482 = vst [vmem:[#allocation7_spill] sm:$0xff] %v8385_v16 }
  0xa9   :  { %v8366_v39 = vsel %vm340_vm1, %v6500_v30, %v8224_v24  ;;  %v455_v24 = vsel %vm454_vm8, %v6465_v35, %v14168_v31  ;;  %v8390_v30 = vsel %vm14231_vm4, %v6416_v36, %v6505_v5  ;;  %v8408_v36 = vunpack.i.l.bf16 %v8213_v18 }
  0xaa   :  { %1266 = vmatpush.msra.mxu0 %v8366_v39  ;;  %v6737_v59 = vpack.i.bf16 %v455_v24, %v6465_v35  ;;  %v6506_v24 = vunpack.i.h.bf16 %v8311_v55 }
  0xac   :  { %6723 = vrot.lane.b32.xlu1 %v8083_v2, %s14379_s16 }
  0xad   :  { %6698 = vrot.lane.b32.xlu2 %v8178_v12, %s8022_s12  ;;  %6658 = vrot.lane.b32.xlu0 %v8138_v8, %s8002_s22 }
  0xae   :  { %v8379_v48 = vpop.permute.xlu1 %6513 }
  0xaf   :  { %v8381_v51 = vpop.permute.xlu0 %6508  ;;  %v14176_v53 = vunpack.i.l.bf16 %v8379_v48  ;;  %v14177_v55 = vunpack.i.h.bf16 %v8379_v48 }
  0xb0   :  { %14481 = vst [vmem:[#allocation6_spill] sm:$0xff] %v8381_v51  ;;  %v6510_v54 = vunpack.i.l.bf16 %v8381_v51 }
  0xb1   :  { %v8395_v31 = vsel %vm14208_vm7, %v6421_v50, %v14176_v53  ;;  %v470_v50 = vsel %vm469_vm9, %v6460_v15, %v14172_v25  ;;  %v14182_v25 = vunpack.i.l.bf16 %v8239_v29 }
  0xb2   :  { %v8401_v26 = vsel %vm317_vm3, %v6510_v54, %v8250_v34 }
  0xb3   :  { %1267 = vmatpush.msra.mxu0 %v8401_v26 }
  0xb4   :  { %6738 = vrot.lane.b32.xlu1 %v6737_v59, %s8021_s11 }
  0xb5   :  { %6713 = vrot.lane.b32.xlu2 %v8178_v12, %s8023_s15  ;;  %6673 = vrot.lane.b32.xlu0 %v8169_v11, %s8023_s15  ;;  %v8427_v12 = vsel %vm162_vm10, %v8408_v36, %v14174_v21  ;;  %v6727_v11 = vpack.i.bf16 %v470_v50, %v6460_v15  ;;  %v8443_v21 = vunpack.i.l.bf16 %v8318_v58  ;;  %v8445_v15 = vpop.permute.xlu2 %6563  ;;  %v6471_v50 = vunpack.i.h.bf16 %v8328_v61 }
  0xb6   :  { %v6529_v34 = vpop.permute.xlu1 %6528  ;;  %14486 = vst [vmem:[#allocation11_spill] sm:$0xff] %v8445_v15 }
  0xb7   :  { %v8419_v54 = vunpack.i.h.bf16 %v6529_v34  ;;  %v6530_v35 = vunpack.i.l.bf16 %v6529_v34  ;;  %v8460_v34 = vsel %vm14208_vm7, %v14177_v55, %v8421_v43  ;;  %v8477_v55 = vsel %vm14259_vm12, %v6470_v33, %v6471_v50 }
  0xb8   :  { %14488 = vst [vmem:[#allocation13_spill] sm:$0xff] %v8460_v34  ;;  %v6481_v33 = vunpack.i.h.bf16 %v8344_v17 }
  0xb9   :  { %14483 = vst [vmem:[#allocation8_spill] sm:$0xff] %v8419_v54  ;;  %v8431_v59 = vsel %vm14231_vm4, %v6530_v35, %v8254_v37  ;;  %v8439_v0 = vsel %vm14231_vm4, %v6506_v24, %v8419_v54  ;;  %v6687_v37 = vpack.i.bf16 %v8427_v12, %v8408_v36  ;;  %v8450_v35 = vsel %vm14231_vm4, %v6505_v5, %v6506_v24 }
  0xba   :  { %14485 = vst [vmem:[#allocation10_spill] sm:$0xff] %v8439_v0  ;;  %v8474_v24 = vsel %vm14258_vm11, %v8443_v21, %v14178_v46  ;;  %v8492_v46 = vunpack.i.l.bf16 %v8313_v56  ;;  %v8517_v43 = vsel %vm14275_vm14, %v6480_v23, %v6481_v33  ;;  %vm248_vm4 = vcmask 785408  }
  0xbb   :  { %14487 = vst [vmem:[#allocation12_spill] sm:$0xff] %v8450_v35  ;;  %v6702_v61 = vpack.i.bf16 %v8474_v24, %v8443_v21 }
  0xbc   :  { %6753 = vrot.lane.b32.xlu1 %v8138_v8, %s14378_s6  ;;  %14490 = vst [vmem:[#allocation15_spill] sm:$0xff] %v8477_v55 }
  0xbd   :  { %6728 = vrot.lane.b32.xlu2 %v6727_v11, %s8021_s11  ;;  %6688 = vrot.lane.b32.xlu0 %v6687_v37, %s8021_s11  ;;  %v8482_v11 = vsel %vm14259_vm12, %v6471_v50, %v14182_v25  ;;  %v14190_v37 = vunpack.i.h.bf16 %v8313_v56  ;;  %14493 = vst [vmem:[#allocation18_spill] sm:$0xff] %v8492_v46  ;;  %v8499_v50 = vpop.permute.xlu2 %6573 }
  0xbe   :  { %v8468_v5 = vpop.permute.xlu1 %6538  ;;  %14491 = vst [vmem:[#allocation16_spill] sm:$0xff] %v8482_v11  ;;  %v8489_v53 = vpack.i.bf16 %v8482_v11, %v8477_v55 }
  0xbf   :  { %14489 = vst [vmem:[#allocation14_spill] sm:$0xff] %v8468_v5  ;;  %v8510_v17 = vsel %vm375_vm13, %v8492_v46, %v14190_v37 }
  0xc0   :  { %14492 = vst [vmem:[#allocation17_spill] sm:$0xff] %v8489_v53  ;;  %v6717_v54 = vpack.i.bf16 %v8510_v17, %v8492_v46  ;;  %v14506_v46 = vunpack.i.h.bf16 %v8379_v48 }
  0xc1   :  { %14494 = vst [vmem:[#allocation19_spill] sm:$0xff] %v8510_v17  ;;  %v6802_v17 = vpack.i.bf16 %v8450_v35, %v8390_v30 }
  0xc2   :  { %14495 = vst [vmem:[#allocation20_spill] sm:$0xff] %v8517_v43 }
  0xc4   :  { %6768 = vrot.lane.b32.xlu1 %v8123_v6, %s8021_s11  ;;  %v8514_v6 = vpack.i.bf16 %v8117_v4, %v8112_v3  ;;  %v8540_v4 = vld [vmem:[%s14162_s0 + $0x30] sm:$0xff] }
  0xc5   :  { %6703 = vrot.lane.b32.xlu0 %v6702_v61, %s8021_s11  ;;  %6743 = vrot.lane.b32.xlu2 %v8489_v53, %s8021_s11  ;;  %v14496_v61 = vunpack.i.l.bf16 %v8342_v1  ;;  %v8542_v23 = vpop.permute.xlu2 %6583 }
  0xc6   :  { %v8504_v25 = vpop.permute.xlu1 %6548 }
  0xc7   :  { %v8522_v55 = vsel %vm14275_vm14, %v6481_v33, %v14496_v61  ;;  %v8544_v33 = vpop.permute.xlu0 %6523  ;;  %v6772_v61 = vpack.i.bf16 %v8540_v4, %v8149_v9 }
  0xc8   :  { %14497 = vst [vmem:[#allocation21_spill] sm:$0xff] %v8522_v55  ;;  %v8528_v0 = vpack.i.bf16 %v8522_v55, %v8517_v43 }
  0xc9   :  { %14499 = vst [vmem:[#allocation23_spill] sm:$0xff] %v8544_v33 }
  0xca   :  { %14498 = vst [vmem:[#allocation22_spill] sm:$0xff] %v8528_v0 }
  0xcc   :  { %6783 = vrot.lane.b32.xlu1 %v8514_v6, %s8019_s9 }
  0xcd   :  { %6718 = vrot.lane.b32.xlu0 %v6717_v54, %s8021_s11  ;;  %6758 = vrot.lane.b32.xlu2 %v8528_v0, %s8021_s11 }
  0xce   :  { %v8535_v3 = vpop.permute.xlu1 %6558 }
  0xcf   :  { %v8559_v34 = vpop.permute.xlu0 %6533 }
  0xd0   :  { %v6536_v51 = vunpack.i.h.bf16 %v8559_v34 }
  0xd4   :  { %6798 = vrot.lane.b32.xlu1 %v8514_v6, %s8020_s10 }
  0xd5   :  { %6733 = vrot.lane.b32.xlu0 %v8083_v2, %s8025_s20  ;;  %6773 = vrot.lane.b32.xlu2 %v6772_v61, %s8002_s22  ;;  %s8026_s22 = smov 82  }
  0xd6   :  { %v8553_v54 = vpop.permute.xlu1 %6568 }
  0xd7   :  { %v8555_v37 = vpop.permute.xlu2 %6598 }
  0xd8   :  { %14500 = vst [vmem:[#allocation24_spill] sm:$0xff] %v8555_v37  ;;  %v14200_v43 = vunpack.i.h.bf16 %v8555_v37  ;;  %v6600_v0 = vunpack.i.l.bf16 %v8555_v37  ;;  %v8575_v37 = vpop.permute.xlu0 %6578 }
  0xda   :  { %v1144_v55 = vsel %vm14281_vm15, %v6600_v0, %v14200_v43  ;;  %v6490_v0 = vunpack.i.l.bf16 %v8268_v40  ;;  %v14504_v43 = vunpack.i.h.bf16 %v8220_v22 }
  0xdb   :  { %1306 = vmatpush.msra.mxu2 %v1144_v55  ;;  %v14206_v55 = vunpack.i.h.bf16 %v8268_v40  ;;  %v14517_v40 = vunpack.i.h.bf16 %v8359_v28 }
  0xdc   :  { %520 = vrot.lane.b32.xlu1 %v8540_v4, %s14369_s24  ;;  %v8591_v35 = vsel %vm340_vm1, %v14504_v43, %v6490_v0  ;;  %s8036_s24 = smov 105  }
  0xdd   :  { %6748 = vrot.lane.b32.xlu0 %v8083_v2, %s8026_s22  ;;  %6788 = vrot.lane.b32.xlu2 %v6772_v61, %s8005_s25  ;;  %s14371_s25 = smov 70   ;;  %v8596_v20 = vsel %vm340_vm1, %v6490_v0, %v14206_v55  ;;  %v6495_v55 = vunpack.i.l.bf16 %v8359_v28 }
  0xde   :  { %v8569_v11 = vpop.permute.xlu1 %6593  ;;  %14505 = vst [vmem:[#allocation28_spill] sm:$0xff] %v8596_v20  ;;  %v6777_v22 = vpack.i.bf16 %v8596_v20, %v8591_v35 }
  0xdf   :  { %v8571_v62 = vpop.permute.xlu2 %6633  ;;  %v6596_v10 = vunpack.i.h.bf16 %v8569_v11  ;;  %v8649_v53 = vsel %vm317_vm3, %v6495_v55, %v14517_v40 }
  0xe0   :  { %14501 = vst [vmem:[#allocation25_spill] sm:$0xff] %v8571_v62 }
  0xe1   :  { %14518 = vst [vmem:[#allocation35_spill] sm:$0xff] %v8649_v53 }
  0xe4   :  { %6823 = vrot.lane.b32.xlu1 %v8334_v63, %s8019_s9 }
  0xe5   :  { %6763 = vrot.lane.b32.xlu0 %v8138_v8, %s14377_s14  ;;  %6803 = vrot.lane.b32.xlu2 %v6802_v17, %s14371_s25  ;;  %v14507_v8 = vunpack.i.l.bf16 %v8379_v48  ;;  %v14509_v48 = vpack.i.bf16 %v8276_v42, %v8431_v59  ;;  %v14512_v42 = vunpack.i.l.bf16 %v8559_v34 }
  0xe6   :  { %v8584_v2 = vpop.permute.xlu1 %6623 }
  0xe7   :  { %14502 = vst [vmem:[#allocation26_spill] sm:$0xff] %v8584_v2  ;;  %v8586_v61 = vpop.permute.xlu2 %6638  ;;  %v8603_v17 = vsel %vm14208_vm7, %v14507_v8, %v14506_v46  ;;  %v14214_v46 = vunpack.i.l.bf16 %v8468_v5  ;;  %v8620_v8 = vpop.permute.xlu0 %6588  ;;  %vm14276_vm7 = vcmask 793600  }
  0xe8   :  { %14503 = vst [vmem:[#allocation27_spill] sm:$0xff] %v8586_v61  ;;  %v6812_v43 = vpack.i.bf16 %v8603_v17, %v8395_v31  ;;  %v8631_v59 = vsel %vm14276_vm7, %v14512_v42, %v6536_v51 }
  0xe9   :  { %14508 = vst [vmem:[#allocation29_spill] sm:$0xff] %v8603_v17 }
  0xea   :  { %14510 = vst [vmem:[#allocation30_spill] sm:$0xff] %v8620_v8  ;;  %v14519_v8 = vunpack.i.l.bf16 %v8569_v11 }
  0xeb   :  { %14513 = vst [vmem:[#allocation32_spill] sm:$0xff] %v8631_v59 }
  0xec   :  { %6833 = vrot.lane.b32.xlu1 %v14509_v48, %s14371_s25  ;;  %v14516_v48 = vunpack.i.h.bf16 %v8246_v32  ;;  %v8663_v32 = vunpack.i.h.bf16 %v8504_v25 }
  0xed   :  { %6778 = vrot.lane.b32.xlu0 %v6777_v22, %s14371_s25  ;;  %6813 = vrot.lane.b32.xlu2 %v6812_v43, %s14371_s25  ;;  %v8636_v22 = vsel %vm14276_vm7, %v6536_v51, %v14214_v46  ;;  %v8656_v51 = vsel %vm14258_vm11, %v14519_v8, %v6596_v10 }
  0xee   :  { %v8624_v0 = vpop.permute.xlu1 %6628  ;;  %14514 = vst [vmem:[#allocation33_spill] sm:$0xff] %v8636_v22  ;;  %v8644_v17 = vsel %vm317_vm3, %v14516_v48, %v6495_v55  ;;  %v6842_v42 = vpack.i.bf16 %v8636_v22, %v8631_v59  ;;  %v6550_v48 = vunpack.i.l.bf16 %v8504_v25  ;;  %v14524_v25 = vunpack.i.h.bf16 %v8282_v45 }
  0xef   :  { %14511 = vst [vmem:[#allocation31_spill] sm:$0xff] %v8624_v0  ;;  %v8626_v20 = vpop.permute.xlu2 %6653  ;;  %v6792_v40 = vpack.i.bf16 %v8649_v53, %v8644_v17  ;;  %v6807_v45 = vpack.i.bf16 %v8232_v27, %v8366_v39  ;;  %v14529_v39 = vunpack.i.h.bf16 %v8270_v41 }
  0xf0   :  { %v8639_v43 = vunpack.i.h.bf16 %v8626_v20  ;;  %14520 = vst [vmem:[#allocation36_spill] sm:$0xff] %v8656_v51  ;;  %v8683_v22 = vsel %vm202_vm6, %v14524_v25, %v6550_v48  ;;  %v8687_v55 = vsel %vm202_vm6, %v6550_v48, %v8663_v32  ;;  %v8699_v25 = vunpack.i.h.bf16 %v8535_v3 }
  0xf1   :  { %14522 = vst [vmem:[#allocation38_spill] sm:$0xff] %v8663_v32  ;;  %v6852_v59 = vpack.i.bf16 %v8687_v55, %v8683_v22  ;;  %v6560_v48 = vunpack.i.l.bf16 %v8535_v3 }
  0xf2   :  { %14515 = vst [vmem:[#allocation34_spill] sm:$0xff] %v8639_v43  ;;  %v8660_v46 = vsel %vm14258_vm11, %v6596_v10, %v8639_v43 }
  0xf3   :  { %14521 = vst [vmem:[#allocation37_spill] sm:$0xff] %v8660_v46  ;;  %v8719_v3 = vsel %vm14315_vm5, %v6560_v48, %v8699_v25 }
  0xf4   :  { %6843 = vrot.lane.b32.xlu1 %v6842_v42, %s14371_s25  ;;  %14525 = vst [vmem:[#allocation40_spill] sm:$0xff] %v8687_v55  ;;  %v8715_v55 = vsel %vm14315_vm5, %v14529_v39, %v6560_v48  ;;  %v6555_v39 = vunpack.i.l.bf16 %v8385_v16  ;;  %v6817_v48 = vpack.i.bf16 %v8260_v38, %v8401_v26 }
  0xf5   :  { %6793 = vrot.lane.b32.xlu0 %v6792_v40, %s14371_s25  ;;  %517 = vrot.lane.b32.xlu2 %v8540_v4, %s14367_s27  ;;  %14526 = vst [vmem:[#allocation41_spill] sm:$0xff] %v8699_v25  ;;  %v6862_v41 = vpack.i.bf16 %v8719_v3, %v8715_v55  ;;  %v6526_v25 = vunpack.i.h.bf16 %v8544_v33  ;;  %s14974_s27 = smov 101  }
  0xf6   :  { %v8674_v10 = vpop.permute.xlu1 %6648  ;;  %14530 = vst [vmem:[#allocation44_spill] sm:$0xff] %v8715_v55  ;;  %v6640_v55 = vunpack.i.l.bf16 %v8586_v61 }
  0xf7   :  { %v8676_v8 = vpop.permute.xlu2 %6668  ;;  %v8678_v43 = vpop.permute.xlu0 %6603  ;;  %14531 = vst [vmem:[#allocation45_spill] sm:$0xff] %v8719_v3 }
  0xf8   :  { %14523 = vst [vmem:[#allocation39_spill] sm:$0xff] %v8678_v43  ;;  %v14221_v42 = vunpack.i.h.bf16 %v8678_v43  ;;  %v6605_v40 = vunpack.i.l.bf16 %v8678_v43 }
  0xfa   :  { %v1139_v46 = vsel %vm14281_vm15, %v6605_v40, %v14221_v42 }
  0xfb   :  { %1307 = vmatpush.msra.mxu2 %v1139_v46 }
  0xfc   :  { %6853 = vrot.lane.b32.xlu1 %v6852_v59, %s14371_s25 }
  0xfd   :  { %6808 = vrot.lane.b32.xlu0 %v6807_v45, %s14371_s25  ;;  %6838 = vrot.lane.b32.xlu2 %v8334_v63, %s8020_s10  ;;  %v6521_v63 = vunpack.i.h.bf16 %v8326_v60  ;;  %v6520_v45 = vunpack.i.l.bf16 %v8326_v60  ;;  %v14532_v60 = vpack.i.bf16 %v8316_v57, %v8347_v19  ;;  %v8759_v19 = vsel %vm248_vm4, %v6526_v25, %v6555_v39 }
  0xfe   :  { %v8706_v40 = vpop.permute.xlu1 %6663  ;;  %v6575_v25 = vunpack.i.l.bf16 %v8499_v50 }
  0xff   :  { %14527 = vst [vmem:[#allocation42_spill] sm:$0xff] %v8706_v40  ;;  %v8708_v42 = vpop.permute.xlu2 %6683  ;;  %v8710_v43 = vpop.permute.xlu0 %6608 }
 0x100   :  { %14528 = vst [vmem:[#allocation43_spill] sm:$0xff] %v8710_v43  ;;  %v14232_v46 = vunpack.i.h.bf16 %v8710_v43  ;;  %v6610_v59 = vunpack.i.l.bf16 %v8710_v43  ;;  %v14535_v43 = vunpack.i.l.bf16 %v8544_v33  ;;  %v14537_v33 = vunpack.i.h.bf16 %v8584_v2 }
 0x102   :  { %v1134_v32 = vsel %vm14281_vm15, %v6610_v59, %v14232_v46  ;;  %v6625_v46 = vunpack.i.l.bf16 %v8584_v2  ;;  %v8756_v57 = vsel %vm248_vm4, %v6521_v63, %v14535_v43  ;;  %v6635_v59 = vunpack.i.l.bf16 %v8571_v62 }
 0x103   :  { %1308 = vmatpush.msra.mxu2 %v1134_v32  ;;  %v8746_v32 = vsel %vm248_vm4, %v6520_v45, %v6521_v63  ;;  %14536 = vst [vmem:[#allocation48_spill] sm:$0xff] %v8756_v57 }
 0x104   :  { %6863 = vrot.lane.b32.xlu1 %v6862_v41, %s14371_s25  ;;  %v1124_v43 = vsel %vm14281_vm15, %v6625_v46, %v14537_v33  ;;  %v14538_v33 = vunpack.i.h.bf16 %v8571_v62  ;;  %v8799_v62 = vsel %vm202_vm6, %v6575_v25, %v8286_v47  ;;  %v6585_v25 = vunpack.i.l.bf16 %v8542_v23 }
 0x105   :  { %6818 = vrot.lane.b32.xlu0 %v6817_v48, %s14371_s25  ;;  %6848 = vrot.lane.b32.xlu2 %v14532_v60, %s14371_s25  ;;  %v8762_v60 = vsel %vm248_vm4, %v6555_v39, %v6520_v45  ;;  %v6827_v45 = vpack.i.bf16 %v8756_v57, %v8746_v32  ;;  %v14543_v57 = vunpack.i.l.bf16 %v8559_v34  ;;  %v6887_v47 = vpack.i.bf16 %v8302_v52, %v8799_v62 }
 0x106   :  { %v8743_v26 = vpop.permute.xlu1 %6678  ;;  %v6857_v39 = vpack.i.bf16 %v8762_v60, %v8759_v19  ;;  %v1119_v46 = vsel %vm14281_vm15, %v6635_v59, %v14538_v33  ;;  %v14541_v59 = vunpack.i.h.bf16 %v8586_v61  ;;  %v14558_v61 = vunpack.i.l.bf16 %v8569_v11 }
 0x107   :  { %v8749_v53 = vpop.permute.xlu2 %6698  ;;  %v8751_v48 = vpop.permute.xlu0 %6613 }
 0x108   :  { %14533 = vst [vmem:[#allocation46_spill] sm:$0xff] %v8749_v53  ;;  %v14242_v3 = vunpack.i.h.bf16 %v8751_v48  ;;  %v6615_v41 = vunpack.i.l.bf16 %v8751_v48  ;;  %v1114_v33 = vsel %vm14281_vm15, %v6640_v55, %v14541_v59 }
 0x109   :  { %14534 = vst [vmem:[#allocation47_spill] sm:$0xff] %v8751_v48 }
 0x10a   :  { %v1129_v16 = vsel %vm14281_vm15, %v6615_v41, %v14242_v3  ;;  %v6665_v41 = vunpack.i.l.bf16 %v8706_v40  ;;  %v6541_v3 = vunpack.i.h.bf16 %v8468_v5 }
 0x10b   :  { %1309 = vmatpush.msra.mxu2 %v1129_v16  ;;  %v6565_v16 = vunpack.i.l.bf16 %v8445_v15 }
 0x10c   :  { %6878 = vrot.lane.b32.xlu1 %v8514_v6, %s14379_s16 }
 0x10d   :  { %1310 = vmatpush.msra.mxu2 %v1124_v43  ;;  %6828 = vrot.lane.b32.xlu0 %v6827_v45, %s14371_s25  ;;  %v14542_v43 = vunpack.i.h.bf16 %v8706_v40 }
 0x10e   :  { %6858 = vrot.lane.b32.xlu2 %v6857_v39, %s14371_s25  ;;  %v8791_v63 = vpop.permute.xlu1 %6693  ;;  %v8808_v39 = vsel %vm14276_vm7, %v6541_v3, %v6565_v16 }
 0x10f   :  { %14539 = vst [vmem:[#allocation49_spill] sm:$0xff] %v8791_v63  ;;  %v8793_v48 = vpop.permute.xlu2 %6713  ;;  %v8795_v2 = vpop.permute.xlu0 %6618  ;;  %1311 = vmatpush.msra.mxu2 %v1119_v46  ;;  %v1109_v45 = vsel %vm14281_vm15, %v6665_v41, %v14542_v43  ;;  %v8813_v46 = vsel %vm14276_vm7, %v6565_v16, %v14543_v57  ;;  %v8832_v41 = vsel %vm14315_vm5, %v6585_v25, %v8280_v44  ;;  %v6655_v25 = vunpack.i.l.bf16 %v8626_v20 }
 0x110   :  { %14540 = vst [vmem:[#allocation50_spill] sm:$0xff] %v8793_v48  ;;  %v6867_v55 = vpack.i.bf16 %v8813_v46, %v8808_v39  ;;  %v6902_v16 = vpack.i.bf16 %v8294_v49, %v8832_v41  ;;  %v6620_v59 = vunpack.i.l.bf16 %v8795_v2  ;;  %v6872_v20 = vpack.i.bf16 %v8644_v17, %v8591_v35 }
 0x111   :  { %1312 = vmatpush.msra.mxu2 %v1114_v33  ;;  %vm271_vm7 = vcmask 777216  }
 0x112   :  { %v8850_v44 = vsel %vm162_vm10, %v6620_v59, %v8408_v36  ;;  %v394_v36 = vsel %vm14258_vm11, %v6655_v25, %v8443_v21 }
 0x113   :  { %1313 = vmatpush.msra.mxu2 %v1109_v45  ;;  %v6927_v59 = vpack.i.bf16 %v8474_v24, %v394_v36 }
 0x114   :  { %6888 = vrot.lane.b32.xlu1 %v6887_v47, %s14371_s25  ;;  %v6917_v47 = vpack.i.bf16 %v8427_v12, %v8850_v44 }
 0x115   :  { %514 = vrot.lane.b32.xlu0 %v8540_v4, %s8003_s23  ;;  %s8030_s23 = smov 115  }
 0x116   :  { %6868 = vrot.lane.b32.xlu2 %v6867_v55, %s14371_s25  ;;  %v8824_v34 = vpop.permute.xlu1 %6708 }
 0x117   :  { %14544 = vst [vmem:[#allocation51_spill] sm:$0xff] %v8824_v34  ;;  %v8826_v3 = vpop.permute.xlu2 %6728  ;;  %v8828_v57 = vpop.permute.xlu0 %6643 }
 0x118   :  { %14545 = vst [vmem:[#allocation52_spill] sm:$0xff] %v8826_v3 }
 0x11c   :  { %6903 = vrot.lane.b32.xlu1 %v6902_v16, %s14371_s25 }
 0x11d   :  { %511 = vrot.lane.b32.xlu0 %v8540_v4, %s8006_s26  ;;  %s14375_s26 = smov 118  }
 0x11e   :  { %452 = vrot.lane.b32.xlu2 %v8149_v9, %s14377_s14  ;;  %v8842_v33 = vpop.permute.xlu1 %6723 }
 0x11f   :  { %v8844_v43 = vpop.permute.xlu0 %6658  ;;  %v8846_v45 = vpop.permute.xlu2 %6743 }
 0x120   :  { %14546 = vst [vmem:[#allocation53_spill] sm:$0xff] %v8846_v45  ;;  %v14561_v15 = vunpack.i.l.bf16 %v8844_v43 }
 0x124   :  { %6918 = vrot.lane.b32.xlu1 %v6917_v47, %s14371_s25  ;;  %v8872_v47 = vunpack.i.h.bf16 %v8553_v54 }
 0x125   :  { %467 = vrot.lane.b32.xlu0 %v8149_v9, %s14378_s6  ;;  %v6570_v9 = vunpack.i.l.bf16 %v8553_v54  ;;  %v14552_v54 = vunpack.i.h.bf16 %v8213_v18  ;;  %v6476_v18 = vunpack.i.h.bf16 %v8239_v29 }
 0x126   :  { %6893 = vrot.lane.b32.xlu2 %v8514_v6, %s8025_s20  ;;  %v8860_v4 = vpop.permute.xlu1 %6738  ;;  %14549 = vst [vmem:[#allocation56_spill] sm:$0xff] %v8872_v47  ;;  %v14550_v6 = vpack.i.bf16 %v8395_v31, %v8390_v30  ;;  %v8902_v30 = vunpack.i.l.bf16 %v8791_v63 }
 0x127   :  { %14547 = vst [vmem:[#allocation54_spill] sm:$0xff] %v8860_v4  ;;  %v8862_v55 = vpop.permute.xlu0 %6673  ;;  %v8864_v16 = vpop.permute.xlu2 %6758 }
 0x128   :  { %14548 = vst [vmem:[#allocation55_spill] sm:$0xff] %v8864_v16 }
 0x129   :  { %14554 = vst [vmem:[#allocation59_spill] sm:$0xff] %v8902_v30 }
 0x12c   :  { %6928 = vrot.lane.b32.xlu1 %v6927_v59, %s14371_s25  ;;  %v8892_v59 = vsel %vm162_vm10, %v14552_v54, %v6570_v9  ;;  %v14559_v54 = vunpack.i.h.bf16 %v8318_v58 }
 0x12d   :  { %6873 = vrot.lane.b32.xlu0 %v6872_v20, %s8021_s11  ;;  %v8896_v20 = vsel %vm162_vm10, %v6570_v9, %v8872_v47  ;;  %v14560_v9 = vunpack.i.l.bf16 %v8239_v29 }
 0x12e   :  { %6908 = vrot.lane.b32.xlu2 %v14550_v6, %s8021_s11  ;;  %v8881_v21 = vpop.permute.xlu1 %6753  ;;  %14553 = vst [vmem:[#allocation58_spill] sm:$0xff] %v8896_v20  ;;  %v6882_v6 = vpack.i.bf16 %v8896_v20, %v8892_v59  ;;  %v6740_v20 = vunpack.i.l.bf16 %v8860_v4 }
 0x12f   :  { %v8883_v24 = vpop.permute.xlu0 %6688  ;;  %v8885_v25 = vpop.permute.xlu2 %6773  ;;  %v8936_v5 = vsel %vm14259_vm12, %v14560_v9, %v6476_v18  ;;  %v8953_v9 = vunpack.i.l.bf16 %v8824_v34  ;;  %v6730_v34 = vunpack.i.l.bf16 %v8826_v3 }
 0x130   :  { %14551 = vst [vmem:[#allocation57_spill] sm:$0xff] %v8883_v24  ;;  %v14247_v36 = vunpack.i.h.bf16 %v8883_v24  ;;  %v6690_v40 = vunpack.i.l.bf16 %v8883_v24  ;;  %v8922_v24 = vsel %vm14259_vm12, %v6476_v18, %v8902_v30  ;;  %v14562_v30 = vunpack.i.h.bf16 %v8198_v13 }
 0x131   :  { %14557 = vst [vmem:[#allocation62_spill] sm:$0xff] %v8922_v24  ;;  %v6630_v18 = vunpack.i.l.bf16 %v8624_v0  ;;  %v14564_v13 = vunpack.i.l.bf16 %v8708_v42  ;;  %vm294_vm12 = vcmask 769024  }
 0x132   :  { %v1104_v31 = vsel %vm14281_vm15, %v6690_v40, %v14247_v36  ;;  %v507_v11 = vsel %vm505_vm0, %v14562_v30, %v14561_v15  ;;  %14563 = vst [vmem:[#allocation63_spill] sm:$0xff] %v8953_v9  ;;  %v14565_v15 = vunpack.i.h.bf16 %v8204_v14 }
 0x133   :  { %1314 = vmatpush.msra.mxu2 %v1104_v31 }
 0x134   :  { %120 = vrot.lane.b32.xlu1 %v8134_v7, %s8025_s20 }
 0x135   :  { %6883 = vrot.lane.b32.xlu0 %v6882_v6, %s14371_s25  ;;  %v8929_v6 = vsel %vm14258_vm11, %v14559_v54, %v14558_v61  ;;  %v6952_v61 = vpack.i.bf16 %v8922_v24, %v8936_v5  ;;  %vm82_vm11 = vcmask 1022976   ;;  %v6745_v24 = vunpack.i.l.bf16 %v8846_v45 }
 0x136   :  { %140 = vrot.lane.b32.xlu2 %v8134_v7, %s14379_s16  ;;  %v8913_v40 = vpop.permute.xlu1 %6768  ;;  %v6897_v54 = vpack.i.bf16 %v8656_v51, %v8929_v6  ;;  %v8965_v51 = vunpack.i.l.bf16 %v8862_v55 }
 0x137   :  { %14555 = vst [vmem:[#allocation60_spill] sm:$0xff] %v8913_v40  ;;  %v8916_v31 = vpop.permute.xlu0 %6703  ;;  %v8918_v36 = vpop.permute.xlu2 %6788 }
 0x138   :  { %14556 = vst [vmem:[#allocation61_spill] sm:$0xff] %v8916_v31  ;;  %v14255_v7 = vunpack.i.h.bf16 %v8916_v31  ;;  %v6705_v63 = vunpack.i.l.bf16 %v8916_v31  ;;  %v6671_v31 = vunpack.i.h.bf16 %v8676_v8 }
 0x139   :  { %14566 = vst [vmem:[#allocation64_spill] sm:$0xff] %v8965_v51 }
 0x13a   :  { %v1099_v58 = vsel %vm14281_vm15, %v6705_v63, %v14255_v7  ;;  %v489_v63 = vsel %vm487_vm2, %v14565_v15, %v14564_v13  ;;  %v6486_v7 = vunpack.i.h.bf16 %v8342_v1  ;;  %v14569_v15 = vunpack.i.h.bf16 %v8313_v56 }
 0x13b   :  { %1315 = vmatpush.msra.mxu2 %v1099_v58  ;;  %v6932_v30 = vpack.i.bf16 %v489_v63, %v507_v11  ;;  %v9010_v58 = vsel %vm82_vm11, %v6671_v31, %v8965_v51 }
 0x13c   :  { %6953 = vrot.lane.b32.xlu1 %v6952_v61, %s14371_s25  ;;  %v8980_v63 = vsel %vm375_vm13, %v14569_v15, %v6630_v18  ;;  %v14572_v15 = vunpack.i.l.bf16 %v8575_v37  ;;  %14575 = vst [vmem:[#allocation68_spill] sm:$0xff] %v9010_v58 }
 0x13d   :  { %6898 = vrot.lane.b32.xlu0 %v6897_v54, %s14371_s25  ;;  %v14570_v54 = vunpack.i.h.bf16 %v8624_v0  ;;  %v14573_v0 = vunpack.i.l.bf16 %v8342_v1 }
 0x13e   :  { %6933 = vrot.lane.b32.xlu2 %v6932_v30, %s8021_s11  ;;  %v8970_v14 = vpop.permute.xlu1 %6783  ;;  %v8989_v30 = vsel %vm14275_vm14, %v6486_v7, %v8953_v9 }
 0x13f   :  { %v8972_v11 = vpop.permute.xlu0 %6718  ;;  %v6786_v61 = vunpack.i.h.bf16 %v8970_v14  ;;  %v8975_v13 = vpop.permute.xlu2 %6803  ;;  %v8985_v29 = vsel %vm375_vm13, %v6630_v18, %v14570_v54  ;;  %14571 = vst [vmem:[#allocation67_spill] sm:$0xff] %v8989_v30  ;;  %v9001_v18 = vsel %vm14275_vm14, %v14573_v0, %v6486_v7  ;;  %v14574_v54 = vunpack.i.l.bf16 %v8676_v8 }
 0x140   :  { %14567 = vst [vmem:[#allocation65_spill] sm:$0xff] %v8972_v11  ;;  %v6720_v56 = vunpack.i.l.bf16 %v8972_v11  ;;  %v6967_v0 = vpack.i.bf16 %v8989_v30, %v9001_v18  ;;  %v6646_v7 = vunpack.i.h.bf16 %v8828_v57  ;;  %vm14298_vm14 = vcmask 1014784  }
 0x141   :  { %14568 = vst [vmem:[#allocation66_spill] sm:$0xff] %v8975_v13  ;;  %v295_v13 = vsel %vm294_vm12, %v6786_v61, %v14572_v15  ;;  %v9006_v9 = vsel %vm82_vm11, %v14574_v54, %v6671_v31  ;;  %v14576_v61 = vunpack.i.h.bf16 %v8972_v11  ;;  %v6645_v15 = vunpack.i.l.bf16 %v8828_v57 }
 0x142   :  { %1268 = vmatpush.msra.mxu0 %v295_v13  ;;  %v6912_v31 = vpack.i.bf16 %v8985_v29, %v8980_v63  ;;  %v14577_v13 = vunpack.i.h.bf16 %v8826_v3  ;;  %v9033_v57 = vunpack.i.l.bf16 %v8674_v10  ;;  %v6760_v3 = vunpack.i.l.bf16 %v8864_v16 }
 0x143   :  { %v1094_v1 = vsel %vm14281_vm15, %v6720_v56, %v14576_v61  ;;  %v6942_v56 = vpack.i.bf16 %v9010_v58, %v9006_v9  ;;  %v6651_v61 = vunpack.i.h.bf16 %v8674_v10  ;;  %v14579_v10 = vunpack.i.h.bf16 %v8860_v4 }
 0x144   :  { %1316 = vmatpush.msra.mxu2 %v1094_v1  ;;  %v1089_v11 = vsel %vm14281_vm15, %v6730_v34, %v14577_v13  ;;  %6968 = vrot.lane.b32.xlu1 %v6967_v0, %s14371_s25  ;;  %14578 = vst [vmem:[#allocation69_spill] sm:$0xff] %v9033_v57  ;;  %v6700_v1 = vunpack.i.l.bf16 %v8749_v53  ;;  %v6770_v0 = vunpack.i.l.bf16 %v8913_v40  ;;  %v14580_v53 = vld [vmem:[#allocation30_spill] sm:$0xff]  ;;  %v14581_v34 = vunpack.i.h.bf16 %v8846_v45 }
 0x145   :  { %6913 = vrot.lane.b32.xlu0 %v6912_v31, %s14371_s25  ;;  %v1084_v30 = vsel %vm14281_vm15, %v6740_v20, %v14579_v10  ;;  %v14282_v58 = vunpack.i.l.bf16 %v14580_v53  ;;  %v9057_v51 = vsel %vm14298_vm14, %v6645_v15, %v6646_v7  ;;  %v9061_v20 = vsel %vm14298_vm14, %v6646_v7, %v9033_v57 }
 0x146   :  { %1317 = vmatpush.msra.mxu2 %v1089_v11  ;;  %6943 = vrot.lane.b32.xlu2 %v6942_v56, %s14371_s25  ;;  %v9042_v13 = vpop.permute.xlu1 %6798  ;;  %v1079_v56 = vsel %vm14281_vm15, %v6745_v24, %v14581_v34  ;;  %14582 = vst [vmem:[#allocation30_spill] sm:$0xff] %v9061_v20  ;;  %v9070_v45 = vsel %vm14298_vm14, %v6700_v1, %v6645_v15  ;;  %v14583_v24 = vunpack.i.h.bf16 %v8864_v16  ;;  %v14584_v4 = vunpack.i.h.bf16 %v8913_v40 }
 0x147   :  { %v9048_v11 = vpop.permute.xlu0 %6733  ;;  %v6801_v31 = vunpack.i.h.bf16 %v9042_v13  ;;  %v9051_v54 = vpop.permute.xlu2 %6813  ;;  %v6680_v16 = vunpack.i.l.bf16 %v8743_v26 }
 0x148   :  { %1318 = vmatpush.msra.mxu2 %v1084_v30  ;;  %v9067_v30 = vsel %vm14298_vm14, %v6651_v61, %v6700_v1  ;;  %v1074_v34 = vsel %vm14281_vm15, %v6760_v3, %v14583_v24  ;;  %v1069_v7 = vsel %vm14281_vm15, %v6770_v0, %v14584_v4  ;;  %v14585_v61 = vld [vmem:[#allocation17_spill] sm:$0xff]  ;;  %v6715_v1 = vunpack.i.l.bf16 %v8793_v48 }
 0x149   :  { %v272_v10 = vsel %vm271_vm7, %v6801_v31, %v14282_v58  ;;  %v6957_v15 = vpack.i.bf16 %v9070_v45, %v9067_v30  ;;  %v6676_v3 = vunpack.i.h.bf16 %v8862_v55  ;;  %v14586_v4 = vld [vmem:[#allocation5_spill] sm:$0xff]  ;;  %vm14285_vm15 = vcmask 670720  }
 0x14a   :  { %1319 = vmatpush.msra.mxu2 %v1079_v56  ;;  %1269 = vmatpush.msra.mxu0 %v272_v10  ;;  %v6922_v56 = vpack.i.bf16 %v9061_v20, %v9057_v51  ;;  %v9089_v0 = vunpack.i.h.bf16 %v14586_v4  ;;  %v14592_v4 = vld [vmem:[#allocation3_spill] sm:$0xff]  ;;  %vm122_vm14 = vcmask 1006592   ;;  %v6661_v48 = vunpack.i.h.bf16 %v8844_v43 }
 0x14b   :  { %v14593_v58 = vunpack.i.h.bf16 %v14592_v4  ;;  %v14597_v4 = vld [vmem:[#allocation6_spill] sm:$0xff] }
 0x14c   :  { %1320 = vmatpush.msra.mxu2 %v1074_v34  ;;  %1270 = vmatpush.msra.mxu0 %v8759_v19  ;;  %v9105_v34 = vld [vmem:[%s14162_s0 + $0x18] sm:$0xff] }
 0x14d   :  { %6983 = vrot.lane.b32.xlu1 %v14585_v61, %s14371_s25  ;;  %6923 = vrot.lane.b32.xlu0 %v6922_v56, %s14371_s25  ;;  %14588 = vst [vmem:[#allocation5_spill] sm:$0xff] %v9105_v34  ;;  %v9117_v56 = vsel %vm82_vm11, %v6676_v3, %v6715_v1  ;;  %v14591_v61 = vunpack.i.l.bf16 %v8676_v8  ;;  %v9132_v40 = vsel %vm340_vm1, %v14593_v58, %v9089_v0  ;;  %v14595_v8 = vld [vmem:[#allocation28_spill] sm:$0xff] }
 0x14e   :  { %1321 = vmatpush.msra.mxu2 %v1069_v7  ;;  %6958 = vrot.lane.b32.xlu2 %v6957_v15, %s14371_s25  ;;  %v9092_v31 = vpop.permute.xlu1 %520  ;;  %14594 = vst [vmem:[#allocation3_spill] sm:$0xff] %v9132_v40 }
 0x14f   :  { %1271 = vmatpush.msra.mxu0 %v8808_v39  ;;  %v9095_v19 = vpop.permute.xlu0 %6748  ;;  %v9097_v10 = vpop.permute.xlu2 %517  ;;  %v9110_v39 = vld [vmem:[%s14162_s0 + $0x20] sm:$0xff] }
 0x150   :  { %14587 = vst [vmem:[#allocation17_spill] sm:$0xff] %v9095_v19  ;;  %v14286_v24 = vunpack.i.h.bf16 %v9095_v19  ;;  %v6750_v55 = vunpack.i.l.bf16 %v9095_v19  ;;  %v9114_v7 = vpack.i.bf16 %v9110_v39, %v9105_v34  ;;  %v14599_v19 = vunpack.i.l.bf16 %v8575_v37 }
 0x151   :  { %1272 = vmatpush.msra.mxu0 %v8799_v62  ;;  %14589 = vst [vmem:[#allocation70_spill] sm:$0xff] %v9110_v39  ;;  %v9122_v62 = vsel %vm82_vm11, %v6715_v1, %v14591_v61  ;;  %v6997_v1 = vpack.i.bf16 %v9132_v40, %v14595_v8  ;;  %v6776_v61 = vunpack.i.h.bf16 %v8885_v25  ;;  %v14602_v39 = vunpack.i.l.bf16 %v8881_v21 }
 0x152   :  { %14590 = vst [vmem:[#allocation71_spill] sm:$0xff] %v9114_v7  ;;  %v1242_v15 = vsel %vm14285_vm15, %v6750_v55, %v14286_v24  ;;  %v6972_v58 = vpack.i.bf16 %v9122_v62, %v9117_v56  ;;  %v9147_v55 = vld [vmem:[%s14163_s3 + $0x18] sm:$0xff]  ;;  %vm14297_vm15 = vcmask 64512  }
 0x153   :  { %1273 = vmatpush.msra.mxu0 %v8832_v41  ;;  %1341 = vmatpush.msra.mxu3 %v1242_v15  ;;  %14596 = vst [vmem:[#allocation28_spill] sm:$0xff] %v9147_v55  ;;  %v14598_v15 = vunpack.i.h.bf16 %v8575_v37 }
 0x154   :  { %6201 = vmatmul.msk.f32.vlgmr.msra.gmra.mxu3 %vm14297_vm15, %v9147_v55  ;;  %vm142_vm15 = vcmask 998400  }
 0x155   :  { %1346 = vmatpush.msrb.mxu3 %v8232_v27  ;;  %1274 = vmatpush.msra.mxu0 %v8850_v44  ;;  %v9154_v27 = vunpack.i.h.bf16 %v14597_v4  ;;  %v6775_v44 = vunpack.i.l.bf16 %v8885_v25  ;;  %v14600_v4 = vld [vmem:[#allocation18_spill] sm:$0xff] }
 0x156   :  { %6938 = vrot.lane.b32.xlu0 %v9114_v7, %s8026_s22  ;;  %6998 = vrot.lane.b32.xlu1 %v6997_v1, %s8021_s11  ;;  %v9159_v24 = vpop.permute.xlu1 %6823  ;;  %v296_v1 = vsel %vm294_vm12, %v14599_v19, %v14598_v15  ;;  %v376_v57 = vsel %vm375_vm13, %v6680_v16, %v14600_v4  ;;  %v14603_v7 = vld [vmem:[#allocation2_spill] sm:$0xff]  ;;  %v14605_v15 = vunpack.i.h.bf16 %v14580_v53  ;;  %v14606_v16 = vunpack.i.l.bf16 %v14580_v53 }
 0x157   :  { %6973 = vrot.lane.b32.xlu2 %v6972_v58, %s14371_s25  ;;  %1347 = vmatpush.msrb.mxu3 %v8260_v38  ;;  %v9161_v41 = vpop.permute.xlu0 %6763  ;;  %v9163_v3 = vpop.permute.xlu2 %6838  ;;  %v9175_v38 = vsel %vm505_vm0, %v6775_v44, %v6776_v61  ;;  %v14604_v20 = vunpack.i.h.bf16 %v14603_v7  ;;  %v14610_v7 = vld [vmem:[#allocation19_spill] sm:$0xff] }
 0x158   :  { %14601 = vst [vmem:[#allocation6_spill] sm:$0xff] %v9175_v38  ;;  %v14299_v25 = vunpack.i.h.bf16 %v9161_v41  ;;  %v6765_v58 = vunpack.i.l.bf16 %v9161_v41  ;;  %v273_v4 = vsel %vm271_vm7, %v14606_v16, %v14605_v15  ;;  %v6987_v15 = vpack.i.bf16 %v8929_v6, %v8892_v59  ;;  %v14630_v38 = vld [vmem:[#allocation41_spill] sm:$0xff] }
 0x159   :  { %1348 = vmatpush.msrb.mxu3 %v296_v1  ;;  %v471_v19 = vsel %vm469_vm9, %v14604_v20, %v14602_v39  ;;  %v14608_v1 = vunpack.i.h.bf16 %v8359_v28  ;;  %v6947_v20 = vpack.i.bf16 %v14610_v7, %v376_v57  ;;  %v9230_v7 = vld [vmem:[%s14162_s0] sm:$0xff] }
 0x15a   :  { %v9192_v61 = vsel %vm454_vm8, %v6765_v58, %v14299_v25 }
 0x15b   :  { %14607 = vst [vmem:[#allocation18_spill] sm:$0xff] %v9192_v61  ;;  %1349 = vmatpush.msrb.mxu3 %v273_v4  ;;  %v9198_v55 = vsel %vm317_vm3, %v14608_v1, %v9154_v27  ;;  %v14300_v4 = vunpack.i.h.bf16 %v8842_v33  ;;  %v14303_v1 = vunpack.i.l.bf16 %v8842_v33 }
 0x15c   :  { %14609 = vst [vmem:[#allocation2_spill] sm:$0xff] %v9198_v55  ;;  %v7012_v39 = vpack.i.bf16 %v471_v19, %v9198_v55 }
 0x15d   :  { %1350 = vmatpush.msrb.mxu3 %v8762_v60  ;;  %v14611_v60 = vld [vmem:[#allocation4_spill] sm:$0xff] }
 0x15e   :  { %6948 = vrot.lane.b32.xlu0 %v6947_v20, %s14371_s25  ;;  %7013 = vrot.lane.b32.xlu1 %v7012_v39, %s8021_s11  ;;  %v9211_v28 = vpop.permute.xlu1 %6833  ;;  %v14612_v16 = vunpack.i.h.bf16 %v14611_v60  ;;  %v14302_v20 = vunpack.i.l.bf16 %v9048_v11  ;;  %v14613_v39 = vld [vmem:[#allocation44_spill] sm:$0xff] }
 0x15f   :  { %6988 = vrot.lane.b32.xlu2 %v6987_v15, %s8021_s11  ;;  %1351 = vmatpush.msrb.mxu3 %v8813_v46  ;;  %v9213_v57 = vpop.permute.xlu0 %6778  ;;  %v9215_v19 = vpop.permute.xlu2 %6848  ;;  %v7993_v46 = vld [vmem:[%s14162_s0 + $0x8] sm:$0xff]  ;;  %v6962_v15 = vpack.i.bf16 %v14613_v39, %v8683_v22 }
 0x160   :  { %v456_v6 = vsel %vm454_vm8, %v14612_v16, %v6765_v58  ;;  %v14301_v58 = vunpack.i.h.bf16 %v9048_v11  ;;  %v144_v16 = vsel %vm142_vm15, %v14303_v1, %v14300_v4  ;;  %v14617_v1 = vld [vmem:[#allocation16_spill] sm:$0xff] }
 0x161   :  { %1352 = vmatpush.msrb.mxu3 %v8302_v52  ;;  %v7002_v52 = vpack.i.bf16 %v7993_v46, %v9230_v7 }
 0x163   :  { %1353 = vmatpush.msrb.mxu3 %v8294_v49  ;;  %v14614_v49 = vld [vmem:[#allocation29_spill] sm:$0xff] }
 0x164   :  { %v7027_v60 = vpack.i.bf16 %v14614_v49, %v456_v6  ;;  %v509_v49 = vsel %vm505_vm0, %v6661_v48, %v6775_v44  ;;  %v7017_v44 = vpack.i.bf16 %v9198_v55, %v9132_v40  ;;  %v9302_v55 = vld [vmem:[%s14163_s3] sm:$0xff] }
 0x165   :  { %1354 = vmatpush.msrb.mxu3 %v8427_v12  ;;  %v124_v12 = vsel %vm122_vm14, %v14302_v20, %v14301_v58 }
 0x166   :  { %6963 = vrot.lane.b32.xlu0 %v6962_v15, %s8021_s11  ;;  %7028 = vrot.lane.b32.xlu1 %v7027_v60, %s8021_s11  ;;  %v9248_v25 = vpop.permute.xlu1 %6843 }
 0x167   :  { %7003 = vrot.lane.b32.xlu2 %v7002_v52, %s14371_s25  ;;  %1355 = vmatpush.msrb.mxu3 %v144_v16  ;;  %v9250_v6 = vpop.permute.xlu0 %6793  ;;  %v9263_v52 = vld [vmem:[%s14162_s0 + $0x10] sm:$0xff]  ;;  %v14615_v16 = vunpack.i.l.bf16 %v8844_v43 }
 0x168   :  { %v9257_v15 = vpop.permute.xlu2 %6858  ;;  %v6977_v60 = vpack.i.bf16 %v9105_v34, %v9263_v52 }
 0x169   :  { %1356 = vmatpush.msrb.mxu3 %v124_v12  ;;  %v508_v4 = vsel %vm505_vm0, %v14615_v16, %v6661_v48  ;;  %v14616_v12 = vld [vmem:[#allocation7_spill] sm:$0xff]  ;;  %vm715_vm0 = vcmask 572416  }
 0x16a   :  { %v7042_v58 = vpack.i.bf16 %v509_v49, %v508_v4  ;;  %v14305_v20 = vunpack.i.h.bf16 %v14616_v12  ;;  %v14618_v49 = vld [vmem:[#allocation21_spill] sm:$0xff] }
 0x16b   :  { %1357 = vmatpush.msrb.mxu3 %v9070_v45 }
 0x16d   :  { %1358 = vmatpush.msrb.mxu3 %v9122_v62 }
 0x16e   :  { %6978 = vrot.lane.b32.xlu0 %v6977_v60, %s14371_s25  ;;  %7043 = vrot.lane.b32.xlu1 %v7042_v58, %s8021_s11  ;;  %v9279_v45 = vpop.permute.xlu1 %6853  ;;  %v14619_v58 = vld [vmem:[#allocation23_spill] sm:$0xff] }
 0x16f   :  { %7018 = vrot.lane.b32.xlu2 %v7017_v44, %s14371_s25  ;;  %1359 = vmatpush.msrb.mxu3 %v14617_v1  ;;  %v9281_v43 = vpop.permute.xlu0 %6808  ;;  %v14620_v60 = vunpack.i.l.bf16 %v14619_v58  ;;  %v14308_v1 = vunpack.i.l.bf16 %v8970_v14  ;;  %v14622_v58 = vld [vmem:[#allocation13_spill] sm:$0xff] }
 0x170   :  { %v14306_v48 = vunpack.i.h.bf16 %v9281_v43  ;;  %v6810_v62 = vunpack.i.l.bf16 %v9281_v43  ;;  %v9285_v4 = vpop.permute.xlu2 %6868 }
 0x171   :  { %1360 = vmatpush.msrb.mxu3 %v14618_v49  ;;  %v9293_v16 = vsel %vm248_vm4, %v14620_v60, %v14305_v20  ;;  %v7032_v60 = vpack.i.bf16 %v8936_v5, %v14622_v58  ;;  %v14623_v20 = vld [vmem:[#allocation22_spill] sm:$0xff]  ;;  %v9325_v49 = vunpack.i.h.bf16 %v8542_v23  ;;  %v14627_v23 = vunpack.i.h.bf16 %v8708_v42 }
 0x172   :  { %14621 = vst [vmem:[#allocation19_spill] sm:$0xff] %v9293_v16  ;;  %v791_v44 = vsel %vm715_vm0, %v6810_v62, %v14306_v48 }
 0x173   :  { %1361 = vmatpush.msrb.mxu3 %v7993_v46  ;;  %1286 = vmatpush.msra.mxu1 %v791_v44  ;;  %v7057_v46 = vpack.i.bf16 %v9089_v0, %v9293_v16  ;;  %v14624_v44 = vunpack.i.h.bf16 %v8575_v37  ;;  %v6835_v16 = vunpack.i.l.bf16 %v9211_v28  ;;  %v9356_v61 = vsel %vm14315_vm5, %v14630_v38, %v9325_v49  ;;  %v14633_v38 = vld [vmem:[#allocation32_spill] sm:$0xff] }
 0x174   :  { %1362 = vmatmul.f32.vlgmr.msrb.gmra.mxu3 %v9302_v55  ;;  %vm14649_vm5 = vcmask 596992  }
 0x175   :  { %1426 = vmatpush.msra.mxu3 %v8591_v35  ;;  %v297_v48 = vsel %vm294_vm12, %v14624_v44, %v14308_v1 }
 0x176   :  { %6993 = vrot.lane.b32.xlu0 %v14623_v20, %s14371_s25  ;;  %7058 = vrot.lane.b32.xlu1 %v7057_v46, %s14371_s25  ;;  %v9317_v35 = vpop.permute.xlu1 %6863  ;;  %v14626_v20 = vunpack.i.h.bf16 %v14580_v53  ;;  %v14629_v46 = vld [vmem:[#allocation35_spill] sm:$0xff]  ;;  %v14631_v53 = vunpack.i.h.bf16 %v9211_v28 }
 0x177   :  { %1427 = vmatpush.msra.mxu3 %v8644_v17  ;;  %7033 = vrot.lane.b32.xlu2 %v7032_v60, %s8021_s11  ;;  %v9327_v62 = vpop.permute.xlu0 %6818  ;;  %v14625_v17 = vunpack.i.l.bf16 %v9042_v13 }
 0x178   :  { %v14313_v37 = vunpack.i.h.bf16 %v9327_v62  ;;  %v6820_v44 = vunpack.i.l.bf16 %v9327_v62  ;;  %v9338_v1 = vpop.permute.xlu2 %452  ;;  %v781_v34 = vsel %vm715_vm0, %v6835_v16, %v14631_v53  ;;  %v14634_v16 = vunpack.i.h.bf16 %v9215_v19 }
 0x179   :  { %1428 = vmatpush.msra.mxu3 %v297_v48  ;;  %v274_v60 = vsel %vm271_vm7, %v14626_v20, %v14625_v17  ;;  %v14628_v48 = vunpack.i.l.bf16 %v8708_v42  ;;  %v6850_v17 = vunpack.i.l.bf16 %v9215_v19 }
 0x17a   :  { %v786_v20 = vsel %vm715_vm0, %v6820_v44, %v14313_v37  ;;  %v6870_v37 = vunpack.i.l.bf16 %v9285_v4 }
 0x17b   :  { %1429 = vmatpush.msra.mxu3 %v274_v60  ;;  %v490_v40 = vsel %vm487_vm2, %v14628_v48, %v14627_v23  ;;  %1287 = vmatpush.msra.mxu1 %v786_v20  ;;  %v7007_v60 = vpack.i.bf16 %v14629_v46, %v8980_v63  ;;  %v6860_v48 = vunpack.i.l.bf16 %v9257_v15  ;;  %v14635_v20 = vunpack.i.h.bf16 %v9257_v15 }
 0x17c   :  { %v7047_v44 = vpack.i.bf16 %v490_v40, %v9001_v18  ;;  %v776_v40 = vsel %vm715_vm0, %v6850_v17, %v14634_v16  ;;  %v14636_v16 = vunpack.i.l.bf16 %v8842_v33 }
 0x17d   :  { %1430 = vmatpush.msra.mxu3 %v8746_v32  ;;  %1288 = vmatpush.msra.mxu1 %v781_v34  ;;  %v14632_v32 = vld [vmem:[#allocation45_spill] sm:$0xff]  ;;  %v9377_v34 = vunpack.i.h.bf16 %v8499_v50  ;;  %v771_v17 = vsel %vm715_vm0, %v6860_v48, %v14635_v20 }
 0x17e   :  { %7008 = vrot.lane.b32.xlu0 %v7007_v60, %s8021_s11  ;;  %v7072_v63 = vpack.i.bf16 %v9356_v61, %v14632_v32  ;;  %v9371_v23 = vpop.permute.xlu1 %6878 }
 0x17f   :  { %1431 = vmatpush.msra.mxu3 %v14633_v38  ;;  %7048 = vrot.lane.b32.xlu2 %v7047_v44, %s8021_s11  ;;  %v6881_v53 = vunpack.i.h.bf16 %v9371_v23  ;;  %v9381_v60 = vpop.permute.xlu0 %6828  ;;  %v9384_v38 = vunpack.i.h.bf16 %v8795_v2  ;;  %v519_v2 = vsel %vm317_vm3, %v9154_v27, %v9097_v10 }
 0x180   :  { %7073 = vrot.lane.b32.xlu1 %v7072_v63, %s8021_s11  ;;  %1289 = vmatpush.msra.mxu1 %v776_v40  ;;  %v9387_v44 = vpop.permute.xlu2 %6893 }
 0x181   :  { %1432 = vmatpush.msra.mxu3 %v8683_v22  ;;  %v6896_v63 = vunpack.i.h.bf16 %v9387_v44  ;;  %v143_v40 = vsel %vm142_vm15, %v6881_v53, %v14636_v16  ;;  %v14637_v22 = vunpack.i.h.bf16 %v9285_v4  ;;  %v14639_v53 = vunpack.i.l.bf16 %v9048_v11 }
 0x182   :  { %1290 = vmatpush.msra.mxu1 %v771_v17  ;;  %1275 = vmatpush.msra.mxu0 %v143_v40  ;;  %v14638_v17 = vld [vmem:[#allocation38_spill] sm:$0xff]  ;;  %v9416_v10 = vsel %vm162_vm10, %v8872_v47, %v9384_v38 }
 0x183   :  { %1433 = vmatpush.msra.mxu3 %v14613_v39  ;;  %v766_v48 = vsel %vm715_vm0, %v6870_v37, %v14637_v22  ;;  %v9408_v50 = vsel %vm202_vm6, %v14638_v17, %v9377_v34  ;;  %v123_v16 = vsel %vm122_vm14, %v6896_v63, %v14639_v53  ;;  %v14640_v39 = vld [vmem:[#allocation40_spill] sm:$0xff]  ;;  %v7087_v40 = vpack.i.bf16 %v519_v2, %v9416_v10  ;;  %v14641_v22 = vld [vmem:[#allocation10_spill] sm:$0xff] }
 0x184   :  { %1291 = vmatpush.msra.mxu1 %v766_v48  ;;  %v7062_v37 = vpack.i.bf16 %v9408_v50, %v14640_v39  ;;  %1276 = vmatpush.msra.mxu0 %v123_v16  ;;  %v14642_v48 = vld [vmem:[#allocation12_spill] sm:$0xff]  ;;  %v14644_v63 = vunpack.i.l.bf16 %v9371_v23  ;;  %v14645_v53 = vunpack.i.h.bf16 %v8842_v33  ;;  %v14647_v33 = vunpack.i.h.bf16 %v9048_v11  ;;  %v14650_v11 = vld [vmem:[#allocation15_spill] sm:$0xff] }
 0x185   :  { %1434 = vmatpush.msra.mxu3 %v8892_v59  ;;  %v14643_v20 = vpack.i.bf16 %v14641_v22, %v14642_v48 }
 0x186   :  { %v145_v47 = vsel %vm142_vm15, %v14645_v53, %v14644_v63  ;;  %v9432_v59 = vpop.permute.xlu1 %6888  ;;  %1277 = vmatpush.msra.mxu0 %v9067_v30  ;;  %v14648_v30 = vld [vmem:[#allocation8_spill] sm:$0xff]  ;;  %v9457_v53 = vunpack.i.h.bf16 %v8743_v26 }
 0x187   :  { %7023 = vrot.lane.b32.xlu0 %v14643_v20, %s8021_s11  ;;  %1435 = vmatpush.msra.mxu3 %v145_v47  ;;  %v6891_v2 = vunpack.i.h.bf16 %v9432_v59  ;;  %v6890_v16 = vunpack.i.l.bf16 %v9432_v59  ;;  %v515_v17 = vpop.permute.xlu0 %514  ;;  %v14646_v20 = vunpack.i.l.bf16 %v9387_v44 }
 0x188   :  { %7063 = vrot.lane.b32.xlu2 %v7062_v37, %s8021_s11  ;;  %7088 = vrot.lane.b32.xlu1 %v7087_v40, %s8021_s11  ;;  %v9443_v47 = vpop.permute.xlu2 %6908  ;;  %v522_v37 = vsel %vm340_vm1, %v9089_v0, %v9092_v31  ;;  %v516_v63 = vsel %vm14649_vm5, %v14648_v30, %v515_v17  ;;  %v14651_v0 = vld [vmem:[#allocation58_spill] sm:$0xff]  ;;  %v14653_v17 = vld [vmem:[#allocation20_spill] sm:$0xff]  ;;  %vm14658_vm5 = vcmask 605184  }
 0x189   :  { %v125_v48 = vsel %vm122_vm14, %v14647_v33, %v14646_v20  ;;  %1278 = vmatpush.msra.mxu0 %v9117_v56  ;;  %v761_v40 = vsel %vm715_vm0, %v6890_v16, %v6891_v2  ;;  %v6790_v20 = vunpack.i.l.bf16 %v8918_v36  ;;  %v7077_v31 = vpack.i.bf16 %v14651_v0, %v522_v37 }
 0x18a   :  { %1436 = vmatpush.msra.mxu3 %v125_v48  ;;  %1292 = vmatpush.msra.mxu1 %v761_v40  ;;  %v6780_v56 = vunpack.i.l.bf16 %v9213_v57  ;;  %v7102_v16 = vpack.i.bf16 %v8985_v29, %v516_v63  ;;  %v6795_v33 = vunpack.i.l.bf16 %v9250_v6  ;;  %v14657_v63 = vld [vmem:[#allocation9_spill] sm:$0xff] }
 0x18b   :  { %1279 = vmatpush.msra.mxu0 %v14650_v11 }
 0x18c   :  { %1437 = vmatpush.msra.mxu3 %v9057_v51  ;;  %v14652_v51 = vpack.i.bf16 %v14622_v58, %v14641_v22  ;;  %v14654_v58 = vunpack.i.h.bf16 %v9281_v43 }
 0x18d   :  { %1280 = vmatpush.msra.mxu0 %v14653_v17 }
 0x18e   :  { %1438 = vmatpush.msra.mxu3 %v9006_v9  ;;  %v9471_v26 = vpop.permute.xlu1 %6903  ;;  %v792_v22 = vsel %vm715_vm0, %v14654_v58, %v6780_v56 }
 0x18f   :  { %7038 = vrot.lane.b32.xlu0 %v14652_v51, %s14371_s25  ;;  %v6906_v9 = vunpack.i.h.bf16 %v9471_v26  ;;  %v6905_v29 = vunpack.i.l.bf16 %v9471_v26  ;;  %v512_v48 = vpop.permute.xlu0 %511  ;;  %1281 = vmatpush.msra.mxu0 %v9230_v7  ;;  %v14659_v7 = vunpack.i.h.bf16 %v8708_v42  ;;  %v14662_v42 = vld [vmem:[#allocation11_spill] sm:$0xff] }
 0x190   :  { %7078 = vrot.lane.b32.xlu2 %v7077_v31, %s8021_s11  ;;  %1439 = vmatpush.msra.mxu3 %v8936_v5  ;;  %v14655_v5 = vld [vmem:[#allocation31_spill] sm:$0xff]  ;;  %v9491_v11 = vsel %vm14658_vm5, %v14657_v63, %v512_v48  ;;  %v9493_v31 = vpop.permute.xlu2 %140  ;;  %v14661_v48 = vunpack.i.h.bf16 %v9327_v62  ;;  %v14663_v62 = vunpack.i.h.bf16 %v9211_v28  ;;  %v14665_v28 = vunpack.i.h.bf16 %v9215_v19 }
 0x191   :  { %7103 = vrot.lane.b32.xlu1 %v7102_v16, %s8021_s11  ;;  %v14656_v37 = vunpack.i.h.bf16 %v14655_v5  ;;  %1366 = vmatpush.msrb.mxu0 %v792_v22  ;;  %v491_v43 = vsel %vm487_vm2, %v14659_v7, %v6790_v20  ;;  %v14660_v16 = vld [vmem:[#allocation66_spill] sm:$0xff]  ;;  %v6566_v22 = vunpack.i.h.bf16 %v14662_v42  ;;  %v14317_v5 = vunpack.i.l.bf16 %v9159_v24 }
 0x192   :  { %1440 = vmatpush.msra.mxu3 %v9001_v18  ;;  %v6805_v51 = vunpack.i.l.bf16 %v14660_v16  ;;  %v787_v58 = vsel %vm715_vm0, %v14661_v48, %v6795_v33  ;;  %v756_v18 = vsel %vm715_vm0, %v6905_v29, %v6906_v9  ;;  %1282 = vmatmul.f32.vlgmr.msra.gmra.mxu0 %v9302_v55  ;;  %v6830_v7 = vunpack.i.l.bf16 %v9381_v60 }
 0x193   :  { %v9487_v40 = vsel %vm375_vm13, %v14656_v37, %v9457_v53  ;;  %1367 = vmatpush.msrb.mxu0 %v787_v58  ;;  %v6815_v37 = vunpack.i.l.bf16 %v9051_v54  ;;  %1293 = vmatpush.msra.mxu1 %v756_v18  ;;  %v7052_v48 = vpack.i.bf16 %v9263_v52, %v491_v43  ;;  %v14316_v42 = vunpack.i.l.bf16 %v9163_v3 }
 0x194   :  { %v7112_v17 = vpack.i.bf16 %v9491_v11, %v9487_v40  ;;  %1441 = vmatpush.msra.mxu3 %v9263_v52  ;;  %v782_v29 = vsel %vm715_vm0, %v14663_v62, %v6805_v51  ;;  %v7092_v58 = vpack.i.bf16 %v14657_v63, %v9356_v61  ;;  %v14666_v61 = vunpack.i.l.bf16 %v8970_v14  ;;  %v14697_v11 = vld [vmem:[#allocation70_spill] sm:$0xff] }
 0x195   :  { %1368 = vmatpush.msrb.mxu0 %v782_v29  ;;  %1442 = vmatmul.f32.vlgmr.msra.gmra.mxu3 %v9302_v55  ;;  %v777_v52 = vsel %vm715_vm0, %v14665_v28, %v6815_v37  ;;  %v6845_v43 = vunpack.i.l.bf16 %v9248_v25  ;;  %vm14671_vm13 = vcmask 793600   ;;  %vm14678_vm5 = vcmask 1031168  }
 0x196   :  { %1506 = vmatpush.msrb.mxu3 %v14595_v8  ;;  %v14664_v8 = vld [vmem:[#allocation37_spill] sm:$0xff]  ;;  %v298_v63 = vsel %vm294_vm12, %v14666_v61, %v14317_v5 }
 0x197   :  { %7053 = vrot.lane.b32.xlu0 %v7052_v48, %s8021_s11  ;;  %v7117_v18 = vpack.i.bf16 %v6566_v22, %v14664_v8  ;;  %1369 = vmatpush.msrb.mxu0 %v777_v52  ;;  %v9549_v29 = vpop.permute.xlu0 %467  ;;  %v14667_v48 = vunpack.i.h.bf16 %v9257_v15  ;;  %v14669_v52 = vld [vmem:[#allocation14_spill] sm:$0xff]  ;;  %v14672_v15 = vunpack.i.h.bf16 %v9285_v4  ;;  %v14674_v4 = vunpack.i.h.bf16 %v14616_v12 }
 0x198   :  { %1507 = vmatpush.msrb.mxu3 %v14629_v46  ;;  %7093 = vrot.lane.b32.xlu2 %v7092_v58, %s14371_s25  ;;  %v9543_v46 = vpop.permute.xlu1 %6918  ;;  %v9556_v58 = vpop.permute.xlu2 %6933  ;;  %v14670_v61 = vunpack.i.l.bf16 %v14669_v52 }
 0x199   :  { %7118 = vrot.lane.b32.xlu1 %v7117_v18, %s14371_s25  ;;  %v6921_v19 = vunpack.i.h.bf16 %v9543_v46  ;;  %v6920_v62 = vunpack.i.l.bf16 %v9543_v46  ;;  %v772_v14 = vsel %vm715_vm0, %v14667_v48, %v6830_v7  ;;  %v14668_v18 = vunpack.i.l.bf16 %v9042_v13 }
 0x19a   :  { %1508 = vmatpush.msrb.mxu3 %v298_v63  ;;  %1370 = vmatpush.msrb.mxu0 %v772_v14  ;;  %v9566_v63 = vsel %vm14671_vm13, %v14670_v61, %v6566_v22  ;;  %v6855_v46 = vunpack.i.l.bf16 %v9279_v45  ;;  %v767_v48 = vsel %vm715_vm0, %v14672_v15, %v6845_v43  ;;  %v14324_v13 = vunpack.i.l.bf16 %v9317_v35  ;;  %v14675_v61 = vld [vmem:[#allocation33_spill] sm:$0xff] }
 0x19b   :  { %v275_v28 = vsel %vm271_vm7, %v14668_v18, %v14316_v42  ;;  %v751_v14 = vsel %vm715_vm0, %v6920_v62, %v6921_v19  ;;  %v14673_v18 = vld [vmem:[#allocation48_spill] sm:$0xff]  ;;  %v7107_v52 = vpack.i.bf16 %v14674_v4, %v9416_v10  ;;  %v7132_v62 = vpack.i.bf16 %v9377_v34, %v9487_v40  ;;  %v14703_v42 = vld [vmem:[#allocation34_spill] sm:$0xff] }
 0x19c   :  { %1509 = vmatpush.msrb.mxu3 %v275_v28  ;;  %1371 = vmatpush.msrb.mxu0 %v767_v48  ;;  %v762_v22 = vsel %vm715_vm0, %v6891_v2, %v6855_v46  ;;  %v7067_v28 = vpack.i.bf16 %v9154_v27, %v9566_v63  ;;  %v757_v59 = vsel %vm715_vm0, %v6906_v9, %v14324_v13  ;;  %v14676_v2 = vld [vmem:[#allocation49_spill] sm:$0xff]  ;;  %v6756_v10 = vunpack.i.h.bf16 %v8881_v21 }
 0x19d   :  { %1294 = vmatpush.msra.mxu1 %v751_v14  ;;  %v9597_v27 = vunpack.i.h.bf16 %v14676_v2  ;;  %v7177_v5 = vpack.i.bf16 %v14703_v42, %v9384_v38  ;;  %vm14715_vm13 = vcmask 97280  }
 0x19e   :  { %1510 = vmatpush.msrb.mxu3 %v14673_v18  ;;  %1372 = vmatpush.msrb.mxu0 %v762_v22  ;;  %v473_v9 = vsel %vm469_vm9, %v6756_v10, %v9549_v29  ;;  %v14677_v22 = vld [vmem:[#allocation59_spill] sm:$0xff] }
 0x19f   :  { %7068 = vrot.lane.b32.xlu0 %v7067_v28, %s14371_s25  ;;  %v9603_v14 = vpop.permute.xlu0 %6873  ;;  %v9614_v28 = vsel %vm14678_vm5, %v14677_v22, %v9597_v27  ;;  %vm14718_vm5 = vmmov %vm14715_vm13 }
 0x1a0   :  { %1511 = vmatpush.msrb.mxu3 %v14675_v61  ;;  %7108 = vrot.lane.b32.xlu2 %v7107_v52, %s14371_s25  ;;  %v6929_v12 = vpop.permute.xlu1 %6928  ;;  %v9605_v26 = vpop.permute.xlu2 %6943  ;;  %v14680_v52 = vunpack.i.l.bf16 %v8881_v21  ;;  %v6791_v21 = vunpack.i.h.bf16 %v8918_v36 }
 0x1a1   :  { %1373 = vmatpush.msrb.mxu0 %v757_v59  ;;  %7133 = vrot.lane.b32.xlu1 %v7132_v62, %s14371_s25  ;;  %v6931_v15 = vunpack.i.h.bf16 %v6929_v12  ;;  %v6930_v48 = vunpack.i.l.bf16 %v6929_v12  ;;  %v14681_v59 = vld [vmem:[#allocation62_spill] sm:$0xff] }
 0x1a2   :  { %1512 = vmatpush.msrb.mxu3 %v14640_v39  ;;  %v14679_v39 = vunpack.i.l.bf16 %v9371_v23  ;;  %v472_v62 = vsel %vm469_vm9, %v14680_v52, %v6756_v10  ;;  %v7147_v2 = vpack.i.bf16 %v9614_v28, %v14681_v59  ;;  %v14682_v12 = vld [vmem:[#allocation50_spill] sm:$0xff]  ;;  %vm14706_vm9 = vcmask 670720  }
 0x1a3   :  { %v746_v18 = vsel %vm715_vm0, %v6930_v48, %v6931_v15  ;;  %v7122_v61 = vpack.i.bf16 %v473_v9, %v472_v62  ;;  %v14318_v23 = vunpack.i.h.bf16 %v14682_v12  ;;  %v14686_v62 = vld [vmem:[#allocation30_spill] sm:$0xff] }
 0x1a4   :  { %1513 = vmatpush.msrb.mxu3 %v14632_v32  ;;  %1295 = vmatpush.msra.mxu1 %v746_v18  ;;  %v146_v4 = vsel %vm142_vm15, %v14679_v39, %v9493_v31  ;;  %v7082_v32 = vpack.i.bf16 %v14648_v30, %v9408_v50  ;;  %v14683_v50 = vunpack.i.l.bf16 %v9387_v44  ;;  %v14684_v18 = vunpack.i.h.bf16 %v9161_v41  ;;  %v9662_v41 = vld [vmem:[%s14163_s3 + $0x10] sm:$0xff]  ;;  %vm14714_vm15 = vmmov %vm14706_vm9 }
 0x1a5   :  { %1322 = vmatmul.f32.vlgmr.msra.gmra.mxu2 %v9662_v41 }
 0x1a6   :  { %1514 = vmatpush.msrb.mxu3 %v14651_v0  ;;  %v458_v39 = vsel %vm454_vm8, %v14684_v18, %v9338_v1  ;;  %vm14702_vm8 = vcmask 1014784  }
 0x1a7   :  { %7083 = vrot.lane.b32.xlu0 %v7082_v32, %s14371_s25  ;;  %v9635_v0 = vpop.permute.xlu0 %6883  ;;  %v492_v32 = vsel %vm487_vm2, %v6790_v20, %v6791_v21  ;;  %vm14695_vm2 = vcmask 1039360  }
 0x1a8   :  { %1515 = vmatpush.msrb.mxu3 %v146_v4  ;;  %7123 = vrot.lane.b32.xlu2 %v7122_v61, %s8021_s11  ;;  %v9631_v48 = vpop.permute.xlu1 %120  ;;  %v14323_v10 = vunpack.i.l.bf16 %v9635_v0  ;;  %v9642_v9 = vpop.permute.xlu2 %6958  ;;  %v14685_v4 = vld [vmem:[#allocation64_spill] sm:$0xff]  ;;  %v7137_v61 = vpack.i.bf16 %v492_v32, %v458_v39  ;;  %v14690_v39 = vld [vmem:[#allocation67_spill] sm:$0xff] }
 0x1a9   :  { %7148 = vrot.lane.b32.xlu1 %v7147_v2, %s8021_s11  ;;  %v126_v30 = vsel %vm122_vm14, %v14683_v50, %v9631_v48  ;;  %v359_v52 = vsel %vm82_vm11, %v14685_v4, %v14318_v23  ;;  %v14687_v2 = vld [vmem:[#allocation68_spill] sm:$0xff]  ;;  %v14341_v23 = vunpack.i.h.bf16 %v9051_v54  ;;  %vm14708_vm14 = vcmask 64512  }
 0x1aa   :  { %1516 = vmatpush.msrb.mxu3 %v126_v30  ;;  %v752_v44 = vsel %vm715_vm0, %v6921_v19, %v14323_v10  ;;  %v14688_v19 = vld [vmem:[#allocation36_spill] sm:$0xff]  ;;  %v7157_v36 = vpack.i.bf16 %v9384_v38, %v359_v52  ;;  %v14691_v52 = vld [vmem:[#allocation5_spill] sm:$0xff] }
 0x1ab   :  { %1374 = vmatpush.msrb.mxu0 %v752_v44  ;;  %v14689_v50 = vpack.i.bf16 %v14664_v8, %v14688_v19  ;;  %v14692_v44 = vld [vmem:[#allocation51_spill] sm:$0xff]  ;;  %v14696_v19 = vld [vmem:[#allocation46_spill] sm:$0xff] }
 0x1ac   :  { %1517 = vmatpush.msrb.mxu3 %v14686_v62  ;;  %v6711_v62 = vunpack.i.h.bf16 %v14692_v44  ;;  %v14701_v44 = vld [vmem:[#allocation69_spill] sm:$0xff] }
 0x1ae   :  { %1518 = vmatpush.msrb.mxu3 %v14687_v2  ;;  %v14694_v2 = vld [vmem:[#allocation63_spill] sm:$0xff] }
 0x1af   :  { %7098 = vrot.lane.b32.xlu0 %v14689_v50, %s8021_s11  ;;  %v9676_v21 = vpop.permute.xlu0 %6898  ;;  %v6701_v50 = vunpack.i.h.bf16 %v14696_v19 }
 0x1b0   :  { %7138 = vrot.lane.b32.xlu2 %v7137_v61, %s8021_s11  ;;  %v9672_v20 = vpop.permute.xlu1 %6953  ;;  %1519 = vmatpush.msrb.mxu3 %v14681_v59  ;;  %v14322_v30 = vunpack.i.l.bf16 %v9676_v21  ;;  %v7152_v59 = vpack.i.bf16 %v14690_v39, %v9377_v34  ;;  %v9705_v34 = vsel %vm14695_vm2, %v14694_v2, %v6711_v62  ;;  %vm14719_vm2 = vmmov %vm14718_vm5 }
 0x1b1   :  { %7158 = vrot.lane.b32.xlu1 %v7157_v36, %s14371_s25  ;;  %v9679_v18 = vpop.permute.xlu2 %6973  ;;  %v7162_v40 = vpack.i.bf16 %v9325_v49, %v9705_v34  ;;  %v14698_v36 = vld [vmem:[#allocation18_spill] sm:$0xff] }
 0x1b2   :  { %1520 = vmatpush.msrb.mxu3 %v14690_v39  ;;  %v747_v8 = vsel %vm715_vm0, %v6931_v15, %v14322_v30  ;;  %v14693_v15 = vld [vmem:[#allocation71_spill] sm:$0xff]  ;;  %v14699_v39 = vld [vmem:[#allocation6_spill] sm:$0xff]  ;;  %v778_v30 = vsel %vm715_vm0, %v6815_v37, %v14341_v23  ;;  %v6976_v10 = vunpack.i.h.bf16 %v9679_v18  ;;  %v6975_v13 = vunpack.i.l.bf16 %v9679_v18 }
 0x1b3   :  { %1375 = vmatpush.msrb.mxu0 %v747_v8  ;;  %v14700_v8 = vpack.i.bf16 %v14698_v36, %v14699_v39  ;;  %v7202_v36 = vpack.i.bf16 %v9597_v27, %v9338_v1  ;;  %v14320_v39 = vunpack.i.h.bf16 %v9250_v6  ;;  %v14704_v1 = vld [vmem:[#allocation17_spill] sm:$0xff]  ;;  %v7167_v37 = vpack.i.bf16 %v14703_v42, %v9614_v28 }
 0x1b4   :  { %1521 = vmatpush.msrb.mxu3 %v14691_v52  ;;  %v731_v28 = vsel %vm715_vm0, %v6975_v13, %v6976_v10 }
 0x1b5   :  { %1522 = vmatmul.f32.vlgmr.msrb.gmra.mxu3 %v9302_v55 }
 0x1b7   :  { %7113 = vrot.lane.b32.xlu0 %v7112_v17, %s8021_s11  ;;  %v9699_v61 = vpop.permute.xlu0 %6913  ;;  %v7187_v17 = vpack.i.bf16 %v6701_v50, %v14697_v11 }
 0x1b8   :  { %7153 = vrot.lane.b32.xlu2 %v7152_v59, %s8021_s11  ;;  %v9695_v32 = vpop.permute.xlu1 %6968 }
 0x1b9   :  { %7173 = vrot.lane.b32.xlu1 %v14693_v15, %s8021_s11  ;;  %v9701_v55 = vpop.permute.xlu2 %6988  ;;  %v362_v15 = vsel %vm14702_vm8, %v14701_v44, %v6701_v50  ;;  %vm14722_vm8 = vmmov %vm14719_vm2 }
 0x1ba   :  { %v7142_v11 = vpack.i.bf16 %v9325_v49, %v362_v15  ;;  %v14325_v15 = vunpack.i.h.bf16 %v14660_v16 }
 0x1bf   :  { %7128 = vrot.lane.b32.xlu0 %v14700_v8, %s8021_s11  ;;  %v9719_v59 = vpop.permute.xlu0 %6923  ;;  %v14705_v8 = vunpack.i.h.bf16 %v14704_v1  ;;  %v7996_v1 = vld [vmem:[%s14162_s0 + $0x28] sm:$0xff] }
 0x1c0   :  { %7163 = vrot.lane.b32.xlu2 %v7162_v40, %s8021_s11  ;;  %v9716_v52 = vpop.permute.xlu1 %6983  ;;  %v14319_v40 = vunpack.i.h.bf16 %v9213_v57 }
 0x1c1   :  { %7188 = vrot.lane.b32.xlu1 %v7187_v17, %s14371_s25  ;;  %v9723_v19 = vpop.permute.xlu2 %7003  ;;  %v6986_v18 = vunpack.i.h.bf16 %v9716_v52 }
 0x1c7   :  { %7143 = vrot.lane.b32.xlu0 %v7142_v11, %s14371_s25  ;;  %v793_v11 = vsel %vm715_vm0, %v6780_v56, %v14319_v40  ;;  %v14707_v56 = vld [vmem:[#allocation28_spill] sm:$0xff]  ;;  %v6960_v40 = vunpack.i.l.bf16 %v9642_v9 }
 0x1c8   :  { %7178 = vrot.lane.b32.xlu2 %v7177_v5, %s8021_s11  ;;  %v9734_v17 = vpop.permute.xlu0 %6938  ;;  %v9736_v50 = vpop.permute.xlu1 %6998 }
 0x1c9   :  { %7203 = vrot.lane.b32.xlu1 %v7202_v36, %s8021_s11  ;;  %v14321_v49 = vunpack.i.l.bf16 %v9734_v17  ;;  %v9740_v38 = vpop.permute.xlu2 %7018  ;;  %v7192_v36 = vpack.i.bf16 %v9549_v29, %v9457_v53  ;;  %v14340_v29 = vunpack.i.h.bf16 %v9381_v60 }
 0x1cb   :  { %v1243_v5 = vsel %vm14706_vm9, %v14705_v8, %v14321_v49  ;;  %v7212_v8 = vpack.i.bf16 %v7996_v1, %v6711_v62  ;;  %vm14725_vm9 = vmmov %vm14719_vm2 }
 0x1cc   :  { %1421 = vmatpush.msrb.mxu2 %v1243_v5  ;;  %v788_v5 = vsel %vm715_vm0, %v6795_v33, %v14320_v39  ;;  %v783_v33 = vsel %vm715_vm0, %v6805_v51, %v14325_v15 }
 0x1cd   :  { %6202 = vmatmul.msk.f32.vlgmr.msrb.gmra.mxu2 %vm14708_vm14, %v14707_v56  ;;  %vm14726_vm14 = vmmov %vm14719_vm2 }
 0x1ce   :  { %1446 = vmatpush.msra.mxu2 %v793_v11  ;;  %v6961_v11 = vunpack.i.h.bf16 %v9642_v9  ;;  %v14339_v9 = vunpack.i.h.bf16 %v9248_v25 }
 0x1cf   :  { %1237 = vrot.lane.b32.xlu0 %v7996_v1, %s8026_s22 }
 0x1d0   :  { %7193 = vrot.lane.b32.xlu2 %v7192_v36, %s8021_s11  ;;  %1447 = vmatpush.msra.mxu2 %v788_v5  ;;  %v6949_v62 = vpop.permute.xlu0 %6948  ;;  %v9772_v1 = vpop.permute.xlu1 %7013  ;;  %v6915_v36 = vunpack.i.l.bf16 %v9699_v61  ;;  %v6925_v5 = vunpack.i.l.bf16 %v9719_v59  ;;  %v768_v42 = vsel %vm715_vm0, %v6845_v43, %v14339_v9 }
 0x1d1   :  { %7213 = vrot.lane.b32.xlu1 %v7212_v8, %s8021_s11  ;;  %v6951_v39 = vunpack.i.h.bf16 %v6949_v62  ;;  %v6950_v49 = vunpack.i.l.bf16 %v6949_v62  ;;  %v14338_v62 = vunpack.i.h.bf16 %v9279_v45  ;;  %s8035_s11 = smov 106  }
 0x1d2   :  { %1448 = vmatpush.msra.mxu2 %v783_v33  ;;  %v773_v33 = vsel %vm715_vm0, %v6830_v7, %v14340_v29  ;;  %v14333_v7 = vunpack.i.h.bf16 %v9317_v35 }
 0x1d3   :  { %v741_v51 = vsel %vm715_vm0, %v6950_v49, %v6951_v39  ;;  %v742_v15 = vsel %vm715_vm0, %v6951_v39, %v6915_v36  ;;  %v9801_v49 = vpop.permute.xlu2 %7033  ;;  %v736_v39 = vsel %vm715_vm0, %v6960_v40, %v6961_v11  ;;  %v763_v43 = vsel %vm715_vm0, %v6855_v46, %v14338_v62 }
 0x1d4   :  { %1449 = vmatpush.msra.mxu2 %v778_v30  ;;  %1296 = vmatpush.msra.mxu1 %v741_v51  ;;  %v6985_v30 = vunpack.i.l.bf16 %v9716_v52  ;;  %v6945_v51 = vunpack.i.l.bf16 %v9605_v26  ;;  %v6955_v52 = vunpack.i.l.bf16 %v9672_v20  ;;  %v14710_v46 = vunpack.i.l.bf16 %v9635_v0 }
 0x1d5   :  { %1376 = vmatpush.msrb.mxu0 %v742_v15  ;;  %v737_v15 = vsel %vm715_vm0, %v6961_v11, %v6925_v5  ;;  %v14344_v62 = vunpack.i.l.bf16 %v9801_v49 }
 0x1d6   :  { %1450 = vmatpush.msra.mxu2 %v773_v33  ;;  %1297 = vmatpush.msra.mxu1 %v736_v39  ;;  %v14332_v33 = vunpack.i.h.bf16 %v9635_v0  ;;  %v726_v13 = vsel %vm715_vm0, %v6985_v30, %v6986_v18  ;;  %v14329_v39 = vunpack.i.h.bf16 %v9676_v21 }
 0x1d7   :  { %1377 = vmatpush.msrb.mxu0 %v737_v15  ;;  %7168 = vrot.lane.b32.xlu0 %v7167_v37, %s14371_s25  ;;  %v727_v37 = vsel %vm715_vm0, %v6986_v18, %v6955_v52  ;;  %v7182_v18 = vpack.i.bf16 %v9457_v53, %v9705_v34  ;;  %v14328_v53 = vunpack.i.h.bf16 %v9605_v26 }
 0x1d8   :  { %7208 = vrot.lane.b32.xlu2 %v7212_v8, %s14371_s25  ;;  %1451 = vmatpush.msra.mxu2 %v768_v42  ;;  %v9818_v40 = vpop.permute.xlu0 %6963  ;;  %v9820_v11 = vpop.permute.xlu1 %7028  ;;  %v732_v8 = vsel %vm715_vm0, %v6976_v10, %v6945_v51  ;;  %v14709_v10 = vunpack.i.l.bf16 %v9317_v35  ;;  %v14326_v42 = vunpack.i.h.bf16 %v9699_v61  ;;  %v753_v30 = vsel %vm715_vm0, %v14710_v46, %v14332_v33 }
 0x1d9   :  { %1298 = vmatpush.msra.mxu1 %v731_v28  ;;  %1378 = vmatpush.msrb.mxu0 %v732_v8  ;;  %v14327_v28 = vunpack.i.h.bf16 %v9719_v59 }
 0x1da   :  { %1452 = vmatpush.msra.mxu2 %v763_v43  ;;  %v758_v15 = vsel %vm715_vm0, %v14709_v10, %v14333_v7  ;;  %v14711_v43 = vunpack.i.l.bf16 %v9676_v21  ;;  %v743_v34 = vsel %vm715_vm0, %v6915_v36, %v14326_v42  ;;  %v14712_v36 = vunpack.i.h.bf16 %v14682_v12 }
 0x1db   :  { %1299 = vmatpush.msra.mxu1 %v726_v13  ;;  %1379 = vmatpush.msrb.mxu0 %v727_v37  ;;  %v9846_v8 = vpop.permute.xlu2 %7048  ;;  %v738_v46 = vsel %vm715_vm0, %v6925_v5, %v14327_v28  ;;  %v14337_v28 = vunpack.i.h.bf16 %v9734_v17  ;;  %v7006_v12 = vunpack.i.h.bf16 %v9723_v19 }
 0x1dc   :  { %1453 = vmatpush.msra.mxu2 %v758_v15  ;;  %v748_v13 = vsel %vm715_vm0, %v14711_v43, %v14329_v39  ;;  %v14330_v15 = vunpack.i.h.bf16 %v9672_v20  ;;  %v733_v43 = vsel %vm715_vm0, %v6945_v51, %v14328_v53  ;;  %v14335_v39 = vunpack.i.h.bf16 %v9736_v50 }
 0x1dd   :  { %v7051_v29 = vunpack.i.h.bf16 %v9846_v8 }
 0x1de   :  { %1454 = vmatpush.msra.mxu2 %v753_v30  ;;  %v14331_v30 = vunpack.i.h.bf16 %v9695_v32 }
 0x1df   :  { %7183 = vrot.lane.b32.xlu0 %v7182_v18, %s14371_s25  ;;  %v6970_v18 = vunpack.i.l.bf16 %v9695_v32 }
 0x1e0   :  { %1455 = vmatpush.msra.mxu2 %v748_v13  ;;  %v9854_v37 = vpop.permute.xlu0 %6978  ;;  %v9856_v10 = vpop.permute.xlu1 %7043  ;;  %v7197_v13 = vpack.i.bf16 %v9597_v27, %v14712_v36 }
 0x1e1   :  { %v14334_v42 = vunpack.i.h.bf16 %v9854_v37  ;;  %v6980_v5 = vunpack.i.l.bf16 %v9854_v37  ;;  %v723_v53 = vsel %vm715_vm0, %v6970_v18, %v14331_v30  ;;  %v9903_v30 = vld [vmem:[%s14163_s3 + $0x8] sm:$0xff]  ;;  %v14343_v9 = vunpack.i.h.bf16 %v9856_v10 }
 0x1e2   :  { %1456 = vmatpush.msra.mxu2 %v743_v34  ;;  %v7005_v34 = vunpack.i.l.bf16 %v9723_v19 }
 0x1e3   :  { %v718_v19 = vsel %vm715_vm0, %v6980_v5, %v14334_v42  ;;  %v6876_v42 = vunpack.i.h.bf16 %v9603_v14 }
 0x1e4   :  { %1457 = vmatpush.msra.mxu2 %v738_v46  ;;  %v728_v46 = vsel %vm715_vm0, %v6955_v52, %v14330_v15  ;;  %v7000_v52 = vunpack.i.l.bf16 %v9736_v50  ;;  %v9893_v15 = vpop.permute.xlu2 %7063  ;;  %v716_v33 = vsel %vm715_vm0, %v7005_v34, %v7006_v12  ;;  %v717_v34 = vsel %vm715_vm0, %v7006_v12, %v6980_v5 }
 0x1e5   :  { %v6911_v5 = vunpack.i.h.bf16 %v9443_v47  ;;  %v14336_v12 = vunpack.i.l.bf16 %v9772_v1 }
 0x1e6   :  { %1458 = vmatpush.msra.mxu2 %v733_v43 }
 0x1e7   :  { %7198 = vrot.lane.b32.xlu0 %v7197_v13, %s14371_s25  ;;  %v6875_v13 = vunpack.i.l.bf16 %v9603_v14  ;;  %v7997_v14 = vld [vmem:[%s14162_s0 + $0x30] sm:$0xff]  ;;  %s8039_s25 = smov 68  }
 0x1e8   :  { %1459 = vmatpush.msra.mxu2 %v728_v46  ;;  %v6994_v51 = vpop.permute.xlu0 %6993  ;;  %v9885_v36 = vpop.permute.xlu1 %7058 }
 0x1e9   :  { %v6996_v27 = vunpack.i.h.bf16 %v6994_v51  ;;  %v6995_v43 = vunpack.i.l.bf16 %v6994_v51 }
 0x1ea   :  { %1460 = vmatpush.msra.mxu2 %v723_v53  ;;  %v14713_v53 = vunpack.i.l.bf16 %v9734_v17 }
 0x1eb   :  { %v721_v46 = vsel %vm715_vm0, %v6995_v43, %v6996_v27  ;;  %v722_v51 = vsel %vm715_vm0, %v6996_v27, %v6970_v18  ;;  %v1147_v18 = vsel %vm14715_vm13, %v7000_v52, %v14335_v39  ;;  %v6910_v27 = vunpack.i.l.bf16 %v9443_v47  ;;  %v14716_v43 = vld [vmem:[#allocation24_spill] sm:$0xff]  ;;  %vm14730_vm13 = vmmov %vm14719_vm2 }
 0x1ec   :  { %1461 = vmatpush.msra.mxu2 %v718_v19  ;;  %1300 = vmatpush.msra.mxu1 %v721_v46  ;;  %v1244_v7 = vsel %vm14714_vm15, %v14713_v53, %v14337_v28  ;;  %v14717_v19 = vunpack.i.h.bf16 %v14716_v43  ;;  %v14720_v53 = vld [vmem:[#allocation39_spill] sm:$0xff]  ;;  %vm14727_vm15 = vmmov %vm14719_vm2 }
 0x1ed   :  { %1380 = vmatpush.msrb.mxu0 %v722_v51  ;;  %1462 = vmatmul.f32.vlgmr.msra.gmra.mxu2 %v9903_v30 }
 0x1ee   :  { %1501 = vmatpush.msrb.mxu2 %v1244_v7  ;;  %1301 = vmatpush.msra.mxu1 %v716_v33  ;;  %v1145_v46 = vsel %vm14718_vm5, %v14717_v19, %v6875_v13  ;;  %v1146_v7 = vsel %vm14719_vm2, %v6875_v13, %v7000_v52  ;;  %v6935_v13 = vunpack.i.l.bf16 %v9556_v58  ;;  %v14723_v52 = vld [vmem:[#allocation43_spill] sm:$0xff]  ;;  %vm14731_vm5 = vcmask 64512  }
 0x1ef   :  { %1381 = vmatpush.msrb.mxu0 %v717_v34  ;;  %1239 = vrot.lane.b32.xlu0 %v7997_v14, %s8026_s22  ;;  %v14724_v47 = vunpack.i.h.bf16 %v14723_v52  ;;  %v14732_v52 = vld [vmem:[#allocation26_spill] sm:$0xff]  ;;  %s8031_s22 = smov 114  }
 0x1f0   :  { %1546 = vmatpush.msra.mxu2 %v1147_v18  ;;  %1386 = vmatpush.msrb.mxu1 %v1145_v46  ;;  %v9926_v33 = vpop.permute.xlu0 %7008  ;;  %v14721_v18 = vunpack.i.h.bf16 %v14720_v53  ;;  %v9947_v53 = vpop.permute.xlu2 %7078 }
 0x1f1   :  { %1466 = vmatpush.msra.mxu0 %v1146_v7  ;;  %v7011_v51 = vunpack.i.h.bf16 %v9926_v33  ;;  %1302 = vmatmul.f32.vlgmr.msra.gmra.mxu1 %v9903_v30  ;;  %v1135_v19 = vsel %vm14725_vm9, %v14724_v47, %v6910_v27  ;;  %v6936_v7 = vunpack.i.h.bf16 %v9556_v58  ;;  %v14733_v47 = vunpack.i.h.bf16 %v14732_v52  ;;  %vm14739_vm9 = vmmov %vm14719_vm2 }
 0x1f2   :  { %v1140_v34 = vsel %vm14722_vm8, %v14721_v18, %v6876_v42  ;;  %v9935_v43 = vpop.permute.xlu1 %7073  ;;  %1382 = vmatmul.f32.vlgmr.msrb.gmra.mxu0 %v9903_v30  ;;  %v14728_v18 = vld [vmem:[#allocation47_spill] sm:$0xff]  ;;  %vm14736_vm8 = vmmov %vm14719_vm2 }
 0x1f3   :  { %1387 = vmatpush.msrb.mxu1 %v1140_v34  ;;  %v1141_v46 = vsel %vm14726_vm14, %v6876_v42, %v7011_v51  ;;  %v1142_v14 = vsel %vm14727_vm15, %v7011_v51, %v14336_v12  ;;  %v14729_v34 = vunpack.i.h.bf16 %v14728_v18  ;;  %v6965_v42 = vunpack.i.l.bf16 %v9818_v40  ;;  %vm14740_vm14 = vmmov %vm14719_vm2 }
 0x1f4   :  { %1467 = vmatpush.msra.mxu0 %v1141_v46  ;;  %1547 = vmatpush.msra.mxu2 %v1142_v14  ;;  %v1125_v51 = vsel %vm14719_vm2, %v14733_v47, %v6935_v13  ;;  %v6966_v18 = vunpack.i.h.bf16 %v9818_v40  ;;  %v6990_v12 = vunpack.i.l.bf16 %v9701_v55  ;;  %v7045_v47 = vunpack.i.l.bf16 %v9856_v10  ;;  %vm14741_vm15 = vmmov %vm14719_vm2 }
 0x1f5   :  { %1388 = vmatpush.msrb.mxu1 %v1135_v19  ;;  %v1130_v39 = vsel %vm14730_vm13, %v14729_v34, %v6911_v5  ;;  %6203 = vmatmul.msk.f32.vlgmr.msrb.gmra.mxu2 %vm14731_vm5, %v14707_v56  ;;  %v14734_v19 = vld [vmem:[#allocation25_spill] sm:$0xff]  ;;  %vm14744_vm13 = vmmov %vm14719_vm2 }
 0x1f6   :  { %v14735_v46 = vunpack.i.h.bf16 %v14734_v19  ;;  %vm14745_vm5 = vmmov %vm14719_vm2 }
 0x1f7   :  { %1389 = vmatpush.msrb.mxu1 %v1130_v39  ;;  %v7031_v39 = vunpack.i.h.bf16 %v9820_v11 }
 0x1f8   :  { %v1120_v14 = vsel %vm14736_vm8, %v14735_v46, %v6936_v7  ;;  %v9986_v2 = vpop.permute.xlu2 %7093  ;;  %vm14748_vm8 = vmmov %vm14719_vm2 }
 0x1f9   :  { %1390 = vmatpush.msrb.mxu1 %v1125_v51  ;;  %v9958_v58 = vpop.permute.xlu0 %7023  ;;  %v14737_v51 = vld [vmem:[#allocation27_spill] sm:$0xff] }
 0x1fa   :  { %v14342_v34 = vunpack.i.h.bf16 %v9958_v58  ;;  %v7025_v56 = vunpack.i.l.bf16 %v9958_v58  ;;  %v9968_v52 = vpop.permute.xlu1 %7088  ;;  %v14738_v28 = vunpack.i.h.bf16 %v14737_v51  ;;  %v14742_v51 = vld [vmem:[#allocation42_spill] sm:$0xff] }
 0x1fb   :  { %1391 = vmatpush.msrb.mxu1 %v1120_v14  ;;  %v14345_v14 = vunpack.i.h.bf16 %v9701_v55  ;;  %v14743_v23 = vunpack.i.h.bf16 %v14742_v51 }
 0x1fc   :  { %v1115_v19 = vsel %vm14739_vm9, %v14738_v28, %v6965_v42  ;;  %v1136_v46 = vsel %vm14740_vm14, %v6910_v27, %v7025_v56  ;;  %v1137_v40 = vsel %vm14741_vm15, %v7025_v56, %v14342_v34  ;;  %v1131_v27 = vsel %vm14745_vm5, %v6911_v5, %v7031_v39  ;;  %vm14749_vm9 = vmmov %vm14719_vm2 }
 0x1fd   :  { %1392 = vmatpush.msrb.mxu1 %v1115_v19  ;;  %1468 = vmatpush.msra.mxu0 %v1136_v46  ;;  %v1110_v28 = vsel %vm14744_vm13, %v14743_v23, %v6966_v18  ;;  %v1132_v56 = vsel %vm14719_vm2, %v7031_v39, %v14344_v62  ;;  %v7065_v19 = vunpack.i.l.bf16 %v9893_v15  ;;  %v14346_v46 = vunpack.i.l.bf16 %v9926_v33  ;;  %vm14750_vm14 = vmmov %vm14719_vm2 }
 0x1fe   :  { %1548 = vmatpush.msra.mxu2 %v1137_v40  ;;  %v14746_v40 = vld [vmem:[#allocation57_spill] sm:$0xff]  ;;  %v1126_v23 = vsel %vm14749_vm9, %v6935_v13, %v7045_v47  ;;  %v14348_v39 = vunpack.i.h.bf16 %v9772_v1  ;;  %vm14753_vm15 = vmmov %vm14719_vm2 }
 0x1ff   :  { %1393 = vmatpush.msrb.mxu1 %v1110_v28  ;;  %1469 = vmatpush.msra.mxu0 %v1131_v27  ;;  %v14747_v34 = vunpack.i.h.bf16 %v14746_v40  ;;  %v1127_v28 = vsel %vm14750_vm14, %v7045_v47, %v14343_v9  ;;  %v7075_v27 = vunpack.i.l.bf16 %v9935_v43  ;;  %vm14754_vm13 = vmmov %vm14719_vm2  ;;  %v7081_v47 = vunpack.i.h.bf16 %v9947_v53  ;;  %v14755_v9 = vld [vmem:[#allocation65_spill] sm:$0xff] }
 0x200   :  { %1549 = vmatpush.msra.mxu2 %v1132_v56  ;;  %v14751_v56 = vld [vmem:[#allocation61_spill] sm:$0xff]  ;;  %v1121_v13 = vsel %vm14754_vm13, %v6936_v7, %v7051_v29  ;;  %vm14757_vm5 = vmmov %vm14719_vm2  ;;  %v14349_v7 = vunpack.i.h.bf16 %v9801_v49 }
 0x201   :  { %v1105_v51 = vsel %vm14748_vm8, %v14747_v34, %v6990_v12  ;;  %v9997_v5 = vpop.permute.xlu0 %7038  ;;  %1470 = vmatpush.msra.mxu0 %v1126_v23  ;;  %v14752_v40 = vunpack.i.h.bf16 %v14751_v56  ;;  %v14347_v23 = vunpack.i.l.bf16 %v9820_v11  ;;  %v1116_v56 = vsel %vm14719_vm2, %v6965_v42, %v7065_v19  ;;  %vm14760_vm8 = vmmov %vm14719_vm2 }
 0x202   :  { %1394 = vmatpush.msrb.mxu1 %v1105_v51  ;;  %1550 = vmatpush.msra.mxu2 %v1127_v28  ;;  %v14756_v28 = vunpack.i.h.bf16 %v14755_v9  ;;  %vm14761_vm9 = vmmov %vm14719_vm2  ;;  %v14350_v9 = vunpack.i.l.bf16 %v9846_v8 }
 0x203   :  { %v1100_v34 = vsel %vm14753_vm15, %v14752_v40, %v14345_v14  ;;  %v10010_v51 = vpop.permute.xlu1 %7103  ;;  %1471 = vmatpush.msra.mxu0 %v1121_v13  ;;  %v14758_v40 = vld [vmem:[#allocation52_spill] sm:$0xff]  ;;  %v1111_v14 = vsel %vm14761_vm9, %v6966_v18, %v7075_v27  ;;  %vm14764_vm14 = vmmov %vm14719_vm2 }
 0x204   :  { %1395 = vmatpush.msrb.mxu1 %v1100_v34  ;;  %v1095_v62 = vsel %vm14757_vm5, %v14756_v28, %v14346_v46  ;;  %v14759_v34 = vunpack.i.h.bf16 %v14758_v40  ;;  %v14762_v28 = vld [vmem:[#allocation54_spill] sm:$0xff]  ;;  %vm14765_vm15 = vmmov %vm14719_vm2  ;;  %v10034_v46 = vpop.permute.xlu2 %7108 }
 0x205   :  { %1472 = vmatpush.msra.mxu0 %v1116_v56  ;;  %v14763_v42 = vunpack.i.h.bf16 %v14762_v28  ;;  %v1106_v56 = vsel %vm14765_vm15, %v6990_v12, %v7081_v47  ;;  %vm14768_vm13 = vmmov %vm14719_vm2 }
 0x206   :  { %1396 = vmatpush.msrb.mxu1 %v1095_v62  ;;  %v1090_v13 = vsel %vm14760_vm8, %v14759_v34, %v14348_v39  ;;  %vm14771_vm5 = vmmov %vm14719_vm2 }
 0x207   :  { %1473 = vmatpush.msra.mxu0 %v1111_v14  ;;  %v1085_v62 = vsel %vm14764_vm14, %v14763_v42, %v14347_v23  ;;  %vm14775_vm8 = vmmov %vm14719_vm2 }
 0x208   :  { %1397 = vmatpush.msrb.mxu1 %v1090_v13  ;;  %v14766_v13 = vld [vmem:[#allocation53_spill] sm:$0xff]  ;;  %vm14777_vm9 = vmmov %vm14719_vm2 }
 0x209   :  { %v10036_v40 = vpop.permute.xlu0 %7053  ;;  %1474 = vmatpush.msra.mxu0 %v1106_v56  ;;  %v14767_v28 = vunpack.i.h.bf16 %v14766_v13  ;;  %v14769_v56 = vld [vmem:[#allocation55_spill] sm:$0xff]  ;;  %vm14780_vm14 = vmmov %vm14719_vm2 }
 0x20a   :  { %1398 = vmatpush.msrb.mxu1 %v1085_v62  ;;  %v14351_v34 = vunpack.i.l.bf16 %v10036_v40  ;;  %v14353_v62 = vunpack.i.h.bf16 %v9935_v43  ;;  %v14770_v39 = vunpack.i.h.bf16 %v14769_v56  ;;  %v14772_v13 = vunpack.i.h.bf16 %v10036_v40  ;;  %vm14782_vm15 = vmmov %vm14719_vm2 }
 0x20b   :  { %v1080_v42 = vsel %vm14768_vm13, %v14767_v28, %v14349_v7  ;;  %v10047_v23 = vpop.permute.xlu1 %7118  ;;  %v14773_v28 = vld [vmem:[#allocation60_spill] sm:$0xff]  ;;  %v7021_v56 = vunpack.i.h.bf16 %v9740_v38  ;;  %vm14792_vm13 = vmmov %vm14719_vm2 }
 0x20c   :  { %1399 = vmatpush.msrb.mxu1 %v1080_v42  ;;  %v1075_v18 = vsel %vm14771_vm5, %v14770_v39, %v14350_v9  ;;  %v1122_v14 = vsel %vm14719_vm2, %v7051_v29, %v14351_v34  ;;  %v14774_v7 = vunpack.i.h.bf16 %v14773_v28  ;;  %v1256_v42 = vld [vmem:[%s14164_s4 + $0xb50] sm:$0xff]  ;;  %v14352_v39 = vunpack.i.l.bf16 %v9968_v52  ;;  %vm14794_vm5 = vmmov %vm14719_vm2 }
 0x20d   :  { %1551 = vmatpush.msra.mxu2 %v1122_v14  ;;  %v14776_v9 = vunpack.i.h.bf16 %v9893_v15  ;;  %v8028_v34 = vmov 0   ;;  %v14779_v14 = vunpack.i.h.bf16 %v9213_v57  ;;  %v1112_v28 = vsel %vm14780_vm14, %v7075_v27, %v14353_v62  ;;  %vm14799_vm14 = vmmov %vm14719_vm2 }
 0x20e   :  { %v1070_v12 = vsel %vm14775_vm8, %v14774_v7, %v14772_v13  ;;  %1400 = vmatpush.msrb.mxu1 %v1075_v18  ;;  %7217 = vset.pattern.permute.xlu2 %v8028_v34  ;;  %v7040_v7 = vunpack.i.l.bf16 %v9997_v5  ;;  %v14778_v18 = vunpack.i.l.bf16 %v9740_v38  ;;  %v1107_v57 = vsel %vm14782_vm15, %v7081_v47, %v14352_v39  ;;  %vm14797_vm8 = vmmov %vm14719_vm2 }
 0x20f   :  { %v1117_v29 = vsel %vm14777_vm9, %v7065_v19, %v14776_v9  ;;  %7253 = vset.pattern.permute.xlu1 %v8028_v34  ;;  %1259 = vperm.xlu2 %7217, %v1256_v42   ;;  %v14365_v9 = vunpack.i.h.bf16 %v9997_v5  ;;  %v14363_v27 = vunpack.i.l.bf16 %v9885_v36  ;;  %v14783_v42 = vunpack.i.h.bf16 %v14660_v16  ;;  %vm14798_vm9 = vmmov %vm14719_vm2 }
 0x210   :  { %1401 = vmatpush.msrb.mxu1 %v1070_v12  ;;  %1552 = vmatpush.msra.mxu2 %v1117_v29  ;;  %v794_v13 = vsel %vm715_vm0, %v14779_v14, %v14778_v18  ;;  %v14781_v12 = vunpack.i.h.bf16 %v9250_v6  ;;  %v10092_v18 = vpop.permute.xlu2 %7123  ;;  %v14784_v47 = vunpack.i.h.bf16 %v9051_v54  ;;  %v14786_v54 = vunpack.i.h.bf16 %v9248_v25  ;;  %vm14801_vm15 = vmmov %vm14719_vm2 }
 0x211   :  { %1402 = vmatmul.f32.vlgmr.msrb.gmra.mxu1 %v9662_v41  ;;  %v10081_v19 = vpop.permute.xlu0 %7068  ;;  %7294 = vset.pattern.permute.xlu0 %v8028_v34  ;;  %v784_v14 = vsel %vm715_vm0, %v14783_v42, %v7040_v7  ;;  %v14788_v25 = vunpack.i.h.bf16 %v9317_v35  ;;  %v7106_v39 = vunpack.i.h.bf16 %v10010_v51 }
 0x212   :  { %1526 = vmatpush.msra.mxu1 %v794_v13  ;;  %1553 = vmatpush.msra.mxu2 %v1112_v28  ;;  %v789_v29 = vsel %vm715_vm0, %v14781_v12, %v7021_v56  ;;  %v14362_v13 = vunpack.i.l.bf16 %v10081_v19  ;;  %v779_v34 = vsel %vm715_vm0, %v14784_v47, %v14365_v9  ;;  %v14785_v28 = vunpack.i.h.bf16 %v9381_v60 }
 0x213   :  { %v10100_v6 = vpop.permute.xlu1 %7133  ;;  %v14787_v60 = vunpack.i.h.bf16 %v9279_v45  ;;  %v14789_v45 = vunpack.i.h.bf16 %v9635_v0  ;;  %v7125_v0 = vunpack.i.l.bf16 %v10092_v18 }
 0x214   :  { %1527 = vmatpush.msra.mxu1 %v789_v29  ;;  %1554 = vmatpush.msra.mxu2 %v1107_v57  ;;  %v774_v16 = vsel %vm715_vm0, %v14785_v28, %v14363_v27  ;;  %v14355_v29 = vunpack.i.l.bf16 %v9986_v2  ;;  %v769_v42 = vsel %vm715_vm0, %v14786_v54, %v14362_v13  ;;  %v14361_v28 = vunpack.i.l.bf16 %v10047_v23 }
 0x215   :  { %v14803_v13 = vunpack.i.h.bf16 %v9801_v49 }
 0x216   :  { %1528 = vmatpush.msra.mxu1 %v784_v14  ;;  %v14354_v14 = vunpack.i.l.bf16 %v10034_v46 }
 0x218   :  { %1529 = vmatpush.msra.mxu1 %v779_v34  ;;  %v10128_v34 = vpop.permute.xlu2 %7138 }
 0x219   :  { %v10113_v12 = vpop.permute.xlu0 %7083 }
 0x21a   :  { %1530 = vmatpush.msra.mxu1 %v774_v16  ;;  %v14356_v57 = vunpack.i.l.bf16 %v10113_v12  ;;  %v759_v16 = vsel %vm715_vm0, %v14788_v25, %v14355_v29 }
 0x21b   :  { %v10136_v54 = vpop.permute.xlu1 %7148 }
 0x21c   :  { %1531 = vmatpush.msra.mxu1 %v769_v42  ;;  %v764_v47 = vsel %vm715_vm0, %v14787_v60, %v14356_v57  ;;  %v14358_v42 = vunpack.i.l.bf16 %v10100_v6  ;;  %v754_v60 = vsel %vm715_vm0, %v14789_v45, %v14354_v14  ;;  %v14791_v45 = vunpack.i.h.bf16 %v9701_v55 }
 0x21e   :  { %1532 = vmatpush.msra.mxu1 %v764_v47 }
 0x220   :  { %1533 = vmatpush.msra.mxu1 %v759_v16  ;;  %v14790_v16 = vunpack.i.h.bf16 %v9676_v21  ;;  %v14795_v21 = vunpack.i.l.bf16 %v9926_v33  ;;  %v10169_v55 = vpop.permute.xlu2 %7153 }
 0x221   :  { %v10144_v47 = vpop.permute.xlu0 %7098 }
 0x222   :  { %1534 = vmatpush.msra.mxu1 %v754_v60  ;;  %v14357_v35 = vunpack.i.h.bf16 %v10144_v47  ;;  %v7100_v25 = vunpack.i.l.bf16 %v10144_v47  ;;  %v749_v62 = vsel %vm715_vm0, %v14790_v16, %v14361_v28  ;;  %v14793_v60 = vunpack.i.h.bf16 %v9699_v61 }
 0x223   :  { %v14796_v16 = vunpack.i.h.bf16 %v9772_v1 }
 0x224   :  { %1535 = vmatpush.msra.mxu1 %v749_v62  ;;  %v1101_v14 = vsel %vm14792_vm13, %v14791_v45, %v7100_v25  ;;  %v744_v29 = vsel %vm715_vm0, %v14793_v60, %v14358_v42  ;;  %v1102_v57 = vsel %vm14794_vm5, %v7100_v25, %v14357_v35  ;;  %v1096_v62 = vsel %vm14719_vm2, %v14795_v21, %v7106_v39  ;;  %v10174_v45 = vpop.permute.xlu1 %7158  ;;  %vm14802_vm13 = vmmov %vm14719_vm2 }
 0x225   :  { %1475 = vmatpush.msra.mxu0 %v1101_v14  ;;  %1555 = vmatpush.msra.mxu2 %v1102_v57  ;;  %v1091_v61 = vsel %vm14797_vm8, %v14796_v16, %v7125_v0  ;;  %v14359_v14 = vunpack.i.h.bf16 %v10092_v18  ;;  %v7151_v16 = vunpack.i.h.bf16 %v10136_v54  ;;  %vm14804_vm5 = vmmov %vm14719_vm2 }
 0x226   :  { %1536 = vmatpush.msra.mxu1 %v744_v29  ;;  %vm14806_vm8 = vmmov %vm14719_vm2 }
 0x227   :  { %1476 = vmatpush.msra.mxu0 %v1096_v62  ;;  %v1092_v57 = vsel %vm14799_vm14, %v7125_v0, %v14359_v14  ;;  %v14364_v62 = vunpack.i.l.bf16 %v10128_v34  ;;  %v14800_v0 = vunpack.i.l.bf16 %v9820_v11  ;;  %vm14808_vm14 = vmmov %vm14719_vm2 }
 0x228   :  { %v10186_v25 = vpop.permute.xlu2 %7163 }
 0x229   :  { %v10176_v60 = vpop.permute.xlu0 %7113  ;;  %1477 = vmatpush.msra.mxu0 %v1091_v61  ;;  %v7150_v61 = vunpack.i.l.bf16 %v10136_v54  ;;  %v1283_v54 = vpop.f32.mrf.mxu0 }
 0x22a   :  { %v14360_v29 = vunpack.i.l.bf16 %v10176_v60 }
 0x22b   :  { %v1081_v27 = vsel %vm14804_vm5, %v14803_v13, %v7150_v61  ;;  %v1082_v11 = vsel %vm14719_vm2, %v7150_v61, %v7151_v16  ;;  %v14809_v61 = vunpack.i.h.bf16 %v10036_v40  ;;  %vm14820_vm5 = vcmask 64512  }
 0x22c   :  { %v1097_v33 = vsel %vm14798_vm9, %v7106_v39, %v14360_v29  ;;  %v10194_v42 = vpop.permute.xlu1 %7173  ;;  %v7156_v39 = vunpack.i.h.bf16 %v10169_v55  ;;  %vm14807_vm9 = vmmov %vm14719_vm2 }
 0x22d   :  { %1556 = vmatpush.msra.mxu2 %v1097_v33  ;;  %v7165_v33 = vunpack.i.l.bf16 %v10186_v25  ;;  %v14366_v29 = vunpack.i.h.bf16 %v10194_v42  ;;  %v7175_v28 = vunpack.i.l.bf16 %v10194_v42 }
 0x22f   :  { %1557 = vmatpush.msra.mxu2 %v1092_v57  ;;  %v1072_v13 = vsel %vm14808_vm14, %v7175_v28, %v14366_v29  ;;  %vm14847_vm14 = vmmov %vm14719_vm2 }
 0x231   :  { %v10188_v21 = vpop.permute.xlu0 %7128 }
 0x232   :  { %v7131_v35 = vunpack.i.h.bf16 %v10188_v21 }
 0x234   :  { %v1086_v57 = vsel %vm14801_vm15, %v14800_v0, %v7131_v35  ;;  %v1087_v14 = vsel %vm14802_vm13, %v7131_v35, %v14364_v62  ;;  %v7061_v0 = vunpack.i.h.bf16 %v9885_v36  ;;  %v14805_v35 = vunpack.i.l.bf16 %v9846_v8  ;;  %vm14810_vm15 = vmmov %vm14719_vm2 }
 0x235   :  { %1478 = vmatpush.msra.mxu0 %v1086_v57  ;;  %1558 = vmatpush.msra.mxu2 %v1087_v14  ;;  %v1077_v57 = vsel %vm14807_vm9, %v7156_v39, %v7165_v33  ;;  %v7071_v62 = vunpack.i.h.bf16 %v10081_v19  ;;  %vm14816_vm13 = vcmask 670720   ;;  %vm14845_vm9 = vmmov %vm14719_vm2 }
 0x236   :  { %v1076_v14 = vsel %vm14806_vm8, %v14805_v35, %v7156_v39  ;;  %v7086_v39 = vunpack.i.h.bf16 %v10113_v12  ;;  %v14811_v35 = vunpack.i.l.bf16 %v9740_v38  ;;  %vm14842_vm8 = vmmov %vm14719_vm2 }
 0x237   :  { %1479 = vmatpush.msra.mxu0 %v1081_v27  ;;  %1559 = vmatpush.msra.mxu2 %v1082_v11  ;;  %v7160_v27 = vunpack.i.l.bf16 %v10174_v45  ;;  %v1071_v11 = vsel %vm14810_vm15, %v14809_v61, %v7175_v28  ;;  %v790_v28 = vsel %vm715_vm0, %v7021_v56, %v7071_v62  ;;  %v14814_v56 = vunpack.i.h.bf16 %v9997_v5  ;;  %vm14848_vm15 = vmmov %vm14816_vm13 }
 0x238   :  { %v795_v29 = vsel %vm715_vm0, %v14811_v35, %v7061_v0  ;;  %v7121_v35 = vunpack.i.h.bf16 %v10047_v23  ;;  %v6841_v5 = vunpack.i.h.bf16 %v9163_v3 }
 0x239   :  { %v10223_v9 = vpop.permute.xlu0 %7143  ;;  %1480 = vmatpush.msra.mxu0 %v1076_v14  ;;  %1560 = vmatpush.msra.mxu2 %v1077_v57  ;;  %v14812_v14 = vunpack.i.h.bf16 %v9719_v59  ;;  %v7096_v59 = vunpack.i.h.bf16 %v9986_v2 }
 0x23a   :  { %v7145_v8 = vunpack.i.l.bf16 %v10223_v9 }
 0x23b   :  { %1481 = vmatpush.msra.mxu0 %v1071_v11  ;;  %1561 = vmatpush.msra.mxu2 %v1072_v13  ;;  %v7111_v13 = vunpack.i.h.bf16 %v10034_v46  ;;  %v780_v62 = vsel %vm715_vm0, %v14814_v56, %v7096_v59  ;;  %v6826_v11 = vunpack.i.h.bf16 %v9159_v24  ;;  %v7161_v59 = vunpack.i.h.bf16 %v10174_v45 }
 0x23c   :  { %v739_v57 = vsel %vm715_vm0, %v14812_v14, %v7145_v8  ;;  %1562 = vmatmul.f32.vlgmr.msra.gmra.mxu2 %v9662_v41  ;;  %1482 = vmatmul.f32.vlgmr.msra.gmra.mxu0 %v9662_v41  ;;  %v785_v41 = vsel %vm715_vm0, %v7040_v7, %v7086_v39  ;;  %v14817_v7 = vunpack.i.l.bf16 %v9885_v36  ;;  %v14818_v14 = vld [vmem:[#allocation3_spill] sm:$0xff]  ;;  %v14821_v36 = vld [vmem:[#allocation2_spill] sm:$0xff]  ;;  %v7155_v45 = vunpack.i.l.bf16 %v10169_v55 }
 0x23d   :  { %1606 = vmatpush.msrb.mxu0 %v795_v29  ;;  %1537 = vmatpush.msra.mxu1 %v739_v57  ;;  %v14813_v29 = vunpack.i.h.bf16 %v9605_v26  ;;  %v14815_v26 = vunpack.i.h.bf16 %v9734_v17  ;;  %v7136_v57 = vunpack.i.h.bf16 %v10100_v6  ;;  %v7146_v17 = vunpack.i.h.bf16 %v10223_v9 }
 0x23e   :  { %v775_v39 = vsel %vm715_vm0, %v14817_v7, %v7111_v13  ;;  %v14822_v13 = vunpack.i.l.bf16 %v9159_v24  ;;  %v14846_v55 = vunpack.i.l.bf16 %v10036_v40  ;;  %v14849_v40 = vunpack.i.h.bf16 %v9893_v15 }
 0x23f   :  { %1607 = vmatpush.msrb.mxu0 %v790_v28  ;;  %v734_v0 = vsel %vm715_vm0, %v14813_v29, %v7160_v27  ;;  %v14819_v28 = vunpack.i.l.bf16 %v10081_v19  ;;  %v14823_v19 = vunpack.i.l.bf16 %v10113_v12  ;;  %v14826_v12 = vunpack.i.l.bf16 %v10034_v46  ;;  %v14830_v46 = vld [vmem:[#allocation38_spill] sm:$0xff] }
 0x240   :  { %1538 = vmatpush.msra.mxu1 %v734_v0  ;;  %v10278_v0 = vld [vmem:[%s14163_s3 + $0x18] sm:$0xff] }
 0x241   :  { %1608 = vmatpush.msrb.mxu0 %v785_v41  ;;  %v10254_v38 = vpop.permute.xlu0 %1237  ;;  %v770_v29 = vsel %vm715_vm0, %v14819_v28, %v7121_v35  ;;  %v299_v41 = vsel %vm294_vm12, %v14822_v13, %v6826_v11  ;;  %v765_v56 = vsel %vm715_vm0, %v14823_v19, %v7136_v57  ;;  %v14825_v35 = vunpack.i.l.bf16 %v9986_v2  ;;  %v14827_v57 = vld [vmem:[#allocation19_spill] sm:$0xff]  ;;  %v10309_v28 = vpop.permute.xlu1 %7188  ;;  %vm14839_vm12 = vmmov %vm14719_vm2 }
 0x242   :  { %v1245_v61 = vsel %vm14816_vm13, %v14815_v26, %v10254_v38  ;;  %v14824_v26 = vunpack.i.l.bf16 %v9163_v3  ;;  %v14828_v3 = vunpack.i.h.bf16 %v9672_v20  ;;  %v14829_v2 = vunpack.i.l.bf16 %v10047_v23  ;;  %v14832_v23 = vld [vmem:[#allocation56_spill] sm:$0xff]  ;;  %vm14850_vm13 = vmmov %vm14719_vm2 }
 0x243   :  { %1609 = vmatpush.msrb.mxu0 %v780_v62  ;;  %1581 = vmatpush.msra.mxu3 %v1245_v61  ;;  %v10290_v62 = vpop.permute.xlu2 %7178  ;;  %v760_v7 = vsel %vm715_vm0, %v14825_v35, %v7146_v17  ;;  %v7190_v20 = vunpack.i.l.bf16 %v10309_v28  ;;  %v7080_v19 = vunpack.i.l.bf16 %v9947_v53 }
 0x244   :  { %6204 = vmatmul.msk.f32.vlgmr.msra.gmra.mxu3 %vm14820_vm5, %v10278_v0  ;;  %v276_v61 = vsel %vm271_vm7, %v14824_v26, %v6841_v5  ;;  %vm14837_vm7 = vmmov %vm14719_vm2 }
 0x245   :  { %1586 = vmatpush.msrb.mxu3 %v14818_v14  ;;  %1610 = vmatpush.msrb.mxu0 %v775_v39  ;;  %v755_v14 = vsel %vm715_vm0, %v14826_v12, %v7161_v59  ;;  %v14831_v59 = vld [vmem:[#allocation41_spill] sm:$0xff]  ;;  %v7116_v12 = vunpack.i.h.bf16 %v10176_v60  ;;  %vm14852_vm5 = vmmov %vm14719_vm2 }
 0x247   :  { %1587 = vmatpush.msrb.mxu3 %v14821_v36  ;;  %1611 = vmatpush.msrb.mxu0 %v770_v29 }
 0x249   :  { %1588 = vmatpush.msrb.mxu3 %v299_v41  ;;  %1612 = vmatpush.msrb.mxu0 %v765_v56  ;;  %v7169_v39 = vpop.permute.xlu0 %7168  ;;  %v14833_v56 = vunpack.i.h.bf16 %v9695_v32 }
 0x24a   :  { %v7171_v24 = vunpack.i.h.bf16 %v7169_v39  ;;  %v7170_v11 = vunpack.i.l.bf16 %v7169_v39  ;;  %v14835_v39 = vunpack.i.h.bf16 %v9854_v37 }
 0x24b   :  { %1589 = vmatpush.msrb.mxu3 %v276_v61  ;;  %1613 = vmatpush.msrb.mxu0 %v760_v7  ;;  %v10312_v29 = vpop.permute.xlu2 %7193  ;;  %v14834_v61 = vunpack.i.l.bf16 %v10100_v6  ;;  %v7091_v7 = vunpack.i.h.bf16 %v9968_v52  ;;  %v7105_v6 = vunpack.i.l.bf16 %v10010_v51 }
 0x24c   :  { %v729_v5 = vsel %vm715_vm0, %v14828_v3, %v7170_v11  ;;  %v750_v17 = vsel %vm715_vm0, %v14829_v2, %v7171_v24  ;;  %v719_v53 = vsel %vm715_vm0, %v14835_v39, %v7190_v20  ;;  %v14836_v24 = vunpack.i.h.bf16 %v9736_v50 }
 0x24d   :  { %1590 = vmatpush.msrb.mxu3 %v14827_v57  ;;  %1614 = vmatpush.msrb.mxu0 %v755_v14  ;;  %v14840_v50 = vunpack.i.h.bf16 %v9958_v58  ;;  %v14841_v2 = vunpack.i.l.bf16 %v9801_v49 }
 0x24e   :  { %1539 = vmatpush.msra.mxu1 %v729_v5 }
 0x24f   :  { %1591 = vmatpush.msrb.mxu3 %v9566_v63  ;;  %1615 = vmatpush.msrb.mxu0 %v750_v17  ;;  %v7191_v63 = vunpack.i.h.bf16 %v10309_v28  ;;  %v1138_v3 = vsel %vm14719_vm2, %v14840_v50, %v7105_v6  ;;  %v14843_v17 = vld [vmem:[#allocation63_spill] sm:$0xff] }
 0x251   :  { %1592 = vmatpush.msrb.mxu3 %v14830_v46  ;;  %v7184_v36 = vpop.permute.xlu0 %7183  ;;  %v740_v32 = vsel %vm715_vm0, %v7145_v8, %v7191_v63  ;;  %v14838_v8 = vunpack.i.l.bf16 %v9772_v1  ;;  %v14851_v63 = vunpack.i.h.bf16 %v9935_v43 }
 0x252   :  { %v7186_v13 = vunpack.i.h.bf16 %v7184_v36  ;;  %v7185_v41 = vunpack.i.l.bf16 %v7184_v36 }
 0x253   :  { %1593 = vmatpush.msrb.mxu3 %v14831_v59  ;;  %v1143_v51 = vsel %vm14839_vm12, %v14838_v8, %v7091_v7  ;;  %v7209_v57 = vpop.permute.xlu2 %7208  ;;  %v7204_v59 = vpop.permute.xlu1 %7203  ;;  %vm14855_vm12 = vmmov %vm14719_vm2 }
 0x254   :  { %v724_v26 = vsel %vm715_vm0, %v14833_v56, %v7185_v41  ;;  %v745_v35 = vsel %vm715_vm0, %v14834_v61, %v7186_v13  ;;  %v7210_v1 = vunpack.i.l.bf16 %v7209_v57  ;;  %v7211_v58 = vunpack.i.h.bf16 %v7209_v57  ;;  %v8000_v13 = vld [vmem:[%s14163_s3] sm:$0xff] }
 0x255   :  { %1594 = vmatpush.msrb.mxu3 %v14832_v23  ;;  %1540 = vmatpush.msra.mxu1 %v724_v26  ;;  %v7180_v23 = vunpack.i.l.bf16 %v10290_v62  ;;  %v14854_v26 = vunpack.i.l.bf16 %v9968_v52  ;;  %v7196_v61 = vunpack.i.h.bf16 %v10312_v29  ;;  %v7205_v43 = vunpack.i.l.bf16 %v7204_v59 }
 0x256   :  { %1616 = vmatpush.msrb.mxu0 %v745_v35  ;;  %v725_v46 = vsel %vm715_vm0, %v7185_v41, %v7210_v1  ;;  %v720_v41 = vsel %vm715_vm0, %v7190_v20, %v7211_v58  ;;  %v7195_v20 = vunpack.i.l.bf16 %v10312_v29  ;;  %v14857_v35 = vunpack.i.l.bf16 %v10176_v60 }
 0x257   :  { %1595 = vmatpush.msrb.mxu3 %v9493_v31  ;;  %1541 = vmatpush.msra.mxu1 %v719_v53  ;;  %v1148_v31 = vsel %vm14837_vm7, %v14836_v24, %v7080_v19  ;;  %v1118_v19 = vsel %vm14850_vm13, %v14849_v40, %v7155_v45  ;;  %vm14853_vm7 = vcmask 64512   ;;  %v1108_v15 = vsel %vm14855_vm12, %v14854_v26, %v7180_v23  ;;  %vm14864_vm13 = vmmov %vm14719_vm2  ;;  %v1739_v26 = vld [vmem:[%s14164_s4 + $0xf0] sm:$0xff] }
 0x258   :  { %1617 = vmatpush.msrb.mxu0 %v740_v32  ;;  %1542 = vmatmul.f32.vlgmr.msra.gmra.mxu1 %v9903_v30  ;;  %v7206_v39 = vunpack.i.h.bf16 %v7204_v59  ;;  %v14859_v52 = vunpack.i.h.bf16 %v10092_v18  ;;  %v14861_v29 = vunpack.i.l.bf16 %v10128_v34  ;;  %v14865_v18 = vunpack.i.h.bf16 %v10194_v42 }
 0x259   :  { %1596 = vmatpush.msrb.mxu3 %v9631_v48  ;;  %1626 = vmatpush.msrb.mxu1 %v1148_v31  ;;  %v7199_v37 = vpop.permute.xlu0 %7198  ;;  %v7130_v48 = vunpack.i.l.bf16 %v10188_v21  ;;  %v1133_v21 = vsel %vm14842_vm8, %v14841_v2, %v7116_v12  ;;  %vm14858_vm8 = vmmov %vm14719_vm2 }
 0x25a   :  { %v7201_v14 = vunpack.i.h.bf16 %v7199_v37  ;;  %v7200_v9 = vunpack.i.l.bf16 %v7199_v37  ;;  %v1343_v37 = vpop.f32.mrf.mxu3 }
 0x25b   :  { %1597 = vmatpush.msrb.mxu3 %v14701_v44  ;;  %1627 = vmatpush.msrb.mxu1 %v1143_v51  ;;  %v7141_v44 = vunpack.i.h.bf16 %v10128_v34  ;;  %v7214_v7 = vpop.permute.xlu1 %7213  ;;  %v8001_v34 = vld [vmem:[%s14163_s3 + $0x10] sm:$0xff] }
 0x25c   :  { %v735_v5 = vsel %vm715_vm0, %v7160_v27, %v7200_v9  ;;  %v14844_v27 = vunpack.i.h.bf16 %v9856_v10  ;;  %v7215_v32 = vunpack.i.l.bf16 %v7214_v7  ;;  %v7216_v6 = vunpack.i.h.bf16 %v7214_v7 }
 0x25d   :  { %1598 = vmatpush.msrb.mxu3 %v14685_v4  ;;  %1628 = vmatpush.msrb.mxu1 %v1138_v3  ;;  %v730_v4 = vsel %vm715_vm0, %v7170_v11, %v7201_v14  ;;  %v7999_v11 = vld [vmem:[%s14162_s0 + $0x20] sm:$0xff]  ;;  %v1123_v36 = vsel %vm14847_vm14, %v14846_v55, %v7141_v44  ;;  %vm14862_vm14 = vmmov %vm14719_vm2  ;;  %s8033_s0 = smov 117  }
 0x25e   :  { %1618 = vmatpush.msrb.mxu0 %v735_v5  ;;  %v1128_v28 = vsel %vm14845_vm9, %v14844_v27, %v7130_v48  ;;  %vm14860_vm9 = vmmov %vm14719_vm2  ;;  %v1078_v24 = vsel %vm14864_vm13, %v7165_v33, %v7215_v32  ;;  %vm14390_vm13 = vcmask 130048  }
 0x25f   :  { %1599 = vmatpush.msrb.mxu3 %v14677_v22  ;;  %1629 = vmatpush.msrb.mxu1 %v1133_v21  ;;  %v7166_v22 = vunpack.i.h.bf16 %v10186_v25  ;;  %v1093_v53 = vsel %vm14860_vm9, %v14859_v52, %v7196_v61  ;;  %v1737_v61 = vld [vmem:[%s14164_s4 + $0xd0] sm:$0xff]  ;;  %vm1801_vm9 = vcmask 1044480  }
 0x260   :  { %1619 = vmatpush.msrb.mxu0 %v730_v4 }
 0x261   :  { %1600 = vmatpush.msrb.mxu3 %v14843_v17  ;;  %1630 = vmatpush.msrb.mxu1 %v1128_v28  ;;  %v1240_v49 = vpop.permute.xlu0 %1239  ;;  %v1113_v56 = vsel %vm14852_vm5, %v14851_v63, %v7166_v22  ;;  %vm14866_vm5 = vmmov %vm14719_vm2 }
 0x262   :  { %1620 = vmatpush.msrb.mxu0 %v725_v46  ;;  %v1246_v10 = vsel %vm14848_vm15, %v10254_v38, %v1240_v49  ;;  %v7181_v38 = vunpack.i.h.bf16 %v10290_v62  ;;  %vm14863_vm15 = vmmov %vm14719_vm2  ;;  %v1073_v31 = vsel %vm14866_vm5, %v14865_v18, %v7216_v6  ;;  %v1363_v25 = vpop.f32.mrf.mxu3  ;;  %vm2251_vm5 = vcmask 261120  }
 0x263   :  { %1601 = vmatpush.msrb.mxu3 %v7999_v11  ;;  %1631 = vmatpush.msrb.mxu1 %v1123_v36  ;;  %v1083_v60 = vsel %vm14863_vm15, %v7151_v16, %v7206_v39  ;;  %v1323_v16 = vpop.f32.mrf.mxu2  ;;  %vm2077_vm15 = vcmask 498688  }
 0x264   :  { %1602 = vmatmul.f32.vlgmr.msrb.gmra.mxu3 %v8000_v13  ;;  %1621 = vmatpush.msrb.mxu0 %v720_v41 }
 0x265   :  { %1661 = vmatpush.msrb.mxu2 %v1246_v10  ;;  %1632 = vmatpush.msrb.mxu1 %v1118_v19 }
 0x266   :  { %1622 = vmatmul.f32.vlgmr.msrb.gmra.mxu0 %v9903_v30  ;;  %6205 = vmatmul.msk.f32.vlgmr.msrb.gmra.mxu2 %vm14853_vm7, %v10278_v0  ;;  %v14856_v30 = vunpack.i.h.bf16 %v10144_v47  ;;  %v1098_v0 = vsel %vm14858_vm8, %v14857_v35, %v7195_v20  ;;  %v1088_v47 = vsel %vm14862_vm14, %v14861_v29, %v7205_v43  ;;  %vm14867_vm7 = vcmask 1039360  }
 0x267   :  { %1633 = vmatpush.msrb.mxu1 %v1113_v56  ;;  %1805 = vmatpush.msra.mxu2 %v1739_v26  ;;  %vm14868_vm12 = vmmov %vm14867_vm7  ;;  %v1743_v26 = vld [vmem:[%s14164_s4 + $0x130] sm:$0xff]  ;;  %vm1797_vm14 = vcmask 564224  }
 0x268   :  { %v1103_v62 = vsel %vm14719_vm2, %v14856_v30, %v7181_v38  ;;  %v1736_v30 = vld [vmem:[%s14164_s4 + $0xc0] sm:$0xff]  ;;  %vm14869_vm2 = vmmov %vm14867_vm7 }
 0x269   :  { %1634 = vmatpush.msrb.mxu1 %v1108_v15  ;;  %v1260_v12 = vpop.permute.xlu2 %1259  ;;  %v1738_v15 = vld [vmem:[%s14164_s4 + $0xe0] sm:$0xff]  ;;  %vm14870_vm8 = vmmov %vm14869_vm2 }
 0x26a   :  { %v1284_v14 = vadd.f32 %v1283_v54, %v1260_v12  ;;  %v1364_v8 = vadd.f32 %v1363_v25, %v1260_v12  ;;  %v1443_v21 = vpop.f32.mrf.mxu3  ;;  %1806 = vmatpush.msra.mxu2 %v1738_v15  ;;  %v1755_v54 = vld [vmem:[%s14164_s4 + $0x1f0] sm:$0xff]  ;;  %v1732_v25 = vld [vmem:[%s14164_s4 + $0x80] sm:$0xff] }
 0x26b   :  { %1635 = vmatpush.msrb.mxu1 %v1103_v62  ;;  %v1423_v50 = vpop.f32.mrf.mxu2  ;;  %v1444_v45 = vadd.f32 %v1443_v21, %v1260_v12  ;;  %v1735_v62 = vld [vmem:[%s14164_s4 + $0xb0] sm:$0xff]  ;;  %1825 = vmatpush.msra.mxu3 %v1755_v54  ;;  %v1784_v21 = vld [vmem:[%s14164_s4 + $0x3c0] sm:$0xff] }
 0x26c   :  { %1807 = vmatpush.msra.mxu2 %v1737_v61  ;;  %v1762_v15 = vld [vmem:[%s14164_s4 + $0x260] sm:$0xff] }
 0x26d   :  { %1636 = vmatpush.msrb.mxu1 %v1098_v0  ;;  %v1778_v61 = vld [vmem:[%s14164_s4 + $0x360] sm:$0xff] }
 0x26e   :  { %v1303_v9 = vpop.f32.mrf.mxu1  ;;  %1808 = vmatpush.msra.mxu2 %v1736_v30  ;;  %v1795_v30 = vld [vmem:[%s14164_s4 + $0x470] sm:$0xff]  ;;  %v1774_v54 = vld [vmem:[%s14164_s4 + $0x320] sm:$0xff] }
 0x26f   :  { %1637 = vmatpush.msrb.mxu1 %v1093_v53  ;;  %v1304_v33 = vadd.f32 %v1303_v9, %v1284_v14  ;;  %v1383_v51 = vpop.f32.mrf.mxu0  ;;  %v1733_v14 = vld [vmem:[%s14164_s4 + $0x90] sm:$0xff] }
 0x270   :  { %v1384_v57 = vadd.f32 %v1383_v51, %v1364_v8  ;;  %1809 = vmatpush.msra.mxu2 %v1735_v62  ;;  %v1753_v9 = vld [vmem:[%s14164_s4 + $0x1d0] sm:$0xff]  ;;  %v1752_v51 = vld [vmem:[%s14164_s4 + $0x1c0] sm:$0xff] }
 0x271   :  { %1638 = vmatpush.msrb.mxu1 %v1088_v47  ;;  %v1324_v42 = vadd.f32 %v1323_v16, %v1304_v33  ;;  %v1754_v16 = vld [vmem:[%s14164_s4 + $0x1e0] sm:$0xff]  ;;  %v1771_v8 = vld [vmem:[%s14164_s4 + $0x2f0] sm:$0xff] }
 0x272   :  { %v1523_v58 = vpop.f32.mrf.mxu3  ;;  %1826 = vmatpush.msra.mxu3 %v1754_v16  ;;  %v1787_v33 = vld [vmem:[%s14164_s4 + $0x3f0] sm:$0xff]  ;;  %1845 = vmatpush.msra.mxu0 %v1771_v8  ;;  %v1742_v62 = vld [vmem:[%s14164_s4 + $0x120] sm:$0xff] }
 0x273   :  { %1639 = vmatpush.msrb.mxu1 %v1083_v60  ;;  %v1344_v5 = vadd.f32 %v1343_v37, %v1324_v42  ;;  %v1463_v2 = vpop.f32.mrf.mxu2  ;;  %v1524_v28 = vadd.f32 %v1523_v58, %v1260_v12  ;;  %v1786_v42 = vld [vmem:[%s14164_s4 + $0x3e0] sm:$0xff]  ;;  %v1767_v58 = vld [vmem:[%s14164_s4 + $0x2b0] sm:$0xff] }
 0x274   :  { %v1464_v17 = vadd.f32 %v1463_v2, %v1444_v45  ;;  %1827 = vmatpush.msra.mxu3 %v1753_v9  ;;  %v1750_v2 = vld [vmem:[%s14164_s4 + $0x1a0] sm:$0xff]  ;;  %v1749_v45 = vld [vmem:[%s14164_s4 + $0x190] sm:$0xff] }
 0x275   :  { %1640 = vmatpush.msrb.mxu1 %v1078_v24  ;;  %v1757_v16 = vld [vmem:[%s14164_s4 + $0x210] sm:$0xff]  ;;  %v1790_v9 = vld [vmem:[%s14164_s4 + $0x420] sm:$0xff] }
 0x276   :  { %1828 = vmatpush.msra.mxu3 %v1752_v51  ;;  %v1772_v8 = vld [vmem:[%s14164_s4 + $0x300] sm:$0xff] }
 0x277   :  { %1641 = vmatpush.msrb.mxu1 %v1073_v31  ;;  %v1788_v51 = vld [vmem:[%s14164_s4 + $0x400] sm:$0xff] }
 0x278   :  { %1642 = vmatmul.f32.vlgmr.msrb.gmra.mxu1 %v8001_v34 }
 0x279   :  { %1865 = vmatpush.msra.mxu1 %v1787_v33  ;;  %v1789_v33 = vld [vmem:[%s14164_s4 + $0x410] sm:$0xff] }
 0x27b   :  { %v1503_v4 = vpop.f32.mrf.mxu2  ;;  %1866 = vmatpush.msra.mxu1 %v1786_v42 }
 0x28e   :  { %v1403_v48 = vpop.f32.mrf.mxu1 }
 0x28f   :  { %v1404_v3 = vadd.f32 %v1403_v48, %v1384_v57  ;;  %v1770_v57 = vld [vmem:[%s14164_s4 + $0x2e0] sm:$0xff]  ;;  %v1731_v48 = vld [vmem:[%s14164_s4 + $0x70] sm:$0xff] }
 0x290   :  { %1846 = vmatpush.msra.mxu0 %v1770_v57 }
 0x291   :  { %v1424_v44 = vadd.f32 %v1423_v50, %v1404_v3  ;;  %v1769_v50 = vld [vmem:[%s14164_s4 + $0x2d0] sm:$0xff] }
 0x292   :  { %v1751_v3 = vld [vmem:[%s14164_s4 + $0x1b0] sm:$0xff]  ;;  %1847 = vmatpush.msra.mxu0 %v1769_v50 }
 0x293   :  { %v7218_v1 = vpack.i.bf16 %v1424_v44, %v1344_v5  ;;  %1829 = vmatpush.msra.mxu3 %v1751_v3 }
 0x295   :  { %7219 = vrot.lane.b32.xlu0 %v7218_v1, %s8016_s17  ;;  %v1768_v1 = vld [vmem:[%s14164_s4 + $0x2c0] sm:$0xff]  ;;  %1830 = vmatpush.msra.mxu3 %v1750_v2 }
 0x296   :  { %1848 = vmatpush.msra.mxu0 %v1768_v1 }
 0x297   :  { %1831 = vmatpush.msra.mxu3 %v1749_v45 }
 0x298   :  { %1849 = vmatpush.msra.mxu0 %v1767_v58 }
 0x2b9   :  { %v1483_v27 = vpop.f32.mrf.mxu0 }
 0x2ba   :  { %v1484_v49 = vadd.f32 %v1483_v27, %v1464_v17  ;;  %v1783_v17 = vld [vmem:[%s14164_s4 + $0x3b0] sm:$0xff]  ;;  %v1728_v27 = vld [vmem:[%s14164_s4 + $0x40] sm:$0xff] }
 0x2bc   :  { %v1504_v59 = vadd.f32 %v1503_v4, %v1484_v49  ;;  %v1729_v4 = vld [vmem:[%s14164_s4 + $0x50] sm:$0xff] }
 0x2bd   :  { %v1727_v49 = vld [vmem:[%s14164_s4 + $0x30] sm:$0xff] }
 0x2bf   :  { %v1563_v22 = vpop.f32.mrf.mxu2 }
 0x2c7   :  { %v1583_v55 = vpop.f32.mrf.mxu3 }
 0x2d5   :  { %v1543_v46 = vpop.f32.mrf.mxu1 }
 0x2d6   :  { %v1544_v11 = vadd.f32 %v1543_v46, %v1524_v28  ;;  %v1766_v28 = vld [vmem:[%s14164_s4 + $0x2a0] sm:$0xff] }
 0x2d7   :  { %v1748_v46 = vld [vmem:[%s14164_s4 + $0x180] sm:$0xff]  ;;  %1850 = vmatpush.msra.mxu0 %v1766_v28 }
 0x2d8   :  { %v1564_v36 = vadd.f32 %v1563_v22, %v1544_v11  ;;  %v1782_v22 = vld [vmem:[%s14164_s4 + $0x3a0] sm:$0xff]  ;;  %v1765_v11 = vld [vmem:[%s14164_s4 + $0x290] sm:$0xff]  ;;  %1832 = vmatpush.msra.mxu3 %v1748_v46 }
 0x2d9   :  { %1851 = vmatpush.msra.mxu0 %v1765_v11 }
 0x2da   :  { %v1584_v10 = vadd.f32 %v1583_v55, %v1564_v36  ;;  %v1747_v55 = vld [vmem:[%s14164_s4 + $0x170] sm:$0xff] }
 0x2db   :  { %v1781_v36 = vld [vmem:[%s14164_s4 + $0x390] sm:$0xff]  ;;  %1833 = vmatpush.msra.mxu3 %v1747_v55 }
 0x2dc   :  { %v7223_v13 = vpack.i.bf16 %v1584_v10, %v1504_v59 }
 0x2de   :  { %7224 = vrot.lane.b32.xlu1 %v7223_v13, %s8016_s17  ;;  %v1746_v13 = vld [vmem:[%s14164_s4 + $0x160] sm:$0xff] }
 0x2df   :  { %1834 = vmatpush.msra.mxu3 %v1746_v13 }
 0x2e3   :  { %v1623_v40 = vpop.f32.mrf.mxu0 }
 0x2e7   :  { %v1603_v41 = vpop.f32.mrf.mxu3 }
 0x2e8   :  { %v1604_v23 = vadd.f32 %v1603_v41, %v1260_v12  ;;  %v1734_v12 = vld [vmem:[%s14164_s4 + $0xa0] sm:$0xff] }
 0x2e9   :  { %v1663_v63 = vpop.f32.mrf.mxu2  ;;  %1810 = vmatpush.msra.mxu2 %v1734_v12  ;;  %v1780_v41 = vld [vmem:[%s14164_s4 + $0x380] sm:$0xff]  ;;  %v1791_v12 = vld [vmem:[%s14164_s4 + $0x430] sm:$0xff] }
 0x2ea   :  { %v1624_v19 = vadd.f32 %v1623_v40, %v1604_v23  ;;  %v1725_v23 = vld [vmem:[%s14164_s4 + $0x10] sm:$0xff] }
 0x2eb   :  { %1811 = vmatpush.msra.mxu2 %v1733_v14  ;;  %v1763_v40 = vld [vmem:[%s14164_s4 + $0x270] sm:$0xff] }
 0x2ec   :  { %v1773_v14 = vld [vmem:[%s14164_s4 + $0x310] sm:$0xff] }
 0x2ed   :  { %1812 = vmatpush.msra.mxu2 %v1732_v25  ;;  %v1756_v25 = vld [vmem:[%s14164_s4 + $0x200] sm:$0xff] }
 0x2ef   :  { %1813 = vmatpush.msra.mxu2 %v1731_v48 }
 0x2f5   :  { %v1643_v38 = vpop.f32.mrf.mxu1 }
 0x2f6   :  { %v1644_v56 = vadd.f32 %v1643_v38, %v1624_v19  ;;  %v1745_v19 = vld [vmem:[%s14164_s4 + $0x150] sm:$0xff] }
 0x2f7   :  { %v1779_v38 = vld [vmem:[%s14164_s4 + $0x370] sm:$0xff]  ;;  %1835 = vmatpush.msra.mxu3 %v1745_v19 }
 0x2f8   :  { %v1664_v20 = vadd.f32 %v1663_v63, %v1644_v56  ;;  %v1724_v63 = vld [vmem:[%s14164_s4] sm:$0xff] }
 0x2f9   :  { %v1744_v56 = vld [vmem:[%s14164_s4 + $0x140] sm:$0xff] }
 0x2fa   :  { %1679 = vrot.lane.b32.xlu2 %v1664_v20, %s8016_s17  ;;  %1836 = vmatpush.msra.mxu3 %v1744_v56 }
 0x2fc   :  { %1837 = vmatpush.msra.mxu3 %v1743_v26 }
 0x2fe   :  { %1838 = vmatpush.msra.mxu3 %v1742_v62 }
 0x307   :  { %v7220_v43 = vpop.permute.xlu0 %7219 }
 0x308   :  { %v7222_v35 = vunpack.i.h.bf16 %v7220_v43  ;;  %v7221_v0 = vunpack.i.l.bf16 %v7220_v43  ;;  %v1761_v43 = vld [vmem:[%s14164_s4 + $0x250] sm:$0xff] }
 0x30a   :  { %v1681_v39 = vsel %vm14867_vm7, %v7221_v0, %v7222_v35  ;;  %v1794_v0 = vld [vmem:[%s14164_s4 + $0x460] sm:$0xff] }
 0x30b   :  { %v10438_v47 = vmax.f32 %v1344_v5, %v1681_v39  ;;  %v1785_v5 = vld [vmem:[%s14164_s4 + $0x3d0] sm:$0xff]  ;;  %v1760_v39 = vld [vmem:[%s14164_s4 + $0x240] sm:$0xff] }
 0x30c   :  { %1867 = vmatpush.msra.mxu1 %v1785_v5 }
 0x30e   :  { %1868 = vmatpush.msra.mxu1 %v1784_v21 }
 0x310   :  { %1869 = vmatpush.msra.mxu1 %v1783_v17 }
 0x312   :  { %1870 = vmatpush.msra.mxu1 %v1782_v22 }
 0x314   :  { %1871 = vmatpush.msra.mxu1 %v1781_v36 }
 0x316   :  { %1872 = vmatpush.msra.mxu1 %v1780_v41 }
 0x318   :  { %1873 = vmatpush.msra.mxu1 %v1779_v38 }
 0x31a   :  { %1874 = vmatpush.msra.mxu1 %v1778_v61 }
 0x350   :  { %v7225_v7 = vpop.permute.xlu1 %7224 }
 0x351   :  { %v7227_v52 = vunpack.i.h.bf16 %v7225_v7  ;;  %v7226_v53 = vunpack.i.l.bf16 %v7225_v7  ;;  %v1741_v7 = vld [vmem:[%s14164_s4 + $0x110] sm:$0xff] }
 0x352   :  { %1839 = vmatpush.msra.mxu3 %v1741_v7  ;;  %v1981_v7 = vld [vmem:[%s14163_s3 + $0x20] sm:$0xff] }
 0x353   :  { %v1682_v32 = vsel %vm14868_vm12, %v7222_v35, %v7226_v53  ;;  %v1683_v29 = vsel %vm14869_vm2, %v7226_v53, %v7227_v52  ;;  %v1777_v35 = vld [vmem:[%s14164_s4 + $0x350] sm:$0xff] }
 0x354   :  { %v10440_v6 = vmax.f32 %v1424_v44, %v1682_v32  ;;  %v1680_v60 = vpop.permute.xlu2 %1679  ;;  %v10442_v24 = vmax.f32 %v1504_v59, %v1683_v29  ;;  %v1730_v44 = vld [vmem:[%s14164_s4 + $0x60] sm:$0xff]  ;;  %1875 = vmatpush.msra.mxu1 %v1777_v35  ;;  %v1793_v53 = vld [vmem:[%s14164_s4 + $0x450] sm:$0xff] }
 0x355   :  { %v10444_v18 = vmax.f32 %v1664_v20, %v1680_v60  ;;  %v1684_v34 = vsel %vm14870_vm8, %v7227_v52, %v1680_v60  ;;  %1814 = vmatpush.msra.mxu2 %v1730_v44  ;;  %v1726_v59 = vld [vmem:[%s14164_s4 + $0x20] sm:$0xff]  ;;  %v1759_v29 = vld [vmem:[%s14164_s4 + $0x230] sm:$0xff] }
 0x356   :  { %1704 = vrot.lane.b32.xlu1 %v10442_v24, %s8008_s28  ;;  %v7228_v31 = vpack.i.bf16 %v10440_v6, %v10438_v47  ;;  %v10454_v37 = vmax.f32 %v1584_v10, %v1684_v34  ;;  %v1764_v10 = vld [vmem:[%s14164_s4 + $0x280] sm:$0xff]  ;;  %v1775_v60 = vld [vmem:[%s14164_s4 + $0x330] sm:$0xff] }
 0x357   :  { %1708 = vrot.lane.b32.xlu2 %v10444_v18, %s8008_s28  ;;  %1815 = vmatpush.msra.mxu2 %v1729_v4  ;;  %v1796_v20 = vld [vmem:[%s14164_s4 + $0x480] sm:$0x1f] }
 0x358   :  { %7229 = vrot.lane.b32.xlu0 %v7228_v31, %s8008_s28  ;;  %1852 = vmatpush.msra.mxu0 %v1764_v10  ;;  %v1776_v52 = vld [vmem:[%s14164_s4 + $0x340] sm:$0xff] }
 0x359   :  { %1816 = vmatpush.msra.mxu2 %v1728_v27  ;;  %v1740_v32 = vld [vmem:[%s14164_s4 + $0x100] sm:$0xff]  ;;  %1876 = vmatpush.msra.mxu1 %v1776_v52 }
 0x35a   :  { %1853 = vmatpush.msra.mxu0 %v1763_v40  ;;  %v1792_v31 = vld [vmem:[%s14164_s4 + $0x440] sm:$0xff]  ;;  %1840 = vmatpush.msra.mxu3 %v1740_v32 }
 0x35b   :  { %1817 = vmatpush.msra.mxu2 %v1727_v49  ;;  %v1758_v34 = vld [vmem:[%s14164_s4 + $0x220] sm:$0xff]  ;;  %1877 = vmatpush.msra.mxu1 %v1775_v60 }
 0x35c   :  { %1854 = vmatpush.msra.mxu0 %v1762_v15  ;;  %v1986_v15 = vld [vmem:[%s14164_s4 + $0xb70] sm:$0xff] }
 0x35d   :  { %1818 = vmatpush.msra.mxu2 %v1726_v59  ;;  %1878 = vmatpush.msra.mxu1 %v1774_v54 }
 0x35e   :  { %1855 = vmatpush.msra.mxu0 %v1761_v43 }
 0x35f   :  { %1819 = vmatpush.msra.mxu2 %v1725_v23  ;;  %1879 = vmatpush.msra.mxu1 %v1773_v14 }
 0x360   :  { %1706 = vrot.lane.b32.xlu0 %v10454_v37, %s8008_s28  ;;  %1856 = vmatpush.msra.mxu0 %v1760_v39  ;;  %v1983_v39 = vld [vmem:[%s14163_s3 + $0x40] sm:$0xff] }
 0x361   :  { %1820 = vmatpush.msra.mxu2 %v1724_v63  ;;  %1880 = vmatpush.msra.mxu1 %v1772_v8  ;;  %v1982_v8 = vld [vmem:[%s14163_s3 + $0x28] sm:$0xff] }
 0x362   :  { %1857 = vmatpush.msra.mxu0 %v1759_v29  ;;  %v1985_v29 = vld [vmem:[%s14164_s4 + $0xb60] sm:$0xff] }
 0x363   :  { %6206 = vmatpush.msk.msrb.mxu2 %vm1801_vm9, %v1796_v20 }
 0x364   :  { %1858 = vmatpush.msra.mxu0 %v1758_v34 }
 0x365   :  { %1893 = vmatpush.msrb.mxu2 %v1795_v30 }
 0x366   :  { %1859 = vmatpush.msra.mxu0 %v1757_v16 }
 0x367   :  { %1894 = vmatpush.msrb.mxu2 %v1794_v0 }
 0x368   :  { %1860 = vmatpush.msra.mxu0 %v1756_v25 }
 0x369   :  { %1895 = vmatpush.msrb.mxu2 %v1793_v53 }
 0x36b   :  { %1896 = vmatpush.msrb.mxu2 %v1792_v31 }
 0x36d   :  { %1897 = vmatpush.msrb.mxu2 %v1791_v12 }
 0x36f   :  { %1898 = vmatpush.msrb.mxu2 %v1790_v9 }
 0x371   :  { %1899 = vmatpush.msrb.mxu2 %v1789_v33 }
 0x373   :  { %1900 = vmatpush.msrb.mxu2 %v1788_v51  ;;  %v1984_v51 = vld [vmem:[%s14163_s3 + $0x48] sm:$0xff] }
 0x3b1   :  { %v1709_v2 = vpop.permute.xlu2 %1708 }
 0x3b2   :  { %v1723_v27 = vmax.f32 %v10444_v18, %v1709_v2 }
 0x3c8   :  { %v1705_v50 = vpop.permute.xlu1 %1704 }
 0x3ca   :  { %v7230_v57 = vpop.permute.xlu0 %7229 }
 0x3cb   :  { %v7232_v42 = vunpack.i.h.bf16 %v7230_v57  ;;  %v7231_v48 = vunpack.i.l.bf16 %v7230_v57 }
 0x3cd   :  { %v1711_v3 = vsel %vm162_vm10, %v7232_v42, %v1705_v50  ;;  %v1710_v5 = vsel %vm162_vm10, %v7231_v48, %v7232_v42 }
 0x3ce   :  { %v1719_v44 = vmax.f32 %v10438_v47, %v1710_v5  ;;  %v1720_v1 = vmax.f32 %v10440_v6, %v1711_v3 }
 0x3d0   :  { %1821 = vmatmul.f32.vlgmr.msra.gmra.mxu2 %v1719_v44  ;;  %1841 = vmatmul.f32.vlgmr.msra.gmra.mxu3 %v1720_v1 }
 0x3d2   :  { %v1707_v21 = vpop.permute.xlu0 %1706 }
 0x3d3   :  { %v1712_v4 = vsel %vm162_vm10, %v1705_v50, %v1707_v21  ;;  %v1713_v58 = vsel %vm162_vm10, %v1707_v21, %v1709_v2 }
 0x3d4   :  { %v1721_v45 = vmax.f32 %v10442_v24, %v1712_v4  ;;  %v1722_v17 = vmax.f32 %v10454_v37, %v1713_v58  ;;  %v2076_v4 = vld [vmem:[%s14164_s4 + $0xa00] sm:$0x1f]  ;;  %v2075_v58 = vld [vmem:[%s14164_s4 + $0x9f0] sm:$0xff] }
 0x3d5   :  { %6210 = vmatpush.msk.msrb.mxu0 %vm1801_vm9, %v2076_v4 }
 0x3d6   :  { %1861 = vmatmul.f32.vlgmr.msra.gmra.mxu0 %v1721_v45  ;;  %1881 = vmatmul.f32.vlgmr.msra.gmra.mxu1 %v1722_v17  ;;  %v2074_v45 = vld [vmem:[%s14164_s4 + $0x9e0] sm:$0xff]  ;;  %v2073_v17 = vld [vmem:[%s14164_s4 + $0x9d0] sm:$0xff] }
 0x3d7   :  { %2096 = vmatpush.msrb.mxu0 %v2075_v58 }
 0x3d8   :  { %6207 = vmatmul.msk.f32.vlgmr.msrb.gmra.mxu2 %vm1797_vm14, %v1723_v27  ;;  %v2072_v27 = vld [vmem:[%s14164_s4 + $0x9c0] sm:$0xff] }
 0x3d9   :  { %2097 = vmatpush.msrb.mxu0 %v2074_v45 }
 0x3db   :  { %2098 = vmatpush.msrb.mxu0 %v2073_v17 }
 0x3dd   :  { %2099 = vmatpush.msrb.mxu0 %v2072_v27 }
 0x453   :  { %v1822_v47 = vpop.f32.mrf.mxu2  ;;  %v1842_v6 = vpop.f32.mrf.mxu3 }
 0x454   :  { %v1843_v28 = vadd.f32 %v1842_v6, %v1822_v47  ;;  %v1862_v46 = vpop.f32.mrf.mxu0  ;;  %v1882_v49 = vpop.f32.mrf.mxu1  ;;  %v2071_v47 = vld [vmem:[%s14164_s4 + $0x9b0] sm:$0xff]  ;;  %v2070_v6 = vld [vmem:[%s14164_s4 + $0x9a0] sm:$0xff] }
 0x455   :  { %2100 = vmatpush.msrb.mxu0 %v2071_v47 }
 0x456   :  { %v1863_v22 = vadd.f32 %v1862_v46, %v1843_v28 }
 0x457   :  { %2101 = vmatpush.msrb.mxu0 %v2070_v6 }
 0x458   :  { %v1883_v11 = vadd.f32 %v1882_v49, %v1863_v22 }
 0x45b   :  { %v1902_v55 = vpop.f32.mrf.mxu2 }
 0x45c   :  { %v1903_v36 = vadd.f32 %v1902_v55, %v1883_v11  ;;  %v2069_v11 = vld [vmem:[%s14164_s4 + $0x990] sm:$0xff] }
 0x45d   :  { %2102 = vmatpush.msrb.mxu0 %v2069_v11 }
 0x45e   :  { %v10673_v59 = vmax.f32 %v1903_v36, 0.0 }
 0x460   :  { %1922 = vrot.lane.b32.xlu0 %v10673_v59, %s8029_s8  ;;  %1925 = vrot.lane.b32.xlu2 %v10673_v59, %s8030_s23 }
 0x461   :  { %1928 = vrot.lane.b32.xlu1 %v10673_v59, %s8031_s22 }
 0x468   :  { %1949 = vrot.lane.b32.xlu0 %v10673_v59, %s8020_s10  ;;  %1952 = vrot.lane.b32.xlu2 %v10673_v59, %s14375_s26  ;;  %s8034_s10 = smov 113   ;;  %s14381_s26 = smov 121  }
 0x469   :  { %1919 = vrot.lane.b32.xlu1 %v10673_v59, %s8033_s0 }
 0x470   :  { %1910 = vrot.lane.b32.xlu0 %v10673_v59, %s8014_s13  ;;  %1946 = vrot.lane.b32.xlu2 %v10673_v59, %s8012_s7 }
 0x471   :  { %1913 = vrot.lane.b32.xlu1 %v10673_v59, %s8023_s15 }
 0x478   :  { %1940 = vrot.lane.b32.xlu0 %v10673_v59, %s14377_s14  ;;  %1907 = vrot.lane.b32.xlu2 %v10673_v59, %s8016_s17  ;;  %s8041_s14 = smov 69  }
 0x479   :  { %1943 = vrot.lane.b32.xlu1 %v10673_v59, %s14378_s6  ;;  %s8040_s6 = smov 44  }
 0x480   :  { %1931 = vrot.lane.b32.xlu0 %v10673_v59, %s8034_s10  ;;  %1934 = vrot.lane.b32.xlu2 %v10673_v59, %s8035_s11 }
 0x481   :  { %1937 = vrot.lane.b32.xlu1 %v10673_v59, %s8036_s24 }
 0x489   :  { %1916 = vrot.lane.b32.xlu1 %v10673_v59, %s8022_s12 }
 0x4ba   :  { %v1926_v24 = vpop.permute.xlu2 %1925 }
 0x4c2   :  { %v1953_v18 = vpop.permute.xlu2 %1952 }
 0x4ca   :  { %v1947_v41 = vpop.permute.xlu2 %1946 }
 0x4d2   :  { %v1923_v37 = vpop.permute.xlu0 %1922  ;;  %v1908_v38 = vpop.permute.xlu2 %1907 }
 0x4d3   :  { %v1929_v10 = vpop.permute.xlu1 %1928 }
 0x4d4   :  { %v7233_v13 = vpack.i.bf16 %v1926_v24, %v1929_v10 }
 0x4d6   :  { %7234 = vrot.lane.b32.xlu2 %v7233_v13, %s8019_s9 }
 0x4da   :  { %v1950_v23 = vpop.permute.xlu0 %1949  ;;  %v1935_v43 = vpop.permute.xlu2 %1934 }
 0x4db   :  { %v1920_v40 = vpop.permute.xlu1 %1919  ;;  %2003 = vmatpush.msra.mxu2 %v1950_v23 }
 0x4dc   :  { %v7238_v19 = vpack.i.bf16 %v1920_v40, %v1923_v37 }
 0x4dd   :  { %2004 = vmatpush.msra.mxu2 %v1947_v41 }
 0x4de   :  { %7239 = vrot.lane.b32.xlu0 %v7238_v19, %s8019_s9 }
 0x4e2   :  { %v1911_v63 = vpop.permute.xlu0 %1910 }
 0x4e3   :  { %v7248_v56 = vpack.i.bf16 %v1908_v38, %v1911_v63  ;;  %v1914_v20 = vpop.permute.xlu1 %1913 }
 0x4e4   :  { %v7243_v26 = vpack.i.bf16 %v1914_v20, %v1953_v18 }
 0x4e5   :  { %7249 = vrot.lane.b32.xlu2 %v7248_v56, %s8019_s9  ;;  %v2163_v56 = vld [vmem:[%s14164_s4 + $0xab8] sm:$0xff] }
 0x4e6   :  { %1954 = vrot.lane.b32.xlu0 %v10673_v59, %s8019_s9  ;;  %7244 = vrot.lane.b32.xlu1 %v7243_v26, %s8019_s9  ;;  %s8038_s9 = smov 120  }
 0x4ea   :  { %v1941_v30 = vpop.permute.xlu0 %1940 }
 0x4eb   :  { %v1944_v61 = vpop.permute.xlu1 %1943 }
 0x4ec   :  { %2005 = vmatpush.msra.mxu2 %v1944_v61  ;;  %v2165_v61 = vld [vmem:[%s14164_s4 + $0xac8] sm:$0xff] }
 0x4ed   :  { %1994 = vperm.xlu2 %7217, %v1986_v15  }
 0x4ee   :  { %2006 = vmatpush.msra.mxu2 %v1941_v30  ;;  %1989 = vperm.xlu1 %7253, %v1985_v29  }
 0x4f2   :  { %v1932_v35 = vpop.permute.xlu0 %1931 }
 0x4f3   :  { %v1938_v62 = vpop.permute.xlu1 %1937 }
 0x4f4   :  { %2007 = vmatpush.msra.mxu2 %v1938_v62 }
 0x4f6   :  { %2008 = vmatpush.msra.mxu2 %v1935_v43 }
 0x4f8   :  { %2009 = vmatpush.msra.mxu2 %v1932_v35 }
 0x4fa   :  { %2010 = vmatpush.msra.mxu2 %v1929_v10 }
 0x4fb   :  { %v1917_v0 = vpop.permute.xlu1 %1916 }
 0x4fc   :  { %2011 = vmatpush.msra.mxu2 %v1926_v24 }
 0x4fe   :  { %2012 = vmatpush.msra.mxu2 %v1923_v37 }
 0x500   :  { %2013 = vmatpush.msra.mxu2 %v1920_v40 }
 0x502   :  { %2014 = vmatpush.msra.mxu2 %v1917_v0 }
 0x504   :  { %2015 = vmatpush.msra.mxu2 %v1914_v20 }
 0x506   :  { %2016 = vmatpush.msra.mxu2 %v1911_v63 }
 0x508   :  { %2017 = vmatpush.msra.mxu2 %v1908_v38 }
 0x50a   :  { %2018 = vmatpush.msra.mxu2 %v10673_v59 }
 0x50b   :  { %2019 = vmatmul.f32.vlgmr.msra.gmra.mxu2 %v1981_v7 }
 0x513   :  { %2022 = vmatmul.f32.gmra.mxu2 %v1983_v39  ;;  %v2167_v39 = vld [vmem:[%s14164_s4 + $0xad8] sm:$0xff] }
 0x530   :  { %v7235_v52 = vpop.permute.xlu2 %7234 }
 0x531   :  { %v7236_v53 = vunpack.i.l.bf16 %v7235_v52  ;;  %v7237_v32 = vunpack.i.h.bf16 %v7235_v52 }
 0x533   :  { %2033 = vmatpush.msrb.mxu2 %v7236_v53 }
 0x535   :  { %2034 = vmatpush.msrb.mxu2 %v7237_v32 }
 0x53f   :  { %v7250_v16 = vpop.permute.xlu2 %7249 }
 0x540   :  { %v7251_v9 = vunpack.i.l.bf16 %v7250_v16  ;;  %v7252_v25 = vunpack.i.h.bf16 %v7250_v16 }
 0x547   :  { %v1995_v44 = vpop.permute.xlu2 %1994 }
 0x550   :  { %v7240_v60 = vpop.permute.xlu0 %7239 }
 0x551   :  { %v7241_v31 = vunpack.i.l.bf16 %v7240_v60  ;;  %v7242_v34 = vunpack.i.h.bf16 %v7240_v60 }
 0x553   :  { %2035 = vmatpush.msrb.mxu2 %v7241_v31  ;;  %v2169_v31 = vld [vmem:[%s14164_s4 + $0xae8] sm:$0xff] }
 0x555   :  { %2036 = vmatpush.msrb.mxu2 %v7242_v34 }
 0x558   :  { %v7245_v54 = vpop.permute.xlu1 %7244  ;;  %v1955_v33 = vpop.permute.xlu0 %1954 }
 0x559   :  { %v7246_v12 = vunpack.i.l.bf16 %v7245_v54  ;;  %v7247_v14 = vunpack.i.h.bf16 %v7245_v54 }
 0x55b   :  { %2037 = vmatpush.msrb.mxu2 %v7246_v12 }
 0x55d   :  { %2038 = vmatpush.msrb.mxu2 %v7247_v14 }
 0x55f   :  { %2039 = vmatpush.msrb.mxu2 %v7251_v9  ;;  %v2162_v9 = vld [vmem:[%s14164_s4 + $0xab0] sm:$0xff] }
 0x560   :  { %v1990_v48 = vpop.permute.xlu1 %1989 }
 0x561   :  { %2040 = vmatpush.msrb.mxu2 %v7252_v25  ;;  %v2164_v25 = vld [vmem:[%s14164_s4 + $0xac0] sm:$0xff] }
 0x563   :  { %2041 = vmatpush.msrb.mxu2 %v1955_v33  ;;  %v2168_v33 = vld [vmem:[%s14164_s4 + $0xae0] sm:$0xff] }
 0x564   :  { %6208 = vmatmul.msk.f32.vlgmr.msrb.gmra.mxu2 %vm317_vm3, %v1982_v8  ;;  %v2166_v8 = vld [vmem:[%s14164_s4 + $0xad0] sm:$0xff] }
 0x56c   :  { %6209 = vmatmul.msk.f32.gmra.mxu2 %vm317_vm3, %v1984_v51 }
 0x58e   :  { %v2020_v57 = vpop.f32.mrf.mxu2 }
 0x58f   :  { %v2021_v50 = vadd.f32 %v2020_v57, %v1990_v48 }
 0x596   :  { %v2023_v42 = vpop.f32.mrf.mxu2 }
 0x597   :  { %v2024_v1 = vadd.f32 %v2023_v42, %v1995_v44  ;;  %v2171_v44 = vld [vmem:[%s14164_s4 + $0xbe0] sm:$0xff] }
 0x5e7   :  { %v2043_v3 = vpop.f32.mrf.mxu2 }
 0x5e8   :  { %v2044_v5 = vadd.f32 %v2043_v3, %v2021_v50 }
 0x5ea   :  { %2051 = vrot.lane.b32.xlu0 %v2044_v5, %s8016_s17 }
 0x5ef   :  { %v2046_v2 = vpop.f32.mrf.mxu2 }
 0x5f0   :  { %v2047_v21 = vadd.f32 %v2046_v2, %v2024_v1  ;;  %v2173_v1 = vld [vmem:[%s14164_s4 + $0xc00] sm:$0xff] }
 0x5f2   :  { %2053 = vrot.lane.b32.xlu1 %v2047_v21, %s8016_s17 }
 0x65c   :  { %v2052_v28 = vpop.permute.xlu0 %2051 }
 0x65d   :  { %v2057_v46 = vmax.f32 %v2044_v5, %v2052_v28  ;;  %v2172_v5 = vld [vmem:[%s14164_s4 + $0xbf0] sm:$0xff] }
 0x65f   :  { %2061 = vrot.lane.b32.xlu2 %v2057_v46, %s8033_s0 }
 0x664   :  { %v2054_v22 = vpop.permute.xlu1 %2053 }
 0x665   :  { %v2058_v49 = vmax.f32 %v2047_v21, %v2054_v22  ;;  %v2170_v21 = vld [vmem:[%s14164_s4 + $0xbd0] sm:$0xff] }
 0x667   :  { %2063 = vrot.lane.b32.xlu0 %v2058_v49, %s8033_s0 }
 0x6b9   :  { %v2062_v55 = vpop.permute.xlu2 %2061 }
 0x6ba   :  { %v2067_v36 = vmax.f32 %v2057_v46, %v2062_v55 }
 0x6bc   :  { %6211 = vmatmul.msk.f32.vlgmr.msrb.gmra.mxu0 %vm2077_vm15, %v2067_v36  ;;  %v2249_v36 = vld [vmem:[%s14164_s4 + $0xb10] sm:$0x3f] }
 0x6d9   :  { %v2064_v59 = vpop.permute.xlu0 %2063 }
 0x6da   :  { %v2068_v24 = vmax.f32 %v2058_v49, %v2064_v59  ;;  %v2250_v59 = vld [vmem:[%s14164_s4 + $0xc10] sm:$0x3f] }
 0x6dc   :  { %6212 = vmatmul.msk.f32.gmra.mxu0 %vm2077_vm15, %v2068_v24 }
 0x739   :  { %v10761_v18 = vpop.f32.mrf.mxu0 }
 0x73a   :  { %v2110_v10 = vmax.f32 %v10761_v18, 0.0 }
 0x759   :  { %v10763_v37 = vpop.f32.mrf.mxu0 }
 0x75a   :  { %v2111_v13 = vmax.f32 %v10763_v37, 0.0  ;;  %v2385_v37 = vlaneseq }
 0x75c   :  { %v7264_v41 = vpack.i.bf16 %v2110_v10, %v2111_v13 }
 0x75e   :  { %7265 = vrot.lane.b32.xlu0 %v7264_v41, %s8025_s20  ;;  %7260 = vrot.lane.b32.xlu2 %v7264_v41, %s14379_s16  ;;  %s14980_s16 = smov 70  }
 0x75f   :  { %7255 = vrot.lane.b32.xlu1 %v7264_v41, %s14381_s26  ;;  %s14981_s26 = smov 71  }
 0x766   :  { %7280 = vrot.lane.b32.xlu0 %v7264_v41, %s8014_s13  ;;  %7275 = vrot.lane.b32.xlu2 %v7264_v41, %s8023_s15 }
 0x767   :  { %7270 = vrot.lane.b32.xlu1 %v7264_v41, %s8022_s12 }
 0x76e   :  { %7290 = vrot.lane.b32.xlu2 %v7264_v41, %s8038_s9 }
 0x76f   :  { %7285 = vrot.lane.b32.xlu1 %v7264_v41, %s8016_s17  ;;  %v2277_v41 = vld [vmem:[%s14165_s2 + $0x10] sm:$0x3f] }
 0x7b8   :  { %v7261_v23 = vpop.permute.xlu2 %7260 }
 0x7b9   :  { %v7262_v30 = vunpack.i.l.bf16 %v7261_v23  ;;  %v7263_v43 = vunpack.i.h.bf16 %v7261_v23  ;;  %v2278_v23 = vld [vmem:[%s14165_s2 + $0x18] sm:$0x3f] }
 0x7c0   :  { %v7276_v40 = vpop.permute.xlu2 %7275 }
 0x7c1   :  { %v7277_v32 = vunpack.i.l.bf16 %v7276_v40  ;;  %v7278_v60 = vunpack.i.h.bf16 %v7276_v40  ;;  %v10838_v40 = vshrl.u32 %v2385_v37, 7 }
 0x7c8   :  { %v7291_v19 = vpop.permute.xlu2 %7290 }
 0x7c9   :  { %v7292_v38 = vunpack.i.l.bf16 %v7291_v19  ;;  %v7293_v63 = vunpack.i.h.bf16 %v7291_v19  ;;  %v2279_v19 = vld [vmem:[%s14165_s2 + $0x20] sm:$0x3f] }
 0x7cb   :  { %2230 = vmatpush.msrb.mxu3 %v7292_v38  ;;  %v2280_v38 = vld [vmem:[%s14165_s2 + $0x28] sm:$0x3f] }
 0x7cd   :  { %2231 = vmatpush.msrb.mxu3 %v7293_v63  ;;  %v2281_v63 = vld [vmem:[%s14165_s2 + $0x30] sm:$0x3f] }
 0x7ce   :  { %6213 = vmatmul.msk.f32.vlgmr.msrb.gmra.mxu3 %vm14390_vm13, %v2163_v56 }
 0x7d0   :  { %v7266_v62 = vpop.permute.xlu0 %7265 }
 0x7d1   :  { %v7256_v20 = vpop.permute.xlu1 %7255  ;;  %v7267_v35 = vunpack.i.l.bf16 %v7266_v62  ;;  %v7268_v7 = vunpack.i.h.bf16 %v7266_v62 }
 0x7d2   :  { %v7257_v26 = vunpack.i.l.bf16 %v7256_v20  ;;  %v7258_v15 = vunpack.i.h.bf16 %v7256_v20 }
 0x7d4   :  { %2187 = vmatpush.msrb.mxu1 %v7257_v26 }
 0x7d6   :  { %2188 = vmatpush.msrb.mxu1 %v7258_v15  ;;  %6214 = vmatmul.msk.f32.gmra.mxu3 %vm14390_vm13, %v2165_v61 }
 0x7d8   :  { %2189 = vmatpush.msrb.mxu1 %v7262_v30  ;;  %v7281_v29 = vpop.permute.xlu0 %7280 }
 0x7d9   :  { %v7271_v0 = vpop.permute.xlu1 %7270  ;;  %v7282_v34 = vunpack.i.l.bf16 %v7281_v29  ;;  %v7283_v12 = vunpack.i.h.bf16 %v7281_v29 }
 0x7da   :  { %2190 = vmatpush.msrb.mxu1 %v7263_v43  ;;  %v7272_v52 = vunpack.i.l.bf16 %v7271_v0  ;;  %v7273_v53 = vunpack.i.h.bf16 %v7271_v0 }
 0x7dc   :  { %2191 = vmatpush.msrb.mxu1 %v7267_v35  ;;  %v2389_v35 = vadd.s32 24, %v10838_v40 }
 0x7de   :  { %2192 = vmatpush.msrb.mxu1 %v7268_v7  ;;  %6215 = vmatmul.msk.f32.gmra.mxu3 %vm14390_vm13, %v2167_v39 }
 0x7e0   :  { %2193 = vmatpush.msrb.mxu1 %v7272_v52 }
 0x7e1   :  { %v7286_v54 = vpop.permute.xlu1 %7285 }
 0x7e2   :  { %2194 = vmatpush.msrb.mxu1 %v7273_v53  ;;  %v7287_v16 = vunpack.i.l.bf16 %v7286_v54  ;;  %v7288_v14 = vunpack.i.h.bf16 %v7286_v54 }
 0x7e4   :  { %2195 = vmatpush.msrb.mxu1 %v7277_v32 }
 0x7e6   :  { %2196 = vmatpush.msrb.mxu1 %v7278_v60  ;;  %6216 = vmatmul.msk.f32.gmra.mxu3 %vm14390_vm13, %v2169_v31 }
 0x7e8   :  { %2197 = vmatpush.msrb.mxu1 %v7282_v34 }
 0x7ea   :  { %2198 = vmatpush.msrb.mxu1 %v7283_v12 }
 0x7ec   :  { %2199 = vmatpush.msrb.mxu1 %v7287_v16 }
 0x7ee   :  { %2200 = vmatpush.msrb.mxu1 %v7288_v14 }
 0x7f0   :  { %2201 = vmatpush.msrb.mxu1 %v2111_v13  ;;  %v2276_v13 = vld [vmem:[%s14165_s2 + $0x8] sm:$0x3f] }
 0x7f2   :  { %2202 = vmatpush.msrb.mxu1 %v2110_v10  ;;  %v2275_v10 = vld [vmem:[%s14165_s2] sm:$0x3f]  ;;  %s14977_s2 = smov 96  }
 0x7f3   :  { %2203 = vmatmul.f32.vlgmr.msrb.gmra.mxu1 %v2162_v9 }
 0x7fb   :  { %2206 = vmatmul.f32.gmra.mxu1 %v2164_v25 }
 0x803   :  { %2209 = vmatmul.f32.gmra.mxu1 %v2166_v8 }
 0x80b   :  { %2212 = vmatmul.f32.gmra.mxu1 %v2168_v33 }
 0x851   :  { %v2233_v51 = vpop.f32.mrf.mxu3 }
 0x859   :  { %v2236_v42 = vpop.f32.mrf.mxu3 }
 0x861   :  { %v2239_v50 = vpop.f32.mrf.mxu3 }
 0x869   :  { %v2242_v58 = vpop.f32.mrf.mxu3 }
 0x870   :  { %v2204_v57 = vpop.f32.mrf.mxu1 }
 0x871   :  { %v2205_v27 = vadd.f32 %v2204_v57, %v2170_v21 }
 0x873   :  { %v2234_v22 = vadd.f32 %v2233_v51, %v2205_v27 }
 0x875   :  { %v2245_v55 = vmax.f32 %v2234_v22, 0.0  ;;  %v2387_v22 = vadd.s32 8, %v10838_v40 }
 0x878   :  { %v2207_v48 = vpop.f32.mrf.mxu1 }
 0x879   :  { %v2208_v45 = vadd.f32 %v2207_v48, %v2171_v44 }
 0x87b   :  { %v2237_v28 = vadd.f32 %v2236_v42, %v2208_v45 }
 0x87d   :  { %v2246_v11 = vmax.f32 %v2237_v28, 0.0 }
 0x880   :  { %v2210_v3 = vpop.f32.mrf.mxu1 }
 0x881   :  { %v2211_v2 = vadd.f32 %v2210_v3, %v2172_v5 }
 0x883   :  { %v2240_v47 = vadd.f32 %v2239_v50, %v2211_v2  ;;  %v10850_v50 = vcvt.s32.f32 %v2389_v35  ;;  %v10867_v35 = vcvt.s32.f32 %v10838_v40 }
 0x885   :  { %v2247_v49 = vmax.f32 %v2240_v47, 0.0 }
 0x888   :  { %v2213_v4 = vpop.f32.mrf.mxu1 }
 0x889   :  { %v2214_v17 = vadd.f32 %v2213_v4, %v2173_v1 }
 0x88b   :  { %v2243_v6 = vadd.f32 %v2242_v58, %v2214_v17  ;;  %v2388_v58 = vadd.s32 16, %v10838_v40 }
 0x88d   :  { %v2248_v46 = vmax.f32 %v2243_v6, 0.0  ;;  %v10854_v37 = vcvt.s32.f32 %v2388_v58 }
 0x88f   :  { %2267 = vmatpush.msra.mxu0 %v2248_v46 }
 0x891   :  { %2268 = vmatpush.msra.mxu0 %v2247_v49 }
 0x893   :  { %2269 = vmatpush.msra.mxu0 %v2246_v11 }
 0x895   :  { %2270 = vmatpush.msra.mxu0 %v2245_v55 }
 0x896   :  { %6217 = vmatmul.msk.f32.vlgmr.msra.gmra.mxu0 %vm2251_vm5, %v2249_v36 }
 0x913   :  { %v2272_v24 = vpop.f32.mrf.mxu0 }
 0x914   :  { %v2273_v18 = vadd.f32 %v2272_v24, %v2250_v59 }
 0x916   :  { %2284 = vperm.xlu0 %7294, %v2273_v18  }
 0x988   :  { %v2285_v56 = vpop.permute.xlu0 %2284 }
 0x989   :  { %v2287_v20 = vmul.f32 %v2285_v56, %v2275_v10  ;;  %v2288_v26 = vmul.f32 %v2285_v56, %v2276_v13  ;;  %v2289_v15 = vmul.f32 %v2285_v56, %v2277_v41  ;;  %v2290_v61 = vmul.f32 %v2285_v56, %v2278_v23 }
 0x98a   :  { %v2291_v30 = vmul.f32 %v2285_v56, %v2279_v19  ;;  %v2292_v62 = vmul.f32 %v2285_v56, %v2280_v38  ;;  %v2293_v43 = vmul.f32 %v2285_v56, %v2281_v63  ;;  %v10856_v56 = vcvt.s32.f32 %v2387_v22 }
 0x98b   :  { %v2301_v0 = vrot.slane %v2287_v20, 1  ;;  %v2302_v7 = vrot.slane %v2288_v26, 1  ;;  %v2303_v39 = vrot.slane %v2289_v15, 1  ;;  %v2304_v52 = vrot.slane %v2290_v61, 1 }
 0x98c   :  { %v2305_v53 = vrot.slane %v2291_v30, 1  ;;  %v2306_v32 = vrot.slane %v2292_v62, 1  ;;  %v2307_v29 = vrot.slane %v2293_v43, 1  ;;  %v2322_v60 = vrot.slane %v2287_v20, 2 }
 0x98d   :  { %v2315_v31 = vadd.f32 %v2301_v0, %v2287_v20  ;;  %v2316_v34 = vadd.f32 %v2302_v7, %v2288_v26  ;;  %v2317_v54 = vadd.f32 %v2303_v39, %v2289_v15  ;;  %v2318_v12 = vadd.f32 %v2304_v52, %v2290_v61 }
 0x98e   :  { %v2319_v16 = vadd.f32 %v2305_v53, %v2291_v30  ;;  %v2320_v14 = vadd.f32 %v2306_v32, %v2292_v62  ;;  %v2321_v9 = vadd.f32 %v2307_v29, %v2293_v43  ;;  %v2323_v25 = vrot.slane %v2288_v26, 2 }
 0x98f   :  { %v2324_v8 = vrot.slane %v2289_v15, 2  ;;  %v2325_v33 = vrot.slane %v2290_v61, 2  ;;  %v2326_v51 = vrot.slane %v2291_v30, 2  ;;  %v2327_v57 = vrot.slane %v2292_v62, 2 }
 0x990   :  { %v2328_v42 = vrot.slane %v2293_v43, 2  ;;  %v2336_v48 = vadd.f32 %v2322_v60, %v2315_v31  ;;  %v2337_v3 = vadd.f32 %v2323_v25, %v2316_v34 }
 0x991   :  { %v2338_v5 = vadd.f32 %v2324_v8, %v2317_v54  ;;  %v2339_v44 = vadd.f32 %v2325_v33, %v2318_v12  ;;  %v2340_v1 = vadd.f32 %v2326_v51, %v2319_v16  ;;  %v2341_v2 = vadd.f32 %v2327_v57, %v2320_v14 }
 0x992   :  { %v2343_v21 = vadd.f32 1.0, %v2336_v48  ;;  %v2344_v4 = vadd.f32 1.0, %v2337_v3  ;;  %v2342_v45 = vadd.f32 %v2328_v42, %v2321_v9 }
 0x993   :  { %v2345_v17 = vadd.f32 1.0, %v2338_v5  ;;  %v2346_v27 = vadd.f32 1.0, %v2339_v44  ;;  %v2347_v47 = vadd.f32 1.0, %v2340_v1  ;;  %v2348_v6 = vadd.f32 1.0, %v2341_v2 }
 0x994   :  { %v2350_v28 = vmul.f32 28.0, %v2343_v21  ;;  %v2351_v46 = vmul.f32 28.0, %v2344_v4  ;;  %v2349_v49 = vadd.f32 1.0, %v2342_v45 }
 0x995   :  { %v2352_v11 = vmul.f32 28.0, %v2345_v17  ;;  %v2353_v55 = vmul.f32 28.0, %v2346_v27  ;;  %v2354_v36 = vmul.f32 28.0, %v2347_v47  ;;  %v2355_v59 = vmul.f32 28.0, %v2348_v6 }
 0x996   :  { %v6218_v24 = vadd.f32 -1.0, %v2350_v28  ;;  %v6219_v18 = vadd.f32 -1.0, %v2351_v46  ;;  %v2356_v10 = vmul.f32 28.0, %v2349_v49 }
 0x997   :  { %v6220_v13 = vadd.f32 -1.0, %v2352_v11  ;;  %v6221_v41 = vadd.f32 -1.0, %v2353_v55  ;;  %v6222_v23 = vadd.f32 -1.0, %v2354_v36  ;;  %v6223_v19 = vadd.f32 -1.0, %v2355_v59 }
 0x998   :  { %v2364_v38 = vmul.f32 0.5, %v6218_v24  ;;  %v2365_v63 = vmul.f32 0.5, %v6219_v18  ;;  %v6224_v20 = vadd.f32 -1.0, %v2356_v10 }
 0x999   :  { %v2366_v26 = vmul.f32 0.5, %v6220_v13  ;;  %v2367_v15 = vmul.f32 0.5, %v6221_v41  ;;  %v10858_v61 = vmul.f32 0.5, %v6222_v23  ;;  %v10860_v30 = vmul.f32 0.5, %v6223_v19 }
 0x99a   :  { %v10862_v62 = vfloor.f32 %v2364_v38  ;;  %v10864_v43 = vfloor.f32 %v2365_v63  ;;  %v10869_v0 = vmul.f32 0.5, %v6224_v20 }
 0x99b   :  { %v10871_v7 = vfloor.f32 %v2366_v26  ;;  %v10873_v39 = vfloor.f32 %v2367_v15  ;;  %v10876_v52 = vfloor.f32 %v10858_v61  ;;  %v10879_v53 = vfloor.f32 %v10860_v30 }
 0x99c   :  { %v10882_v32 = vsub.f32 %v2364_v38, %v10862_v62  ;;  %v10885_v29 = vperm.slane %v10862_v62, 0  ;;  %v10888_v40 = vadd.f32 1.0, %v10862_v62  ;;  %v10891_v60 = vsub.f32 %v2365_v63, %v10864_v43 }
 0x99d   :  { %v10894_v31 = vperm.slane %v10864_v43, 0  ;;  %v10897_v34 = vadd.f32 1.0, %v10864_v43  ;;  %v10900_v54 = vsub.f32 %v2366_v26, %v10871_v7  ;;  %v10903_v12 = vperm.slane %v10871_v7, 0 }
 0x99e   :  { %vm2422_vm7 = vcmp.eq.f32.partialorder %v10850_v50, %v10885_v29  ;;  %v14389_v16 = vsub.f32 1.0, %v10882_v32  ;;  %v10909_v14 = vperm.slane %v10888_v40, 0  ;;  %v10912_v9 = vperm.slane %v10882_v32, 0 }
 0x99f   :  { %vm2423_vm12 = vcmp.eq.f32.partialorder %v10850_v50, %v10894_v31  ;;  %v14386_v25 = vsub.f32 1.0, %v10891_v60  ;;  %v10918_v8 = vperm.slane %v10897_v34, 0  ;;  %v10921_v33 = vperm.slane %v10891_v60, 0 }
 0x9a0   :  { %v10925_v51 = vperm.slane %v14389_v16, 0  ;;  %vm2506_vm2 = vcmp.eq.f32.partialorder %v10850_v50, %v10909_v14  ;;  %vm2424_vm8 = vcmp.eq.f32.partialorder %v10850_v50, %v10903_v12  ;;  %v14385_v57 = vsub.f32 1.0, %v10900_v54 }
 0x9a1   :  { %v2541_v42 = vsel %vm2506_vm2, %v10912_v9, 0.0  ;;  %v10935_v48 = vperm.slane %v14386_v25, 0  ;;  %vm2507_vm9 = vcmp.eq.f32.partialorder %v10850_v50, %v10918_v8  ;;  %v10940_v3 = vadd.f32 1.0, %v10871_v7 }
 0x9a2   :  { %v2464_v5 = vsel %vm2422_vm7, %v10925_v51, 0.0  ;;  %v2542_v44 = vsel %vm2507_vm9, %v10921_v33, 0.0  ;;  %v10949_v1 = vperm.slane %v14385_v57, 0  ;;  %v10952_v2 = vperm.slane %v10900_v54, 0 }
 0x9a3   :  { %v10954_v21 = vadd.f32 %v2541_v42, %v2464_v5  ;;  %v2465_v4 = vsel %vm2423_vm12, %v10935_v48, 0.0  ;;  %v10961_v58 = vperm.slane %v10940_v3, 0  ;;  %v10964_v45 = vsub.f32 %v2367_v15, %v10873_v39 }
 0x9a4   :  { %v10966_v17 = vadd.f32 %v2542_v44, %v2465_v4  ;;  %v2466_v27 = vsel %vm2424_vm8, %v10949_v1, 0.0  ;;  %v10970_v47 = vperm.slane %v10873_v39, 0  ;;  %v10973_v6 = vadd.f32 1.0, %v10873_v39 }
 0x9a5   :  { %14871 = vst [vmem:[#allocation4_spill] sm:$0xff] %v10954_v21  ;;  %2772 = vmatpush.msrb.mxu0 %v10954_v21  ;;  %vm2508_vm15 = vcmp.eq.f32.partialorder %v10850_v50, %v10961_v58  ;;  %v14388_v28 = vsub.f32 1.0, %v10964_v45  ;;  %v10980_v46 = vperm.slane %v10964_v45, 0  ;;  %vm2415_vm7 = vcmp.eq.f32.partialorder %v10854_v37, %v10885_v29 }
 0x9a6   :  { %14872 = vst [vmem:[#allocation44_spill] sm:$0xff] %v10966_v17  ;;  %2801 = vmatpush.msra.mxu2 %v10966_v17  ;;  %v2543_v22 = vsel %vm2508_vm15, %v10952_v2, 0.0  ;;  %vm2425_vm12 = vcmp.eq.f32.partialorder %v10850_v50, %v10970_v47  ;;  %v10989_v49 = vperm.slane %v10973_v6, 0  ;;  %v2457_v11 = vsel %vm2415_vm7, %v10925_v51, 0.0 }
 0x9a7   :  { %v10992_v55 = vadd.f32 %v2543_v22, %v2466_v27  ;;  %v10996_v36 = vperm.slane %v14388_v28, 0  ;;  %vm2499_vm2 = vcmp.eq.f32.partialorder %v10854_v37, %v10909_v14  ;;  %vm2416_vm8 = vcmp.eq.f32.partialorder %v10854_v37, %v10894_v31 }
 0x9a8   :  { %vm2509_vm9 = vcmp.eq.f32.partialorder %v10850_v50, %v10989_v49  ;;  %v2534_v59 = vsel %vm2499_vm2, %v10912_v9, 0.0  ;;  %v2458_v24 = vsel %vm2416_vm8, %v10935_v48, 0.0  ;;  %vm2500_vm15 = vcmp.eq.f32.partialorder %v10854_v37, %v10918_v8 }
 0x9a9   :  { %14873 = vst [vmem:[#allocation29_spill] sm:$0xff] %v10992_v55  ;;  %2830 = vmatpush.msra.mxu3 %v10992_v55  ;;  %v2467_v18 = vsel %vm2425_vm12, %v10996_v36, 0.0  ;;  %v2544_v10 = vsel %vm2509_vm9, %v10980_v46, 0.0  ;;  %v11011_v13 = vadd.f32 %v2534_v59, %v2457_v11  ;;  %v2535_v41 = vsel %vm2500_vm15, %v10921_v33, 0.0 }
 0x9aa   :  { %v11014_v23 = vadd.f32 %v2544_v10, %v2467_v18  ;;  %v11016_v19 = vadd.f32 %v2535_v41, %v2458_v24  ;;  %vm2417_vm7 = vcmp.eq.f32.partialorder %v10854_v37, %v10903_v12  ;;  %vm2501_vm2 = vcmp.eq.f32.partialorder %v10854_v37, %v10961_v58 }
 0x9ab   :  { %14874 = vst [vmem:[#allocation7_spill] sm:$0xff] %v11011_v13  ;;  %2773 = vmatpush.msrb.mxu0 %v11011_v13  ;;  %v2459_v38 = vsel %vm2417_vm7, %v10949_v1, 0.0  ;;  %v2536_v63 = vsel %vm2501_vm2, %v10952_v2, 0.0  ;;  %vm2418_vm12 = vcmp.eq.f32.partialorder %v10854_v37, %v10970_v47  ;;  %vm2502_vm8 = vcmp.eq.f32.partialorder %v10854_v37, %v10989_v49 }
 0x9ac   :  { %14875 = vst [vmem:[#allocation16_spill] sm:$0xff] %v11014_v23  ;;  %2859 = vmatpush.msra.mxu1 %v11014_v23  ;;  %2802 = vmatpush.msra.mxu2 %v11016_v19  ;;  %v11031_v20 = vadd.f32 %v2536_v63, %v2459_v38  ;;  %v2460_v26 = vsel %vm2418_vm12, %v10996_v36, 0.0  ;;  %v2537_v15 = vsel %vm2502_vm8, %v10980_v46, 0.0  ;;  %vm2408_vm9 = vcmp.eq.f32.partialorder %v10856_v56, %v10885_v29 }
 0x9ad   :  { %14876 = vst [vmem:[#allocation21_spill] sm:$0xff] %v11016_v19  ;;  %v11037_v42 = vadd.f32 %v2537_v15, %v2460_v26  ;;  %v2450_v5 = vsel %vm2408_vm9, %v10925_v51, 0.0  ;;  %vm2492_vm15 = vcmp.eq.f32.partialorder %v10856_v56, %v10909_v14  ;;  %vm2409_vm7 = vcmp.eq.f32.partialorder %v10856_v56, %v10894_v31 }
 0x9ae   :  { %14877 = vst [vmem:[#allocation23_spill] sm:$0xff] %v11031_v20  ;;  %2831 = vmatpush.msra.mxu3 %v11031_v20  ;;  %v2527_v44 = vsel %vm2492_vm15, %v10912_v9, 0.0  ;;  %v2451_v4 = vsel %vm2409_vm7, %v10935_v48, 0.0  ;;  %vm2493_vm2 = vcmp.eq.f32.partialorder %v10856_v56, %v10918_v8  ;;  %vm2410_vm12 = vcmp.eq.f32.partialorder %v10856_v56, %v10903_v12 }
 0x9af   :  { %14878 = vst [vmem:[#allocation13_spill] sm:$0xff] %v11037_v42  ;;  %2860 = vmatpush.msra.mxu1 %v11037_v42  ;;  %v11052_v27 = vadd.f32 %v2527_v44, %v2450_v5  ;;  %v2528_v22 = vsel %vm2493_vm2, %v10921_v33, 0.0  ;;  %v2452_v11 = vsel %vm2410_vm12, %v10949_v1, 0.0  ;;  %vm2494_vm8 = vcmp.eq.f32.partialorder %v10856_v56, %v10961_v58 }
 0x9b0   :  { %v11058_v59 = vadd.f32 %v2528_v22, %v2451_v4  ;;  %v2529_v24 = vsel %vm2494_vm8, %v10952_v2, 0.0  ;;  %vm2411_vm9 = vcmp.eq.f32.partialorder %v10856_v56, %v10970_v47  ;;  %vm2495_vm15 = vcmp.eq.f32.partialorder %v10856_v56, %v10989_v49 }
 0x9b1   :  { %14879 = vst [vmem:[#allocation22_spill] sm:$0xff] %v11052_v27  ;;  %2774 = vmatpush.msrb.mxu0 %v11052_v27  ;;  %v11066_v18 = vadd.f32 %v2529_v24, %v2452_v11  ;;  %v2453_v10 = vsel %vm2411_vm9, %v10996_v36, 0.0  ;;  %v2530_v41 = vsel %vm2495_vm15, %v10980_v46, 0.0  ;;  %vm2401_vm7 = vcmp.eq.f32.partialorder %v10867_v35, %v10885_v29 }
 0x9b2   :  { %14880 = vst [vmem:[#allocation35_spill] sm:$0xff] %v11058_v59  ;;  %2803 = vmatpush.msra.mxu2 %v11058_v59  ;;  %v11073_v38 = vadd.f32 %v2530_v41, %v2453_v10  ;;  %v2443_v63 = vsel %vm2401_vm7, %v10925_v51, 0.0  ;;  %vm2485_vm2 = vcmp.eq.f32.partialorder %v10867_v35, %v10909_v14  ;;  %vm2402_vm12 = vcmp.eq.f32.partialorder %v10867_v35, %v10894_v31 }
 0x9b3   :  { %14881 = vst [vmem:[#allocation45_spill] sm:$0xff] %v11066_v18  ;;  %2832 = vmatpush.msra.mxu3 %v11066_v18  ;;  %v2520_v26 = vsel %vm2485_vm2, %v10912_v9, 0.0  ;;  %v2444_v15 = vsel %vm2402_vm12, %v10935_v48, 0.0  ;;  %vm2486_vm8 = vcmp.eq.f32.partialorder %v10867_v35, %v10918_v8  ;;  %vm2403_vm9 = vcmp.eq.f32.partialorder %v10867_v35, %v10903_v12  ;;  %v11097_v9 = vld [vmem:[%s14166_s1] sm:$0xff] }
 0x9b4   :  { %14882 = vst [vmem:[#allocation32_spill] sm:$0xff] %v11073_v38  ;;  %2861 = vmatpush.msra.mxu1 %v11073_v38  ;;  %v11088_v29 = vadd.f32 %v2520_v26, %v2443_v63  ;;  %v2521_v14 = vsel %vm2486_vm8, %v10921_v33, 0.0  ;;  %v2445_v31 = vsel %vm2403_vm9, %v10949_v1, 0.0  ;;  %vm2487_vm15 = vcmp.eq.f32.partialorder %v10867_v35, %v10961_v58 }
 0x9b5   :  { %v11099_v8 = vadd.f32 %v2521_v14, %v2444_v15  ;;  %v2522_v12 = vsel %vm2487_vm15, %v10952_v2, 0.0  ;;  %vm2404_vm7 = vcmp.eq.f32.partialorder %v10867_v35, %v10970_v47  ;;  %vm2488_vm2 = vcmp.eq.f32.partialorder %v10867_v35, %v10989_v49 }
 0x9b6   :  { %14883 = vst [vmem:[#allocation40_spill] sm:$0xff] %v11088_v29  ;;  %2775 = vmatpush.msrb.mxu0 %v11088_v29  ;;  %v11107_v33 = vadd.f32 %v2522_v12, %v2445_v31  ;;  %v2446_v51 = vsel %vm2404_vm7, %v10996_v36, 0.0  ;;  %v2523_v48 = vsel %vm2488_vm2, %v10980_v46, 0.0  ;;  %v11113_v1 = vsub.f32 %v10858_v61, %v10876_v52 }
 0x9b7   :  { %14884 = vst [vmem:[#allocation10_spill] sm:$0xff] %v11099_v8  ;;  %2804 = vmatpush.msra.mxu2 %v11099_v8  ;;  %v11116_v2 = vadd.f32 %v2523_v48, %v2446_v51  ;;  %6225 = vmatmul.msk.f32.vlgmr.msrb.gmra.mxu0 %vm2251_vm5, %v11097_v9  ;;  %v11121_v58 = vperm.slane %v10876_v52, 0  ;;  %v11124_v47 = vadd.f32 1.0, %v10876_v52  ;;  %v11128_v46 = vsub.f32 %v10860_v30, %v10879_v53  ;;  %v11199_v51 = vld [vmem:[%s14166_s1 + $0x8] sm:$0xff] }
 0x9b8   :  { %14885 = vst [vmem:[#allocation12_spill] sm:$0xff] %v11107_v33  ;;  %2833 = vmatpush.msra.mxu3 %v11107_v33  ;;  %6229 = vmatmul.msk.f32.vlgmr.msra.gmra.mxu2 %vm2251_vm5, %v11097_v9  ;;  %v14384_v61 = vsub.f32 1.0, %v11113_v1  ;;  %v11135_v49 = vperm.slane %v11113_v1, 0  ;;  %v11138_v36 = vperm.slane %v10879_v53, 0  ;;  %v11141_v5 = vadd.f32 1.0, %v10879_v53 }
 0x9b9   :  { %14886 = vst [vmem:[#allocation8_spill] sm:$0xff] %v11116_v2  ;;  %2862 = vmatpush.msra.mxu1 %v11116_v2  ;;  %6233 = vmatmul.msk.f32.vlgmr.msra.gmra.mxu3 %vm2251_vm5, %v11097_v9  ;;  %vm2426_vm12 = vcmp.eq.f32.partialorder %v10850_v50, %v11121_v58  ;;  %v11149_v30 = vperm.slane %v11124_v47, 0  ;;  %v14383_v44 = vsub.f32 1.0, %v11128_v46  ;;  %v11153_v4 = vperm.slane %v11128_v46, 0 }
 0x9ba   :  { %6237 = vmatmul.msk.f32.vlgmr.msra.gmra.mxu1 %vm2251_vm5, %v11097_v9  ;;  %v11159_v22 = vperm.slane %v14384_v61, 0  ;;  %vm2427_vm8 = vcmp.eq.f32.partialorder %v10850_v50, %v11138_v36  ;;  %v11164_v11 = vperm.slane %v11141_v5, 0  ;;  %v11167_v24 = vfloor.f32 %v10869_v0 }
 0x9bb   :  { %vm2510_vm9 = vcmp.eq.f32.partialorder %v10850_v50, %v11149_v30  ;;  %v11173_v10 = vperm.slane %v14383_v44, 0  ;;  %3020 = vmatpush.msrb.mxu1 %v10954_v21  ;;  %vm2419_vm15 = vcmp.eq.f32.partialorder %v10854_v37, %v11121_v58  ;;  %vm2503_vm7 = vcmp.eq.f32.partialorder %v10854_v37, %v11149_v30 }
 0x9bc   :  { %v2468_v41 = vsel %vm2426_vm12, %v11159_v22, 0.0  ;;  %v2545_v63 = vsel %vm2510_vm9, %v11135_v49, 0.0  ;;  %vm2511_vm2 = vcmp.eq.f32.partialorder %v10850_v50, %v11164_v11  ;;  %v11186_v26 = vsub.f32 %v10869_v0, %v11167_v24 }
 0x9bd   :  { %v11188_v15 = vadd.f32 %v2545_v63, %v2468_v41  ;;  %v2469_v14 = vsel %vm2427_vm8, %v11173_v10, 0.0  ;;  %v2546_v31 = vsel %vm2511_vm2, %v11153_v4, 0.0  ;;  %v11193_v12 = vperm.slane %v11167_v24, 0  ;;  %3021 = vmatpush.msrb.mxu1 %v11011_v13 }
 0x9be   :  { %v11201_v48 = vadd.f32 %v2546_v31, %v2469_v14  ;;  %v14387_v0 = vsub.f32 1.0, %v11186_v26  ;;  %v11205_v41 = vadd.f32 1.0, %v11167_v24  ;;  %v11208_v63 = vperm.slane %v11186_v26, 0 }
 0x9bf   :  { %14887 = vst [vmem:[#allocation15_spill] sm:$0xff] %v11188_v15  ;;  %2888 = vmatpush.msra.mxu0 %v11188_v15  ;;  %vm2428_vm12 = vcmp.eq.f32.partialorder %v10850_v50, %v11193_v12  ;;  %v2461_v44 = vsel %vm2419_vm15, %v11159_v22, 0.0  ;;  %v2538_v14 = vsel %vm2503_vm7, %v11135_v49, 0.0  ;;  %vm2420_vm8 = vcmp.eq.f32.partialorder %v10854_v37, %v11138_v36  ;;  %3022 = vmatpush.msrb.mxu1 %v11052_v27 }
 0x9c0   :  { %14888 = vst [vmem:[#allocation58_spill] sm:$0xff] %v11201_v48  ;;  %2917 = vmatpush.msrb.mxu2 %v11201_v48  ;;  %v2442_v31 = vperm.slane %v14387_v0, 0  ;;  %v2484_v61 = vperm.slane %v11205_v41, 0  ;;  %v11228_v57 = vadd.f32 %v2538_v14, %v2461_v44  ;;  %v2462_v25 = vsel %vm2420_vm8, %v11173_v10, 0.0  ;;  %6226 = vmatmul.msk.f32.gmra.mxu0 %vm2251_vm5, %v11199_v51 }
 0x9c1   :  { %vm2504_vm9 = vcmp.eq.f32.partialorder %v10854_v37, %v11164_v11  ;;  %vm2421_vm15 = vcmp.eq.f32.partialorder %v10854_v37, %v11193_v12  ;;  %vm2412_vm7 = vcmp.eq.f32.partialorder %v10856_v56, %v11121_v58  ;;  %vm2496_vm2 = vcmp.eq.f32.partialorder %v10856_v56, %v11149_v30  ;;  %3023 = vmatpush.msrb.mxu1 %v11088_v29 }
 0x9c2   :  { %14889 = vst [vmem:[#allocation20_spill] sm:$0xff] %v11228_v57  ;;  %v2470_v44 = vsel %vm2428_vm12, %v2442_v31, 0.0  ;;  %vm2512_vm8 = vcmp.eq.f32.partialorder %v10850_v50, %v2484_v61  ;;  %2889 = vmatpush.msra.mxu0 %v11228_v57  ;;  %v2539_v14 = vsel %vm2504_vm9, %v11153_v4, 0.0  ;;  %v2463_v0 = vsel %vm2421_vm15, %v2442_v31, 0.0  ;;  %6230 = vmatmul.msk.f32.gmra.mxu2 %vm2251_vm5, %v11199_v51 }
 0x9c3   :  { %3136 = vmatpush.msra.mxu1 %v11188_v15  ;;  %v2547_v28 = vsel %vm2512_vm8, %v11208_v63, 0.0  ;;  %v11250_v16 = vadd.f32 %v2539_v14, %v2462_v25  ;;  %vm2505_vm13 = vcmp.eq.f32.partialorder %v10854_v37, %v2484_v61  ;;  %v2454_v29 = vsel %vm2412_vm7, %v11159_v22, 0.0  ;;  %6234 = vmatmul.msk.f32.gmra.mxu3 %vm2251_vm5, %v11199_v51 }
 0x9c4   :  { %v11258_v27 = vadd.f32 %v2547_v28, %v2470_v44  ;;  %v2540_v13 = vsel %vm2505_vm13, %v11208_v63, 0.0  ;;  %v2531_v25 = vsel %vm2496_vm2, %v11135_v49, 0.0  ;;  %vm2413_vm12 = vcmp.eq.f32.partialorder %v10856_v56, %v11138_v36  ;;  %6238 = vmatmul.msk.f32.gmra.mxu1 %vm2251_vm5, %v11199_v51 }
 0x9c5   :  { %14890 = vst [vmem:[#allocation31_spill] sm:$0xff] %v11250_v16  ;;  %2918 = vmatpush.msrb.mxu2 %v11250_v16  ;;  %v11270_v14 = vadd.f32 %v2540_v13, %v2463_v0  ;;  %v11272_v15 = vadd.f32 %v2531_v25, %v2454_v29  ;;  %v2455_v28 = vsel %vm2413_vm12, %v11173_v10, 0.0  ;;  %vm2497_vm13 = vcmp.eq.f32.partialorder %v10856_v56, %v11164_v11  ;;  %v11288_v13 = vld [vmem:[%s14166_s1 + $0x10] sm:$0xff] }
 0x9c6   :  { %14891 = vst [vmem:[#allocation9_spill] sm:$0xff] %v11258_v27  ;;  %3137 = vmatpush.msra.mxu1 %v11228_v57  ;;  %2946 = vmatpush.msrb.mxu3 %v11258_v27  ;;  %v2532_v44 = vsel %vm2497_vm13, %v11153_v4, 0.0  ;;  %vm2414_vm9 = vcmp.eq.f32.partialorder %v10856_v56, %v11193_v12  ;;  %vm2498_vm15 = vcmp.eq.f32.partialorder %v10856_v56, %v2484_v61 }
 0x9c7   :  { %14892 = vst [vmem:[#allocation66_spill] sm:$0xff] %v11270_v14  ;;  %vm2405_vm7 = vcmp.eq.f32.partialorder %v10867_v35, %v11121_v58  ;;  %2890 = vmatpush.msra.mxu0 %v11272_v15  ;;  %v11291_v29 = vadd.f32 %v2532_v44, %v2455_v28  ;;  %v2456_v0 = vsel %vm2414_vm9, %v2442_v31, 0.0  ;;  %v2533_v25 = vsel %vm2498_vm15, %v11208_v63, 0.0 }
 0x9c8   :  { %14893 = vst [vmem:[#allocation11_spill] sm:$0xff] %v11272_v15  ;;  %v2447_v57 = vsel %vm2405_vm7, %v11159_v22, 0.0  ;;  %3138 = vmatpush.msra.mxu1 %v11272_v15  ;;  %2947 = vmatpush.msrb.mxu3 %v11270_v14  ;;  %v11297_v21 = vadd.f32 %v2533_v25, %v2456_v0  ;;  %vm2489_vm2 = vcmp.eq.f32.partialorder %v10867_v35, %v11149_v30  ;;  %v11367_v25 = vperm.slane %v10864_v43, 3 }
 0x9c9   :  { %14894 = vst [vmem:[#allocation37_spill] sm:$0xff] %v11291_v29  ;;  %vm2406_vm8 = vcmp.eq.f32.partialorder %v10867_v35, %v11138_v36  ;;  %vm2490_vm12 = vcmp.eq.f32.partialorder %v10867_v35, %v11164_v11  ;;  %2919 = vmatpush.msrb.mxu2 %v11291_v29  ;;  %v2524_v58 = vsel %vm2489_vm2, %v11135_v49, 0.0  ;;  %vm2407_vm13 = vcmp.eq.f32.partialorder %v10867_v35, %v11193_v12 }
 0x9ca   :  { %14895 = vst [vmem:[#allocation14_spill] sm:$0xff] %v11297_v21  ;;  %v2448_v22 = vsel %vm2406_vm8, %v11173_v10, 0.0  ;;  %v2525_v28 = vsel %vm2490_vm12, %v11153_v4, 0.0  ;;  %6227 = vmatmul.msk.f32.gmra.mxu0 %vm2251_vm5, %v11288_v13  ;;  %2948 = vmatpush.msrb.mxu3 %v11297_v21  ;;  %v11314_v36 = vadd.f32 %v2524_v58, %v2447_v57  ;;  %v2449_v11 = vsel %vm2407_vm13, %v2442_v31, 0.0 }
 0x9cb   :  { %v11316_v30 = vadd.f32 %v2525_v28, %v2448_v22  ;;  %vm2491_vm9 = vcmp.eq.f32.partialorder %v10867_v35, %v2484_v61  ;;  %6231 = vmatmul.msk.f32.gmra.mxu2 %vm2251_vm5, %v11288_v13  ;;  %6235 = vmatmul.msk.f32.gmra.mxu3 %vm2251_vm5, %v11288_v13  ;;  %v11325_v4 = vperm.slane %v10862_v62, 3  ;;  %v14898_v10 = vsub.f32 1.0, %v10882_v32 }
 0x9cc   :  { %14896 = vst [vmem:[#allocation48_spill] sm:$0xff] %v11314_v36  ;;  %v2526_v49 = vsel %vm2491_vm9, %v11208_v63, 0.0  ;;  %v11332_v12 = vperm.slane %v10888_v40, 3  ;;  %2891 = vmatpush.msra.mxu0 %v11314_v36  ;;  %v11339_v63 = vperm.slane %v10882_v32, 3  ;;  %v11342_v31 = vperm.slane %v10873_v39, 3  ;;  %3139 = vmatpush.msra.mxu1 %v11314_v36 }
 0x9cd   :  { %14897 = vst [vmem:[#allocation33_spill] sm:$0xff] %v11316_v30  ;;  %v11329_v57 = vperm.slane %v14898_v10, 3  ;;  %2920 = vmatpush.msrb.mxu2 %v11316_v30  ;;  %v11336_v61 = vadd.f32 %v2526_v49, %v2449_v11  ;;  %v14900_v62 = vsub.f32 1.0, %v10964_v45  ;;  %vm2583_vm15 = vcmp.eq.f32.partialorder %v10867_v35, %v11325_v4  ;;  %6239 = vmatmul.msk.f32.gmra.mxu1 %vm2251_vm5, %v11288_v13 }
 0x9ce   :  { %3049 = vmatpush.msrb.mxu0 %v10966_v17  ;;  %vm2653_vm7 = vcmp.eq.f32.partialorder %v10867_v35, %v11332_v12  ;;  %v11355_v32 = vperm.slane %v10973_v6, 3  ;;  %v11358_v39 = vperm.slane %v10964_v45, 3  ;;  %vm2586_vm2 = vcmp.eq.f32.partialorder %v10867_v35, %v11342_v31  ;;  %v11374_v45 = vld [vmem:[%s14166_s1 + $0x18] sm:$0xff] }
 0x9cf   :  { %14899 = vst [vmem:[#allocation49_spill] sm:$0xff] %v11336_v61  ;;  %v11346_v44 = vperm.slane %v14900_v62, 3  ;;  %3078 = vmatpush.msra.mxu2 %v10992_v55  ;;  %2949 = vmatpush.msrb.mxu3 %v11336_v61  ;;  %v2618_v40 = vsel %vm2583_vm15, %v11329_v57, 0.0  ;;  %v2688_v0 = vsel %vm2653_vm7, %v11339_v63, 0.0  ;;  %v14901_v22 = vsub.f32 1.0, %v10891_v60 }
 0x9d0   :  { %3050 = vmatpush.msrb.mxu0 %v11016_v19  ;;  %v11376_v6 = vadd.f32 %v2688_v0, %v2618_v40  ;;  %vm2656_vm8 = vcmp.eq.f32.partialorder %v10867_v35, %v11355_v32  ;;  %vm2584_vm12 = vcmp.eq.f32.partialorder %v10867_v35, %v11367_v25  ;;  %v11392_v11 = vperm.slane %v10897_v34, 3 }
 0x9d1   :  { %3107 = vmatpush.msra.mxu3 %v11014_v23  ;;  %v2621_v58 = vsel %vm2586_vm2, %v11346_v44, 0.0  ;;  %v11383_v43 = vperm.slane %v14901_v22, 3  ;;  %3079 = vmatpush.msra.mxu2 %v11031_v20  ;;  %v2691_v28 = vsel %vm2656_vm8, %v11358_v39, 0.0  ;;  %v11395_v49 = vperm.slane %v10891_v60, 3 }
 0x9d2   :  { %3051 = vmatpush.msrb.mxu0 %v11058_v59  ;;  %v11399_v10 = vadd.f32 %v2691_v28, %v2621_v58  ;;  %v11403_v40 = vperm.slane %v10871_v7, 3  ;;  %v14902_v0 = vsub.f32 1.0, %v10900_v54  ;;  %vm2654_vm13 = vcmp.eq.f32.partialorder %v10867_v35, %v11392_v11 }
 0x9d3   :  { %3108 = vmatpush.msra.mxu3 %v11037_v42  ;;  %v2619_v62 = vsel %vm2584_vm12, %v11383_v43, 0.0  ;;  %3080 = vmatpush.msra.mxu2 %v11066_v18  ;;  %v11415_v60 = vperm.slane %v10940_v3, 3  ;;  %v11418_v34 = vperm.slane %v10900_v54, 3  ;;  %vm2590_vm9 = vcmp.eq.f32.partialorder %v10856_v56, %v11325_v4 }
 0x9d4   :  { %v11407_v22 = vperm.slane %v14902_v0, 3  ;;  %6228 = vmatmul.msk.f32.gmra.mxu0 %vm2251_vm5, %v11374_v45  ;;  %v2689_v7 = vsel %vm2654_vm13, %v11395_v49, 0.0  ;;  %vm2585_vm15 = vcmp.eq.f32.partialorder %v10867_v35, %v11403_v40  ;;  %v2625_v58 = vsel %vm2590_vm9, %v11329_v57, 0.0  ;;  %6236 = vmatmul.msk.f32.gmra.mxu3 %vm2251_vm5, %v11374_v45 }
 0x9d5   :  { %3109 = vmatpush.msra.mxu3 %v11073_v38  ;;  %3052 = vmatpush.msrb.mxu0 %v11099_v8  ;;  %vm2660_vm7 = vcmp.eq.f32.partialorder %v10856_v56, %v11332_v12  ;;  %v11433_v54 = vadd.f32 %v2689_v7, %v2619_v62  ;;  %vm2655_vm2 = vcmp.eq.f32.partialorder %v10867_v35, %v11415_v60 }
 0x9d6   :  { %3081 = vmatpush.msra.mxu2 %v11107_v33  ;;  %v2620_v3 = vsel %vm2585_vm15, %v11407_v22, 0.0  ;;  %v2695_v28 = vsel %vm2660_vm7, %v11339_v63, 0.0  ;;  %v2690_v0 = vsel %vm2655_vm2, %v11418_v34, 0.0  ;;  %vm2593_vm8 = vcmp.eq.f32.partialorder %v10856_v56, %v11342_v31  ;;  %6240 = vmatmul.msk.f32.gmra.mxu1 %vm2251_vm5, %v11374_v45 }
 0x9d7   :  { %3110 = vmatpush.msra.mxu3 %v11116_v2  ;;  %6232 = vmatmul.msk.f32.gmra.mxu2 %vm2251_vm5, %v11374_v45  ;;  %v11443_v36 = vadd.f32 %v2695_v28, %v2625_v58  ;;  %vm2663_vm12 = vcmp.eq.f32.partialorder %v10856_v56, %v11355_v32  ;;  %v11449_v62 = vadd.f32 %v2690_v0, %v2620_v3  ;;  %v2628_v7 = vsel %vm2593_vm8, %v11346_v44, 0.0 }
 0x9d8   :  { %v2698_v15 = vsel %vm2663_vm12, %v11358_v39, 0.0  ;;  %vm2591_vm13 = vcmp.eq.f32.partialorder %v10856_v56, %v11367_v25  ;;  %vm2661_vm9 = vcmp.eq.f32.partialorder %v10856_v56, %v11392_v11  ;;  %vm2592_vm15 = vcmp.eq.f32.partialorder %v10856_v56, %v11403_v40 }
 0x9d9   :  { %v11455_v2 = vadd.f32 %v2698_v15, %v2628_v7  ;;  %v2626_v58 = vsel %vm2591_vm13, %v11383_v43, 0.0  ;;  %v2696_v3 = vsel %vm2661_vm9, %v11395_v49, 0.0  ;;  %v2627_v28 = vsel %vm2592_vm15, %v11407_v22, 0.0 }
 0x9da   :  { %vm2662_vm7 = vcmp.eq.f32.partialorder %v10856_v56, %v11415_v60  ;;  %vm2597_vm2 = vcmp.eq.f32.partialorder %v10854_v37, %v11325_v4  ;;  %v11470_v15 = vadd.f32 %v2696_v3, %v2626_v58  ;;  %vm2667_vm8 = vcmp.eq.f32.partialorder %v10854_v37, %v11332_v12 }
 0x9db   :  { %v2697_v0 = vsel %vm2662_vm7, %v11418_v34, 0.0  ;;  %v2632_v7 = vsel %vm2597_vm2, %v11329_v57, 0.0  ;;  %v2702_v42 = vsel %vm2667_vm8, %v11339_v63, 0.0  ;;  %vm2600_vm12 = vcmp.eq.f32.partialorder %v10854_v37, %v11342_v31 }
 0x9dc   :  { %6241 = vmatmul.msk.f32.vlgmr.msra.gmra.mxu0 %vm2251_vm5, %v11097_v9  ;;  %v11478_v38 = vadd.f32 %v2697_v0, %v2627_v28  ;;  %vm2670_vm13 = vcmp.eq.f32.partialorder %v10854_v37, %v11355_v32  ;;  %v11486_v58 = vadd.f32 %v2702_v42, %v2632_v7  ;;  %v2635_v3 = vsel %vm2600_vm12, %v11346_v44, 0.0  ;;  %6249 = vmatmul.msk.f32.vlgmr.msrb.gmra.mxu3 %vm2251_vm5, %v11097_v9  ;;  %v11506_v42 = vld [vmem:[%s14166_s1 + $0x20] sm:$0xff] }
 0x9dd   :  { %3165 = vmatpush.msra.mxu0 %v11201_v48  ;;  %v2705_v23 = vsel %vm2670_vm13, %v11358_v39, 0.0  ;;  %vm2598_vm9 = vcmp.eq.f32.partialorder %v10854_v37, %v11367_v25  ;;  %vm2668_vm15 = vcmp.eq.f32.partialorder %v10854_v37, %v11392_v11  ;;  %vm2599_vm7 = vcmp.eq.f32.partialorder %v10854_v37, %v11403_v40 }
 0x9de   :  { %v11494_v28 = vadd.f32 %v2705_v23, %v2635_v3  ;;  %v2633_v0 = vsel %vm2598_vm9, %v11383_v43, 0.0  ;;  %v2703_v23 = vsel %vm2668_vm15, %v11395_v49, 0.0  ;;  %v2634_v7 = vsel %vm2599_vm7, %v11407_v22, 0.0  ;;  %6253 = vmatmul.msk.f32.vlgmr.msrb.gmra.mxu1 %vm2251_vm5, %v11506_v42 }
 0x9df   :  { %6245 = vmatmul.msk.f32.vlgmr.msrb.gmra.mxu2 %vm2251_vm5, %v11097_v9  ;;  %3166 = vmatpush.msra.mxu0 %v11250_v16  ;;  %vm2669_vm2 = vcmp.eq.f32.partialorder %v10854_v37, %v11415_v60  ;;  %vm2604_vm8 = vcmp.eq.f32.partialorder %v10850_v50, %v11325_v4  ;;  %v11516_v9 = vadd.f32 %v2703_v23, %v2633_v0  ;;  %v11600_v0 = vperm.slane %v11167_v24, 3 }
 0x9e0   :  { %3194 = vmatpush.msrb.mxu2 %v11258_v27  ;;  %v2704_v3 = vsel %vm2669_vm2, %v11418_v34, 0.0  ;;  %v2639_v48 = vsel %vm2604_vm8, %v11329_v57, 0.0  ;;  %vm2674_vm12 = vcmp.eq.f32.partialorder %v10850_v50, %v11332_v12  ;;  %vm2607_vm13 = vcmp.eq.f32.partialorder %v10850_v50, %v11342_v31 }
 0x9e1   :  { %3167 = vmatpush.msra.mxu0 %v11291_v29  ;;  %v11523_v16 = vadd.f32 %v2704_v3, %v2634_v7  ;;  %v2709_v33 = vsel %vm2674_vm12, %v11339_v63, 0.0  ;;  %vm2677_vm9 = vcmp.eq.f32.partialorder %v10850_v50, %v11355_v32  ;;  %v2642_v57 = vsel %vm2607_vm13, %v11346_v44, 0.0 }
 0x9e2   :  { %3195 = vmatpush.msrb.mxu2 %v11270_v14  ;;  %v11533_v4 = vadd.f32 %v2709_v33, %v2639_v48  ;;  %v2712_v12 = vsel %vm2677_vm9, %v11358_v39, 0.0  ;;  %vm2605_vm15 = vcmp.eq.f32.partialorder %v10850_v50, %v11367_v25  ;;  %vm2675_vm7 = vcmp.eq.f32.partialorder %v10850_v50, %v11392_v11 }
 0x9e3   :  { %3168 = vmatpush.msra.mxu0 %v11316_v30  ;;  %v11540_v63 = vadd.f32 %v2712_v12, %v2642_v57  ;;  %v2640_v31 = vsel %vm2605_vm15, %v11383_v43, 0.0  ;;  %vm2606_vm2 = vcmp.eq.f32.partialorder %v10850_v50, %v11403_v40  ;;  %v2710_v33 = vsel %vm2675_vm7, %v11395_v49, 0.0 }
 0x9e4   :  { %3196 = vmatpush.msrb.mxu2 %v11297_v21  ;;  %6242 = vmatmul.msk.f32.gmra.mxu0 %vm2251_vm5, %v11199_v51  ;;  %v2641_v48 = vsel %vm2606_vm2, %v11407_v22, 0.0  ;;  %vm2676_vm8 = vcmp.eq.f32.partialorder %v10850_v50, %v11415_v60  ;;  %v11555_v44 = vperm.slane %v10876_v52, 3  ;;  %v11557_v32 = vadd.f32 %v2710_v33, %v2640_v31 }
 0x9e5   :  { %v2711_v39 = vsel %vm2676_vm8, %v11418_v34, 0.0  ;;  %v14903_v25 = vsub.f32 1.0, %v11113_v1  ;;  %v11565_v11 = vperm.slane %v11124_v47, 3  ;;  %6250 = vmatmul.msk.f32.gmra.mxu3 %vm2251_vm5, %v11199_v51  ;;  %v11575_v52 = vperm.slane %v11113_v1, 3  ;;  %v11585_v47 = vld [vmem:[%s14166_s1 + $0x28] sm:$0xff] }
 0x9e6   :  { %3197 = vmatpush.msrb.mxu2 %v11336_v61  ;;  %v11570_v49 = vadd.f32 %v2711_v39, %v2641_v48  ;;  %vm2587_vm12 = vcmp.eq.f32.partialorder %v10867_v35, %v11555_v44  ;;  %v11578_v40 = vperm.slane %v10879_v53, 3  ;;  %v14904_v60 = vsub.f32 1.0, %v11128_v46  ;;  %6254 = vmatmul.msk.f32.gmra.mxu1 %vm2251_vm5, %v11585_v47 }
 0x9e7   :  { %v11562_v43 = vperm.slane %v14903_v25, 3  ;;  %6246 = vmatmul.msk.f32.gmra.mxu2 %vm2251_vm5, %v11199_v51  ;;  %vm2657_vm13 = vcmp.eq.f32.partialorder %v10867_v35, %v11565_v11  ;;  %v11593_v34 = vperm.slane %v11141_v5, 3  ;;  %v2686_v51 = vperm.slane %v11128_v46, 3 }
 0x9e8   :  { %v2616_v1 = vperm.slane %v14904_v60, 3  ;;  %v2692_v53 = vsel %vm2657_vm13, %v11575_v52, 0.0  ;;  %vm2588_vm9 = vcmp.eq.f32.partialorder %v10867_v35, %v11578_v40  ;;  %v14905_v3 = vsub.f32 1.0, %v11186_v26 }
 0x9e9   :  { %v2622_v22 = vsel %vm2587_vm12, %v11562_v43, 0.0  ;;  %vm2658_vm15 = vcmp.eq.f32.partialorder %v10867_v35, %v11593_v34  ;;  %vm2589_vm7 = vcmp.eq.f32.partialorder %v10867_v35, %v11600_v0  ;;  %v2652_v46 = vperm.slane %v11205_v41, 3 }
 0x9ea   :  { %v11602_v23 = vadd.f32 %v2692_v53, %v2622_v22  ;;  %v2623_v7 = vsel %vm2588_vm9, %v2616_v1, 0.0  ;;  %v2617_v5 = vperm.slane %v14905_v3, 3  ;;  %v2693_v57 = vsel %vm2658_vm15, %v2686_v51, 0.0  ;;  %v2994_v22 = vld [vmem:[%s14166_s1 + $0x30] sm:$0xff] }
 0x9eb   :  { %v2687_v24 = vperm.slane %v11186_v26, 3  ;;  %v11614_v12 = vadd.f32 %v2693_v57, %v2623_v7  ;;  %vm2594_vm2 = vcmp.eq.f32.partialorder %v10856_v56, %v11555_v44  ;;  %vm2664_vm8 = vcmp.eq.f32.partialorder %v10856_v56, %v11565_v11 }
 0x9ec   :  { %v2624_v31 = vsel %vm2589_vm7, %v2617_v5, 0.0  ;;  %6243 = vmatmul.msk.f32.gmra.mxu0 %vm2251_vm5, %v11288_v13  ;;  %vm2659_vm12 = vcmp.eq.f32.partialorder %v10867_v35, %v2652_v46  ;;  %v2629_v33 = vsel %vm2594_vm2, %v11562_v43, 0.0  ;;  %v2699_v41 = vsel %vm2664_vm8, %v11575_v52, 0.0 }
 0x9ed   :  { %vm2595_vm13 = vcmp.eq.f32.partialorder %v10856_v56, %v11578_v40  ;;  %v2694_v26 = vsel %vm2659_vm12, %v2687_v24, 0.0  ;;  %v11627_v48 = vadd.f32 %v2699_v41, %v2629_v33  ;;  %vm2665_vm9 = vcmp.eq.f32.partialorder %v10856_v56, %v11593_v34  ;;  %6251 = vmatmul.msk.f32.gmra.mxu3 %vm2251_vm5, %v11288_v13 }
 0x9ee   :  { %v2630_v39 = vsel %vm2595_vm13, %v2616_v1, 0.0  ;;  %v11633_v25 = vadd.f32 %v2694_v26, %v2624_v31  ;;  %v2700_v35 = vsel %vm2665_vm9, %v2686_v51, 0.0  ;;  %vm2596_vm15 = vcmp.eq.f32.partialorder %v10856_v56, %v11600_v0  ;;  %6255 = vmatmul.msk.f32.gmra.mxu1 %vm2251_vm5, %v2994_v22 }
 0x9ef   :  { %vm2666_vm7 = vcmp.eq.f32.partialorder %v10856_v56, %v2652_v46  ;;  %6247 = vmatmul.msk.f32.gmra.mxu2 %vm2251_vm5, %v11288_v13  ;;  %v11643_v60 = vadd.f32 %v2700_v35, %v2630_v39  ;;  %v2631_v53 = vsel %vm2596_vm15, %v2617_v5, 0.0  ;;  %vm2601_vm2 = vcmp.eq.f32.partialorder %v10854_v37, %v11555_v44 }
 0x9f0   :  { %14906 = vst [vmem:[#allocation59_spill] sm:$0xff] %v11633_v25  ;;  %v2701_v7 = vsel %vm2666_vm7, %v2687_v24, 0.0  ;;  %v2636_v57 = vsel %vm2601_vm2, %v11562_v43, 0.0  ;;  %vm2671_vm8 = vcmp.eq.f32.partialorder %v10854_v37, %v11565_v11  ;;  %vm2602_vm12 = vcmp.eq.f32.partialorder %v10854_v37, %v11578_v40 }
 0x9f1   :  { %v11647_v3 = vadd.f32 %v2701_v7, %v2631_v53  ;;  %v2706_v56 = vsel %vm2671_vm8, %v11575_v52, 0.0  ;;  %v2637_v13 = vsel %vm2602_vm12, %v2616_v1, 0.0  ;;  %vm2672_vm13 = vcmp.eq.f32.partialorder %v10854_v37, %v11593_v34 }
 0x9f2   :  { %vm2603_vm9 = vcmp.eq.f32.partialorder %v10854_v37, %v11600_v0  ;;  %v11660_v31 = vadd.f32 %v2706_v56, %v2636_v57  ;;  %v2707_v33 = vsel %vm2672_vm13, %v2686_v51, 0.0  ;;  %vm2673_vm15 = vcmp.eq.f32.partialorder %v10854_v37, %v2652_v46 }
 0x9f3   :  { %14907 = vst [vmem:[#allocation62_spill] sm:$0xff] %v11647_v3  ;;  %v2638_v41 = vsel %vm2603_vm9, %v2617_v5, 0.0  ;;  %v11663_v26 = vadd.f32 %v2707_v33, %v2637_v13  ;;  %v2708_v39 = vsel %vm2673_vm15, %v2687_v24, 0.0  ;;  %vm2608_vm7 = vcmp.eq.f32.partialorder %v10850_v50, %v11555_v44 }
 0x9f4   :  { %vm2678_vm2 = vcmp.eq.f32.partialorder %v10850_v50, %v11565_v11  ;;  %6244 = vmatmul.msk.f32.gmra.mxu0 %vm2251_vm5, %v11374_v45  ;;  %v11671_v35 = vadd.f32 %v2708_v39, %v2638_v41  ;;  %v2643_v53 = vsel %vm2608_vm7, %v11562_v43, 0.0  ;;  %vm2609_vm8 = vcmp.eq.f32.partialorder %v10850_v50, %v11578_v40  ;;  %v2995_v43 = vld [vmem:[%s14166_s1 + $0x38] sm:$0xff] }
 0x9f5   :  { %v2713_v7 = vsel %vm2678_vm2, %v11575_v52, 0.0  ;;  %v2644_v57 = vsel %vm2609_vm8, %v2616_v1, 0.0  ;;  %vm2679_vm12 = vcmp.eq.f32.partialorder %v10850_v50, %v11593_v34  ;;  %vm2610_vm13 = vcmp.eq.f32.partialorder %v10850_v50, %v11600_v0  ;;  %6252 = vmatmul.msk.f32.gmra.mxu3 %vm2251_vm5, %v11374_v45 }
 0x9f6   :  { %14908 = vst [vmem:[#allocation50_spill] sm:$0xff] %v11671_v35  ;;  %v11677_v37 = vadd.f32 %v2713_v7, %v2643_v53  ;;  %v2714_v44 = vsel %vm2679_vm12, %v2686_v51, 0.0  ;;  %v2645_v11 = vsel %vm2610_vm13, %v2617_v5, 0.0  ;;  %vm2680_vm9 = vcmp.eq.f32.partialorder %v10850_v50, %v2652_v46  ;;  %6256 = vmatmul.msk.f32.gmra.mxu1 %vm2251_vm5, %v2995_v43 }
 0x9f7   :  { %6248 = vmatmul.msk.f32.gmra.mxu2 %vm2251_vm5, %v11374_v45  ;;  %v11691_v52 = vadd.f32 %v2714_v44, %v2644_v57  ;;  %v2715_v40 = vsel %vm2680_vm9, %v2687_v24, 0.0  ;;  %vm4241_vm15 = vcmask 556032   ;;  %vm14989_vm7 = vcmask 793600  }
 0x9f8   :  { %v11693_v1 = vadd.f32 %v2715_v40, %v2645_v11  ;;  %vm14990_vm2 = vcmask 809984   ;;  %vm14991_vm8 = vcmask 1014784   ;;  %vm14992_vm12 = vmmov %vm14989_vm7  ;;  %vm14993_vm13 = vcmask 1031168  }
 0x9f9   :  { %vm14994_vm9 = vcmask 1039360  }
 0x9fa   :  { %14909 = vst [vmem:[#allocation64_spill] sm:$0xff] %v11693_v1 }
 0x9fc   :  { %6257 = vmatmul.msk.f32.vlgmr.msrb.gmra.mxu0 %vm2251_vm5, %v11506_v42 }
 0x9fd   :  { %6265 = vmatmul.msk.f32.vlgmr.msra.gmra.mxu3 %vm2251_vm5, %v11506_v42 }
 0x9fe   :  { %6269 = vmatmul.msk.f32.vlgmr.msra.gmra.mxu1 %vm2251_vm5, %v11506_v42 }
 0x9ff   :  { %6261 = vmatmul.msk.f32.vlgmr.msra.gmra.mxu2 %vm2251_vm5, %v11506_v42 }
 0xa04   :  { %6258 = vmatmul.msk.f32.gmra.mxu0 %vm2251_vm5, %v11585_v47 }
 0xa05   :  { %6266 = vmatmul.msk.f32.gmra.mxu3 %vm2251_vm5, %v11585_v47 }
 0xa06   :  { %6270 = vmatmul.msk.f32.gmra.mxu1 %vm2251_vm5, %v11585_v47 }
 0xa07   :  { %6262 = vmatmul.msk.f32.gmra.mxu2 %vm2251_vm5, %v11585_v47 }
 0xa0c   :  { %6259 = vmatmul.msk.f32.gmra.mxu0 %vm2251_vm5, %v2994_v22 }
 0xa0d   :  { %6267 = vmatmul.msk.f32.gmra.mxu3 %vm2251_vm5, %v2994_v22 }
 0xa0e   :  { %6271 = vmatmul.msk.f32.gmra.mxu1 %vm2251_vm5, %v2994_v22 }
 0xa0f   :  { %6263 = vmatmul.msk.f32.gmra.mxu2 %vm2251_vm5, %v2994_v22 }
 0xa14   :  { %6260 = vmatmul.msk.f32.gmra.mxu0 %vm2251_vm5, %v2995_v43 }
 0xa15   :  { %6268 = vmatmul.msk.f32.gmra.mxu3 %vm2251_vm5, %v2995_v43 }
 0xa16   :  { %6272 = vmatmul.msk.f32.gmra.mxu1 %vm2251_vm5, %v2995_v43 }
 0xa17   :  { %6264 = vmatmul.msk.f32.gmra.mxu2 %vm2251_vm5, %v2995_v43 }
 0xa1c   :  { %6273 = vmatmul.msk.f32.vlgmr.msra.gmra.mxu0 %vm2251_vm5, %v11506_v42 }
 0xa1f   :  { %6277 = vmatmul.msk.f32.vlgmr.msrb.gmra.mxu2 %vm2251_vm5, %v11506_v42 }
 0xa24   :  { %6274 = vmatmul.msk.f32.gmra.mxu0 %vm2251_vm5, %v11585_v47 }
 0xa27   :  { %6278 = vmatmul.msk.f32.gmra.mxu2 %vm2251_vm5, %v11585_v47 }
 0xa2c   :  { %6275 = vmatmul.msk.f32.gmra.mxu0 %vm2251_vm5, %v2994_v22 }
 0xa2f   :  { %6279 = vmatmul.msk.f32.gmra.mxu2 %vm2251_vm5, %v2994_v22 }
 0xa34   :  { %6276 = vmatmul.msk.f32.gmra.mxu0 %vm2251_vm5, %v2995_v43  ;;  %v11731_v50 = vpop.f32.mrf.mxu0 }
 0xa37   :  { %6280 = vmatmul.msk.f32.gmra.mxu2 %vm2251_vm5, %v2995_v43  ;;  %v11734_v45 = vpop.f32.mrf.mxu1 }
 0xa38   :  { %14910 = vst [vmem:[#allocation30_spill] sm:$0xff] %v11734_v45 }
 0xa3b   :  { %v11736_v34 = vpop.f32.mrf.mxu2 }
 0xa3c   :  { %v11738_v42 = vpop.f32.mrf.mxu3 }
 0xa3d   :  { %14911 = vst [vmem:[#allocation68_spill] sm:$0xff] %v11738_v42  ;;  %v11740_v51 = vpop.f32.mrf.mxu0 }
 0xa41   :  { %v11742_v0 = vpop.f32.mrf.mxu1 }
 0xa42   :  { %14912 = vst [vmem:[#allocation36_spill] sm:$0xff] %v11742_v0 }
 0xa45   :  { %v11744_v47 = vpop.f32.mrf.mxu2 }
 0xa46   :  { %v11746_v5 = vpop.f32.mrf.mxu3 }
 0xa47   :  { %14913 = vst [vmem:[#allocation67_spill] sm:$0xff] %v11746_v5  ;;  %v11748_v46 = vpop.f32.mrf.mxu0 }
 0xa4a   :  { %v11750_v24 = vpop.f32.mrf.mxu1 }
 0xa4b   :  { %14914 = vst [vmem:[#allocation5_spill] sm:$0xff] %v11750_v24 }
 0xa4e   :  { %v11752_v22 = vpop.f32.mrf.mxu2  ;;  %v11754_v56 = vpop.f32.mrf.mxu3 }
 0xa4f   :  { %14915 = vst [vmem:[#allocation51_spill] sm:$0xff] %v11754_v56 }
 0xa51   :  { %v11756_v13 = vpop.f32.mrf.mxu0 }
 0xa53   :  { %v11758_v33 = vpop.f32.mrf.mxu1 }
 0xa54   :  { %14916 = vst [vmem:[#allocation71_spill] sm:$0xff] %v11758_v33 }
 0xa57   :  { %v11760_v41 = vpop.f32.mrf.mxu3 }
 0xa58   :  { %14917 = vst [vmem:[#allocation46_spill] sm:$0xff] %v11760_v41 }
 0xa59   :  { %v11762_v39 = vpop.f32.mrf.mxu0 }
 0xa5a   :  { %v11764_v53 = vpop.f32.mrf.mxu2 }
 0xa5b   :  { %v3025_v7 = vpop.f32.mrf.mxu1 }
 0xa5f   :  { %v11766_v57 = vpop.f32.mrf.mxu3 }
 0xa60   :  { %14918 = vst [vmem:[#allocation70_spill] sm:$0xff] %v11766_v57 }
 0xa61   :  { %v11768_v44 = vpop.f32.mrf.mxu0 }
 0xa62   :  { %v11770_v11 = vpop.f32.mrf.mxu2 }
 0xa63   :  { %v3028_v43 = vpop.f32.mrf.mxu1 }
 0xa64   :  { %v3219_v3 = vmul.f32 %v3028_v43, %v11443_v36 }
 0xa68   :  { %v11772_v40 = vpop.f32.mrf.mxu3 }
 0xa69   :  { %14919 = vst [vmem:[#allocation18_spill] sm:$0xff] %v11772_v40  ;;  %v11774_v45 = vpop.f32.mrf.mxu0 }
 0xa6a   :  { %v11776_v0 = vpop.f32.mrf.mxu2 }
 0xa6b   :  { %v3031_v24 = vpop.f32.mrf.mxu1 }
 0xa6c   :  { %v3226_v21 = vmul.f32 %v3031_v24, %v11486_v58 }
 0xa70   :  { %v11778_v33 = vpop.f32.mrf.mxu3 }
 0xa71   :  { %14920 = vst [vmem:[#allocation6_spill] sm:$0xff] %v11778_v33  ;;  %v11780_v42 = vpop.f32.mrf.mxu0  ;;  %v3212_v33 = vmul.f32 %v3025_v7, %v11376_v6 }
 0xa72   :  { %v11782_v61 = vpop.f32.mrf.mxu2 }
 0xa73   :  { %v3034_v25 = vpop.f32.mrf.mxu1 }
 0xa74   :  { %v3233_v57 = vmul.f32 %v3034_v25, %v11533_v4  ;;  %v11795_v25 = vld [vmem:[%s14164_s4 + $0xb30] sm:$0xff] }
 0xa76   :  { %3255 = vmatpush.msrb.mxu3 %v3233_v57 }
 0xa78   :  { %v11785_v30 = vpop.f32.mrf.mxu3  ;;  %3256 = vmatpush.msrb.mxu3 %v3226_v21 }
 0xa79   :  { %14921 = vst [vmem:[#allocation69_spill] sm:$0xff] %v11785_v30  ;;  %v3054_v5 = vpop.f32.mrf.mxu0 }
 0xa7a   :  { %v11788_v40 = vpop.f32.mrf.mxu2  ;;  %3257 = vmatpush.msrb.mxu3 %v3219_v3  ;;  %v3213_v18 = vmul.f32 %v3054_v5, %v11433_v54 }
 0xa7b   :  { %v3141_v56 = vpop.f32.mrf.mxu1 }
 0xa7c   :  { %3258 = vmatpush.msrb.mxu3 %v3212_v33 }
 0xa7d   :  { %6281 = vmatmul.msk.f32.vlgmr.msrb.gmra.mxu3 %vm2251_vm5, %v11795_v25 }
 0xa80   :  { %v3112_v30 = vpop.f32.mrf.mxu3 }
 0xa81   :  { %v3057_v29 = vpop.f32.mrf.mxu0 }
 0xa82   :  { %v3083_v24 = vpop.f32.mrf.mxu2  ;;  %v3220_v27 = vmul.f32 %v3057_v29, %v11470_v15 }
 0xa83   :  { %v3144_v57 = vpop.f32.mrf.mxu1 }
 0xa88   :  { %v3115_v35 = vpop.f32.mrf.mxu3 }
 0xa89   :  { %v3060_v43 = vpop.f32.mrf.mxu0  ;;  %v3222_v5 = vmul.f32 %v3115_v35, %v11455_v2  ;;  %v2986_v35 = vmul.f32 %v11764_v53, %v11557_v32  ;;  %v2972_v53 = vmul.f32 %v11744_v47, %v11470_v15  ;;  %v11850_v47 = vld [vmem:[%s14164_s4 + $0xb20] sm:$0xff] }
 0xa8a   :  { %v3086_v21 = vpop.f32.mrf.mxu2  ;;  %v3227_v1 = vmul.f32 %v3060_v43, %v11516_v9 }
 0xa8b   :  { %v3147_v41 = vpop.f32.mrf.mxu1 }
 0xa8c   :  { %v3230_v29 = vmul.f32 %v3147_v41, %v11660_v31 }
 0xa90   :  { %v3118_v7 = vpop.f32.mrf.mxu3 }
 0xa91   :  { %v3063_v3 = vpop.f32.mrf.mxu0 }
 0xa92   :  { %v3089_v14 = vpop.f32.mrf.mxu2  ;;  %v3234_v33 = vmul.f32 %v3063_v3, %v11557_v32 }
 0xa93   :  { %v3150_v8 = vpop.f32.mrf.mxu1 }
 0xa94   :  { %3275 = vmatpush.msrb.mxu1 %v3234_v33  ;;  %v3237_v19 = vmul.f32 %v3150_v8, %v11677_v37  ;;  %v3223_v8 = vmul.f32 %v3144_v57, %v11627_v48  ;;  %v2990_v57 = vmul.f32 %v11788_v40, %v11691_v52  ;;  %v2976_v40 = vmul.f32 %v11776_v0, %v11643_v60 }
 0xa96   :  { %3276 = vmatpush.msrb.mxu1 %v3227_v1  ;;  %v3229_v1 = vmul.f32 %v3118_v7, %v11494_v28 }
 0xa98   :  { %3277 = vmatpush.msrb.mxu1 %v3220_v27  ;;  %v3121_v59 = vpop.f32.mrf.mxu3  ;;  %v3228_v27 = vmul.f32 %v3089_v14, %v11523_v16  ;;  %v2985_v14 = vmul.f32 %v11756_v13, %v11533_v4  ;;  %v2971_v13 = vmul.f32 %v11740_v51, %v11443_v36 }
 0xa99   :  { %v11803_v20 = vpop.f32.mrf.mxu0  ;;  %v3236_v17 = vmul.f32 %v3121_v59, %v11540_v63  ;;  %v3216_v59 = vmul.f32 %v3141_v56, %v11602_v23  ;;  %v2979_v56 = vmul.f32 %v11752_v22, %v11516_v9  ;;  %v2965_v22 = vmul.f32 %v11736_v34, %v11433_v54 }
 0xa9a   :  { %v3092_v55 = vpop.f32.mrf.mxu2  ;;  %3278 = vmatpush.msrb.mxu1 %v3213_v18  ;;  %v3215_v18 = vmul.f32 %v3112_v30, %v11399_v10  ;;  %v2978_v30 = vmul.f32 %v11748_v46, %v11486_v58  ;;  %v2964_v46 = vmul.f32 %v11731_v50, %v11376_v6  ;;  %v2982_v50 = vmul.f32 %v11774_v45, %v11660_v31 }
 0xa9b   :  { %v3235_v3 = vmul.f32 %v3092_v55, %v11570_v49  ;;  %6282 = vmatmul.msk.f32.vlgmr.msrb.gmra.mxu1 %vm2251_vm5, %v11795_v25  ;;  %3315 = vmatpush.msrb.mxu0 %v3236_v17  ;;  %v3221_v55 = vmul.f32 %v3086_v21, %v11478_v38  ;;  %v3214_v17 = vmul.f32 %v3083_v24, %v11449_v62 }
 0xa9c   :  { %3335 = vmatpush.msra.mxu1 %v3237_v19  ;;  %v2989_v24 = vmul.f32 %v11780_v42, %v11677_v37  ;;  %v2983_v34 = vmul.f32 %v11782_v61, %v11663_v26  ;;  %v2975_v42 = vmul.f32 %v11768_v44, %v11627_v48  ;;  %v2968_v45 = vmul.f32 %v11762_v39, %v11602_v23  ;;  %v14922_v44 = vld [vmem:[#allocation44_spill] sm:$0xff]  ;;  %v14924_v39 = vld [vmem:[#allocation21_spill] sm:$0xff] }
 0xa9d   :  { %3295 = vmatpush.msra.mxu3 %v3235_v3  ;;  %3316 = vmatpush.msrb.mxu0 %v3229_v1  ;;  %v2969_v61 = vmul.f32 %v11770_v11, %v11614_v12  ;;  %v14923_v3 = vld [vmem:[#allocation29_spill] sm:$0xff]  ;;  %v14925_v11 = vld [vmem:[#allocation23_spill] sm:$0xff] }
 0xa9e   :  { %3336 = vmatpush.msra.mxu1 %v3230_v29  ;;  %v14926_v1 = vld [vmem:[#allocation35_spill] sm:$0xff] }
 0xa9f   :  { %3296 = vmatpush.msra.mxu3 %v3228_v27  ;;  %3317 = vmatpush.msrb.mxu0 %v3222_v5  ;;  %v14927_v27 = vld [vmem:[#allocation45_spill] sm:$0xff]  ;;  %v14928_v5 = vld [vmem:[#allocation10_spill] sm:$0xff] }
 0xaa0   :  { %3337 = vmatpush.msra.mxu1 %v3223_v8  ;;  %v3217_v8 = vmul.f32 %v11803_v20, %v11614_v12  ;;  %v14934_v20 = vld [vmem:[#allocation66_spill] sm:$0xff] }
 0xaa1   :  { %3297 = vmatpush.msra.mxu3 %v3221_v55  ;;  %v3173_v19 = vpop.f32.mrf.mxu0  ;;  %3318 = vmatpush.msrb.mxu0 %v3215_v18  ;;  %v14929_v55 = vld [vmem:[#allocation12_spill] sm:$0xff] }
 0xaa2   :  { %v11823_v41 = vpop.f32.mrf.mxu2  ;;  %3338 = vmatpush.msra.mxu1 %v3216_v59  ;;  %6284 = vmatmul.msk.f32.vlgmr.msrb.gmra.mxu0 %vm2251_vm5, %v11795_v25  ;;  %v3224_v29 = vmul.f32 %v3173_v19, %v11643_v60  ;;  %v14930_v59 = vld [vmem:[#allocation58_spill] sm:$0xff] }
 0xaa3   :  { %3298 = vmatpush.msra.mxu3 %v3214_v17  ;;  %3398 = vmatpush.msra.mxu0 %v2985_v14  ;;  %v14931_v17 = vld [vmem:[#allocation9_spill] sm:$0xff]  ;;  %v11890_v19 = vld [vmem:[%s14166_s1 + $0x40] sm:$0xff]  ;;  %v14932_v14 = vld [vmem:[#allocation64_spill] sm:$0xff] }
 0xaa4   :  { %3418 = vmatpush.msrb.mxu1 %v2986_v35  ;;  %6283 = vmatmul.msk.f32.vlgmr.msra.gmra.mxu3 %vm2251_vm5, %v11795_v25 }
 0xaa5   :  { %6285 = vmatmul.msk.f32.vlgmr.msra.gmra.mxu1 %vm2251_vm5, %v11795_v25  ;;  %3399 = vmatpush.msra.mxu0 %v2978_v30  ;;  %v14933_v30 = vld [vmem:[#allocation31_spill] sm:$0xff] }
 0xaa6   :  { %3419 = vmatpush.msrb.mxu1 %v2979_v56  ;;  %v14935_v56 = vld [vmem:[#allocation46_spill] sm:$0xff] }
 0xaa7   :  { %3400 = vmatpush.msra.mxu0 %v2971_v13  ;;  %v2987_v13 = vmul.f32 %v14935_v56, %v11570_v49  ;;  %v14955_v56 = vld [vmem:[#allocation16_spill] sm:$0xff] }
 0xaa8   :  { %3420 = vmatpush.msrb.mxu1 %v2972_v53  ;;  %v14936_v53 = vld [vmem:[#allocation50_spill] sm:$0xff] }
 0xaa9   :  { %v3176_v51 = vpop.f32.mrf.mxu0  ;;  %3401 = vmatpush.msra.mxu0 %v2964_v46 }
 0xaaa   :  { %v3202_v43 = vpop.f32.mrf.mxu2  ;;  %3421 = vmatpush.msrb.mxu1 %v2965_v22  ;;  %6288 = vmatmul.msk.f32.vlgmr.msra.gmra.mxu0 %vm2251_vm5, %v11850_v47  ;;  %v3231_v0 = vmul.f32 %v3176_v51, %v11663_v26  ;;  %v14937_v22 = vld [vmem:[#allocation37_spill] sm:$0xff]  ;;  %v14939_v51 = vld [vmem:[#allocation62_spill] sm:$0xff] }
 0xaab   :  { %3478 = vmatpush.msrb.mxu0 %v2989_v24  ;;  %v14938_v24 = vld [vmem:[#allocation51_spill] sm:$0xff] }
 0xaac   :  { %3498 = vmatpush.msra.mxu1 %v2990_v57  ;;  %v2980_v57 = vmul.f32 %v14938_v24, %v11523_v16  ;;  %v14959_v24 = vld [vmem:[#allocation32_spill] sm:$0xff] }
 0xaad   :  { %3479 = vmatpush.msrb.mxu0 %v2982_v50  ;;  %6289 = vmatmul.msk.f32.vlgmr.msrb.gmra.mxu1 %vm2251_vm5, %v11850_v47  ;;  %v3225_v50 = vmul.f32 %v3202_v43, %v14939_v51  ;;  %v3527_v43 = vld [vmem:[%s14166_s1 + $0x48] sm:$0xff] }
 0xaae   :  { %3499 = vmatpush.msra.mxu1 %v2983_v34  ;;  %v14940_v34 = vld [vmem:[#allocation14_spill] sm:$0xff] }
 0xaaf   :  { %3480 = vmatpush.msrb.mxu0 %v2975_v42  ;;  %v14941_v42 = vld [vmem:[#allocation67_spill] sm:$0xff] }
 0xab0   :  { %3500 = vmatpush.msra.mxu1 %v2976_v40  ;;  %v2973_v40 = vmul.f32 %v14941_v42, %v11478_v38  ;;  %v14962_v42 = vld [vmem:[#allocation8_spill] sm:$0xff] }
 0xab1   :  { %3481 = vmatpush.msrb.mxu0 %v2968_v45  ;;  %v3179_v21 = vpop.f32.mrf.mxu0  ;;  %v14942_v45 = vld [vmem:[#allocation33_spill] sm:$0xff] }
 0xab2   :  { %v3205_v7 = vpop.f32.mrf.mxu2  ;;  %3501 = vmatpush.msra.mxu1 %v2969_v61  ;;  %v3238_v33 = vmul.f32 %v3179_v21, %v11691_v52  ;;  %6292 = vmatmul.msk.f32.vlgmr.msrb.gmra.mxu0 %vm2251_vm5, %v11850_v47  ;;  %v14943_v61 = vld [vmem:[#allocation59_spill] sm:$0xff] }
 0xab3   :  { %3583 = vmatpush.msra.mxu0 %v14922_v44  ;;  %v3232_v46 = vmul.f32 %v3205_v7, %v14936_v53  ;;  %v3218_v21 = vmul.f32 %v11823_v41, %v14943_v61  ;;  %v14944_v7 = vld [vmem:[#allocation49_spill] sm:$0xff]  ;;  %v14945_v44 = vld [vmem:[#allocation68_spill] sm:$0xff] }
 0xab4   :  { %3612 = vmatpush.msrb.mxu1 %v14923_v3  ;;  %3355 = vmatpush.msra.mxu2 %v3238_v33  ;;  %v2966_v33 = vmul.f32 %v14945_v44, %v11449_v62  ;;  %v14946_v3 = vld [vmem:[#allocation71_spill] sm:$0xff]  ;;  %v14948_v41 = vld [vmem:[#allocation5_spill] sm:$0xff] }
 0xab5   :  { %3584 = vmatpush.msra.mxu0 %v14924_v39  ;;  %6293 = vmatmul.msk.f32.vlgmr.msra.gmra.mxu1 %vm2251_vm5, %v11850_v47  ;;  %v14947_v39 = vld [vmem:[#allocation69_spill] sm:$0xff] }
 0xab6   :  { %3613 = vmatpush.msrb.mxu1 %v14925_v11  ;;  %3356 = vmatpush.msra.mxu2 %v3231_v0  ;;  %v2988_v0 = vmul.f32 %v14946_v3, %v11540_v63  ;;  %v2991_v11 = vmul.f32 %v14947_v39, %v14932_v14 }
 0xab7   :  { %3585 = vmatpush.msra.mxu0 %v14926_v1  ;;  %v14949_v1 = vld [vmem:[#allocation6_spill] sm:$0xff] }
 0xab8   :  { %3614 = vmatpush.msrb.mxu1 %v14927_v27  ;;  %3357 = vmatpush.msra.mxu2 %v3224_v29  ;;  %v2981_v29 = vmul.f32 %v14948_v41, %v11494_v28  ;;  %v2984_v27 = vmul.f32 %v14949_v1, %v14936_v53 }
 0xab9   :  { %3586 = vmatpush.msra.mxu0 %v14928_v5 }
 0xaba   :  { %3615 = vmatpush.msrb.mxu1 %v14929_v55  ;;  %v3208_v18 = vpop.f32.mrf.mxu2  ;;  %3358 = vmatpush.msra.mxu2 %v3217_v8  ;;  %v14950_v8 = vld [vmem:[#allocation36_spill] sm:$0xff] }
 0xabb   :  { %3699 = vmatpush.msrb.mxu0 %v14930_v59  ;;  %v3239_v35 = vmul.f32 %v3208_v18, %v14932_v14  ;;  %6286 = vmatmul.msk.f32.vlgmr.msra.gmra.mxu2 %vm2251_vm5, %v11795_v25  ;;  %v2974_v5 = vmul.f32 %v14950_v8, %v11455_v2  ;;  %v14952_v59 = vld [vmem:[#allocation30_spill] sm:$0xff] }
 0xabc   :  { %3728 = vmatpush.msra.mxu1 %v14931_v17  ;;  %6299 = vmatmul.msk.f32.vlgmr.msra.gmra.mxu0 %vm2251_vm5, %v11890_v19  ;;  %v2967_v18 = vmul.f32 %v14952_v59, %v11399_v10  ;;  %v14953_v17 = vld [vmem:[#allocation70_spill] sm:$0xff] }
 0xabd   :  { %3700 = vmatpush.msrb.mxu0 %v14933_v30  ;;  %3375 = vmatpush.msrb.mxu3 %v3239_v35  ;;  %v2970_v35 = vmul.f32 %v14953_v17, %v14943_v61  ;;  %v3528_v30 = vld [vmem:[%s14166_s1 + $0x50] sm:$0xff] }
 0xabe   :  { %3729 = vmatpush.msra.mxu1 %v14934_v20  ;;  %3438 = vmatpush.msrb.mxu2 %v2987_v13  ;;  %v14954_v20 = vld [vmem:[#allocation4_spill] sm:$0xff]  ;;  %v14956_v13 = vld [vmem:[#allocation7_spill] sm:$0xff] }
 0xabf   :  { %3701 = vmatpush.msrb.mxu0 %v14937_v22  ;;  %6303 = vmatmul.msk.f32.vlgmr.msrb.gmra.mxu1 %vm2251_vm5, %v11890_v19  ;;  %v14958_v22 = vld [vmem:[#allocation22_spill] sm:$0xff] }
 0xac0   :  { %3730 = vmatpush.msra.mxu1 %v14940_v34  ;;  %3376 = vmatpush.msrb.mxu3 %v3232_v46  ;;  %v14957_v46 = vld [vmem:[#allocation13_spill] sm:$0xff]  ;;  %v14961_v34 = vld [vmem:[#allocation15_spill] sm:$0xff] }
 0xac1   :  { %3702 = vmatpush.msrb.mxu0 %v14942_v45  ;;  %3439 = vmatpush.msrb.mxu2 %v2980_v57  ;;  %v14960_v57 = vld [vmem:[#allocation40_spill] sm:$0xff] }
 0xac2   :  { %3731 = vmatpush.msra.mxu1 %v14944_v7  ;;  %3377 = vmatpush.msrb.mxu3 %v3225_v50  ;;  %v3529_v50 = vld [vmem:[%s14166_s1 + $0x58] sm:$0xff]  ;;  %v14965_v45 = vld [vmem:[#allocation48_spill] sm:$0xff] }
 0xac3   :  { %3440 = vmatpush.msrb.mxu2 %v2973_v40  ;;  %v14964_v40 = vld [vmem:[#allocation11_spill] sm:$0xff] }
 0xac4   :  { %3378 = vmatpush.msrb.mxu3 %v3218_v21  ;;  %6300 = vmatmul.msk.f32.gmra.mxu0 %vm2251_vm5, %v3527_v43 }
 0xac5   :  { %6287 = vmatmul.msk.f32.vlgmr.msrb.gmra.mxu3 %vm2251_vm5, %v11795_v25  ;;  %3441 = vmatpush.msrb.mxu2 %v2966_v33  ;;  %v14951_v25 = vld [vmem:[#allocation18_spill] sm:$0xff] }
 0xac6   :  { %3458 = vmatpush.msra.mxu3 %v2988_v0  ;;  %6290 = vmatmul.msk.f32.vlgmr.msrb.gmra.mxu2 %vm2251_vm5, %v11850_v47  ;;  %v2977_v55 = vmul.f32 %v14951_v25, %v14939_v51 }
 0xac7   :  { %3518 = vmatpush.msra.mxu2 %v2991_v11  ;;  %6304 = vmatmul.msk.f32.gmra.mxu1 %vm2251_vm5, %v3527_v43 }
 0xac8   :  { %3459 = vmatpush.msra.mxu3 %v2981_v29 }
 0xac9   :  { %3519 = vmatpush.msra.mxu2 %v2984_v27 }
 0xaca   :  { %3460 = vmatpush.msra.mxu3 %v2974_v5 }
 0xacb   :  { %3520 = vmatpush.msra.mxu2 %v2977_v55 }
 0xacc   :  { %3461 = vmatpush.msra.mxu3 %v2967_v18  ;;  %6301 = vmatmul.msk.f32.gmra.mxu0 %vm2251_vm5, %v3528_v30 }
 0xacd   :  { %3521 = vmatpush.msra.mxu2 %v2970_v35  ;;  %6291 = vmatmul.msk.f32.vlgmr.msra.gmra.mxu3 %vm2251_vm5, %v11850_v47 }
 0xace   :  { %3554 = vmatpush.msrb.mxu3 %v14954_v20  ;;  %6294 = vmatmul.msk.f32.vlgmr.msra.gmra.mxu2 %vm2251_vm5, %v11850_v47  ;;  %v14963_v47 = vld [vmem:[#allocation20_spill] sm:$0xff] }
 0xacf   :  { %3641 = vmatpush.msrb.mxu2 %v14955_v56  ;;  %6305 = vmatmul.msk.f32.gmra.mxu1 %vm2251_vm5, %v3528_v30 }
 0xad0   :  { %3555 = vmatpush.msrb.mxu3 %v14956_v13 }
 0xad1   :  { %3642 = vmatpush.msrb.mxu2 %v14957_v46 }
 0xad2   :  { %3556 = vmatpush.msrb.mxu3 %v14958_v22 }
 0xad3   :  { %3643 = vmatpush.msrb.mxu2 %v14959_v24 }
 0xad4   :  { %3557 = vmatpush.msrb.mxu3 %v14960_v57  ;;  %6302 = vmatmul.msk.f32.gmra.mxu0 %vm2251_vm5, %v3529_v50 }
 0xad5   :  { %3644 = vmatpush.msrb.mxu2 %v14962_v42  ;;  %6295 = vmatmul.msk.f32.vlgmr.msrb.gmra.mxu3 %vm2251_vm5, %v11890_v19 }
 0xad6   :  { %3670 = vmatpush.msra.mxu3 %v14961_v34  ;;  %6307 = vmatmul.msk.f32.vlgmr.msrb.gmra.mxu2 %vm2251_vm5, %v11890_v19 }
 0xad7   :  { %6306 = vmatmul.msk.f32.gmra.mxu1 %vm2251_vm5, %v3529_v50 }
 0xad8   :  { %3671 = vmatpush.msra.mxu3 %v14963_v47 }
 0xada   :  { %3672 = vmatpush.msra.mxu3 %v14964_v40 }
 0xadc   :  { %3673 = vmatpush.msra.mxu3 %v14965_v45  ;;  %6315 = vmatmul.msk.f32.vlgmr.msrb.gmra.mxu0 %vm2251_vm5, %v11890_v19 }
 0xadd   :  { %6296 = vmatmul.msk.f32.gmra.mxu3 %vm2251_vm5, %v3527_v43 }
 0xade   :  { %6308 = vmatmul.msk.f32.gmra.mxu2 %vm2251_vm5, %v3527_v43 }
 0xadf   :  { %6319 = vmatmul.msk.f32.vlgmr.msra.gmra.mxu1 %vm2251_vm5, %v11890_v19 }
 0xae4   :  { %6316 = vmatmul.msk.f32.gmra.mxu0 %vm2251_vm5, %v3527_v43 }
 0xae5   :  { %6297 = vmatmul.msk.f32.gmra.mxu3 %vm2251_vm5, %v3528_v30 }
 0xae6   :  { %6309 = vmatmul.msk.f32.gmra.mxu2 %vm2251_vm5, %v3528_v30 }
 0xae7   :  { %6320 = vmatmul.msk.f32.gmra.mxu1 %vm2251_vm5, %v3527_v43 }
 0xaec   :  { %6317 = vmatmul.msk.f32.gmra.mxu0 %vm2251_vm5, %v3528_v30 }
 0xaed   :  { %6298 = vmatmul.msk.f32.gmra.mxu3 %vm2251_vm5, %v3529_v50 }
 0xaee   :  { %6310 = vmatmul.msk.f32.gmra.mxu2 %vm2251_vm5, %v3529_v50 }
 0xaef   :  { %6321 = vmatmul.msk.f32.gmra.mxu1 %vm2251_vm5, %v3528_v30 }
 0xaf4   :  { %6318 = vmatmul.msk.f32.gmra.mxu0 %vm2251_vm5, %v3529_v50 }
 0xaf5   :  { %6311 = vmatmul.msk.f32.vlgmr.msra.gmra.mxu3 %vm2251_vm5, %v11890_v19 }
 0xaf7   :  { %6322 = vmatmul.msk.f32.gmra.mxu1 %vm2251_vm5, %v3529_v50 }
 0xafd   :  { %6312 = vmatmul.msk.f32.gmra.mxu3 %vm2251_vm5, %v3527_v43 }
 0xb00   :  { %v12007_v39 = vpop.f32.mrf.mxu3 }
 0xb05   :  { %6313 = vmatmul.msk.f32.gmra.mxu3 %vm2251_vm5, %v3528_v30 }
 0xb0d   :  { %6314 = vmatmul.msk.f32.gmra.mxu3 %vm2251_vm5, %v3529_v50 }
 0xb18   :  { %v11993_v21 = vpop.f32.mrf.mxu1 }
 0xb1f   :  { %v11995_v7 = vpop.f32.mrf.mxu0 }
 0xb20   :  { %14966 = vst [vmem:[#allocation34_spill] sm:$0xff] %v11995_v7 }
 0xb22   :  { %v11997_v44 = vpop.f32.mrf.mxu1 }
 0xb23   :  { %14967 = vst [vmem:[#allocation17_spill] sm:$0xff] %v11997_v44 }
 0xb27   :  { %v11999_v33 = vpop.f32.mrf.mxu0  ;;  %v12011_v41 = vpop.f32.mrf.mxu3 }
 0xb28   :  { %14970 = vst [vmem:[#allocation39_spill] sm:$0xff] %v12011_v41 }
 0xb2a   :  { %v12001_v3 = vpop.f32.mrf.mxu1 }
 0xb2f   :  { %v12003_v19 = vpop.f32.mrf.mxu0 }
 0xb30   :  { %14968 = vst [vmem:[#allocation28_spill] sm:$0xff] %v12003_v19 }
 0xb32   :  { %v12005_v0 = vpop.f32.mrf.mxu1 }
 0xb33   :  { %14969 = vst [vmem:[#allocation24_spill] sm:$0xff] %v12005_v0 }
 0xb39   :  { %v3588_v43 = vpop.f32.mrf.mxu0 }
 0xb3c   :  { %v12009_v11 = vpop.f32.mrf.mxu1 }
 0xb3e   :  { %v12017_v8 = vpop.f32.mrf.mxu2 }
 0xb3f   :  { %14971 = vst [vmem:[#allocation43_spill] sm:$0xff] %v12017_v8 }
 0xb41   :  { %v3591_v29 = vpop.f32.mrf.mxu0 }
 0xb44   :  { %v12013_v1 = vpop.f32.mrf.mxu1 }
 0xb48   :  { %v12015_v27 = vpop.f32.mrf.mxu3 }
 0xb49   :  { %v3594_v5 = vpop.f32.mrf.mxu0  ;;  %v12021_v59 = vpop.f32.mrf.mxu2 }
 0xb4a   :  { %14973 = vst [vmem:[#allocation26_spill] sm:$0xff] %v12021_v59 }
 0xb4c   :  { %v3623_v25 = vpop.f32.mrf.mxu1 }
 0xb50   :  { %v12019_v55 = vpop.f32.mrf.mxu3 }
 0xb51   :  { %14972 = vst [vmem:[#allocation47_spill] sm:$0xff] %v12019_v55  ;;  %v3597_v18 = vpop.f32.mrf.mxu0  ;;  %v12023_v20 = vpop.f32.mrf.mxu2 }
 0xb54   :  { %v3626_v17 = vpop.f32.mrf.mxu1 }
 0xb58   :  { %v3559_v35 = vpop.f32.mrf.mxu3 }
 0xb59   :  { %v3704_v30 = vpop.f32.mrf.mxu0  ;;  %v12025_v24 = vpop.f32.mrf.mxu2  ;;  %v3746_v55 = vmul.f32 %v3559_v35, %v11376_v6  ;;  %v14983_v35 = vld [vmem:[#allocation17_spill] sm:$0xff] }
 0xb5c   :  { %v3733_v56 = vpop.f32.mrf.mxu1 }
 0xb60   :  { %v3562_v13 = vpop.f32.mrf.mxu3 }
 0xb61   :  { %v3707_v46 = vpop.f32.mrf.mxu0  ;;  %v3649_v42 = vpop.f32.mrf.mxu2  ;;  %v3753_v44 = vmul.f32 %v3562_v13, %v11443_v36  ;;  %v14985_v13 = vld [vmem:[#allocation43_spill] sm:$0xff] }
 0xb62   :  { %v3758_v7 = vmul.f32 %v3707_v46, %v11643_v60  ;;  %v3761_v60 = vmul.f32 %v3594_v5, %v11516_v9  ;;  %v3762_v9 = vmul.f32 %v3623_v25, %v11523_v16  ;;  %v3756_v16 = vmul.f32 %v3649_v42, %v11455_v2  ;;  %v14979_v5 = vld [vmem:[#allocation26_spill] sm:$0xff]  ;;  %v14986_v46 = vld [vmem:[#allocation24_spill] sm:$0xff] }
 0xb63   :  { %v3524_v2 = vadd.f32 %v12023_v20, %v12015_v27 }
 0xb64   :  { %v3736_v22 = vpop.f32.mrf.mxu1 }
 0xb65   :  { %v3759_v6 = vmul.f32 %v3736_v22, %v14939_v51  ;;  %v3769_v51 = vmul.f32 %v3626_v17, %v11570_v49  ;;  %v3504_v22 = vadd.f32 %v14986_v46, %v14985_v13 }
 0xb68   :  { %v3565_v57 = vpop.f32.mrf.mxu3 }
 0xb69   :  { %v3710_v50 = vpop.f32.mrf.mxu0  ;;  %v3760_v0 = vmul.f32 %v3565_v57, %v11486_v58  ;;  %v3745_v58 = vld [vmem:[%s14164_s4 + $0xb40] sm:$0xff] }
 0xb6a   :  { %v3765_v59 = vmul.f32 %v3710_v50, %v11663_v26  ;;  %v3768_v26 = vmul.f32 %v3597_v18, %v11557_v32  ;;  %v3754_v32 = vmul.f32 %v3591_v29, %v11470_v15 }
 0xb6c   :  { %v3739_v34 = vpop.f32.mrf.mxu1 }
 0xb70   :  { %v3568_v47 = vpop.f32.mrf.mxu3 }
 0xb71   :  { %v3767_v40 = vmul.f32 %v3568_v47, %v11533_v4  ;;  %v3713_v45 = vpop.f32.mrf.mxu0  ;;  %v3766_v4 = vmul.f32 %v3739_v34, %v14936_v53  ;;  %v3752_v53 = vmul.f32 %v3733_v56, %v14943_v61  ;;  %v3755_v61 = vmul.f32 %v12013_v1, %v11478_v38 }
 0xb72   :  { %v3772_v8 = vmul.f32 %v3713_v45, %v11691_v52  ;;  %v3751_v52 = vmul.f32 %v3704_v30, %v11614_v12  ;;  %v3747_v12 = vmul.f32 %v3588_v43, %v11433_v54  ;;  %v3748_v54 = vmul.f32 %v12009_v11, %v11449_v62  ;;  %v14984_v30 = vld [vmem:[#allocation28_spill] sm:$0xff] }
 0xb73   :  { %3789 = vmatpush.msra.mxu2 %v3767_v40  ;;  %v3749_v38 = vmul.f32 %v12025_v24, %v11399_v10  ;;  %v3484_v20 = vadd.f32 %v14984_v30, %v14983_v35 }
 0xb74   :  { %v3742_v19 = vpop.f32.mrf.mxu1  ;;  %3889 = vmatpush.msra.mxu0 %v3772_v8  ;;  %v14978_v8 = vld [vmem:[#allocation39_spill] sm:$0xff] }
 0xb75   :  { %v3773_v41 = vmul.f32 %v3742_v19, %v14932_v14  ;;  %3790 = vmatpush.msra.mxu2 %v3760_v0  ;;  %v3652_v14 = vpop.f32.mrf.mxu2  ;;  %v3444_v25 = vadd.f32 %v14979_v5, %v14978_v8 }
 0xb76   :  { %3890 = vmatpush.msra.mxu0 %v3765_v59  ;;  %v3763_v19 = vmul.f32 %v3652_v14, %v11494_v28 }
 0xb77   :  { %3791 = vmatpush.msra.mxu2 %v3753_v44  ;;  %3909 = vmatpush.msrb.mxu1 %v3773_v41 }
 0xb78   :  { %v3675_v36 = vpop.f32.mrf.mxu3  ;;  %3891 = vmatpush.msra.mxu0 %v3758_v7 }
 0xb79   :  { %3792 = vmatpush.msra.mxu2 %v3746_v55  ;;  %3910 = vmatpush.msrb.mxu1 %v3766_v4  ;;  %v3750_v43 = vmul.f32 %v3675_v36, %v11602_v23  ;;  %v3404_v23 = vadd.f32 %v11999_v33, %v12007_v39  ;;  %v14976_v39 = vld [vmem:[#allocation47_spill] sm:$0xff] }
 0xb7a   :  { %6323 = vmatmul.msk.f32.vlgmr.msra.gmra.mxu2 %vm2251_vm5, %v3745_v58  ;;  %3892 = vmatpush.msra.mxu0 %v3751_v52 }
 0xb7b   :  { %3809 = vmatpush.msrb.mxu2 %v3768_v26  ;;  %3911 = vmatpush.msrb.mxu1 %v3759_v6 }
 0xb7c   :  { %6328 = vmatmul.msk.f32.vlgmr.msra.gmra.mxu0 %vm2251_vm5, %v3745_v58 }
 0xb7d   :  { %3810 = vmatpush.msrb.mxu2 %v3761_v60  ;;  %3912 = vmatpush.msrb.mxu1 %v3752_v53  ;;  %v3655_v15 = vpop.f32.mrf.mxu2 }
 0xb7e   :  { %6329 = vmatmul.msk.f32.vlgmr.msrb.gmra.mxu1 %vm2251_vm5, %v3745_v58  ;;  %v3770_v44 = vmul.f32 %v3655_v15, %v11540_v63 }
 0xb7f   :  { %3811 = vmatpush.msrb.mxu2 %v3754_v32 }
 0xb80   :  { %v3678_v7 = vpop.f32.mrf.mxu3 }
 0xb81   :  { %3812 = vmatpush.msrb.mxu2 %v3747_v12  ;;  %v3757_v28 = vmul.f32 %v3678_v7, %v11627_v48  ;;  %v3424_v48 = vadd.f32 %v12001_v3, %v11993_v21  ;;  %v14975_v3 = vld [vmem:[#allocation34_spill] sm:$0xff] }
 0xb82   :  { %6324 = vmatmul.msk.f32.vlgmr.msrb.gmra.mxu2 %vm2251_vm5, %v3745_v58  ;;  %v3464_v27 = vadd.f32 %v14976_v39, %v14975_v3 }
 0xb83   :  { %3829 = vmatpush.msra.mxu2 %v3769_v51 }
 0xb85   :  { %3830 = vmatpush.msra.mxu2 %v3762_v9 }
 0xb87   :  { %3831 = vmatpush.msra.mxu2 %v3755_v61 }
 0xb88   :  { %v3681_v49 = vpop.f32.mrf.mxu3 }
 0xb89   :  { %3832 = vmatpush.msra.mxu2 %v3748_v54  ;;  %v3764_v63 = vmul.f32 %v3681_v49, %v11660_v31 }
 0xb8a   :  { %6325 = vmatmul.msk.f32.vlgmr.msra.gmra.mxu2 %vm2251_vm5, %v3745_v58 }
 0xb8b   :  { %3849 = vmatpush.msrb.mxu2 %v3770_v44 }
 0xb8d   :  { %3850 = vmatpush.msrb.mxu2 %v3763_v19 }
 0xb8f   :  { %3851 = vmatpush.msrb.mxu2 %v3756_v16 }
 0xb90   :  { %v3684_v0 = vpop.f32.mrf.mxu3 }
 0xb91   :  { %3852 = vmatpush.msrb.mxu2 %v3749_v38  ;;  %v3771_v62 = vmul.f32 %v3684_v0, %v11677_v37 }
 0xb92   :  { %6326 = vmatmul.msk.f32.vlgmr.msrb.gmra.mxu2 %vm2251_vm5, %v3745_v58 }
 0xb93   :  { %3869 = vmatpush.msrb.mxu3 %v3771_v62 }
 0xb95   :  { %3870 = vmatpush.msrb.mxu3 %v3764_v63 }
 0xb97   :  { %3871 = vmatpush.msrb.mxu3 %v3757_v28 }
 0xb99   :  { %3872 = vmatpush.msrb.mxu3 %v3750_v43 }
 0xb9a   :  { %6327 = vmatmul.msk.f32.vlgmr.msrb.gmra.mxu3 %vm2251_vm5, %v3745_v58  ;;  %vm4265_vm5 = vcmask 359424  }
 0xbf9   :  { %v3894_v56 = vpop.f32.mrf.mxu0 }
 0xbfa   :  { %v12129_v57 = vadd.f32 %v3894_v56, %v3504_v22 }
 0xbfb   :  { %v3914_v10 = vpop.f32.mrf.mxu1 }
 0xbfc   :  { %v3923_v11 = vadd.f32 %v3914_v10, %v3524_v2  ;;  %14988 = vst [vmem:[#allocation27_spill] sm:$0xff] %v12129_v57 }
 0xbfd   :  { %v3794_v37 = vpop.f32.mrf.mxu2 }
 0xbfe   :  { %4304 = vrot.lane.b32.xlu1 %v3923_v11, %s8010_s30  ;;  %4307 = vrot.lane.b32.xlu0 %v3923_v11, %s8018_s21  ;;  %v12076_v41 = vadd.f32 %v3794_v37, %v3404_v23 }
 0xc05   :  { %v3814_v31 = vpop.f32.mrf.mxu2 }
 0xc06   :  { %v12078_v29 = vadd.f32 %v3814_v31, %v3424_v48  ;;  %4301 = vrot.lane.b32.xlu1 %v3923_v11, %s8009_s29 }
 0xc08   :  { %v7310_v1 = vpack.i.bf16 %v12078_v29, %v12076_v41 }
 0xc0a   :  { %7311 = vrot.lane.b32.xlu2 %v7310_v1, %s8008_s28  ;;  %7306 = vrot.lane.b32.xlu0 %v7310_v1, %s8009_s29 }
 0xc0d   :  { %v3834_v21 = vpop.f32.mrf.mxu2 }
 0xc0e   :  { %4298 = vrot.lane.b32.xlu1 %v3923_v11, %s8008_s28  ;;  %v12100_v59 = vadd.f32 %v3834_v21, %v3444_v25 }
 0xc12   :  { %7326 = vrot.lane.b32.xlu2 %v7310_v1, %s8014_s13  ;;  %7321 = vrot.lane.b32.xlu0 %v7310_v1, %s8023_s15 }
 0xc15   :  { %v3854_v33 = vpop.f32.mrf.mxu2 }
 0xc16   :  { %4290 = vrot.lane.b32.xlu1 %v3923_v11, %s14974_s27  ;;  %v12098_v55 = vadd.f32 %v3854_v33, %v3464_v27 }
 0xc18   :  { %v7395_v18 = vpack.i.bf16 %v12098_v55, %v12100_v59 }
 0xc1a   :  { %7341 = vrot.lane.b32.xlu2 %v7310_v1, %s8039_s25  ;;  %7336 = vrot.lane.b32.xlu0 %v7310_v1, %s8040_s6 }
 0xc1d   :  { %v3874_v17 = vpop.f32.mrf.mxu3 }
 0xc1e   :  { %7296 = vrot.lane.b32.xlu1 %v7310_v1, %s8018_s21  ;;  %v12127_v24 = vadd.f32 %v3874_v17, %v3484_v20 }
 0xc20   :  { %14987 = vst [vmem:[#allocation25_spill] sm:$0xff] %v12127_v24  ;;  %v12135_v50 = vpack.i.bf16 %v12129_v57, %v12127_v24 }
 0xc22   :  { %7346 = vrot.lane.b32.xlu2 %v7310_v1, %s8041_s14  ;;  %7366 = vrot.lane.b32.xlu0 %v7310_v1, %s14977_s2 }
 0xc26   :  { %7301 = vrot.lane.b32.xlu1 %v7310_v1, %s8010_s30 }
 0xc2a   :  { %7351 = vrot.lane.b32.xlu2 %v7310_v1, %s14980_s16  ;;  %7396 = vrot.lane.b32.xlu0 %v7395_v18, %s8008_s28 }
 0xc2e   :  { %7316 = vrot.lane.b32.xlu1 %v7310_v1, %s14974_s27 }
 0xc32   :  { %7356 = vrot.lane.b32.xlu2 %v7310_v1, %s14981_s26  ;;  %7411 = vrot.lane.b32.xlu0 %v7395_v18, %s8014_s13 }
 0xc36   :  { %7331 = vrot.lane.b32.xlu1 %v7310_v1, %s8016_s17 }
 0xc3a   :  { %7361 = vrot.lane.b32.xlu2 %v7310_v1, %s14982_s18  ;;  %7421 = vrot.lane.b32.xlu0 %v7395_v18, %s8040_s6 }
 0xc3e   :  { %7376 = vrot.lane.b32.xlu1 %v7310_v1, %s8042_s19 }
 0xc42   :  { %7371 = vrot.lane.b32.xlu2 %v7310_v1, %s8022_s12  ;;  %7426 = vrot.lane.b32.xlu0 %v7395_v18, %s8039_s25 }
 0xc46   :  { %7391 = vrot.lane.b32.xlu1 %v7395_v18, %s8009_s29 }
 0xc4a   :  { %7431 = vrot.lane.b32.xlu0 %v7395_v18, %s8041_s14  ;;  %7381 = vrot.lane.b32.xlu2 %v7395_v18, %s8018_s21 }
 0xc4e   :  { %7406 = vrot.lane.b32.xlu1 %v7395_v18, %s8023_s15 }
 0xc52   :  { %7436 = vrot.lane.b32.xlu0 %v7395_v18, %s14980_s16  ;;  %7386 = vrot.lane.b32.xlu2 %v7395_v18, %s8010_s30 }
 0xc56   :  { %7441 = vrot.lane.b32.xlu1 %v7395_v18, %s14981_s26 }
 0xc5a   :  { %7446 = vrot.lane.b32.xlu0 %v7395_v18, %s14982_s18  ;;  %7401 = vrot.lane.b32.xlu2 %v7395_v18, %s14974_s27 }
 0xc5e   :  { %7466 = vrot.lane.b32.xlu1 %v12135_v50, %s8010_s30 }
 0xc62   :  { %7451 = vrot.lane.b32.xlu0 %v7395_v18, %s14977_s2  ;;  %7416 = vrot.lane.b32.xlu2 %v7395_v18, %s8016_s17 }
 0xc64   :  { %v12141_v34 = vpop.permute.xlu2 %7311 }
 0xc65   :  { %v7313_v17 = vunpack.i.l.bf16 %v12141_v34 }
 0xc66   :  { %7481 = vrot.lane.b32.xlu1 %v12135_v50, %s14974_s27 }
 0xc6a   :  { %7456 = vrot.lane.b32.xlu2 %v7395_v18, %s8022_s12  ;;  %7461 = vrot.lane.b32.xlu0 %v12135_v50, %s8018_s21  ;;  %v7314_v18 = vunpack.i.h.bf16 %v12141_v34 }
 0xc6c   :  { %v12148_v42 = vpop.permute.xlu2 %7326  ;;  %v4034_v34 = vsel %vm162_vm10, %v7313_v17, %v7314_v18 }
 0xc6e   :  { %7491 = vrot.lane.b32.xlu1 %v12135_v50, %s8014_s13 }
 0xc70   :  { %v12152_v47 = vpop.permute.xlu1 %4304  ;;  %v12158_v40 = vpop.permute.xlu0 %4307 }
 0xc72   :  { %7471 = vrot.lane.b32.xlu2 %v12135_v50, %s8009_s29  ;;  %7476 = vrot.lane.b32.xlu0 %v12135_v50, %s8008_s28 }
 0xc74   :  { %v12160_v45 = vpop.permute.xlu2 %7341 }
 0xc75   :  { %v7344_v32 = vunpack.i.h.bf16 %v12160_v45  ;;  %v7343_v12 = vunpack.i.l.bf16 %v12160_v45  ;;  %v12340_v45 = vld [vmem:[%s14163_s3 + $0x60] sm:$0xff] }
 0xc76   :  { %7496 = vrot.lane.b32.xlu1 %v12135_v50, %s8016_s17 }
 0xc77   :  { %v4242_v19 = vsel %vm4241_vm15, %v7343_v12, %v7344_v32 }
 0xc78   :  { %v12164_v58 = vpop.permute.xlu1 %4301 }
 0xc7a   :  { %7486 = vrot.lane.b32.xlu2 %v12135_v50, %s8023_s15  ;;  %7506 = vrot.lane.b32.xlu0 %v12135_v50, %s8039_s25 }
 0xc7c   :  { %v12170_v4 = vpop.permute.xlu2 %7346  ;;  %v12172_v36 = vpop.permute.xlu0 %7306 }
 0xc7d   :  { %v7349_v9 = vunpack.i.h.bf16 %v12170_v4  ;;  %v7348_v61 = vunpack.i.l.bf16 %v12170_v4  ;;  %v7309_v8 = vunpack.i.h.bf16 %v12172_v36  ;;  %v7308_v5 = vunpack.i.l.bf16 %v12172_v36 }
 0xc7e   :  { %7501 = vrot.lane.b32.xlu1 %v12135_v50, %s8040_s6 }
 0xc7f   :  { %v4218_v0 = vsel %vm1797_vm14, %v7348_v61, %v7349_v9  ;;  %v12254_v13 = vsel %vm14990_vm2, %v7308_v5, %v7309_v8  ;;  %v14426_v61 = vunpack.i.h.bf16 %v12148_v42 }
 0xc80   :  { %v12176_v26 = vpop.permute.xlu1 %4298 }
 0xc82   :  { %4007 = vrot.lane.b32.xlu2 %v12127_v24, %s8022_s12  ;;  %7511 = vrot.lane.b32.xlu0 %v12135_v50, %s8041_s14 }
 0xc84   :  { %v12182_v52 = vpop.permute.xlu2 %7351  ;;  %v12184_v6 = vpop.permute.xlu0 %7321 }
 0xc85   :  { %v7354_v44 = vunpack.i.h.bf16 %v12182_v52  ;;  %v7353_v49 = vunpack.i.l.bf16 %v12182_v52  ;;  %v14428_v46 = vunpack.i.h.bf16 %v12184_v6  ;;  %v7323_v22 = vunpack.i.l.bf16 %v12184_v6 }
 0xc87   :  { %v4195_v2 = vsel %vm715_vm0, %v7353_v49, %v7354_v44 }
 0xc88   :  { %v12186_v14 = vpop.permute.xlu1 %4290 }
 0xc8a   :  { %7516 = vrot.lane.b32.xlu0 %v12135_v50, %s14980_s16  ;;  %s8043_s16 = smov 92  }
 0xc8c   :  { %v12190_v60 = vpop.permute.xlu2 %7356  ;;  %v12192_v53 = vpop.permute.xlu0 %7336 }
 0xc8d   :  { %v7339_v51 = vunpack.i.h.bf16 %v12192_v53  ;;  %v7338_v7 = vunpack.i.l.bf16 %v12192_v53  ;;  %v7359_v16 = vunpack.i.h.bf16 %v12190_v60  ;;  %v7358_v38 = vunpack.i.l.bf16 %v12190_v60 }
 0xc8f   :  { %v4266_v15 = vsel %vm4265_vm5, %v7338_v7, %v7339_v51  ;;  %v4172_v37 = vsel %vm340_vm1, %v7358_v38, %v7359_v16 }
 0xc90   :  { %4540 = vmatpush.msra.mxu2 %v4266_v15  ;;  %v7297_v54 = vpop.permute.xlu1 %7296  ;;  %v7328_v15 = vunpack.i.l.bf16 %v12148_v42 }
 0xc91   :  { %v7299_v23 = vunpack.i.h.bf16 %v7297_v54  ;;  %v7298_v31 = vunpack.i.l.bf16 %v7297_v54 }
 0xc92   :  { %4541 = vmatpush.msra.mxu2 %v4242_v19  ;;  %7521 = vrot.lane.b32.xlu0 %v12135_v50, %s14981_s26  ;;  %v3988_v19 = vsel %vm82_vm11, %v7323_v22, %v14428_v46  ;;  %s8045_s26 = smov 112  }
 0xc93   :  { %v4103_v25 = vsel %vm14989_vm7, %v7298_v31, %v7299_v23 }
 0xc94   :  { %v12215_v62 = vpop.permute.xlu2 %7361  ;;  %v12217_v63 = vpop.permute.xlu0 %7366  ;;  %4542 = vmatpush.msra.mxu2 %v4218_v0 }
 0xc95   :  { %v7364_v28 = vunpack.i.h.bf16 %v12215_v62  ;;  %v7363_v43 = vunpack.i.l.bf16 %v12215_v62  ;;  %v7369_v10 = vunpack.i.h.bf16 %v12217_v63  ;;  %v7368_v11 = vunpack.i.l.bf16 %v12217_v63 }
 0xc96   :  { %4543 = vmatpush.msra.mxu2 %v4195_v2 }
 0xc97   :  { %v4149_v1 = vsel %vm317_vm3, %v7363_v43, %v7364_v28  ;;  %v4126_v3 = vsel %vm248_vm4, %v7368_v11, %v7369_v10  ;;  %v12286_v11 = vsel %vm14993_vm13, %v7328_v15, %v14426_v61 }
 0xc98   :  { %4544 = vmatpush.msra.mxu2 %v4172_v37  ;;  %v7302_v48 = vpop.permute.xlu1 %7301 }
 0xc99   :  { %v7304_v21 = vunpack.i.h.bf16 %v7302_v48  ;;  %v7303_v33 = vunpack.i.l.bf16 %v7302_v48 }
 0xc9a   :  { %4545 = vmatpush.msra.mxu2 %v4149_v1  ;;  %7526 = vrot.lane.b32.xlu0 %v12135_v50, %s14982_s18  ;;  %s15116_s18 = smov 118  }
 0xc9b   :  { %v4080_v35 = vsel %vm202_vm6, %v7303_v33, %v7304_v21 }
 0xc9c   :  { %v12237_v39 = vpop.permute.xlu2 %7371  ;;  %4546 = vmatpush.msra.mxu2 %v4126_v3  ;;  %v12239_v27 = vpop.permute.xlu0 %7396 }
 0xc9d   :  { %v14431_v20 = vunpack.i.h.bf16 %v12237_v39  ;;  %v7373_v56 = vunpack.i.l.bf16 %v12237_v39 }
 0xc9e   :  { %4547 = vmatpush.msra.mxu2 %v4103_v25 }
 0xca0   :  { %v12247_v30 = vpop.permute.xlu1 %7316  ;;  %4548 = vmatpush.msra.mxu2 %v4080_v35 }
 0xca2   :  { %4549 = vmatpush.msra.mxu2 %v12254_v13  ;;  %7531 = vrot.lane.b32.xlu0 %v12135_v50, %s14977_s2  ;;  %v4011_v50 = vsel %vm14991_vm8, %v7373_v56, %v14431_v20  ;;  %vm14995_vm8 = vcmask 826368  }
 0xca4   :  { %4550 = vmatpush.msra.mxu2 %v4034_v34  ;;  %v12262_v12 = vpop.permute.xlu0 %7411  ;;  %v12264_v7 = vpop.permute.xlu2 %7381 }
 0xca5   :  { %v7383_v54 = vunpack.i.l.bf16 %v12264_v7  ;;  %v14423_v17 = vunpack.i.h.bf16 %v12264_v7  ;;  %v14436_v62 = vunpack.i.h.bf16 %v12262_v12 }
 0xca6   :  { %4551 = vmatpush.msra.mxu2 %v4011_v50 }
 0xca7   :  { %v12273_v49 = vsel %vm14992_vm12, %v7299_v23, %v7383_v54  ;;  %vm14996_vm12 = vmmov %vm14994_vm9 }
 0xca8   :  { %v12278_v38 = vpop.permute.xlu1 %7331  ;;  %4552 = vmatpush.msra.mxu2 %v3988_v19  ;;  %v7540_v0 = vpack.i.bf16 %v12273_v49, %v4103_v25 }
 0xca9   :  { %v14425_v43 = vunpack.i.h.bf16 %v12278_v38  ;;  %v7333_v2 = vunpack.i.l.bf16 %v12278_v38 }
 0xcaa   :  { %4553 = vmatpush.msra.mxu2 %v12286_v11  ;;  %7541 = vrot.lane.b32.xlu2 %v7540_v0, %s8042_s19 }
 0xcab   :  { %v12293_v37 = vsel %vm14994_vm9, %v7333_v2, %v14425_v43  ;;  %vm14999_vm9 = vmmov %vm14990_vm2 }
 0xcac   :  { %4554 = vmatpush.msra.mxu2 %v12293_v37  ;;  %v12296_v48 = vpop.permute.xlu0 %7421  ;;  %v12298_v23 = vpop.permute.xlu2 %7386 }
 0xcad   :  { %v7423_v31 = vunpack.i.l.bf16 %v12296_v48  ;;  %v7388_v1 = vunpack.i.l.bf16 %v12298_v23  ;;  %v7389_v22 = vunpack.i.h.bf16 %v12298_v23 }
 0xcae   :  { %4555 = vmatpush.msra.mxu2 %v12076_v41  ;;  %v12319_v41 = vsel %vm14989_vm7, %v7383_v54, %v14423_v17  ;;  %v14424_v54 = vunpack.i.l.bf16 %v12239_v27  ;;  %vm15000_vm7 = vmmov %vm14990_vm2 }
 0xcaf   :  { %v12304_v33 = vsel %vm202_vm6, %v7304_v21, %v7388_v1  ;;  %v4267_v3 = vsel %vm4265_vm5, %v7339_v51, %v7423_v31  ;;  %4556 = vmatmul.f32.vlgmr.msra.gmra.mxu2 %v12340_v45 }
 0xcb0   :  { %v12309_v5 = vpop.permute.xlu1 %7376  ;;  %4586 = vmatpush.msrb.mxu0 %v4267_v3  ;;  %v7545_v25 = vpack.i.bf16 %v12304_v33, %v4080_v35  ;;  %v7565_v35 = vpack.i.bf16 %v4034_v34, %v12319_v41  ;;  %v12352_v0 = vsel %vm162_vm10, %v7314_v18, %v14424_v54 }
 0xcb2   :  { %7546 = vrot.lane.b32.xlu2 %v7545_v25, %s8042_s19 }
 0xcb4   :  { %v12314_v56 = vpop.permute.xlu0 %7426  ;;  %v12331_v15 = vpop.permute.xlu2 %7401 }
 0xcb5   :  { %v7428_v53 = vunpack.i.l.bf16 %v12314_v56  ;;  %v14429_v54 = vunpack.i.h.bf16 %v12331_v15  ;;  %v7403_v43 = vunpack.i.l.bf16 %v12331_v15 }
 0xcb7   :  { %v4243_v51 = vsel %vm4241_vm15, %v7344_v32, %v7428_v53  ;;  %v12345_v32 = vsel %vm202_vm6, %v7388_v1, %v7389_v22 }
 0xcb8   :  { %v12327_v21 = vpop.permute.xlu1 %7391  ;;  %4587 = vmatpush.msrb.mxu0 %v4243_v51  ;;  %v7570_v1 = vpack.i.bf16 %v12345_v32, %v12352_v0 }
 0xcb9   :  { %v7394_v25 = vunpack.i.h.bf16 %v12327_v21  ;;  %v7393_v51 = vunpack.i.l.bf16 %v12327_v21 }
 0xcba   :  { %7566 = vrot.lane.b32.xlu2 %v7565_v35, %s8042_s19 }
 0xcbb   :  { %v12373_v4 = vsel %vm14990_vm2, %v7393_v51, %v7394_v25  ;;  %v4058_v63 = vsel %vm14999_vm9, %v7309_v8, %v7393_v51  ;;  %v7319_v8 = vunpack.i.h.bf16 %v12247_v30  ;;  %vm15001_vm2 = vmmov %vm14995_vm8  ;;  %vm15009_vm9 = vcmask 1031168  }
 0xcbc   :  { %v12335_v50 = vpop.permute.xlu0 %7431  ;;  %v12366_v18 = vpop.permute.xlu2 %7416 }
 0xcbd   :  { %v7433_v34 = vunpack.i.l.bf16 %v12335_v50 }
 0xcbf   :  { %v4219_v2 = vsel %vm1797_vm14, %v7349_v9, %v7433_v34 }
 0xcc0   :  { %v12359_v3 = vpop.permute.xlu1 %7406  ;;  %4588 = vmatpush.msrb.mxu0 %v4219_v2 }
 0xcc2   :  { %7571 = vrot.lane.b32.xlu2 %v7570_v1, %s8042_s19  ;;  %v7575_v1 = vpack.i.bf16 %v3988_v19, %v12373_v4  ;;  %v4294_v19 = vsel %vm14995_vm8, %v7403_v43, %v14429_v54  ;;  %v14434_v54 = vunpack.i.h.bf16 %v12366_v18  ;;  %vm15004_vm8 = vcmask 1014784  }
 0xcc4   :  { %v12368_v35 = vpop.permute.xlu0 %7436  ;;  %v12400_v46 = vpop.permute.xlu2 %7456 }
 0xcc5   :  { %v14427_v9 = vunpack.i.l.bf16 %v12368_v35 }
 0xcc7   :  { %v4196_v2 = vsel %vm715_vm0, %v7354_v44, %v14427_v9  ;;  %v14432_v44 = vunpack.i.h.bf16 %v12296_v48 }
 0xcc8   :  { %v12381_v17 = vpop.permute.xlu1 %7441  ;;  %4589 = vmatpush.msrb.mxu0 %v4196_v2 }
 0xcc9   :  { %v14430_v61 = vunpack.i.l.bf16 %v12381_v17 }
 0xcca   :  { %7576 = vrot.lane.b32.xlu2 %v7575_v1, %s8042_s19  ;;  %v7585_v1 = vpack.i.bf16 %v12293_v37, %v4294_v19 }
 0xccb   :  { %v4173_v52 = vsel %vm340_vm1, %v7359_v16, %v14430_v61  ;;  %v14435_v61 = vunpack.i.l.bf16 %v12366_v18 }
 0xccc   :  { %v12394_v9 = vpop.permute.xlu0 %7446  ;;  %4590 = vmatpush.msrb.mxu0 %v4173_v52  ;;  %v12413_v52 = vsel %vm4265_vm5, %v7423_v31, %v14432_v44  ;;  %v14438_v31 = vunpack.i.h.bf16 %v12314_v56 }
 0xccd   :  { %v14433_v2 = vunpack.i.l.bf16 %v12394_v9 }
 0xccf   :  { %v4150_v60 = vsel %vm317_vm3, %v7364_v28, %v14433_v2  ;;  %v7413_v28 = vunpack.i.l.bf16 %v12262_v12  ;;  %v12449_v2 = vpop.permute.xlu2 %7471 }
 0xcd0   :  { %4591 = vmatpush.msrb.mxu0 %v4150_v60  ;;  %v12407_v16 = vpop.permute.xlu1 %7466 }
 0xcd1   :  { %v12418_v20 = vunpack.i.h.bf16 %v12407_v16 }
 0xcd2   :  { %7586 = vrot.lane.b32.xlu2 %v7585_v1, %s8042_s19  ;;  %v12435_v1 = vsel %vm14996_vm12, %v14435_v61, %v14434_v54  ;;  %vm15005_vm12 = vmmov %vm15001_vm2 }
 0xcd3   :  { %v4306_v37 = vsel %vm202_vm6, %v12418_v20, %v12152_v47  ;;  %14997 = vst [vmem:[#allocation42_spill] sm:$0xff] %v12435_v1  ;;  %v12442_v47 = vsel %vm14993_vm13, %v7413_v28, %v14436_v62  ;;  %v14439_v62 = vunpack.i.l.bf16 %v12407_v16  ;;  %vm15007_vm13 = vcmask 793600  }
 0xcd4   :  { %v7535_v19 = vpack.i.bf16 %v12098_v55, %v4306_v37  ;;  %v12428_v60 = vpop.permute.xlu0 %7451  ;;  %14998 = vst [vmem:[#allocation57_spill] sm:$0xff] %v12442_v47  ;;  %v7595_v61 = vpack.i.bf16 %v12435_v1, %v12442_v47  ;;  %v15030_v1 = vunpack.i.l.bf16 %v12394_v9 }
 0xcd5   :  { %v14437_v44 = vunpack.i.l.bf16 %v12428_v60  ;;  %v12480_v36 = vsel %vm202_vm6, %v7389_v22, %v14439_v62  ;;  %v4293_v22 = vsel %vm15001_vm2, %v7319_v8, %v7403_v43  ;;  %v15006_v62 = vunpack.i.h.bf16 %v12184_v6 }
 0xcd6   :  { %7536 = vrot.lane.b32.xlu1 %v7535_v19, %s8042_s19  ;;  %v12460_v19 = vsel %vm4241_vm15, %v7428_v53, %v14438_v31  ;;  %v7550_v53 = vpack.i.bf16 %v4058_v63, %v12254_v13  ;;  %v7458_v31 = vunpack.i.l.bf16 %v12400_v46  ;;  %v14456_v47 = vunpack.i.h.bf16 %v12428_v60 }
 0xcd7   :  { %v4127_v37 = vsel %vm248_vm4, %v7369_v10, %v14437_v44  ;;  %v14442_v10 = vunpack.i.l.bf16 %v12449_v2 }
 0xcd8   :  { %4592 = vmatpush.msrb.mxu0 %v4127_v37  ;;  %v12451_v54 = vpop.permute.xlu1 %7481  ;;  %v14440_v37 = vunpack.i.h.bf16 %v12335_v50 }
 0xcd9   :  { %v12491_v13 = vsel %vm15000_vm7, %v7394_v25, %v14442_v10  ;;  %v15010_v10 = vunpack.i.l.bf16 %v12366_v18  ;;  %vm15012_vm7 = vcmask 1039360  }
 0xcda   :  { %4593 = vmatpush.msrb.mxu0 %v12273_v49  ;;  %7596 = vrot.lane.b32.xlu2 %v7595_v61, %s8042_s19  ;;  %v7318_v61 = vunpack.i.l.bf16 %v12247_v30  ;;  %v14441_v49 = vunpack.i.l.bf16 %v12359_v3  ;;  %v7605_v23 = vpack.i.bf16 %v12491_v13, %v12480_v36  ;;  %v12501_v30 = vld [vmem:[%s14163_s3 + $0x80] sm:$0xff]  ;;  %v12508_v21 = vsel %vm1797_vm14, %v7433_v34, %v14440_v37 }
 0xcdb   :  { %4559 = vmatmul.f32.gmra.mxu2 %v12501_v30  ;;  %v14444_v34 = vunpack.i.l.bf16 %v12451_v54 }
 0xcdc   :  { %4594 = vmatpush.msrb.mxu0 %v12304_v33  ;;  %v12471_v44 = vpop.permute.xlu0 %7461 }
 0xcdd   :  { %v12512_v25 = vunpack.i.h.bf16 %v12471_v44  ;;  %v14445_v43 = vunpack.i.l.bf16 %v12471_v44 }
 0xcde   :  { %4595 = vmatpush.msrb.mxu0 %v4058_v63  ;;  %7551 = vrot.lane.b32.xlu1 %v7550_v53, %s8042_s19  ;;  %v4292_v63 = vsel %vm15005_vm12, %v7318_v61, %v7319_v8  ;;  %v14443_v53 = vunpack.i.h.bf16 %v12451_v54  ;;  %v15011_v8 = vunpack.i.h.bf16 %v12278_v38  ;;  %vm15018_vm12 = vcmask 1014784  }
 0xcdf   :  { %15002 = vst [vmem:[#allocation61_spill] sm:$0xff] %v12512_v25  ;;  %v4309_v37 = vsel %vm15007_vm13, %v12512_v25, %v12158_v40 }
 0xce0   :  { %4596 = vmatpush.msrb.mxu0 %v12352_v0  ;;  %v12496_v33 = vpop.permute.xlu1 %7491  ;;  %v15003_v0 = vunpack.i.h.bf16 %v12237_v39  ;;  %v12528_v39 = vsel %vm82_vm11, %v15006_v62, %v14441_v49  ;;  %v15008_v62 = vunpack.i.h.bf16 %v12148_v42  ;;  %v4296_v42 = vsel %vm15001_vm2, %v14444_v34, %v14443_v53 }
 0xce1   :  { %v15017_v34 = vunpack.i.h.bf16 %v12400_v46  ;;  %vm15037_vm2 = vcmask 1039360  }
 0xce2   :  { %v4012_v51 = vsel %vm15004_vm8, %v15003_v0, %v7458_v31  ;;  %7606 = vrot.lane.b32.xlu2 %v7605_v23, %s8042_s19  ;;  %v7555_v23 = vpack.i.bf16 %v4293_v22, %v4292_v63  ;;  %v3966_v49 = vsel %vm15009_vm9, %v15008_v62, %v7413_v28  ;;  %v12549_v22 = vsel %vm15012_vm7, %v15011_v8, %v15010_v10  ;;  %v7487_v0 = vpop.permute.xlu2 %7486  ;;  %vm15013_vm8 = vmmov %vm15007_vm13 }
 0xce3   :  { %4597 = vmatpush.msrb.mxu0 %v4012_v51  ;;  %v7399_v51 = vunpack.i.h.bf16 %v12239_v27  ;;  %v12561_v40 = vsel %vm15013_vm8, %v14445_v43, %v12512_v25  ;;  %v7635_v28 = vpack.i.bf16 %v4309_v37, %v4296_v42  ;;  %v15016_v62 = vunpack.i.l.bf16 %v12368_v35  ;;  %vm15024_vm13 = vmmov %vm15009_vm9 }
 0xce4   :  { %v12533_v61 = vpop.permute.xlu0 %7476  ;;  %15014 = vst [vmem:[#allocation65_spill] sm:$0xff] %v12561_v40  ;;  %v12581_v43 = vsel %vm15018_vm12, %v7458_v31, %v15017_v34  ;;  %v12584_v37 = vunpack.i.h.bf16 %v12496_v33  ;;  %v12590_v63 = vunpack.i.h.bf16 %v12449_v2  ;;  %v7409_v31 = vunpack.i.h.bf16 %v12359_v3  ;;  %vm15042_vm8 = vmmov %vm15037_vm2 }
 0xce5   :  { %4598 = vmatpush.msrb.mxu0 %v12528_v39  ;;  %v14446_v6 = vunpack.i.l.bf16 %v12533_v61  ;;  %v15021_v42 = vunpack.i.h.bf16 %v12381_v17  ;;  %vm15026_vm9 = vcmask 809984   ;;  %vm15046_vm12 = vcmask 793600  }
 0xce6   :  { %7556 = vrot.lane.b32.xlu1 %v7555_v23, %s8042_s19  ;;  %v15015_v23 = vunpack.i.h.bf16 %v12368_v35  ;;  %15019 = vst [vmem:[#allocation52_spill] sm:$0xff] %v12584_v37  ;;  %vm15028_vm7 = vmmov %vm15026_vm9 }
 0xce7   :  { %4599 = vmatpush.msrb.mxu0 %v3966_v49  ;;  %v12566_v38 = vsel %vm162_vm10, %v7399_v51, %v14446_v6  ;;  %v7488_v6 = vunpack.i.l.bf16 %v7487_v0  ;;  %15020 = vst [vmem:[#allocation54_spill] sm:$0xff] %v12590_v63 }
 0xce8   :  { %v7610_v10 = vpack.i.bf16 %v12566_v38, %v12561_v40  ;;  %v7497_v8 = vpop.permute.xlu1 %7496  ;;  %v12576_v53 = vsel %vm715_vm0, %v15016_v62, %v15015_v23  ;;  %v7560_v23 = vpack.i.bf16 %v3966_v49, %v12286_v11  ;;  %v4303_v11 = vsel %vm15026_vm9, %v12590_v63, %v12164_v58 }
 0xce9   :  { %4600 = vmatpush.msrb.mxu0 %v12549_v22  ;;  %v12613_v40 = vsel %vm82_vm11, %v7409_v31, %v7488_v6  ;;  %v15027_v49 = vunpack.i.l.bf16 %v12449_v2  ;;  %vm15050_vm9 = vcmask 826368  }
 0xcea   :  { %7636 = vrot.lane.b32.xlu2 %v7635_v28, %s8042_s19  ;;  %7611 = vrot.lane.b32.xlu0 %v7610_v10, %s8042_s19  ;;  %v15023_v10 = vunpack.i.l.bf16 %v12496_v33 }
 0xceb   :  { %4601 = vmatpush.msrb.mxu0 %v12078_v29  ;;  %v15022_v29 = vunpack.i.l.bf16 %v12381_v17 }
 0xcec   :  { %4602 = vmatmul.f32.vlgmr.msrb.gmra.mxu0 %v12340_v45  ;;  %v12597_v62 = vpop.permute.xlu0 %7506  ;;  %v12610_v25 = vsel %vm15024_vm13, %v15023_v10, %v12584_v37  ;;  %v15029_v10 = vunpack.i.h.bf16 %v12394_v9  ;;  %vm4418_vm13 = vcmask 351232  }
 0xced   :  { %v12604_v28 = vsel %vm340_vm1, %v15022_v29, %v15021_v42  ;;  %15025 = vst [vmem:[#allocation53_spill] sm:$0xff] %v12610_v25  ;;  %v12623_v42 = vsel %vm15028_vm7, %v15027_v49, %v12590_v63  ;;  %v7645_v29 = vpack.i.bf16 %v4303_v11, %v12610_v25  ;;  %v7498_v49 = vunpack.i.l.bf16 %v7497_v8 }
 0xcee   :  { %7561 = vrot.lane.b32.xlu1 %v7560_v23, %s8042_s19  ;;  %v12633_v23 = vsel %vm317_vm3, %v15030_v1, %v15029_v10  ;;  %v7620_v58 = vpack.i.bf16 %v12613_v40, %v12623_v42  ;;  %v15031_v11 = vunpack.i.l.bf16 %v12239_v27  ;;  %v15032_v1 = vunpack.i.h.bf16 %v12296_v48 }
 0xcef   :  { %v12653_v63 = vunpack.i.h.bf16 %v7487_v0  ;;  %v15035_v48 = vunpack.i.h.bf16 %v12314_v56 }
 0xcf0   :  { %v12626_v34 = vpop.permute.xlu1 %7501  ;;  %v12643_v25 = vsel %vm162_vm10, %v15031_v11, %v7399_v51 }
 0xcf1   :  { %v14453_v2 = vunpack.i.l.bf16 %v12626_v34  ;;  %15033 = vst [vmem:[#allocation55_spill] sm:$0xff] %v12653_v63  ;;  %v7580_v27 = vpack.i.bf16 %v12643_v25, %v12528_v39  ;;  %v15038_v39 = vunpack.i.h.bf16 %v12335_v50  ;;  %v7650_v56 = vpack.i.bf16 %v12584_v37, %v12653_v63 }
 0xcf2   :  { %7646 = vrot.lane.b32.xlu2 %v7645_v29, %s8042_s19  ;;  %7621 = vrot.lane.b32.xlu0 %v7620_v58, %s8042_s19  ;;  %v15034_v58 = vunpack.i.l.bf16 %v12597_v62 }
 0xcf3   :  { %v4269_v10 = vsel %vm4265_vm5, %v15032_v1, %v14453_v2  ;;  %v15036_v1 = vunpack.i.h.bf16 %v12366_v18  ;;  %v15039_v18 = vunpack.i.l.bf16 %v12428_v60 }
 0xcf4   :  { %4605 = vmatmul.f32.gmra.mxu0 %v12501_v30  ;;  %4678 = vmatpush.msrb.mxu2 %v4269_v10  ;;  %v12657_v51 = vpop.permute.xlu0 %7511  ;;  %v4245_v11 = vsel %vm4241_vm15, %v15035_v48, %v15034_v58  ;;  %v12678_v10 = vsel %vm82_vm11, %v7488_v6, %v12653_v63  ;;  %v15040_v58 = vunpack.i.l.bf16 %v12359_v3  ;;  %v12696_v48 = vunpack.i.h.bf16 %v7497_v8 }
 0xcf5   :  { %v14455_v29 = vunpack.i.l.bf16 %v12657_v51  ;;  %v12668_v2 = vsel %vm15037_vm2, %v15036_v1, %v7498_v49  ;;  %v12703_v1 = vunpack.i.h.bf16 %v12533_v61  ;;  %v7379_v63 = vunpack.i.h.bf16 %v12309_v5 }
 0xcf6   :  { %7581 = vrot.lane.b32.xlu1 %v7580_v27, %s8042_s19  ;;  %4679 = vmatpush.msrb.mxu2 %v4245_v11  ;;  %v12687_v27 = vsel %vm248_vm4, %v15039_v18, %v14456_v47  ;;  %v12692_v50 = vsel %vm82_vm11, %v15040_v58, %v7409_v31  ;;  %v7640_v6 = vpack.i.bf16 %v12678_v10, %v12668_v2  ;;  %v12700_v11 = vpop.permute.xlu2 %4007  ;;  %v15045_v58 = vunpack.i.h.bf16 %v12264_v7 }
 0xcf7   :  { %v4221_v0 = vsel %vm1797_vm14, %v15038_v39, %v14455_v29  ;;  %15041 = vst [vmem:[#allocation60_spill] sm:$0xff] %v12696_v48  ;;  %v7590_v3 = vpack.i.bf16 %v12692_v50, %v12549_v22  ;;  %v12712_v8 = vsel %vm15042_vm8, %v7498_v49, %v12696_v48  ;;  %v4522_v22 = vld [vmem:[%s14164_s4 + $0xb80] sm:$0xff]  ;;  %v4300_v18 = vsel %vm162_vm10, %v12703_v1, %v12176_v26 }
 0xcf8   :  { %4680 = vmatpush.msrb.mxu2 %v4221_v0  ;;  %v15043_v0 = vunpack.i.h.bf16 %v12368_v35  ;;  %v15044_v49 = vunpack.i.l.bf16 %v12471_v44  ;;  %v15047_v44 = vunpack.i.h.bf16 %v12381_v17 }
 0xcfa   :  { %7651 = vrot.lane.b32.xlu2 %v7650_v56, %s8042_s19  ;;  %7641 = vrot.lane.b32.xlu0 %v7640_v6, %s8042_s19  ;;  %v4106_v6 = vsel %vm15046_vm12, %v15045_v58, %v15044_v49  ;;  %v15051_v58 = vunpack.i.l.bf16 %v12407_v16 }
 0xcfb   :  { %v7600_v35 = vpack.i.bf16 %v4106_v6, %v12100_v59 }
 0xcfc   :  { %v12707_v39 = vpop.permute.xlu0 %7516 }
 0xcfd   :  { %v14454_v31 = vunpack.i.l.bf16 %v12707_v39 }
 0xcfe   :  { %7591 = vrot.lane.b32.xlu1 %v7590_v3, %s8042_s19  ;;  %v7655_v3 = vpack.i.bf16 %v4300_v18, %v12712_v8  ;;  %v15049_v18 = vunpack.i.h.bf16 %v12331_v15 }
 0xcff   :  { %v4198_v56 = vsel %vm715_vm0, %v15043_v0, %v14454_v31 }
 0xd00   :  { %4681 = vmatpush.msrb.mxu2 %v4198_v56 }
 0xd02   :  { %4526 = vperm.xlu2 %7217, %v4522_v22   ;;  %7656 = vrot.lane.b32.xlu0 %v7655_v3, %s8042_s19  ;;  %v15048_v22 = vunpack.i.l.bf16 %v12451_v54  ;;  %v12751_v3 = vsel %vm202_vm6, %v15051_v58, %v12418_v20  ;;  %vm15057_vm6 = vcmask 1031168  }
 0xd04   :  { %v7542_v0 = vpop.permute.xlu2 %7541  ;;  %v12734_v31 = vpop.permute.xlu0 %7521  ;;  %v4295_v49 = vsel %vm15050_vm9, %v15049_v18, %v15048_v22  ;;  %v4523_v18 = vld [vmem:[%s14164_s4 + $0xb90] sm:$0xff] }
 0xd05   :  { %v7544_v29 = vunpack.i.h.bf16 %v7542_v0  ;;  %v7543_v47 = vunpack.i.l.bf16 %v7542_v0  ;;  %v7523_v26 = vunpack.i.l.bf16 %v12734_v31  ;;  %v7615_v17 = vpack.i.bf16 %v4295_v49, %v12751_v3 }
 0xd06   :  { %7601 = vrot.lane.b32.xlu1 %v7600_v35, %s8042_s19  ;;  %v15053_v49 = vunpack.i.l.bf16 %v12597_v62 }
 0xd07   :  { %v4459_v7 = vsel %vm4418_vm13, %v7543_v47, %v7544_v29  ;;  %v4175_v56 = vsel %vm340_vm1, %v15047_v44, %v7523_v26  ;;  %v14458_v47 = vunpack.i.h.bf16 %v12597_v62 }
 0xd08   :  { %4570 = vmatpush.msra.mxu3 %v4459_v7  ;;  %4682 = vmatpush.msrb.mxu2 %v4175_v56  ;;  %v15052_v56 = vunpack.i.h.bf16 %v12394_v9 }
 0xd09   :  { %v12773_v58 = vsel %vm4241_vm15, %v15053_v49, %v14458_v47  ;;  %vm15061_vm15 = vmmov %vm15050_vm9 }
 0xd0a   :  { %4009 = vrot.lane.b32.xlu0 %v12129_v57, %s8022_s12 }
 0xd0c   :  { %v7547_v35 = vpop.permute.xlu2 %7546  ;;  %v12757_v0 = vpop.permute.xlu0 %7526 }
 0xd0d   :  { %v7549_v7 = vunpack.i.h.bf16 %v7547_v35  ;;  %v7548_v15 = vunpack.i.l.bf16 %v7547_v35  ;;  %v7528_v44 = vunpack.i.l.bf16 %v12757_v0  ;;  %v15055_v35 = vunpack.i.l.bf16 %v12496_v33 }
 0xd0e   :  { %7616 = vrot.lane.b32.xlu1 %v7615_v17, %s8042_s19  ;;  %v15054_v17 = vunpack.i.l.bf16 %v12533_v61  ;;  %v15058_v33 = vunpack.i.h.bf16 %v12428_v60  ;;  %v14461_v60 = vunpack.i.h.bf16 %v12707_v39 }
 0xd0f   :  { %v4454_v16 = vsel %vm4418_vm13, %v7548_v15, %v7549_v7  ;;  %v4152_v22 = vsel %vm317_vm3, %v15052_v56, %v7528_v44  ;;  %v15056_v15 = vunpack.i.h.bf16 %v12262_v12 }
 0xd10   :  { %4571 = vmatpush.msra.mxu3 %v4454_v16  ;;  %4683 = vmatpush.msrb.mxu2 %v4152_v22  ;;  %v12779_v9 = vsel %vm162_vm10, %v15054_v17, %v12703_v1  ;;  %v14463_v22 = vunpack.i.h.bf16 %v12657_v51 }
 0xd11   :  { %v3968_v16 = vsel %vm15057_vm6, %v15056_v15, %v15055_v35  ;;  %v15059_v35 = vunpack.i.l.bf16 %v12657_v51  ;;  %vm5118_vm6 = vcmask 1046528  }
 0xd12   :  { %4531 = vperm.xlu0 %7294, %v4523_v18   ;;  %v7625_v56 = vpack.i.bf16 %v3968_v16, %v12779_v9 }
 0xd13   :  { %v12808_v15 = vsel %vm1797_vm14, %v15059_v35, %v14463_v22  ;;  %vm15064_vm14 = vcmask 1014784  }
 0xd14   :  { %v12788_v37 = vpop.permute.xlu2 %7566  ;;  %v12790_v49 = vpop.permute.xlu0 %7531 }
 0xd15   :  { %v14468_v61 = vunpack.i.l.bf16 %v12788_v37  ;;  %v14462_v17 = vunpack.i.l.bf16 %v12790_v49 }
 0xd16   :  { %7626 = vrot.lane.b32.xlu1 %v7625_v56, %s8042_s19  ;;  %v15060_v56 = vunpack.i.h.bf16 %v12451_v54 }
 0xd17   :  { %v4460_v12 = vsel %vm4418_vm13, %v7544_v29, %v14468_v61  ;;  %v4129_v18 = vsel %vm248_vm4, %v15058_v33, %v14462_v17 }
 0xd18   :  { %4616 = vmatpush.msra.mxu1 %v4460_v12  ;;  %4684 = vmatpush.msrb.mxu2 %v4129_v18  ;;  %v4297_v29 = vsel %vm15061_vm15, %v15060_v56, %v12186_v14  ;;  %v15062_v14 = vunpack.i.l.bf16 %v12707_v39 }
 0xd19   :  { %v7630_v47 = vpack.i.bf16 %v4297_v29, %v12127_v24 }
 0xd1a   :  { %4685 = vmatpush.msrb.mxu2 %v4106_v6  ;;  %v12831_v6 = vsel %vm715_vm0, %v15062_v14, %v14461_v60  ;;  %vm15095_vm0 = vmmov %vm15037_vm2 }
 0xd1b   :  { %vm15097_vm7 = vmmov %vm15095_vm0 }
 0xd1c   :  { %v12816_v33 = vpop.permute.xlu2 %7571  ;;  %4686 = vmatpush.msrb.mxu2 %v12480_v36  ;;  %v15063_v36 = vunpack.i.h.bf16 %v12400_v46  ;;  %vm15099_vm8 = vmmov %vm15095_vm0 }
 0xd1d   :  { %v14467_v12 = vunpack.i.h.bf16 %v12816_v33  ;;  %vm15100_vm12 = vmmov %vm15095_vm0 }
 0xd1e   :  { %7631 = vrot.lane.b32.xlu1 %v7630_v47, %s8042_s19  ;;  %4687 = vmatpush.msrb.mxu2 %v12491_v13  ;;  %v4014_v47 = vsel %vm15064_vm14, %v15063_v36, %v12700_v11  ;;  %v7660_v13 = vpack.i.bf16 %v12129_v57, %v12696_v48  ;;  %v7573_v36 = vunpack.i.l.bf16 %v12816_v33  ;;  %vm15102_vm9 = vmmov %vm15095_vm0 }
 0xd1f   :  { %v4455_v54 = vsel %vm4418_vm13, %v7549_v7, %v14467_v12  ;;  %v14460_v7 = vunpack.i.h.bf16 %v12734_v31  ;;  %vm15103_vm15 = vmmov %vm15095_vm0 }
 0xd20   :  { %4617 = vmatpush.msra.mxu1 %v4455_v54  ;;  %4688 = vmatpush.msrb.mxu2 %v12566_v38  ;;  %v14459_v38 = vunpack.i.h.bf16 %v12757_v0 }
 0xd21   :  { %v12848_v46 = vsel %vm340_vm1, %v7523_v26, %v14460_v7  ;;  %v7569_v7 = vunpack.i.h.bf16 %v12788_v37  ;;  %vm15085_vm1 = vmmov %vm15064_vm14 }
 0xd22   :  { %4689 = vmatpush.msrb.mxu2 %v4014_v47  ;;  %vm15104_vm14 = vmmov %vm15095_vm0 }
 0xd23   :  { %v4444_v22 = vsel %vm4418_vm13, %v7569_v7, %v7573_v36 }
 0xd24   :  { %v12840_v18 = vpop.permute.xlu2 %7576  ;;  %4690 = vmatpush.msrb.mxu2 %v12613_v40  ;;  %v12858_v40 = vsel %vm317_vm3, %v7528_v44, %v14459_v38 }
 0xd25   :  { %v14471_v47 = vunpack.i.l.bf16 %v12840_v18 }
 0xd26   :  { %7661 = vrot.lane.b32.xlu1 %v7660_v13, %s8042_s19  ;;  %4691 = vmatpush.msrb.mxu2 %v3968_v16  ;;  %s15117_s19 = smov 121  }
 0xd28   :  { %4692 = vmatpush.msrb.mxu2 %v12668_v2 }
 0xd2a   :  { %4693 = vmatpush.msrb.mxu2 %v12098_v55 }
 0xd2b   :  { %4694 = vmatmul.f32.vlgmr.msrb.gmra.mxu2 %v12340_v45 }
 0xd2c   :  { %v12853_v35 = vpop.permute.xlu2 %7586 }
 0xd33   :  { %4697 = vmatmul.f32.gmra.mxu2 %v12501_v30 }
 0xd34   :  { %v12861_v2 = vpop.permute.xlu2 %7596 }
 0xd3c   :  { %v12863_v16 = vpop.permute.xlu2 %7606 }
 0xd44   :  { %v12865_v26 = vpop.permute.xlu2 %7636 }
 0xd45   :  { %v14466_v55 = vunpack.i.h.bf16 %v12865_v26 }
 0xd47   :  { %4800 = vmatpush.msra.mxu2 %v14466_v55 }
 0xd48   :  { %v12870_v56 = vpop.permute.xlu1 %7536 }
 0xd49   :  { %v14465_v29 = vunpack.i.l.bf16 %v12870_v56 }
 0xd4b   :  { %4801 = vmatpush.msra.mxu2 %v14465_v29 }
 0xd4c   :  { %v12875_v44 = vpop.permute.xlu2 %7646 }
 0xd4d   :  { %v14464_v54 = vunpack.i.h.bf16 %v12875_v44 }
 0xd4f   :  { %4802 = vmatpush.msra.mxu2 %v14464_v54 }
 0xd50   :  { %v7552_v14 = vpop.permute.xlu1 %7551 }
 0xd51   :  { %v7554_v13 = vunpack.i.h.bf16 %v7552_v14  ;;  %v7553_v38 = vunpack.i.l.bf16 %v7552_v14 }
 0xd53   :  { %v4449_v60 = vsel %vm4418_vm13, %v7553_v38, %v7554_v13  ;;  %v4450_v17 = vsel %vm4418_vm13, %v7554_v13, %v14471_v47  ;;  %v7579_v38 = vunpack.i.h.bf16 %v12840_v18 }
 0xd54   :  { %4572 = vmatpush.msra.mxu3 %v4449_v60  ;;  %4618 = vmatpush.msra.mxu1 %v4450_v17 }
 0xd56   :  { %4573 = vmatpush.msra.mxu3 %v4444_v22 }
 0xd58   :  { %v7557_v54 = vpop.permute.xlu1 %7556 }
 0xd59   :  { %v7559_v29 = vunpack.i.h.bf16 %v7557_v54  ;;  %v7558_v55 = vunpack.i.l.bf16 %v7557_v54  ;;  %v14475_v54 = vunpack.i.l.bf16 %v12853_v35 }
 0xd5b   :  { %v4439_v12 = vsel %vm4418_vm13, %v7558_v55, %v7559_v29 }
 0xd5c   :  { %4574 = vmatpush.msra.mxu3 %v4439_v12  ;;  %v12889_v14 = vpop.permute.xlu0 %7611 }
 0xd60   :  { %v7562_v61 = vpop.permute.xlu1 %7561 }
 0xd61   :  { %v7564_v60 = vunpack.i.h.bf16 %v7562_v61  ;;  %v7563_v17 = vunpack.i.l.bf16 %v7562_v61  ;;  %v4440_v61 = vsel %vm4418_vm13, %v7559_v29, %v14475_v54  ;;  %v7599_v54 = vunpack.i.h.bf16 %v12861_v2 }
 0xd63   :  { %v4429_v47 = vsel %vm4418_vm13, %v7563_v17, %v7564_v60  ;;  %v7598_v17 = vunpack.i.l.bf16 %v12861_v2  ;;  %v15070_v2 = vunpack.i.l.bf16 %v12626_v34 }
 0xd64   :  { %v12891_v57 = vpop.permute.xlu0 %7621 }
 0xd68   :  { %v12894_v48 = vpop.permute.xlu1 %7581 }
 0xd69   :  { %v14474_v7 = vunpack.i.h.bf16 %v12894_v48  ;;  %v7583_v22 = vunpack.i.l.bf16 %v12894_v48 }
 0xd6b   :  { %v4434_v55 = vsel %vm4418_vm13, %v7579_v38, %v7583_v22  ;;  %v4445_v12 = vsel %vm4418_vm13, %v7573_v36, %v14474_v7  ;;  %v7378_v38 = vunpack.i.l.bf16 %v12309_v5  ;;  %v7589_v36 = vunpack.i.h.bf16 %v12853_v35 }
 0xd6c   :  { %4575 = vmatpush.msra.mxu3 %v4434_v55  ;;  %4619 = vmatpush.msra.mxu1 %v4445_v12  ;;  %v12903_v13 = vpop.permute.xlu0 %7641 }
 0xd6e   :  { %4576 = vmatpush.msra.mxu3 %v4429_v47  ;;  %4620 = vmatpush.msra.mxu1 %v4440_v61  ;;  %v12922_v47 = vld [vmem:[%s14163_s3 + $0x68] sm:$0xff]  ;;  %v4419_v61 = vsel %vm4418_vm13, %v7378_v38, %v7379_v63 }
 0xd70   :  { %v12910_v24 = vpop.permute.xlu1 %7591 }
 0xd71   :  { %v7594_v55 = vunpack.i.h.bf16 %v12910_v24  ;;  %v7593_v12 = vunpack.i.l.bf16 %v12910_v24  ;;  %v4430_v24 = vsel %vm4418_vm13, %v7564_v60, %v7598_v17  ;;  %v7613_v60 = vunpack.i.l.bf16 %v12889_v14 }
 0xd73   :  { %v4424_v7 = vsel %vm4418_vm13, %v7589_v36, %v7593_v12  ;;  %v4435_v29 = vsel %vm4418_vm13, %v7583_v22, %v7594_v55 }
 0xd74   :  { %4577 = vmatpush.msra.mxu3 %v4424_v7  ;;  %4621 = vmatpush.msra.mxu1 %v4435_v29  ;;  %v12924_v5 = vpop.permute.xlu0 %7656  ;;  %v4425_v7 = vsel %vm4418_vm13, %v7593_v12, %v7599_v54  ;;  %v15065_v12 = vunpack.i.l.bf16 %v12788_v37 }
 0xd75   :  { %v14476_v36 = vunpack.i.h.bf16 %v12924_v5 }
 0xd76   :  { %4578 = vmatpush.msra.mxu3 %v4419_v61  ;;  %4622 = vmatpush.msra.mxu1 %v4430_v24 }
 0xd77   :  { %6330 = vmatmul.msk.f32.vlgmr.msra.gmra.mxu3 %vm317_vm3, %v12922_v47  ;;  %4803 = vmatpush.msra.mxu2 %v14476_v36 }
 0xd78   :  { %4632 = vmatpush.msrb.mxu3 %v12413_v52  ;;  %v12940_v22 = vpop.permute.xlu1 %7601  ;;  %4623 = vmatpush.msra.mxu1 %v4425_v7  ;;  %v7608_v52 = vunpack.i.l.bf16 %v12863_v16  ;;  %v12958_v7 = vld [vmem:[%s14163_s3 + $0x88] sm:$0xff] }
 0xd79   :  { %v7604_v38 = vunpack.i.h.bf16 %v12940_v22  ;;  %v7603_v29 = vunpack.i.l.bf16 %v12940_v22 }
 0xd7a   :  { %4633 = vmatpush.msrb.mxu3 %v12460_v19  ;;  %v7609_v19 = vunpack.i.h.bf16 %v12863_v16  ;;  %v7614_v16 = vunpack.i.h.bf16 %v12889_v14  ;;  %v7534_v14 = vunpack.i.h.bf16 %v12790_v49 }
 0xd7b   :  { %v4420_v61 = vsel %vm4418_vm13, %v7379_v63, %v7603_v29  ;;  %v4462_v24 = vsel %vm4418_vm13, %v7604_v38, %v7613_v60  ;;  %v4461_v36 = vsel %vm4418_vm13, %v15065_v12, %v7604_v38  ;;  %v15069_v12 = vunpack.i.l.bf16 %v12853_v35 }
 0xd7c   :  { %4634 = vmatpush.msrb.mxu3 %v12508_v21  ;;  %4624 = vmatpush.msra.mxu1 %v4420_v61  ;;  %v15066_v21 = vunpack.i.h.bf16 %v12816_v33  ;;  %v7623_v61 = vunpack.i.l.bf16 %v12891_v57  ;;  %v7643_v35 = vunpack.i.l.bf16 %v12903_v13 }
 0xd7d   :  { %4708 = vmatpush.msra.mxu0 %v4462_v24  ;;  %6332 = vmatmul.msk.f32.vlgmr.msra.gmra.mxu1 %vm317_vm3, %v12922_v47 }
 0xd7e   :  { %4635 = vmatpush.msrb.mxu3 %v12576_v53  ;;  %4662 = vmatpush.msrb.mxu1 %v4461_v36  ;;  %v4456_v63 = vsel %vm4418_vm13, %v15066_v21, %v7608_v52  ;;  %v15067_v53 = vunpack.i.l.bf16 %v12840_v18  ;;  %v7624_v18 = vunpack.i.h.bf16 %v12891_v57 }
 0xd7f   :  { %6331 = vmatmul.msk.f32.gmra.mxu3 %vm317_vm3, %v12958_v7 }
 0xd80   :  { %4636 = vmatpush.msrb.mxu3 %v12604_v28  ;;  %4663 = vmatpush.msrb.mxu1 %v4456_v63  ;;  %v12970_v37 = vpop.permute.xlu1 %7616  ;;  %v4451_v36 = vsel %vm4418_vm13, %v15067_v53, %v7609_v19  ;;  %v15068_v28 = vunpack.i.h.bf16 %v12894_v48  ;;  %v4436_v48 = vsel %vm4418_vm13, %v7594_v55, %v7624_v18  ;;  %v7644_v53 = vunpack.i.h.bf16 %v12903_v13 }
 0xd81   :  { %v7619_v22 = vunpack.i.h.bf16 %v12970_v37  ;;  %v7618_v38 = vunpack.i.l.bf16 %v12970_v37  ;;  %v15077_v37 = vunpack.i.h.bf16 %v12657_v51 }
 0xd82   :  { %4637 = vmatpush.msrb.mxu3 %v12633_v23  ;;  %4664 = vmatpush.msrb.mxu1 %v4451_v36  ;;  %v4446_v33 = vsel %vm4418_vm13, %v15068_v28, %v7614_v16  ;;  %v4452_v23 = vsel %vm4418_vm13, %v7609_v19, %v7623_v61  ;;  %v7638_v19 = vunpack.i.l.bf16 %v12865_v26  ;;  %v7539_v36 = vunpack.i.h.bf16 %v12870_v56 }
 0xd83   :  { %v4457_v24 = vsel %vm4418_vm13, %v7608_v52, %v7618_v38  ;;  %v4441_v21 = vsel %vm4418_vm13, %v15069_v12, %v7619_v22  ;;  %v7658_v28 = vunpack.i.l.bf16 %v12924_v5  ;;  %v15071_v12 = vld [vmem:[#allocation57_spill] sm:$0xff] }
 0xd84   :  { %4638 = vmatpush.msrb.mxu3 %v12687_v27  ;;  %4665 = vmatpush.msrb.mxu1 %v4446_v33 }
 0xd85   :  { %4709 = vmatpush.msra.mxu0 %v4457_v24  ;;  %6333 = vmatmul.msk.f32.gmra.mxu1 %vm317_vm3, %v12958_v7 }
 0xd86   :  { %4639 = vmatpush.msrb.mxu3 %v12319_v41  ;;  %4666 = vmatpush.msrb.mxu1 %v4441_v21  ;;  %v15072_v21 = vld [vmem:[#allocation42_spill] sm:$0xff] }
 0xd87   :  { %4710 = vmatpush.msra.mxu0 %v4452_v23 }
 0xd88   :  { %4640 = vmatpush.msrb.mxu3 %v12345_v32  ;;  %4667 = vmatpush.msrb.mxu1 %v4436_v48  ;;  %v12999_v27 = vpop.permute.xlu1 %7626  ;;  %v7504_v32 = vunpack.i.h.bf16 %v12626_v34 }
 0xd89   :  { %v7629_v52 = vunpack.i.h.bf16 %v12999_v27  ;;  %v7628_v63 = vunpack.i.l.bf16 %v12999_v27 }
 0xd8a   :  { %4641 = vmatpush.msrb.mxu3 %v12373_v4  ;;  %v4426_v4 = vsel %vm4418_vm13, %v7599_v54, %v7643_v35  ;;  %v4270_v54 = vsel %vm4265_vm5, %v15070_v2, %v7504_v32  ;;  %vm15096_vm5 = vmmov %vm15095_vm0 }
 0xd8b   :  { %v4431_v41 = vsel %vm4418_vm13, %v7598_v17, %v7629_v52  ;;  %v4447_v55 = vsel %vm4418_vm13, %v7614_v16, %v7628_v63  ;;  %v4442_v17 = vsel %vm4418_vm13, %v7619_v22, %v7638_v19  ;;  %v4421_v16 = vsel %vm4418_vm13, %v7603_v29, %v7539_v36  ;;  %v7652_v22 = vpop.permute.xlu2 %7651 }
 0xd8c   :  { %4642 = vmatpush.msrb.mxu3 %v12643_v25  ;;  %4668 = vmatpush.msrb.mxu1 %v4431_v41  ;;  %v7648_v25 = vunpack.i.l.bf16 %v12875_v44  ;;  %v7653_v34 = vunpack.i.l.bf16 %v7652_v22 }
 0xd8d   :  { %4711 = vmatpush.msra.mxu0 %v4447_v55  ;;  %v15076_v55 = vunpack.i.h.bf16 %v12875_v44 }
 0xd8e   :  { %4643 = vmatpush.msrb.mxu3 %v12581_v43  ;;  %4669 = vmatpush.msrb.mxu1 %v4426_v4  ;;  %v4437_v43 = vsel %vm4418_vm13, %v7624_v18, %v7644_v53  ;;  %v4427_v18 = vsel %vm4418_vm13, %v7643_v35, %v7658_v28  ;;  %v7654_v35 = vunpack.i.h.bf16 %v7652_v22 }
 0xd8f   :  { %4712 = vmatpush.msra.mxu0 %v4442_v17 }
 0xd90   :  { %4644 = vmatpush.msrb.mxu3 %v12692_v50  ;;  %v13027_v33 = vpop.permute.xlu1 %7631  ;;  %4670 = vmatpush.msrb.mxu1 %v4421_v16  ;;  %v4432_v50 = vsel %vm4418_vm13, %v7629_v52, %v7648_v25  ;;  %v15074_v52 = vunpack.i.l.bf16 %v12870_v56  ;;  %v4433_v27 = vsel %vm4418_vm13, %v7648_v25, %v7654_v35 }
 0xd91   :  { %v7634_v29 = vunpack.i.h.bf16 %v13027_v33  ;;  %4713 = vmatpush.msra.mxu0 %v4437_v43  ;;  %v7633_v24 = vunpack.i.l.bf16 %v13027_v33  ;;  %6334 = vmatmul.msk.f32.vlgmr.msrb.gmra.mxu1 %vm317_vm3, %v12922_v47 }
 0xd92   :  { %4724 = vmatpush.msra.mxu1 %v4270_v54  ;;  %4645 = vmatpush.msrb.mxu3 %v15071_v12  ;;  %v4458_v41 = vsel %vm4418_vm13, %v7618_v38, %v15074_v52  ;;  %v15078_v38 = vunpack.i.h.bf16 %v12924_v5  ;;  %v15092_v5 = vld [vmem:[#allocation27_spill] sm:$0xff] }
 0xd93   :  { %4714 = vmatpush.msra.mxu0 %v4432_v50  ;;  %4804 = vmatpush.msra.mxu2 %v7634_v29  ;;  %v4422_v23 = vsel %vm4418_vm13, %v7539_v36, %v7633_v24  ;;  %v4443_v51 = vsel %vm4418_vm13, %v7638_v19, %v7634_v29 }
 0xd94   :  { %4725 = vmatpush.msra.mxu1 %v12773_v58  ;;  %4646 = vmatpush.msrb.mxu3 %v15072_v21  ;;  %v15073_v58 = vunpack.i.h.bf16 %v12865_v26  ;;  %v15083_v26 = vunpack.i.h.bf16 %v12757_v0 }
 0xd95   :  { %4715 = vmatpush.msra.mxu0 %v4427_v18  ;;  %4805 = vmatpush.msra.mxu2 %v7653_v34 }
 0xd96   :  { %4726 = vmatpush.msra.mxu1 %v12808_v15  ;;  %4647 = vmatpush.msrb.mxu3 %v12100_v59  ;;  %v4463_v48 = vsel %vm4418_vm13, %v7613_v60, %v15073_v58  ;;  %v15075_v60 = vunpack.i.h.bf16 %v12597_v62  ;;  %v4448_v62 = vsel %vm4418_vm13, %v7628_v63, %v15078_v38  ;;  %v4603_v63 = vpop.f32.mrf.mxu0 }
 0xd97   :  { %4648 = vmatmul.f32.vlgmr.msrb.gmra.mxu3 %v12340_v45  ;;  %4716 = vmatpush.msra.mxu0 %v4422_v23 }
 0xd98   :  { %4754 = vmatpush.msra.mxu3 %v4463_v48  ;;  %6336 = vmatmul.msk.f32.vlgmr.msra.gmra.mxu0 %vm317_vm3, %v12922_v47  ;;  %v7662_v59 = vpop.permute.xlu1 %7661 }
 0xd99   :  { %4727 = vmatpush.msra.mxu1 %v12831_v6  ;;  %4770 = vmatpush.msrb.mxu0 %v7504_v32  ;;  %v7663_v15 = vunpack.i.l.bf16 %v7662_v59  ;;  %v4453_v6 = vsel %vm4418_vm13, %v7623_v61, %v15076_v55  ;;  %v7664_v56 = vunpack.i.h.bf16 %v7662_v59  ;;  %v15080_v61 = vunpack.i.h.bf16 %v12707_v39 }
 0xd9a   :  { %4806 = vmatpush.msra.mxu2 %v7654_v35  ;;  %4755 = vmatpush.msra.mxu3 %v4458_v41  ;;  %v4438_v39 = vsel %vm4418_vm13, %v7644_v53, %v7653_v34 }
 0xd9b   :  { %4728 = vmatpush.msra.mxu1 %v12848_v46  ;;  %4771 = vmatpush.msrb.mxu0 %v15075_v60  ;;  %v15079_v46 = vunpack.i.l.bf16 %v12790_v49  ;;  %v15082_v49 = vunpack.i.h.bf16 %v12734_v31  ;;  %v4010_v31 = vpop.permute.xlu0 %4009  ;;  %v4428_v13 = vsel %vm4418_vm13, %v7658_v28, %v7663_v15  ;;  %v4423_v0 = vsel %vm4418_vm13, %v7633_v24, %v7664_v56  ;;  %vm15101_vm13 = vmmov %vm15095_vm0 }
 0xd9c   :  { %4756 = vmatpush.msra.mxu3 %v4453_v6  ;;  %4807 = vmatpush.msra.mxu2 %v7663_v15  ;;  %v4015_v44 = vsel %vm15085_vm1, %v12700_v11, %v4010_v31  ;;  %v15088_v11 = vld [vmem:[#allocation25_spill] sm:$0xff]  ;;  %vm15105_vm1 = vmmov %vm15095_vm0 }
 0xd9d   :  { %4729 = vmatpush.msra.mxu1 %v12858_v40  ;;  %4772 = vmatpush.msrb.mxu0 %v15077_v37  ;;  %v4130_v57 = vsel %vm248_vm4, %v15079_v46, %v7534_v14  ;;  %v15081_v40 = vld [vmem:[#allocation65_spill] sm:$0xff]  ;;  %vm15094_vm4 = vmmov %vm15037_vm2 }
 0xd9e   :  { %4757 = vmatpush.msra.mxu3 %v4448_v62  ;;  %4808 = vmatpush.msra.mxu2 %v7664_v56 }
 0xd9f   :  { %4730 = vmatpush.msra.mxu1 %v4130_v57  ;;  %4773 = vmatpush.msrb.mxu0 %v15080_v61 }
 0xda0   :  { %4651 = vmatmul.f32.gmra.mxu3 %v12501_v30  ;;  %6337 = vmatmul.msk.f32.gmra.mxu0 %vm317_vm3, %v12958_v7 }
 0xda1   :  { %4758 = vmatpush.msra.mxu3 %v4443_v51  ;;  %4731 = vmatpush.msra.mxu1 %v15081_v40 }
 0xda2   :  { %4774 = vmatpush.msrb.mxu0 %v15082_v49  ;;  %6335 = vmatmul.msk.f32.gmra.mxu1 %vm317_vm3, %v12958_v7 }
 0xda3   :  { %4759 = vmatpush.msra.mxu3 %v4438_v39  ;;  %4732 = vmatpush.msra.mxu1 %v12751_v3  ;;  %v15084_v3 = vld [vmem:[#allocation61_spill] sm:$0xff]  ;;  %v4532_v25 = vpop.permute.xlu0 %4531 }
 0xda4   :  { %4775 = vmatpush.msrb.mxu0 %v15083_v26  ;;  %6340 = vmatmul.msk.f32.vlgmr.msra.gmra.mxu2 %vm317_vm3, %v12922_v47 }
 0xda5   :  { %4760 = vmatpush.msra.mxu3 %v4433_v27  ;;  %4733 = vmatpush.msra.mxu1 %v12623_v42  ;;  %v15086_v42 = vld [vmem:[#allocation54_spill] sm:$0xff] }
 0xda6   :  { %4776 = vmatpush.msrb.mxu0 %v7534_v14 }
 0xda7   :  { %4761 = vmatpush.msra.mxu3 %v4428_v13  ;;  %4734 = vmatpush.msra.mxu1 %v12779_v9  ;;  %v15087_v9 = vld [vmem:[#allocation53_spill] sm:$0xff] }
 0xda8   :  { %4777 = vmatpush.msrb.mxu0 %v15084_v3 }
 0xda9   :  { %4762 = vmatpush.msra.mxu3 %v4423_v0  ;;  %4735 = vmatpush.msra.mxu1 %v4015_v44 }
 0xdaa   :  { %4778 = vmatpush.msrb.mxu0 %v12418_v20  ;;  %6338 = vmatmul.msk.f32.vlgmr.msra.gmra.mxu3 %vm317_vm3, %v12922_v47  ;;  %v15089_v20 = vld [vmem:[#allocation55_spill] sm:$0xff]  ;;  %v15091_v47 = vld [vmem:[#allocation60_spill] sm:$0xff] }
 0xdab   :  { %4736 = vmatpush.msra.mxu1 %v12678_v10  ;;  %v15090_v10 = vld [vmem:[#allocation52_spill] sm:$0xff] }
 0xdac   :  { %4779 = vmatpush.msrb.mxu0 %v15086_v42  ;;  %6341 = vmatmul.msk.f32.gmra.mxu2 %vm317_vm3, %v12958_v7 }
 0xdad   :  { %4737 = vmatpush.msra.mxu1 %v15087_v9 }
 0xdae   :  { %4780 = vmatpush.msrb.mxu0 %v12703_v1  ;;  %v4557_v1 = vpop.f32.mrf.mxu2 }
 0xdaf   :  { %4738 = vmatpush.msra.mxu1 %v12712_v8  ;;  %v4527_v8 = vpop.permute.xlu2 %4526 }
 0xdb0   :  { %4781 = vmatpush.msrb.mxu0 %v4010_v31  ;;  %v4604_v32 = vadd.f32 %v4603_v63, %v4527_v8  ;;  %v4558_v19 = vadd.f32 %v4557_v1, %v4527_v8 }
 0xdb1   :  { %4739 = vmatpush.msra.mxu1 %v15088_v11 }
 0xdb2   :  { %4782 = vmatpush.msrb.mxu0 %v15089_v20  ;;  %4740 = vmatmul.f32.vlgmr.msra.gmra.mxu1 %v12340_v45 }
 0xdb3   :  { %6339 = vmatmul.msk.f32.gmra.mxu3 %vm317_vm3, %v12958_v7  ;;  %vm15093_vm3 = vmmov %vm15037_vm2 }
 0xdb4   :  { %4783 = vmatpush.msrb.mxu0 %v15090_v10  ;;  %vm15098_vm2 = vmmov %vm15095_vm0 }
 0xdb6   :  { %4784 = vmatpush.msrb.mxu0 %v15091_v47  ;;  %v4560_v17 = vpop.f32.mrf.mxu2 }
 0xdb8   :  { %4785 = vmatpush.msrb.mxu0 %v15092_v5 }
 0xdb9   :  { %4786 = vmatmul.f32.vlgmr.msrb.gmra.mxu0 %v12340_v45  ;;  %v4606_v45 = vpop.f32.mrf.mxu0 }
 0xdba   :  { %4743 = vmatmul.f32.gmra.mxu1 %v12501_v30  ;;  %v4607_v28 = vadd.f32 %v4606_v45, %v4532_v25 }
 0xdbe   :  { %v4695_v29 = vpop.f32.mrf.mxu2 }
 0xdbf   :  { %v4696_v34 = vadd.f32 %v4695_v29, %v4527_v8 }
 0xdc1   :  { %4789 = vmatmul.f32.gmra.mxu0 %v12501_v30  ;;  %v4561_v30 = vadd.f32 %v4560_v17, %v4532_v25 }
 0xdc6   :  { %v4698_v52 = vpop.f32.mrf.mxu2 }
 0xdc7   :  { %v4699_v14 = vadd.f32 %v4698_v52, %v4532_v25 }
 0xdfa   :  { %v4580_v53 = vpop.f32.mrf.mxu3  ;;  %v4626_v36 = vpop.f32.mrf.mxu1 }
 0xdfb   :  { %v13143_v7 = vadd.f32 %v4580_v53, %v4558_v19  ;;  %v13145_v4 = vadd.f32 %v4626_v36, %v4604_v32 }
 0xdfd   :  { %v7665_v16 = vpack.i.bf16 %v13145_v4, %v13143_v7 }
 0xdff   :  { %7666 = vrot.lane.b32.xlu1 %v7665_v16, %s8016_s17 }
 0xe02   :  { %v4583_v33 = vpop.f32.mrf.mxu3  ;;  %v4629_v43 = vpop.f32.mrf.mxu1 }
 0xe03   :  { %v4584_v2 = vadd.f32 %v4583_v33, %v4561_v30  ;;  %v13150_v54 = vadd.f32 %v4629_v43, %v4607_v28  ;;  %v5012_v28 = vld [vmem:[%s14164_s4 + $0x670] sm:$0xff]  ;;  %v4978_v43 = vld [vmem:[%s14164_s4 + $0x560] sm:$0xff] }
 0xe05   :  { %v7675_v22 = vpack.i.bf16 %v13150_v54, %v4584_v2 }
 0xe07   :  { %7676 = vrot.lane.b32.xlu0 %v7675_v22, %s8016_s17 }
 0xe0e   :  { %v4672_v24 = vpop.f32.mrf.mxu1 }
 0xe15   :  { %v4718_v12 = vpop.f32.mrf.mxu0 }
 0xe16   :  { %v13154_v18 = vadd.f32 %v4718_v12, %v4696_v34 }
 0xe1a   :  { %v4649_v50 = vpop.f32.mrf.mxu3 }
 0xe1b   :  { %v4650_v21 = vadd.f32 %v4649_v50, %v4527_v8 }
 0xe1d   :  { %v4673_v23 = vadd.f32 %v4672_v24, %v4650_v21  ;;  %v4721_v41 = vpop.f32.mrf.mxu0 }
 0xe1e   :  { %v13162_v55 = vadd.f32 %v4721_v41, %v4699_v14  ;;  %v4976_v14 = vld [vmem:[%s14164_s4 + $0x550] sm:$0xff] }
 0xe1f   :  { %v7670_v58 = vpack.i.bf16 %v13154_v18, %v4673_v23  ;;  %v4675_v35 = vpop.f32.mrf.mxu1 }
 0xe21   :  { %7671 = vrot.lane.b32.xlu2 %v7670_v58, %s8016_s17 }
 0xe23   :  { %v4652_v48 = vpop.f32.mrf.mxu3 }
 0xe24   :  { %v4653_v59 = vadd.f32 %v4652_v48, %v4532_v25 }
 0xe26   :  { %v13158_v15 = vadd.f32 %v4675_v35, %v4653_v59 }
 0xe27   :  { %v4810_v38 = vpop.f32.mrf.mxu2 }
 0xe28   :  { %4844 = vrot.lane.b32.xlu1 %v13158_v15, %s8016_s17 }
 0xe2d   :  { %v4764_v60 = vpop.f32.mrf.mxu3 }
 0xe2f   :  { %v4741_v6 = vpop.f32.mrf.mxu1  ;;  %v4813_v26 = vpop.f32.mrf.mxu2 }
 0xe30   :  { %v4742_v56 = vadd.f32 %v4741_v6, %v4527_v8  ;;  %4846 = vrot.lane.b32.xlu1 %v13162_v55, %s8016_s17  ;;  %v5008_v6 = vld [vmem:[%s14164_s4 + $0x650] sm:$0xff] }
 0xe32   :  { %v13166_v37 = vadd.f32 %v4764_v60, %v4742_v56  ;;  %v5010_v60 = vld [vmem:[%s14164_s4 + $0x660] sm:$0xff]  ;;  %v4972_v56 = vld [vmem:[%s14164_s4 + $0x530] sm:$0xff] }
 0xe34   :  { %4836 = vrot.lane.b32.xlu2 %v13166_v37, %s8016_s17 }
 0xe36   :  { %v4787_v62 = vpop.f32.mrf.mxu0  ;;  %v4767_v61 = vpop.f32.mrf.mxu3 }
 0xe37   :  { %v4788_v46 = vadd.f32 %v4787_v62, %v4527_v8  ;;  %v4744_v57 = vpop.f32.mrf.mxu1  ;;  %v5004_v62 = vld [vmem:[%s14164_s4 + $0x630] sm:$0xff] }
 0xe38   :  { %v4745_v51 = vadd.f32 %v4744_v57, %v4532_v25  ;;  %v5044_v57 = vld [vmem:[%s14164_s4 + $0x770] sm:$0xff] }
 0xe39   :  { %v4811_v40 = vadd.f32 %v4810_v38, %v4788_v46  ;;  %v4970_v38 = vld [vmem:[%s14164_s4 + $0x520] sm:$0xff] }
 0xe3a   :  { %v13170_v49 = vadd.f32 %v4767_v61, %v4745_v51  ;;  %v5046_v46 = vld [vmem:[%s14164_s4 + $0x780] sm:$0xff]  ;;  %v4968_v61 = vld [vmem:[%s14164_s4 + $0x510] sm:$0xff] }
 0xe3b   :  { %4838 = vrot.lane.b32.xlu0 %v4811_v40, %s8016_s17  ;;  %v5002_v51 = vld [vmem:[%s14164_s4 + $0x620] sm:$0xff]  ;;  %5171 = vmatpush.msrb.mxu2 %v5046_v46  ;;  %v5064_v46 = vld [vmem:[%s14164_s4 + $0x810] sm:$0xff] }
 0xe3c   :  { %4848 = vrot.lane.b32.xlu2 %v13170_v49, %s8016_s17 }
 0xe3d   :  { %5172 = vmatpush.msrb.mxu2 %v5044_v57  ;;  %v5096_v57 = vld [vmem:[%s14164_s4 + $0x910] sm:$0xff] }
 0xe3e   :  { %v4790_v39 = vpop.f32.mrf.mxu0 }
 0xe3f   :  { %v4791_v27 = vadd.f32 %v4790_v39, %v4532_v25  ;;  %v5014_v25 = vld [vmem:[%s14164_s4 + $0x680] sm:$0xff]  ;;  %v5000_v39 = vld [vmem:[%s14164_s4 + $0x610] sm:$0xff] }
 0xe40   :  { %5148 = vmatpush.msrb.mxu1 %v5014_v25  ;;  %v5030_v25 = vld [vmem:[%s14164_s4 + $0x700] sm:$0xff] }
 0xe41   :  { %v4814_v31 = vadd.f32 %v4813_v26, %v4791_v27  ;;  %v5040_v26 = vld [vmem:[%s14164_s4 + $0x750] sm:$0xff] }
 0xe42   :  { %5149 = vmatpush.msrb.mxu1 %v5012_v28  ;;  %v4964_v27 = vld [vmem:[%s14164_s4 + $0x4f0] sm:$0xff] }
 0xe43   :  { %4850 = vrot.lane.b32.xlu0 %v4814_v31, %s8016_s17  ;;  %v5108_v28 = vld [vmem:[%s14164_s4 + $0x970] sm:$0xff] }
 0xe44   :  { %5150 = vmatpush.msrb.mxu1 %v5010_v60  ;;  %v5100_v60 = vld [vmem:[%s14164_s4 + $0x930] sm:$0xff] }
 0xe46   :  { %5151 = vmatpush.msrb.mxu1 %v5008_v6  ;;  %v5020_v6 = vld [vmem:[%s14164_s4 + $0x6b0] sm:$0xff] }
 0xe71   :  { %v7667_v13 = vpop.permute.xlu1 %7666 }
 0xe72   :  { %v7669_v3 = vunpack.i.h.bf16 %v7667_v13  ;;  %v7668_v0 = vunpack.i.l.bf16 %v7667_v13  ;;  %v5038_v13 = vld [vmem:[%s14164_s4 + $0x740] sm:$0xff] }
 0xe74   :  { %v4852_v20 = vsel %vm15093_vm3, %v7668_v0, %v7669_v3  ;;  %v4996_v0 = vld [vmem:[%s14164_s4 + $0x5f0] sm:$0xff]  ;;  %vm15106_vm3 = vmmov %vm15095_vm0 }
 0xe75   :  { %v13183_v32 = vmax.f32 %v13143_v7, %v4852_v20  ;;  %v4982_v7 = vld [vmem:[%s14164_s4 + $0x580] sm:$0xff] }
 0xe76   :  { %5125 = vmatpush.msrb.mxu3 %v4982_v7  ;;  %v4958_v20 = vld [vmem:[%s14164_s4 + $0x4c0] sm:$0xff] }
 0xe77   :  { %v5110_v7 = vld [vmem:[%s14164_s4 + $0x980] sm:$0x7f] }
 0xe79   :  { %v7677_v44 = vpop.permute.xlu0 %7676 }
 0xe7a   :  { %v7679_v42 = vunpack.i.h.bf16 %v7677_v44  ;;  %v7678_v9 = vunpack.i.l.bf16 %v7677_v44  ;;  %v5036_v44 = vld [vmem:[%s14164_s4 + $0x730] sm:$0xff] }
 0xe7b   :  { %v7672_v11 = vpop.permute.xlu2 %7671 }
 0xe7c   :  { %v4857_v10 = vsel %vm15094_vm4, %v7678_v9, %v7679_v42  ;;  %v7674_v47 = vunpack.i.h.bf16 %v7672_v11  ;;  %v7673_v5 = vunpack.i.l.bf16 %v7672_v11  ;;  %v4994_v9 = vld [vmem:[%s14164_s4 + $0x5e0] sm:$0xff]  ;;  %vm5500_vm4 = vcmask 932864  }
 0xe7d   :  { %v13178_v1 = vmax.f32 %v4584_v2, %v4857_v10  ;;  %v5034_v11 = vld [vmem:[%s14164_s4 + $0x720] sm:$0xff]  ;;  %v4992_v10 = vld [vmem:[%s14164_s4 + $0x5d0] sm:$0xff] }
 0xe7e   :  { %v4853_v8 = vsel %vm15095_vm0, %v7669_v3, %v7673_v5  ;;  %v4854_v63 = vsel %vm15096_vm5, %v7673_v5, %v7674_v47  ;;  %v4962_v3 = vld [vmem:[%s14164_s4 + $0x4e0] sm:$0xff]  ;;  %vm5493_vm0 = vcmask 941056   ;;  %vm5479_vm5 = vcmask 957440  }
 0xe7f   :  { %v13186_v19 = vmax.f32 %v13145_v4, %v4853_v8  ;;  %v13188_v53 = vmax.f32 %v4673_v23, %v4854_v63  ;;  %v4980_v4 = vld [vmem:[%s14164_s4 + $0x570] sm:$0xff]  ;;  %v4990_v5 = vld [vmem:[%s14164_s4 + $0x5c0] sm:$0xff] }
 0xe80   :  { %5126 = vmatpush.msrb.mxu3 %v4980_v4  ;;  %v4954_v8 = vld [vmem:[%s14164_s4 + $0x4a0] sm:$0xff]  ;;  %v4988_v63 = vld [vmem:[%s14164_s4 + $0x5b0] sm:$0xff] }
 0xe81   :  { %v7685_v36 = vpack.i.bf16 %v13178_v1, %v13188_v53  ;;  %v7680_v17 = vpack.i.bf16 %v13186_v19, %v13183_v32  ;;  %v4984_v4 = vld [vmem:[%s14164_s4 + $0x590] sm:$0xff] }
 0xe82   :  { %5127 = vmatpush.msrb.mxu3 %v4978_v43  ;;  %v5028_v43 = vld [vmem:[%s14164_s4 + $0x6f0] sm:$0xff] }
 0xe83   :  { %7686 = vrot.lane.b32.xlu2 %v7685_v36, %s8008_s28  ;;  %7681 = vrot.lane.b32.xlu1 %v7680_v17, %s8008_s28  ;;  %v4952_v36 = vld [vmem:[%s14164_s4 + $0x490] sm:$0xff]  ;;  %v4986_v17 = vld [vmem:[%s14164_s4 + $0x5a0] sm:$0xff] }
 0xe84   :  { %5128 = vmatpush.msrb.mxu3 %v4976_v14  ;;  %v5068_v14 = vld [vmem:[%s14164_s4 + $0x830] sm:$0xff] }
 0xe8e   :  { %v4837_v16 = vpop.permute.xlu2 %4836 }
 0xe8f   :  { %v4855_v45 = vsel %vm15097_vm7, %v7674_v47, %v4837_v16  ;;  %v4956_v47 = vld [vmem:[%s14164_s4 + $0x4b0] sm:$0xff]  ;;  %vm5507_vm7 = vcmask 924672  }
 0xe90   :  { %v13214_v2 = vmax.f32 %v13154_v18, %v4855_v45  ;;  %v5078_v45 = vld [vmem:[%s14164_s4 + $0x880] sm:$0xff] }
 0xe91   :  { %5194 = vmatpush.msra.mxu0 %v5078_v45  ;;  %v5084_v45 = vld [vmem:[%s14164_s4 + $0x8b0] sm:$0xff] }
 0xe96   :  { %v4849_v24 = vpop.permute.xlu2 %4848 }
 0xe9a   :  { %v4845_v30 = vpop.permute.xlu1 %4844 }
 0xe9b   :  { %v4858_v33 = vsel %vm15098_vm2, %v7679_v42, %v4845_v30  ;;  %v4960_v42 = vld [vmem:[%s14164_s4 + $0x4d0] sm:$0xff]  ;;  %vm15109_vm2 = vcmask 1031168  }
 0xe9c   :  { %v13217_v22 = vmax.f32 %v13150_v54, %v4858_v33  ;;  %v4983_v33 = vld [vmem:[%s14164_s4 + $0x588] sm:$0xff] }
 0xe9e   :  { %v7690_v29 = vpack.i.bf16 %v13214_v2, %v13217_v22 }
 0xea0   :  { %7691 = vrot.lane.b32.xlu0 %v7690_v29, %s8008_s28  ;;  %v5074_v29 = vld [vmem:[%s14164_s4 + $0x860] sm:$0xff] }
 0xea2   :  { %v4847_v12 = vpop.permute.xlu1 %4846 }
 0xea3   :  { %v4859_v50 = vsel %vm15099_vm8, %v4845_v30, %v4847_v12  ;;  %v4860_v34 = vsel %vm15100_vm12, %v4847_v12, %v4849_v24  ;;  %v5076_v30 = vld [vmem:[%s14164_s4 + $0x870] sm:$0xff]  ;;  %v4981_v12 = vld [vmem:[%s14164_s4 + $0x578] sm:$0xff]  ;;  %vm15111_vm8 = vmmov %vm15105_vm1 }
 0xea4   :  { %v13225_v21 = vmax.f32 %v13158_v15, %v4859_v50  ;;  %v13228_v54 = vmax.f32 %v13162_v55, %v4860_v34  ;;  %v4974_v55 = vld [vmem:[%s14164_s4 + $0x540] sm:$0xff]  ;;  %5195 = vmatpush.msra.mxu0 %v5076_v30  ;;  %v5072_v34 = vld [vmem:[%s14164_s4 + $0x850] sm:$0xff]  ;;  %vm15112_vm12 = vmmov %vm15105_vm1 }
 0xea5   :  { %5129 = vmatpush.msrb.mxu3 %v4974_v55  ;;  %v5026_v50 = vld [vmem:[%s14164_s4 + $0x6e0] sm:$0xff]  ;;  %v4975_v55 = vld [vmem:[%s14164_s4 + $0x548] sm:$0xff] }
 0xea6   :  { %v7695_v18 = vpack.i.bf16 %v13228_v54, %v13225_v21  ;;  %5196 = vmatpush.msra.mxu0 %v5074_v29  ;;  %v5082_v29 = vld [vmem:[%s14164_s4 + $0x8a0] sm:$0xff] }
 0xea7   :  { %5130 = vmatpush.msrb.mxu3 %v4972_v56  ;;  %v5066_v56 = vld [vmem:[%s14164_s4 + $0x820] sm:$0xff] }
 0xea8   :  { %7696 = vrot.lane.b32.xlu0 %v7695_v18, %s8008_s28  ;;  %v5104_v18 = vld [vmem:[%s14164_s4 + $0x950] sm:$0xff]  ;;  %5197 = vmatpush.msra.mxu0 %v5072_v34 }
 0xea9   :  { %5131 = vmatpush.msrb.mxu3 %v4970_v38  ;;  %v4973_v38 = vld [vmem:[%s14164_s4 + $0x538] sm:$0xff] }
 0xeab   :  { %5132 = vmatpush.msrb.mxu3 %v4968_v61  ;;  %v4971_v61 = vld [vmem:[%s14164_s4 + $0x528] sm:$0xff] }
 0xead   :  { %v4839_v23 = vpop.permute.xlu0 %4838 }
 0xeae   :  { %v4856_v58 = vsel %vm15101_vm13, %v4837_v16, %v4839_v23  ;;  %v4879_v48 = vmax.f32 %v4811_v40, %v4839_v23  ;;  %v5042_v40 = vld [vmem:[%s14164_s4 + $0x760] sm:$0xff]  ;;  %v5032_v16 = vld [vmem:[%s14164_s4 + $0x710] sm:$0xff]  ;;  %v4979_v23 = vld [vmem:[%s14164_s4 + $0x568] sm:$0xff]  ;;  %vm5582_vm13 = vcmask 744448  }
 0xeaf   :  { %v13235_v35 = vmax.f32 %v13166_v37, %v4856_v58  ;;  %v5006_v37 = vld [vmem:[%s14164_s4 + $0x640] sm:$0xff]  ;;  %5173 = vmatpush.msrb.mxu2 %v5042_v40  ;;  %v5024_v58 = vld [vmem:[%s14164_s4 + $0x6d0] sm:$0xff] }
 0xeb0   :  { %4908 = vrot.lane.b32.xlu2 %v4879_v48, %s8008_s28  ;;  %5152 = vmatpush.msrb.mxu1 %v5006_v37  ;;  %v5070_v48 = vld [vmem:[%s14164_s4 + $0x840] sm:$0xff] }
 0xeb1   :  { %4906 = vrot.lane.b32.xlu1 %v13235_v35, %s8008_s28  ;;  %5174 = vmatpush.msrb.mxu2 %v5040_v26  ;;  %v5098_v37 = vld [vmem:[%s14164_s4 + $0x920] sm:$0xff]  ;;  %v5015_v26 = vld [vmem:[%s14164_s4 + $0x688] sm:$0xff] }
 0xeb2   :  { %5153 = vmatpush.msrb.mxu1 %v5004_v62  ;;  %5198 = vmatpush.msra.mxu0 %v5070_v48  ;;  %v5018_v62 = vld [vmem:[%s14164_s4 + $0x6a0] sm:$0xff] }
 0xeb3   :  { %5175 = vmatpush.msrb.mxu2 %v5038_v13  ;;  %v5062_v40 = vld [vmem:[%s14164_s4 + $0x800] sm:$0xff]  ;;  %v4967_v13 = vld [vmem:[%s14164_s4 + $0x508] sm:$0xff] }
 0xeb4   :  { %5154 = vmatpush.msrb.mxu1 %v5002_v51  ;;  %5199 = vmatpush.msra.mxu0 %v5068_v14  ;;  %v5016_v51 = vld [vmem:[%s14164_s4 + $0x690] sm:$0xff]  ;;  %v4999_v14 = vld [vmem:[%s14164_s4 + $0x608] sm:$0xff] }
 0xeb5   :  { %v4851_v59 = vpop.permute.xlu0 %4850  ;;  %5176 = vmatpush.msrb.mxu2 %v5036_v44  ;;  %v5090_v44 = vld [vmem:[%s14164_s4 + $0x8e0] sm:$0xff] }
 0xeb6   :  { %v4861_v15 = vsel %vm15102_vm9, %v4849_v24, %v4851_v59  ;;  %v4885_v52 = vmax.f32 %v4814_v31, %v4851_v59  ;;  %v4998_v31 = vld [vmem:[%s14164_s4 + $0x600] sm:$0xff]  ;;  %5155 = vmatpush.msrb.mxu1 %v5000_v39  ;;  %5200 = vmatpush.msra.mxu0 %v5066_v56  ;;  %v4969_v39 = vld [vmem:[%s14164_s4 + $0x518] sm:$0xff]  ;;  %vm15113_vm9 = vcmask 130048  }
 0xeb7   :  { %v13242_v41 = vmax.f32 %v13170_v49, %v4861_v15  ;;  %v4966_v49 = vld [vmem:[%s14164_s4 + $0x500] sm:$0xff]  ;;  %5177 = vmatpush.msrb.mxu2 %v5034_v11  ;;  %v4977_v15 = vld [vmem:[%s14164_s4 + $0x558] sm:$0xff]  ;;  %v5056_v11 = vld [vmem:[%s14164_s4 + $0x7d0] sm:$0xff] }
 0xeb8   :  { %4920 = vrot.lane.b32.xlu2 %v4885_v52, %s8008_s28  ;;  %5133 = vmatpush.msrb.mxu3 %v4966_v49  ;;  %v5106_v24 = vld [vmem:[%s14164_s4 + $0x960] sm:$0xff]  ;;  %v4997_v56 = vld [vmem:[%s14164_s4 + $0x5f8] sm:$0xff] }
 0xeb9   :  { %4918 = vrot.lane.b32.xlu1 %v13242_v41, %s8008_s28  ;;  %5156 = vmatpush.msrb.mxu1 %v4998_v31  ;;  %v5102_v59 = vld [vmem:[%s14164_s4 + $0x940] sm:$0xff]  ;;  %v5092_v31 = vld [vmem:[%s14164_s4 + $0x8f0] sm:$0xff] }
 0xeba   :  { %5134 = vmatpush.msrb.mxu3 %v4964_v27  ;;  %5178 = vmatpush.msrb.mxu2 %v5032_v16  ;;  %v5022_v52 = vld [vmem:[%s14164_s4 + $0x6c0] sm:$0xff]  ;;  %v5060_v27 = vld [vmem:[%s14164_s4 + $0x7f0] sm:$0xff] }
 0xebb   :  { %5157 = vmatpush.msrb.mxu1 %v4996_v0  ;;  %5201 = vmatpush.msra.mxu0 %v5064_v46  ;;  %v5094_v49 = vld [vmem:[%s14164_s4 + $0x900] sm:$0xff]  ;;  %v4995_v46 = vld [vmem:[%s14164_s4 + $0x5e8] sm:$0xff] }
 0xebc   :  { %5135 = vmatpush.msrb.mxu3 %v4962_v3  ;;  %5179 = vmatpush.msrb.mxu2 %v5030_v25  ;;  %v5013_v3 = vld [vmem:[%s14164_s4 + $0x678] sm:$0xff]  ;;  %v5058_v0 = vld [vmem:[%s14164_s4 + $0x7e0] sm:$0xff] }
 0xebd   :  { %5158 = vmatpush.msrb.mxu1 %v4994_v9  ;;  %5202 = vmatpush.msra.mxu0 %v5062_v40  ;;  %v5011_v9 = vld [vmem:[%s14164_s4 + $0x668] sm:$0xff]  ;;  %v4993_v40 = vld [vmem:[%s14164_s4 + $0x5d8] sm:$0xff] }
 0xebe   :  { %5136 = vmatpush.msrb.mxu3 %v4960_v42  ;;  %5180 = vmatpush.msrb.mxu2 %v5028_v43  ;;  %v4965_v42 = vld [vmem:[%s14164_s4 + $0x4f8] sm:$0xff]  ;;  %v5050_v43 = vld [vmem:[%s14164_s4 + $0x7a0] sm:$0xff] }
 0xebf   :  { %5159 = vmatpush.msrb.mxu1 %v4992_v10  ;;  %5203 = vmatpush.msra.mxu0 %v5060_v27  ;;  %v4963_v10 = vld [vmem:[%s14164_s4 + $0x4e8] sm:$0xff] }
 0xec0   :  { %5137 = vmatpush.msrb.mxu3 %v4958_v20  ;;  %5181 = vmatpush.msrb.mxu2 %v5026_v50  ;;  %v5088_v20 = vld [vmem:[%s14164_s4 + $0x8d0] sm:$0xff]  ;;  %v4991_v27 = vld [vmem:[%s14164_s4 + $0x5c8] sm:$0xff] }
 0xec1   :  { %5160 = vmatpush.msrb.mxu1 %v4990_v5  ;;  %5204 = vmatpush.msra.mxu0 %v5058_v0  ;;  %v5054_v5 = vld [vmem:[%s14164_s4 + $0x7c0] sm:$0xff]  ;;  %v5048_v50 = vld [vmem:[%s14164_s4 + $0x790] sm:$0xff]  ;;  %v4989_v0 = vld [vmem:[%s14164_s4 + $0x5b8] sm:$0xff] }
 0xec2   :  { %5138 = vmatpush.msrb.mxu3 %v4956_v47  ;;  %5182 = vmatpush.msrb.mxu2 %v5024_v58  ;;  %v5009_v47 = vld [vmem:[%s14164_s4 + $0x658] sm:$0xff]  ;;  %v4955_v58 = vld [vmem:[%s14164_s4 + $0x4a8] sm:$0xff] }
 0xec3   :  { %5161 = vmatpush.msrb.mxu1 %v4988_v63  ;;  %5205 = vmatpush.msra.mxu0 %v5056_v11  ;;  %v4961_v63 = vld [vmem:[%s14164_s4 + $0x4d8] sm:$0xff]  ;;  %v4987_v11 = vld [vmem:[%s14164_s4 + $0x5a8] sm:$0xff] }
 0xec4   :  { %5139 = vmatpush.msrb.mxu3 %v4954_v8  ;;  %5183 = vmatpush.msrb.mxu2 %v5022_v52  ;;  %v5086_v8 = vld [vmem:[%s14164_s4 + $0x8c0] sm:$0xff]  ;;  %v5047_v52 = vld [vmem:[%s14164_s4 + $0x788] sm:$0xff] }
 0xec5   :  { %5162 = vmatpush.msrb.mxu1 %v4986_v17  ;;  %v5052_v17 = vld [vmem:[%s14164_s4 + $0x7b0] sm:$0xff]  ;;  %5206 = vmatpush.msra.mxu0 %v5054_v5  ;;  %v4985_v5 = vld [vmem:[%s14164_s4 + $0x598] sm:$0xff] }
 0xec6   :  { %5140 = vmatpush.msrb.mxu3 %v4952_v36  ;;  %5184 = vmatpush.msrb.mxu2 %v5020_v6  ;;  %v5007_v36 = vld [vmem:[%s14164_s4 + $0x648] sm:$0xff] }
 0xec7   :  { %5163 = vmatpush.msrb.mxu1 %v4984_v4  ;;  %5207 = vmatpush.msra.mxu0 %v5052_v17  ;;  %v5111_v6 = vld [vmem:[%s14164_s4 + $0x988] sm:$0x7f]  ;;  %v5029_v17 = vld [vmem:[%s14164_s4 + $0x6f8] sm:$0xff] }
 0xec8   :  { %6342 = vmatpush.msk.msra.mxu3 %vm5118_vm6, %v5110_v7  ;;  %5185 = vmatpush.msrb.mxu2 %v5018_v62  ;;  %v4959_v7 = vld [vmem:[%s14164_s4 + $0x4c8] sm:$0xff]  ;;  %v5109_v62 = vld [vmem:[%s14164_s4 + $0x978] sm:$0xff] }
 0xec9   :  { %5240 = vmatpush.msra.mxu1 %v4983_v33  ;;  %v5005_v33 = vld [vmem:[%s14164_s4 + $0x638] sm:$0xff]  ;;  %5208 = vmatpush.msra.mxu0 %v5050_v43 }
 0xeca   :  { %5218 = vmatpush.msra.mxu3 %v5108_v28  ;;  %5186 = vmatpush.msrb.mxu2 %v5016_v51  ;;  %v5107_v51 = vld [vmem:[%s14164_s4 + $0x968] sm:$0xff]  ;;  %v5057_v43 = vld [vmem:[%s14164_s4 + $0x7d8] sm:$0xff] }
 0xecb   :  { %5241 = vmatpush.msra.mxu1 %v4981_v12  ;;  %v5003_v12 = vld [vmem:[%s14164_s4 + $0x628] sm:$0xff]  ;;  %5209 = vmatpush.msra.mxu0 %v5048_v50 }
 0xecc   :  { %5219 = vmatpush.msra.mxu3 %v5106_v24  ;;  %5263 = vmatpush.msra.mxu2 %v5015_v26  ;;  %v4957_v24 = vld [vmem:[%s14164_s4 + $0x4b8] sm:$0xff]  ;;  %v5055_v50 = vld [vmem:[%s14164_s4 + $0x7c8] sm:$0xff] }
 0xecd   :  { %5242 = vmatpush.msra.mxu1 %v4979_v23  ;;  %v5080_v23 = vld [vmem:[%s14164_s4 + $0x890] sm:$0xff]  ;;  %5286 = vmatpush.msrb.mxu0 %v5047_v52  ;;  %v5105_v26 = vld [vmem:[%s14164_s4 + $0x958] sm:$0xff] }
 0xece   :  { %5220 = vmatpush.msra.mxu3 %v5104_v18  ;;  %5264 = vmatpush.msra.mxu2 %v5013_v3  ;;  %v5103_v3 = vld [vmem:[%s14164_s4 + $0x948] sm:$0xff]  ;;  %v5053_v52 = vld [vmem:[%s14164_s4 + $0x7b8] sm:$0xff] }
 0xecf   :  { %5243 = vmatpush.msra.mxu1 %v4977_v15  ;;  %v5001_v15 = vld [vmem:[%s14164_s4 + $0x618] sm:$0xff] }
 0xed0   :  { %5221 = vmatpush.msra.mxu3 %v5102_v59  ;;  %5265 = vmatpush.msra.mxu2 %v5011_v9  ;;  %v5101_v9 = vld [vmem:[%s14164_s4 + $0x938] sm:$0xff] }
 0xed1   :  { %5244 = vmatpush.msra.mxu1 %v4975_v55  ;;  %v5077_v55 = vld [vmem:[%s14164_s4 + $0x878] sm:$0xff] }
 0xed2   :  { %5222 = vmatpush.msra.mxu3 %v5100_v60  ;;  %5266 = vmatpush.msra.mxu2 %v5009_v47  ;;  %v5045_v60 = vld [vmem:[%s14164_s4 + $0x778] sm:$0xff]  ;;  %v5099_v47 = vld [vmem:[%s14164_s4 + $0x928] sm:$0xff] }
 0xed3   :  { %5245 = vmatpush.msra.mxu1 %v4973_v38  ;;  %5287 = vmatpush.msrb.mxu0 %v5045_v60  ;;  %v5075_v38 = vld [vmem:[%s14164_s4 + $0x868] sm:$0xff] }
 0xed4   :  { %5223 = vmatpush.msra.mxu3 %v5098_v37  ;;  %5267 = vmatpush.msra.mxu2 %v5007_v36  ;;  %v5043_v37 = vld [vmem:[%s14164_s4 + $0x768] sm:$0xff]  ;;  %v5097_v36 = vld [vmem:[%s14164_s4 + $0x918] sm:$0xff] }
 0xed5   :  { %5246 = vmatpush.msra.mxu1 %v4971_v61  ;;  %5288 = vmatpush.msrb.mxu0 %v5043_v37  ;;  %v5073_v61 = vld [vmem:[%s14164_s4 + $0x858] sm:$0xff] }
 0xed6   :  { %5224 = vmatpush.msra.mxu3 %v5096_v57  ;;  %5268 = vmatpush.msra.mxu2 %v5005_v33  ;;  %v5041_v57 = vld [vmem:[%s14164_s4 + $0x758] sm:$0xff] }
 0xed7   :  { %5247 = vmatpush.msra.mxu1 %v4969_v39  ;;  %5289 = vmatpush.msrb.mxu0 %v5041_v57  ;;  %v5071_v39 = vld [vmem:[%s14164_s4 + $0x848] sm:$0xff]  ;;  %v5025_v33 = vld [vmem:[%s14164_s4 + $0x6d8] sm:$0xff] }
 0xed8   :  { %5225 = vmatpush.msra.mxu3 %v5094_v49  ;;  %5269 = vmatpush.msra.mxu2 %v5003_v12  ;;  %v5039_v49 = vld [vmem:[%s14164_s4 + $0x748] sm:$0xff] }
 0xed9   :  { %5248 = vmatpush.msra.mxu1 %v4967_v13  ;;  %5290 = vmatpush.msrb.mxu0 %v5039_v49  ;;  %v5069_v13 = vld [vmem:[%s14164_s4 + $0x838] sm:$0xff] }
 0xeda   :  { %5226 = vmatpush.msra.mxu3 %v5092_v31  ;;  %5270 = vmatpush.msra.mxu2 %v5001_v15  ;;  %v5037_v31 = vld [vmem:[%s14164_s4 + $0x738] sm:$0xff] }
 0xedb   :  { %5249 = vmatpush.msra.mxu1 %v4965_v42  ;;  %5291 = vmatpush.msrb.mxu0 %v5037_v31  ;;  %v5067_v42 = vld [vmem:[%s14164_s4 + $0x828] sm:$0xff]  ;;  %v5021_v15 = vld [vmem:[%s14164_s4 + $0x6b8] sm:$0xff] }
 0xedc   :  { %5227 = vmatpush.msra.mxu3 %v5090_v44  ;;  %5271 = vmatpush.msra.mxu2 %v4999_v14  ;;  %v5035_v44 = vld [vmem:[%s14164_s4 + $0x728] sm:$0xff] }
 0xedd   :  { %5250 = vmatpush.msra.mxu1 %v4963_v10  ;;  %v13509_v16 = vpop.permute.xlu2 %7686  ;;  %5292 = vmatpush.msrb.mxu0 %v5035_v44  ;;  %v5065_v10 = vld [vmem:[%s14164_s4 + $0x818] sm:$0xff] }
 0xede   :  { %5228 = vmatpush.msra.mxu3 %v5088_v20  ;;  %v7688_v25 = vunpack.i.l.bf16 %v13509_v16  ;;  %5272 = vmatpush.msra.mxu2 %v4997_v56  ;;  %v5033_v20 = vld [vmem:[%s14164_s4 + $0x718] sm:$0xff]  ;;  %v5051_v56 = vld [vmem:[%s14164_s4 + $0x7a8] sm:$0xff] }
 0xedf   :  { %5251 = vmatpush.msra.mxu1 %v4961_v63  ;;  %5293 = vmatpush.msrb.mxu0 %v5033_v20  ;;  %v5063_v63 = vld [vmem:[%s14164_s4 + $0x808] sm:$0xff] }
 0xee0   :  { %5229 = vmatpush.msra.mxu3 %v5086_v8  ;;  %5273 = vmatpush.msra.mxu2 %v4995_v46  ;;  %v5031_v8 = vld [vmem:[%s14164_s4 + $0x708] sm:$0xff]  ;;  %v5081_v46 = vld [vmem:[%s14164_s4 + $0x898] sm:$0xff] }
 0xee1   :  { %5252 = vmatpush.msra.mxu1 %v4959_v7  ;;  %5294 = vmatpush.msrb.mxu0 %v5031_v8  ;;  %v5095_v7 = vld [vmem:[%s14164_s4 + $0x908] sm:$0xff] }
 0xee2   :  { %5230 = vmatpush.msra.mxu3 %v5084_v45  ;;  %5274 = vmatpush.msra.mxu2 %v4993_v40  ;;  %v5061_v45 = vld [vmem:[%s14164_s4 + $0x7f8] sm:$0xff] }
 0xee3   :  { %5253 = vmatpush.msra.mxu1 %v4957_v24  ;;  %5295 = vmatpush.msrb.mxu0 %v5029_v17  ;;  %v5023_v24 = vld [vmem:[%s14164_s4 + $0x6c8] sm:$0xff] }
 0xee4   :  { %5231 = vmatpush.msra.mxu3 %v5082_v29  ;;  %5275 = vmatpush.msra.mxu2 %v4991_v27  ;;  %v5091_v29 = vld [vmem:[%s14164_s4 + $0x8e8] sm:$0xff] }
 0xee5   :  { %5254 = vmatpush.msra.mxu1 %v4955_v58 }
 0xee6   :  { %5232 = vmatpush.msra.mxu3 %v5080_v23  ;;  %5276 = vmatpush.msra.mxu2 %v4989_v0 }
 0xee8   :  { %5277 = vmatpush.msra.mxu2 %v4987_v11 }
 0xeea   :  { %5278 = vmatpush.msra.mxu2 %v4985_v5 }
 0xef5   :  { %v7682_v4 = vpop.permute.xlu1 %7681 }
 0xef6   :  { %v7684_v30 = vunpack.i.h.bf16 %v7682_v4  ;;  %v7683_v28 = vunpack.i.l.bf16 %v7682_v4  ;;  %v5027_v4 = vld [vmem:[%s14164_s4 + $0x6e8] sm:$0xff] }
 0xef7   :  { %5296 = vmatpush.msrb.mxu0 %v5027_v4 }
 0xef8   :  { %v4923_v34 = vsel %vm162_vm10, %v7684_v30, %v7688_v25  ;;  %v4922_v18 = vsel %vm162_vm10, %v7683_v28, %v7684_v30  ;;  %v5059_v30 = vld [vmem:[%s14164_s4 + $0x7e8] sm:$0xff]  ;;  %v5093_v28 = vld [vmem:[%s14164_s4 + $0x8f8] sm:$0xff] }
 0xef9   :  { %v13547_v48 = vmax.f32 %v13186_v19, %v4923_v34  ;;  %v13550_v59 = vmax.f32 %v13183_v32, %v4922_v18  ;;  %v5079_v19 = vld [vmem:[%s14164_s4 + $0x888] sm:$0xff]  ;;  %v4953_v32 = vld [vmem:[%s14164_s4 + $0x498] sm:$0xff]  ;;  %5297 = vmatpush.msrb.mxu0 %v5025_v33  ;;  %v7689_v18 = vunpack.i.h.bf16 %v13509_v16 }
 0xefa   :  { %5255 = vmatpush.msra.mxu1 %v4953_v32  ;;  %v5089_v34 = vld [vmem:[%s14164_s4 + $0x8d8] sm:$0xff] }
 0xefb   :  { %5141 = vmatmul.f32.vlgmr.msrb.gmra.mxu3 %v13550_v59  ;;  %5164 = vmatmul.f32.vlgmr.msrb.gmra.mxu1 %v13547_v48  ;;  %v5085_v16 = vld [vmem:[%s14164_s4 + $0x8b8] sm:$0xff] }
 0xefc   :  { %5309 = vmatpush.msrb.mxu3 %v5079_v19  ;;  %6345 = vmatpush.msk.msrb.mxu1 %vm5118_vm6, %v5111_v6  ;;  %v5087_v19 = vld [vmem:[%s14164_s4 + $0x8c8] sm:$0xff] }
 0xefd   :  { %5298 = vmatpush.msrb.mxu0 %v5023_v24  ;;  %v5019_v6 = vld [vmem:[%s14164_s4 + $0x6a8] sm:$0xff] }
 0xefe   :  { %5310 = vmatpush.msrb.mxu3 %v5077_v55  ;;  %5333 = vmatpush.msrb.mxu1 %v5109_v62 }
 0xeff   :  { %5299 = vmatpush.msrb.mxu0 %v5021_v15 }
 0xf00   :  { %5311 = vmatpush.msrb.mxu3 %v5075_v38  ;;  %5334 = vmatpush.msrb.mxu1 %v5107_v51 }
 0xf01   :  { %5300 = vmatpush.msrb.mxu0 %v5019_v6 }
 0xf02   :  { %5312 = vmatpush.msrb.mxu3 %v5073_v61  ;;  %5335 = vmatpush.msrb.mxu1 %v5105_v26 }
 0xf04   :  { %5313 = vmatpush.msrb.mxu3 %v5071_v39  ;;  %5336 = vmatpush.msrb.mxu1 %v5103_v3 }
 0xf06   :  { %5314 = vmatpush.msrb.mxu3 %v5069_v13  ;;  %5337 = vmatpush.msrb.mxu1 %v5101_v9 }
 0xf08   :  { %5315 = vmatpush.msrb.mxu3 %v5067_v42  ;;  %5338 = vmatpush.msrb.mxu1 %v5099_v47 }
 0xf0a   :  { %5316 = vmatpush.msrb.mxu3 %v5065_v10  ;;  %5339 = vmatpush.msrb.mxu1 %v5097_v36  ;;  %v4909_v49 = vpop.permute.xlu2 %4908 }
 0xf0c   :  { %5317 = vmatpush.msrb.mxu3 %v5063_v63  ;;  %5340 = vmatpush.msrb.mxu1 %v5095_v7 }
 0xf0e   :  { %5318 = vmatpush.msrb.mxu3 %v5061_v45  ;;  %5341 = vmatpush.msrb.mxu1 %v5093_v28 }
 0xf10   :  { %5319 = vmatpush.msrb.mxu3 %v5059_v30  ;;  %5342 = vmatpush.msrb.mxu1 %v5091_v29 }
 0xf12   :  { %v7692_v12 = vpop.permute.xlu0 %7691  ;;  %5320 = vmatpush.msrb.mxu3 %v5057_v43  ;;  %5343 = vmatpush.msrb.mxu1 %v5089_v34 }
 0xf13   :  { %v7694_v23 = vunpack.i.h.bf16 %v7692_v12  ;;  %v7693_v58 = vunpack.i.l.bf16 %v7692_v12 }
 0xf14   :  { %5321 = vmatpush.msrb.mxu3 %v5055_v50  ;;  %5344 = vmatpush.msrb.mxu1 %v5087_v19 }
 0xf15   :  { %v4924_v32 = vsel %vm162_vm10, %v7688_v25, %v7694_v23  ;;  %v4927_v14 = vsel %vm162_vm10, %v7689_v18, %v7693_v58  ;;  %v5083_v25 = vld [vmem:[%s14164_s4 + $0x8a8] sm:$0xff] }
 0xf16   :  { %v4944_v60 = vmax.f32 %v13188_v53, %v4924_v32  ;;  %v4947_v55 = vmax.f32 %v13178_v1, %v4927_v14  ;;  %5322 = vmatpush.msrb.mxu3 %v5053_v52  ;;  %v5017_v1 = vld [vmem:[%s14164_s4 + $0x698] sm:$0xff]  ;;  %5345 = vmatpush.msrb.mxu1 %v5085_v16 }
 0xf17   :  { %v5049_v53 = vld [vmem:[%s14164_s4 + $0x798] sm:$0xff]  ;;  %5301 = vmatpush.msrb.mxu0 %v5017_v1 }
 0xf18   :  { %5144 = vmatmul.f32.gmra.mxu3 %v4947_v55  ;;  %5187 = vmatmul.f32.vlgmr.msrb.gmra.mxu2 %v4944_v60 }
 0xf19   :  { %5323 = vmatpush.msrb.mxu3 %v5051_v56  ;;  %5346 = vmatpush.msrb.mxu1 %v5083_v25 }
 0xf1a   :  { %v7697_v37 = vpop.permute.xlu0 %7696 }
 0xf1b   :  { %v7699_v38 = vunpack.i.h.bf16 %v7697_v37  ;;  %v7698_v62 = vunpack.i.l.bf16 %v7697_v37  ;;  %5324 = vmatpush.msrb.mxu3 %v5049_v53  ;;  %5347 = vmatpush.msrb.mxu1 %v5081_v46 }
 0xf1d   :  { %v4928_v57 = vsel %vm162_vm10, %v7693_v58, %v7698_v62  ;;  %v4929_v61 = vsel %vm162_vm10, %v7698_v62, %v7699_v38 }
 0xf1e   :  { %v4948_v51 = vmax.f32 %v13217_v22, %v4928_v57  ;;  %v4949_v40 = vmax.f32 %v13225_v21, %v4929_v61  ;;  %v4921_v22 = vpop.permute.xlu2 %4920 }
 0xf20   :  { %5167 = vmatmul.f32.gmra.mxu1 %v4948_v51  ;;  %5190 = vmatmul.f32.gmra.mxu2 %v4949_v40 }
 0xf23   :  { %v4907_v39 = vpop.permute.xlu1 %4906 }
 0xf24   :  { %v4925_v26 = vsel %vm162_vm10, %v7694_v23, %v4907_v39  ;;  %v4926_v27 = vsel %vm162_vm10, %v4907_v39, %v4909_v49 }
 0xf25   :  { %v4945_v31 = vmax.f32 %v13214_v2, %v4925_v26  ;;  %v4946_v13 = vmax.f32 %v13235_v35, %v4926_v27 }
 0xf27   :  { %5210 = vmatmul.f32.vlgmr.msra.gmra.mxu0 %v4945_v31  ;;  %6343 = vmatmul.msk.f32.vlgmr.msra.gmra.mxu3 %vm15103_vm15, %v4946_v13  ;;  %vm15114_vm15 = vmmov %vm15113_vm9 }
 0xf28   :  { %5256 = vmatmul.f32.vlgmr.msra.gmra.mxu1 %v13550_v59  ;;  %5279 = vmatmul.f32.vlgmr.msra.gmra.mxu2 %v13547_v48 }
 0xf2b   :  { %v4919_v21 = vpop.permute.xlu1 %4918 }
 0xf2c   :  { %v4930_v3 = vsel %vm162_vm10, %v7699_v38, %v4919_v21  ;;  %v4931_v0 = vsel %vm162_vm10, %v4919_v21, %v4921_v22  ;;  %vm5486_vm10 = vcmask 949248  }
 0xf2d   :  { %v4950_v44 = vmax.f32 %v13228_v54, %v4930_v3  ;;  %v4951_v42 = vmax.f32 %v13242_v41, %v4931_v0 }
 0xf2f   :  { %5213 = vmatmul.f32.gmra.mxu0 %v4950_v44  ;;  %6344 = vmatmul.msk.f32.gmra.mxu3 %vm15104_vm14, %v4951_v42  ;;  %vm15115_vm14 = vmmov %vm15113_vm9 }
 0xf30   :  { %5259 = vmatmul.f32.gmra.mxu1 %v4947_v55  ;;  %5282 = vmatmul.f32.gmra.mxu2 %v4948_v51 }
 0xf37   :  { %5302 = vmatmul.f32.vlgmr.msrb.gmra.mxu0 %v4944_v60  ;;  %5325 = vmatmul.f32.vlgmr.msrb.gmra.mxu3 %v4945_v31 }
 0xf38   :  { %6346 = vmatmul.msk.f32.vlgmr.msrb.gmra.mxu1 %vm15105_vm1, %v4946_v13  ;;  %vm6135_vm1 = vcmask 457728  }
 0xf3f   :  { %5305 = vmatmul.f32.gmra.mxu0 %v4949_v40  ;;  %5328 = vmatmul.f32.gmra.mxu3 %v4950_v44 }
 0xf40   :  { %6347 = vmatmul.msk.f32.gmra.mxu1 %vm15106_vm3, %v4951_v42  ;;  %vm6165_vm3 = vcmask 7168  }
 0xf78   :  { %v5165_v2 = vpop.f32.mrf.mxu1 }
 0xf7e   :  { %v5142_v35 = vpop.f32.mrf.mxu3 }
 0xf7f   :  { %v5166_v10 = vadd.f32 %v5165_v2, %v5142_v35 }
 0xf9b   :  { %v5188_v59 = vpop.f32.mrf.mxu2  ;;  %v5145_v54 = vpop.f32.mrf.mxu3 }
 0xf9c   :  { %v5189_v5 = vadd.f32 %v5188_v59, %v5166_v10 }
 0xf9d   :  { %v5168_v48 = vpop.f32.mrf.mxu1 }
 0xf9e   :  { %v5169_v8 = vadd.f32 %v5168_v48, %v5145_v54 }
 0xfa3   :  { %v5191_v11 = vpop.f32.mrf.mxu2 }
 0xfa4   :  { %v5211_v9 = vpop.f32.mrf.mxu0  ;;  %v5192_v63 = vadd.f32 %v5191_v11, %v5169_v8 }
 0xfa5   :  { %v5257_v41 = vpop.f32.mrf.mxu1  ;;  %v5212_v36 = vadd.f32 %v5211_v9, %v5189_v5 }
 0xfaa   :  { %v5234_v20 = vpop.f32.mrf.mxu3 }
 0xfab   :  { %v5235_v17 = vadd.f32 %v5234_v20, %v5212_v36  ;;  %v5280_v28 = vpop.f32.mrf.mxu2 }
 0xfac   :  { %v5214_v47 = vpop.f32.mrf.mxu0  ;;  %v5281_v24 = vadd.f32 %v5280_v28, %v5257_v41 }
 0xfad   :  { %v5215_v45 = vadd.f32 %v5214_v47, %v5192_v63  ;;  %v5260_v7 = vpop.f32.mrf.mxu1  ;;  %v13754_v33 = vmax.f32 %v5235_v17, 0.0 }
 0xfb2   :  { %v5237_v4 = vpop.f32.mrf.mxu3 }
 0xfb3   :  { %v5238_v30 = vadd.f32 %v5237_v4, %v5215_v45  ;;  %v5283_v15 = vpop.f32.mrf.mxu2 }
 0xfb4   :  { %v5303_v29 = vpop.f32.mrf.mxu0  ;;  %v5284_v32 = vadd.f32 %v5283_v15, %v5260_v7 }
 0xfb5   :  { %v13756_v43 = vmax.f32 %v5238_v30, 0.0  ;;  %v5304_v50 = vadd.f32 %v5303_v29, %v5281_v24  ;;  %v5349_v23 = vpop.f32.mrf.mxu1 }
 0xfb7   :  { %v13760_v12 = vpack.i.bf16 %v13754_v33, %v13756_v43 }
 0xfb9   :  { %7701 = vrot.lane.b32.xlu1 %v13760_v12, %s8043_s16 }
 0xfba   :  { %v5326_v34 = vpop.f32.mrf.mxu3 }
 0xfbb   :  { %v5327_v18 = vadd.f32 %v5326_v34, %v5304_v50 }
 0xfbc   :  { %v5306_v19 = vpop.f32.mrf.mxu0 }
 0xfbd   :  { %v5350_v58 = vadd.f32 %v5349_v23, %v5327_v18  ;;  %v5307_v55 = vadd.f32 %v5306_v19, %v5284_v32  ;;  %v5352_v56 = vpop.f32.mrf.mxu1 }
 0xfbf   :  { %v5356_v52 = vmax.f32 %v5350_v58, 0.0 }
 0xfc1   :  { %v13764_v14 = vpack.i.bf16 %v5356_v52, %v13754_v33 }
 0xfc2   :  { %v5329_v60 = vpop.f32.mrf.mxu3 }
 0xfc3   :  { %7716 = vrot.lane.b32.xlu2 %v13764_v14, %s8029_s8  ;;  %7711 = vrot.lane.b32.xlu0 %v13764_v14, %s8030_s23  ;;  %v5330_v6 = vadd.f32 %v5329_v60, %v5307_v55 }
 0xfc4   :  { %7706 = vrot.lane.b32.xlu1 %v13764_v14, %s8031_s22 }
 0xfc5   :  { %v5353_v16 = vadd.f32 %v5352_v56, %v5330_v6 }
 0xfc7   :  { %v5358_v1 = vmax.f32 %v5353_v16, 0.0 }
 0xfc9   :  { %v13779_v53 = vpack.i.bf16 %v5358_v1, %v13756_v43 }
 0xfcb   :  { %7731 = vrot.lane.b32.xlu2 %v13764_v14, %s8014_s13  ;;  %7726 = vrot.lane.b32.xlu0 %v13764_v14, %s8023_s15 }
 0xfcc   :  { %7721 = vrot.lane.b32.xlu1 %v13764_v14, %s8033_s0 }
 0xfd3   :  { %7741 = vrot.lane.b32.xlu0 %v13764_v14, %s8034_s10  ;;  %7751 = vrot.lane.b32.xlu2 %v13779_v53, %s8030_s23 }
 0xfd4   :  { %7736 = vrot.lane.b32.xlu1 %v13764_v14, %s8016_s17 }
 0xfdb   :  { %7766 = vrot.lane.b32.xlu2 %v13760_v12, %s8008_s28  ;;  %7746 = vrot.lane.b32.xlu0 %v13779_v53, %s8031_s22  ;;  %s8044_s28 = smov 91  }
 0xfdc   :  { %7756 = vrot.lane.b32.xlu1 %v13779_v53, %s8029_s8 }
 0xfe3   :  { %7771 = vrot.lane.b32.xlu2 %v13760_v12, %s14974_s27  ;;  %7776 = vrot.lane.b32.xlu0 %v13779_v53, %s8033_s0  ;;  %s15108_s27 = smov 104  }
 0xfe4   :  { %7761 = vrot.lane.b32.xlu1 %v13760_v12, %s8022_s12 }
 0xfeb   :  { %7781 = vrot.lane.b32.xlu2 %v13779_v53, %s8023_s15  ;;  %7796 = vrot.lane.b32.xlu0 %v13779_v53, %s8016_s17 }
 0xfec   :  { %7791 = vrot.lane.b32.xlu1 %v13779_v53, %s8014_s13 }
 0xff3   :  { %7786 = vrot.lane.b32.xlu2 %v13760_v12, %s8012_s7  ;;  %s15107_s7 = smov 103  }
 0xffb   :  { %7801 = vrot.lane.b32.xlu2 %v13779_v53, %s8034_s10 }
0x101d   :  { %v13809_v25 = vpop.permute.xlu2 %7716 }
0x101e   :  { %v7719_v37 = vunpack.i.h.bf16 %v13809_v25  ;;  %v7718_v38 = vunpack.i.l.bf16 %v13809_v25 }
0x1020   :  { %v5487_v62 = vsel %vm5486_vm10, %v7718_v38, %v7719_v37 }
0x1021   :  { %v7820_v46 = vpack.i.bf16 %v7719_v37, %v5487_v62 }
0x1023   :  { %7821 = vrot.lane.b32.xlu0 %v7820_v46, %s8044_s28 }
0x1025   :  { %v13817_v57 = vpop.permute.xlu2 %7731 }
0x1026   :  { %v7734_v46 = vunpack.i.h.bf16 %v13817_v57 }
0x102b   :  { %v7702_v61 = vpop.permute.xlu1 %7701 }
0x102c   :  { %v7703_v51 = vunpack.i.l.bf16 %v7702_v61  ;;  %v7704_v49 = vunpack.i.h.bf16 %v7702_v61 }
0x102d   :  { %v13819_v40 = vpop.permute.xlu2 %7751 }
0x102e   :  { %5684 = vmatpush.msra.mxu0 %v7703_v51  ;;  %v7754_v4 = vunpack.i.h.bf16 %v13819_v40  ;;  %v7753_v30 = vunpack.i.l.bf16 %v13819_v40 }
0x1030   :  { %5685 = vmatpush.msra.mxu0 %v7704_v49  ;;  %v5495_v23 = vsel %vm5493_vm0, %v7753_v30, %v7754_v4  ;;  %v7733_v49 = vunpack.i.l.bf16 %v13817_v57 }
0x1031   :  { %v7840_v19 = vpack.i.bf16 %v7754_v4, %v5495_v23 }
0x1035   :  { %v13821_v39 = vpop.permute.xlu0 %7711  ;;  %v7767_v26 = vpop.permute.xlu2 %7766 }
0x1036   :  { %v7768_v27 = vunpack.i.l.bf16 %v7767_v26  ;;  %v7707_v31 = vpop.permute.xlu1 %7706  ;;  %v7769_v21 = vunpack.i.h.bf16 %v7767_v26  ;;  %v7714_v44 = vunpack.i.h.bf16 %v13821_v39  ;;  %v7713_v42 = vunpack.i.l.bf16 %v13821_v39 }
0x1037   :  { %v7709_v13 = vunpack.i.h.bf16 %v7707_v31  ;;  %v7708_v22 = vunpack.i.l.bf16 %v7707_v31 }
0x1038   :  { %5686 = vmatpush.msra.mxu0 %v7768_v27  ;;  %v5494_v54 = vsel %vm5493_vm0, %v7713_v42, %v7714_v44 }
0x1039   :  { %v5501_v3 = vsel %vm5500_vm4, %v7708_v22, %v7709_v13  ;;  %v7810_v10 = vpack.i.bf16 %v7714_v44, %v5494_v54 }
0x103a   :  { %v7805_v0 = vpack.i.bf16 %v7709_v13, %v5501_v3  ;;  %5687 = vmatpush.msra.mxu0 %v7769_v21  ;;  %v5463_v13 = vsel %vm15109_vm2, %v7733_v49, %v7734_v46 }
0x103b   :  { %v7850_v21 = vpack.i.bf16 %v7734_v46, %v5463_v13 }
0x103c   :  { %7806 = vrot.lane.b32.xlu2 %v7805_v0, %s8044_s28 }
0x103d   :  { %v13827_v2 = vpop.permute.xlu0 %7726  ;;  %v7772_v35 = vpop.permute.xlu2 %7771 }
0x103e   :  { %v7773_v48 = vunpack.i.l.bf16 %v7772_v35  ;;  %v7722_v59 = vpop.permute.xlu1 %7721  ;;  %v7774_v11 = vunpack.i.h.bf16 %v7772_v35  ;;  %v7729_v5 = vunpack.i.h.bf16 %v13827_v2  ;;  %v7728_v8 = vunpack.i.l.bf16 %v13827_v2  ;;  %v5633_v2 = vld [vmem:[%s14164_s4 + $0xbc0] sm:$0xff] }
0x103f   :  { %v7724_v9 = vunpack.i.h.bf16 %v7722_v59  ;;  %v7723_v41 = vunpack.i.l.bf16 %v7722_v59 }
0x1040   :  { %5688 = vmatpush.msra.mxu0 %v7773_v48  ;;  %v5469_v45 = vsel %vm82_vm11, %v7728_v8, %v7729_v5 }
0x1041   :  { %v5480_v20 = vsel %vm5479_vm5, %v7723_v41, %v7724_v9  ;;  %v7830_v7 = vpack.i.bf16 %v7729_v5, %v5469_v45  ;;  %v5623_v5 = vld [vmem:[%s14163_s3 + $0xc0] sm:$0xff] }
0x1042   :  { %v7825_v47 = vpack.i.bf16 %v7724_v9, %v5480_v20  ;;  %5689 = vmatpush.msra.mxu0 %v7774_v11  ;;  %v5619_v20 = vld [vmem:[%s14163_s3 + $0xa0] sm:$0xff] }
0x1044   :  { %7826 = vrot.lane.b32.xlu0 %v7825_v47, %s8044_s28  ;;  %7811 = vrot.lane.b32.xlu2 %v7810_v10, %s8044_s28 }
0x1045   :  { %v13835_v63 = vpop.permute.xlu0 %7741  ;;  %v7782_v36 = vpop.permute.xlu2 %7781 }
0x1046   :  { %v13837_v17 = vpop.permute.xlu1 %7736  ;;  %v7784_v61 = vunpack.i.h.bf16 %v7782_v36  ;;  %v7783_v51 = vunpack.i.l.bf16 %v7782_v36  ;;  %v7744_v39 = vunpack.i.h.bf16 %v13835_v63  ;;  %v7743_v26 = vunpack.i.l.bf16 %v13835_v63 }
0x1048   :  { %v5470_v57 = vsel %vm82_vm11, %v7783_v51, %v7784_v61  ;;  %vm15110_vm11 = vmmov %vm15109_vm2 }
0x104c   :  { %7831 = vrot.lane.b32.xlu0 %v7830_v7, %s8044_s28  ;;  %7816 = vrot.lane.b32.xlu2 %v13760_v12, %s15107_s7  ;;  %v5632_v7 = vld [vmem:[%s14164_s4 + $0xbb0] sm:$0xff] }
0x104d   :  { %v7787_v28 = vpop.permute.xlu2 %7786  ;;  %v7747_v29 = vpop.permute.xlu0 %7746 }
0x104e   :  { %v7788_v24 = vunpack.i.l.bf16 %v7787_v28  ;;  %v7749_v50 = vunpack.i.h.bf16 %v7747_v29  ;;  %v7748_v34 = vunpack.i.l.bf16 %v7747_v29  ;;  %v7757_v18 = vpop.permute.xlu1 %7756  ;;  %v7789_v58 = vunpack.i.h.bf16 %v7787_v28 }
0x104f   :  { %v7759_v32 = vunpack.i.h.bf16 %v7757_v18  ;;  %v7758_v60 = vunpack.i.l.bf16 %v7757_v18 }
0x1050   :  { %v5502_v15 = vsel %vm5500_vm4, %v7748_v34, %v7749_v50  ;;  %5658 = vmatpush.msrb.mxu2 %v7748_v34  ;;  %5690 = vmatpush.msra.mxu0 %v7788_v24 }
0x1051   :  { %v7835_v52 = vpack.i.bf16 %v7749_v50, %v5502_v15  ;;  %v5488_v1 = vsel %vm5486_vm10, %v7758_v60, %v7759_v32  ;;  %vm6167_vm10 = vcmask 1024  }
0x1052   :  { %5659 = vmatpush.msrb.mxu2 %v7708_v22  ;;  %5691 = vmatpush.msra.mxu0 %v7789_v58  ;;  %v7845_v40 = vpack.i.bf16 %v7759_v32, %v5488_v1  ;;  %v5508_v22 = vsel %vm5507_vm7, %v7743_v26, %v7744_v39 }
0x1053   :  { %7836 = vrot.lane.b32.xlu1 %v7835_v52, %s8044_s28  ;;  %v7905_v3 = vpack.i.bf16 %v7744_v39, %v5508_v22 }
0x1054   :  { %7841 = vrot.lane.b32.xlu0 %v7840_v19, %s8044_s28  ;;  %7856 = vrot.lane.b32.xlu2 %v13760_v12, %s15108_s27  ;;  %v5620_v19 = vld [vmem:[%s14163_s3 + $0xa8] sm:$0xff] }
0x1055   :  { %5660 = vmatpush.msrb.mxu2 %v7753_v30  ;;  %v7777_v55 = vpop.permute.xlu0 %7776 }
0x1056   :  { %v7779_v6 = vunpack.i.h.bf16 %v7777_v55  ;;  %v7778_v56 = vunpack.i.l.bf16 %v7777_v55  ;;  %v7762_v16 = vpop.permute.xlu1 %7761  ;;  %v5624_v55 = vld [vmem:[%s14163_s3 + $0xc8] sm:$0xff] }
0x1057   :  { %5661 = vmatpush.msrb.mxu2 %v7713_v42  ;;  %v7763_v27 = vunpack.i.l.bf16 %v7762_v16  ;;  %v7764_v31 = vunpack.i.h.bf16 %v7762_v16  ;;  %v7738_v42 = vunpack.i.l.bf16 %v13837_v17 }
0x1058   :  { %v5481_v37 = vsel %vm5479_vm5, %v7778_v56, %v7779_v6 }
0x1059   :  { %v7865_v62 = vpack.i.bf16 %v7779_v6, %v5481_v37  ;;  %5662 = vmatpush.msrb.mxu2 %v7758_v60 }
0x105b   :  { %5663 = vmatpush.msrb.mxu2 %v7718_v38  ;;  %7866 = vrot.lane.b32.xlu1 %v7865_v62, %s8044_s28  ;;  %v7870_v38 = vpack.i.bf16 %v7784_v61, %v5470_v57 }
0x105c   :  { %7846 = vrot.lane.b32.xlu0 %v7845_v40, %s8044_s28  ;;  %7891 = vrot.lane.b32.xlu2 %v13760_v12, %s8045_s26  ;;  %v7739_v12 = vunpack.i.h.bf16 %v13837_v17  ;;  %s8046_s26 = smov 119  }
0x105d   :  { %5664 = vmatpush.msrb.mxu2 %v7763_v27  ;;  %v7797_v35 = vpop.permute.xlu0 %7796 }
0x105e   :  { %v7792_v25 = vpop.permute.xlu1 %7791  ;;  %v5457_v59 = vsel %vm15111_vm8, %v7738_v42, %v7739_v12  ;;  %v7798_v54 = vunpack.i.l.bf16 %v7797_v35  ;;  %v7799_v11 = vunpack.i.h.bf16 %v7797_v35 }
0x105f   :  { %5665 = vmatpush.msrb.mxu2 %v7764_v31  ;;  %v7794_v0 = vunpack.i.h.bf16 %v7792_v25  ;;  %v7793_v44 = vunpack.i.l.bf16 %v7792_v25  ;;  %v7860_v41 = vpack.i.bf16 %v7739_v12, %v5457_v59 }
0x1060   :  { %v5458_v10 = vsel %vm15112_vm12, %v7798_v54, %v7799_v11 }
0x1061   :  { %5666 = vmatpush.msrb.mxu2 %v7783_v51  ;;  %v5464_v48 = vsel %vm15110_vm11, %v7793_v44, %v7794_v0  ;;  %v7880_v47 = vpack.i.bf16 %v7799_v11, %v5458_v10 }
0x1062   :  { %v7875_v9 = vpack.i.bf16 %v7794_v0, %v5464_v48 }
0x1063   :  { %5667 = vmatpush.msrb.mxu2 %v7728_v8  ;;  %7871 = vrot.lane.b32.xlu1 %v7870_v38, %s8044_s28  ;;  %v5631_v8 = vld [vmem:[%s14164_s4 + $0xba0] sm:$0xff] }
0x1064   :  { %7851 = vrot.lane.b32.xlu0 %v7850_v21, %s8044_s28  ;;  %7906 = vrot.lane.b32.xlu2 %v7905_v3, %s8044_s28 }
0x1065   :  { %5668 = vmatpush.msrb.mxu2 %v7793_v44 }
0x1067   :  { %5669 = vmatpush.msrb.mxu2 %v7733_v49 }
0x1069   :  { %5670 = vmatpush.msrb.mxu2 %v7798_v54 }
0x106b   :  { %5671 = vmatpush.msrb.mxu2 %v7738_v42  ;;  %7876 = vrot.lane.b32.xlu1 %v7875_v9, %s8044_s28 }
0x106c   :  { %7861 = vrot.lane.b32.xlu0 %v7860_v41, %s8044_s28  ;;  %5646 = vperm.xlu2 %7217, %v5633_v2  }
0x106d   :  { %5672 = vmatpush.msrb.mxu2 %v13756_v43  ;;  %v7802_v43 = vpop.permute.xlu2 %7801 }
0x106e   :  { %v7804_v36 = vunpack.i.h.bf16 %v7802_v43  ;;  %v7803_v17 = vunpack.i.l.bf16 %v7802_v43 }
0x106f   :  { %5673 = vmatpush.msrb.mxu2 %v13754_v33  ;;  %v5627_v33 = vld [vmem:[%s14163_s3 + $0xe0] sm:$0xff] }
0x1070   :  { %5674 = vmatmul.f32.vlgmr.msrb.gmra.mxu2 %v5619_v20 }
0x1073   :  { %7881 = vrot.lane.b32.xlu1 %v7880_v47, %s8044_s28 }
0x1074   :  { %7896 = vrot.lane.b32.xlu0 %v13764_v14, %s8044_s28  ;;  %v5509_v14 = vsel %vm5507_vm7, %v7803_v17, %v7804_v36 }
0x1075   :  { %v7900_v45 = vpack.i.bf16 %v7804_v36, %v5509_v14 }
0x1078   :  { %5677 = vmatmul.f32.gmra.mxu2 %v5623_v5 }
0x107b   :  { %7886 = vrot.lane.b32.xlu1 %v13779_v53, %s8044_s28 }
0x107c   :  { %5636 = vperm.xlu0 %7294, %v5631_v8  }
0x1080   :  { %5680 = vmatmul.f32.gmra.mxu2 %v5627_v33 }
0x1083   :  { %7901 = vrot.lane.b32.xlu1 %v7900_v45, %s8044_s28 }
0x108b   :  { %5641 = vperm.xlu1 %7253, %v5632_v7  }
0x1095   :  { %v7822_v24 = vpop.permute.xlu0 %7821 }
0x1096   :  { %v7807_v4 = vpop.permute.xlu2 %7806  ;;  %v7824_v57 = vunpack.i.h.bf16 %v7822_v24  ;;  %v7823_v13 = vunpack.i.l.bf16 %v7822_v24 }
0x1097   :  { %v7809_v6 = vunpack.i.h.bf16 %v7807_v4  ;;  %v7808_v56 = vunpack.i.l.bf16 %v7807_v4 }
0x1098   :  { %v5593_v12 = vsel %vm5582_vm13, %v7823_v13, %v7824_v57 }
0x1099   :  { %v5597_v40 = vsel %vm5582_vm13, %v7808_v56, %v7809_v6 }
0x109e   :  { %v7812_v30 = vpop.permute.xlu2 %7811 }
0x109f   :  { %v7814_v63 = vunpack.i.h.bf16 %v7812_v30  ;;  %v7813_v51 = vunpack.i.l.bf16 %v7812_v30 }
0x10a1   :  { %v5595_v31 = vsel %vm5582_vm13, %v7813_v51, %v7814_v63  ;;  %v5630_v63 = vld [vmem:[%s14163_s3 + $0xf8] sm:$0xff] }
0x10a6   :  { %v7817_v28 = vpop.permute.xlu2 %7816 }
0x10a7   :  { %v7818_v53 = vunpack.i.l.bf16 %v7817_v28  ;;  %v7819_v29 = vunpack.i.h.bf16 %v7817_v28 }
0x10a9   :  { %5692 = vmatpush.msra.mxu0 %v7818_v53 }
0x10ab   :  { %5693 = vmatpush.msra.mxu0 %v7819_v29 }
0x10ae   :  { %v7857_v50 = vpop.permute.xlu2 %7856 }
0x10af   :  { %v7858_v34 = vunpack.i.l.bf16 %v7857_v50  ;;  %v7859_v18 = vunpack.i.h.bf16 %v7857_v50 }
0x10b1   :  { %5694 = vmatpush.msra.mxu0 %v7858_v34 }
0x10b3   :  { %5695 = vmatpush.msra.mxu0 %v7859_v18 }
0x10b6   :  { %v7827_v23 = vpop.permute.xlu0 %7826  ;;  %v7892_v58 = vpop.permute.xlu2 %7891 }
0x10b7   :  { %v7893_v15 = vunpack.i.l.bf16 %v7892_v58  ;;  %v7894_v52 = vunpack.i.h.bf16 %v7892_v58  ;;  %v7829_v0 = vunpack.i.h.bf16 %v7827_v23  ;;  %v7828_v44 = vunpack.i.l.bf16 %v7827_v23 }
0x10b9   :  { %5696 = vmatpush.msra.mxu0 %v7893_v15  ;;  %v5591_v41 = vsel %vm5582_vm13, %v7828_v44, %v7829_v0  ;;  %v5621_v15 = vld [vmem:[%s14163_s3 + $0xb0] sm:$0xff] }
0x10bb   :  { %5697 = vmatpush.msra.mxu0 %v7894_v52 }
0x10bd   :  { %5698 = vmatpush.msra.mxu0 %v7803_v17 }
0x10be   :  { %v7832_v32 = vpop.permute.xlu0 %7831 }
0x10bf   :  { %5699 = vmatpush.msra.mxu0 %v7743_v26  ;;  %v5628_v26 = vld [vmem:[%s14163_s3 + $0xe8] sm:$0xff]  ;;  %v7834_v54 = vunpack.i.h.bf16 %v7832_v32  ;;  %v7833_v9 = vunpack.i.l.bf16 %v7832_v32 }
0x10c0   :  { %5700 = vmatmul.f32.vlgmr.msra.gmra.mxu0 %v5620_v19  ;;  %v7907_v19 = vpop.permute.xlu2 %7906 }
0x10c1   :  { %v5589_v20 = vsel %vm5582_vm13, %v7833_v9, %v7834_v54 }
0x10c5   :  { %v7837_v60 = vpop.permute.xlu1 %7836 }
0x10c6   :  { %v7839_v16 = vunpack.i.h.bf16 %v7837_v60  ;;  %v7838_v1 = vunpack.i.l.bf16 %v7837_v60  ;;  %v7842_v37 = vpop.permute.xlu0 %7841  ;;  %v7909_v60 = vunpack.i.h.bf16 %v7907_v19 }
0x10c7   :  { %v7844_v62 = vunpack.i.h.bf16 %v7842_v37  ;;  %v7843_v46 = vunpack.i.l.bf16 %v7842_v37  ;;  %v5622_v37 = vld [vmem:[%s14163_s3 + $0xb8] sm:$0xff] }
0x10c8   :  { %5703 = vmatmul.f32.gmra.mxu0 %v5624_v55  ;;  %v5598_v61 = vsel %vm5582_vm13, %v7838_v1, %v7839_v16  ;;  %v7908_v55 = vunpack.i.l.bf16 %v7907_v19  ;;  %v5625_v1 = vld [vmem:[%s14163_s3 + $0xd0] sm:$0xff] }
0x10c9   :  { %5710 = vmatpush.msra.mxu3 %v5598_v61  ;;  %v5596_v49 = vsel %vm5582_vm13, %v7843_v46, %v7844_v62  ;;  %v5629_v46 = vld [vmem:[%s14163_s3 + $0xf0] sm:$0xff]  ;;  %v5626_v61 = vld [vmem:[%s14163_s3 + $0xd8] sm:$0xff] }
0x10ca   :  { %v5599_v62 = vsel %vm5582_vm13, %v7908_v55, %v7909_v60 }
0x10cb   :  { %5711 = vmatpush.msra.mxu3 %v5597_v40 }
0x10cd   :  { %v7867_v39 = vpop.permute.xlu1 %7866  ;;  %5712 = vmatpush.msra.mxu3 %v5596_v49 }
0x10ce   :  { %v7847_v27 = vpop.permute.xlu0 %7846  ;;  %v7869_v38 = vunpack.i.h.bf16 %v7867_v39  ;;  %v7868_v21 = vunpack.i.l.bf16 %v7867_v39 }
0x10cf   :  { %v7849_v22 = vunpack.i.h.bf16 %v7847_v27  ;;  %v7848_v25 = vunpack.i.l.bf16 %v7847_v27  ;;  %5713 = vmatpush.msra.mxu3 %v5595_v31 }
0x10d0   :  { %5706 = vmatmul.f32.gmra.mxu0 %v5628_v26  ;;  %v5592_v35 = vsel %vm5582_vm13, %v7868_v21, %v7869_v38 }
0x10d1   :  { %v5594_v3 = vsel %vm5582_vm13, %v7848_v25, %v7849_v22 }
0x10d2   :  { %5714 = vmatpush.msra.mxu3 %v5594_v3 }
0x10d4   :  { %5715 = vmatpush.msra.mxu3 %v5593_v12 }
0x10d5   :  { %v7872_v42 = vpop.permute.xlu1 %7871 }
0x10d6   :  { %v7874_v48 = vunpack.i.h.bf16 %v7872_v42  ;;  %v7873_v59 = vunpack.i.l.bf16 %v7872_v42  ;;  %5716 = vmatpush.msra.mxu3 %v5592_v35  ;;  %v7852_v2 = vpop.permute.xlu0 %7851 }
0x10d7   :  { %v7854_v47 = vunpack.i.h.bf16 %v7852_v2  ;;  %v7853_v5 = vunpack.i.l.bf16 %v7852_v2 }
0x10d8   :  { %5717 = vmatpush.msra.mxu3 %v5591_v41  ;;  %v5590_v11 = vsel %vm5582_vm13, %v7873_v59, %v7874_v48  ;;  %v5647_v48 = vpop.permute.xlu2 %5646 }
0x10d9   :  { %v5587_v33 = vsel %vm5582_vm13, %v7853_v5, %v7854_v47 }
0x10da   :  { %5718 = vmatpush.msra.mxu3 %v5590_v11 }
0x10dc   :  { %5719 = vmatpush.msra.mxu3 %v5589_v20 }
0x10dd   :  { %v7877_v10 = vpop.permute.xlu1 %7876 }
0x10de   :  { %v7879_v43 = vunpack.i.h.bf16 %v7877_v10  ;;  %v7878_v8 = vunpack.i.l.bf16 %v7877_v10  ;;  %v7862_v17 = vpop.permute.xlu0 %7861 }
0x10df   :  { %v7864_v45 = vunpack.i.h.bf16 %v7862_v17  ;;  %v7863_v7 = vunpack.i.l.bf16 %v7862_v17  ;;  %v5801_v17 = vld [vmem:[%s14164_s4 + $0xaa0] sm:$0x7f] }
0x10e0   :  { %v5588_v36 = vsel %vm5582_vm13, %v7878_v8, %v7879_v43  ;;  %6351 = vmatpush.msk.msra.mxu2 %vm5118_vm6, %v5801_v17  ;;  %vm5802_vm6 = vcmask 646144  }
0x10e1   :  { %5720 = vmatpush.msra.mxu3 %v5588_v36  ;;  %v5585_v53 = vsel %vm5582_vm13, %v7863_v7, %v7864_v45  ;;  %v5798_v45 = vld [vmem:[%s14164_s4 + $0xa70] sm:$0xff]  ;;  %v5797_v7 = vld [vmem:[%s14164_s4 + $0xa60] sm:$0xff] }
0x10e3   :  { %5721 = vmatpush.msra.mxu3 %v5587_v33  ;;  %v5800_v33 = vld [vmem:[%s14164_s4 + $0xa90] sm:$0xff] }
0x10e4   :  { %5822 = vmatpush.msra.mxu2 %v5800_v33 }
0x10e5   :  { %v7882_v14 = vpop.permute.xlu1 %7881 }
0x10e6   :  { %v7884_v4 = vunpack.i.h.bf16 %v7882_v14  ;;  %v7883_v30 = vunpack.i.l.bf16 %v7882_v14  ;;  %v7897_v29 = vpop.permute.xlu0 %7896  ;;  %v5799_v14 = vld [vmem:[%s14164_s4 + $0xa80] sm:$0xff] }
0x10e7   :  { %v7899_v50 = vunpack.i.h.bf16 %v7897_v29  ;;  %v7898_v34 = vunpack.i.l.bf16 %v7897_v29  ;;  %5823 = vmatpush.msra.mxu2 %v5799_v14  ;;  %v5792_v29 = vld [vmem:[%s14164_s4 + $0xa10] sm:$0xff] }
0x10e8   :  { %v5586_v28 = vsel %vm5582_vm13, %v7883_v30, %v7884_v4  ;;  %v5796_v4 = vld [vmem:[%s14164_s4 + $0xa50] sm:$0xff]  ;;  %v5795_v30 = vld [vmem:[%s14164_s4 + $0xa40] sm:$0xff] }
0x10e9   :  { %5722 = vmatpush.msra.mxu3 %v5586_v28  ;;  %v5583_v52 = vsel %vm5582_vm13, %v7898_v34, %v7899_v50  ;;  %5824 = vmatpush.msra.mxu2 %v5798_v45  ;;  %v5794_v28 = vld [vmem:[%s14164_s4 + $0xa30] sm:$0xff] }
0x10eb   :  { %5723 = vmatpush.msra.mxu3 %v5585_v53  ;;  %5825 = vmatpush.msra.mxu2 %v5797_v7  ;;  %v5793_v53 = vld [vmem:[%s14164_s4 + $0xa20] sm:$0xff] }
0x10ed   :  { %v7887_v24 = vpop.permute.xlu1 %7886  ;;  %5826 = vmatpush.msra.mxu2 %v5796_v4 }
0x10ee   :  { %v7889_v18 = vunpack.i.h.bf16 %v7887_v24  ;;  %v7888_v23 = vunpack.i.l.bf16 %v7887_v24  ;;  %v5637_v49 = vpop.permute.xlu0 %5636 }
0x10ef   :  { %5827 = vmatpush.msra.mxu2 %v5795_v30 }
0x10f0   :  { %v5584_v58 = vsel %vm5582_vm13, %v7888_v23, %v7889_v18 }
0x10f1   :  { %5724 = vmatpush.msra.mxu3 %v5584_v58  ;;  %5828 = vmatpush.msra.mxu2 %v5794_v28 }
0x10f3   :  { %5725 = vmatpush.msra.mxu3 %v5583_v52  ;;  %v5675_v51 = vpop.f32.mrf.mxu2  ;;  %5829 = vmatpush.msra.mxu2 %v5793_v53 }
0x10f4   :  { %5726 = vmatmul.f32.vlgmr.msra.gmra.mxu3 %v5621_v15  ;;  %v5676_v39 = vadd.f32 %v5675_v51, %v5637_v49 }
0x10f5   :  { %v7902_v32 = vpop.permute.xlu1 %7901  ;;  %5830 = vmatpush.msra.mxu2 %v5792_v29 }
0x10f6   :  { %v7904_v6 = vunpack.i.h.bf16 %v7902_v32  ;;  %v7903_v56 = vunpack.i.l.bf16 %v7902_v32 }
0x10f8   :  { %v5600_v16 = vsel %vm5582_vm13, %v7903_v56, %v7904_v6 }
0x10f9   :  { %5750 = vmatpush.msra.mxu1 %v5600_v16 }
0x10fb   :  { %5751 = vmatpush.msra.mxu1 %v5599_v62  ;;  %v5678_v27 = vpop.f32.mrf.mxu2 }
0x10fc   :  { %5729 = vmatmul.f32.gmra.mxu3 %v5625_v1  ;;  %6348 = vmatmul.msk.f32.vlgmr.msra.gmra.mxu1 %vm15113_vm9, %v5622_v37 }
0x10fd   :  { %v5642_v57 = vpop.permute.xlu1 %5641 }
0x10fe   :  { %v5679_v21 = vadd.f32 %v5678_v27, %v5642_v57 }
0x1103   :  { %v5681_v12 = vpop.f32.mrf.mxu2 }
0x1104   :  { %5732 = vmatmul.f32.gmra.mxu3 %v5629_v46  ;;  %6349 = vmatmul.msk.f32.gmra.mxu1 %vm15114_vm15, %v5626_v61  ;;  %v5682_v54 = vadd.f32 %v5681_v12, %v5647_v48 }
0x110c   :  { %6350 = vmatmul.msk.f32.gmra.mxu1 %vm15115_vm14, %v5630_v63 }
0x113d   :  { %v5701_v40 = vpop.f32.mrf.mxu0 }
0x113e   :  { %v5702_v26 = vadd.f32 %v5701_v40, %v5676_v39 }
0x1145   :  { %v5704_v22 = vpop.f32.mrf.mxu0 }
0x1146   :  { %v5705_v3 = vadd.f32 %v5704_v22, %v5679_v21 }
0x114d   :  { %v5707_v59 = vpop.f32.mrf.mxu0 }
0x114e   :  { %v5708_v9 = vadd.f32 %v5707_v59, %v5682_v54 }
0x1177   :  { %v5727_v31 = vpop.f32.mrf.mxu3 }
0x1178   :  { %v5728_v13 = vadd.f32 %v5727_v31, %v5702_v26 }
0x1179   :  { %v5753_v25 = vpop.f32.mrf.mxu1 }
0x117a   :  { %v5754_v38 = vadd.f32 %v5753_v25, %v5728_v13 }
0x117c   :  { %5765 = vrot.lane.b32.xlu0 %v5754_v38, %s8016_s17 }
0x117f   :  { %v5730_v0 = vpop.f32.mrf.mxu3 }
0x1180   :  { %v5731_v44 = vadd.f32 %v5730_v0, %v5705_v3 }
0x1181   :  { %v5756_v42 = vpop.f32.mrf.mxu1 }
0x1182   :  { %v5757_v35 = vadd.f32 %v5756_v42, %v5731_v44 }
0x1184   :  { %5767 = vrot.lane.b32.xlu1 %v5757_v35, %s8016_s17 }
0x1187   :  { %v5733_v2 = vpop.f32.mrf.mxu3 }
0x1188   :  { %v5734_v41 = vadd.f32 %v5733_v2, %v5708_v9 }
0x1189   :  { %v5759_v11 = vpop.f32.mrf.mxu1 }
0x118a   :  { %v5760_v20 = vadd.f32 %v5759_v11, %v5734_v41 }
0x118c   :  { %5769 = vrot.lane.b32.xlu2 %v5760_v20, %s8016_s17 }
0x11e6   :  { %v5770_v10 = vpop.permute.xlu2 %5769 }
0x11e7   :  { %v5776_v47 = vmax.f32 %v5760_v20, %v5770_v10 }
0x11e9   :  { %5784 = vrot.lane.b32.xlu2 %v5776_v47, %s8029_s8 }
0x11ee   :  { %v5766_v5 = vpop.permute.xlu0 %5765 }
0x11ef   :  { %v5774_v43 = vmax.f32 %v5754_v38, %v5766_v5 }
0x11f1   :  { %5780 = vrot.lane.b32.xlu0 %v5774_v43, %s8029_s8 }
0x11f6   :  { %v5768_v8 = vpop.permute.xlu1 %5767 }
0x11f7   :  { %v5775_v36 = vmax.f32 %v5757_v35, %v5768_v8 }
0x11f9   :  { %5782 = vrot.lane.b32.xlu1 %v5775_v36, %s8029_s8 }
0x1243   :  { %v5785_v23 = vpop.permute.xlu2 %5784 }
0x1244   :  { %v5791_v58 = vmax.f32 %v5776_v47, %v5785_v23 }
0x1263   :  { %v5781_v24 = vpop.permute.xlu0 %5780 }
0x1264   :  { %v5789_v50 = vmax.f32 %v5774_v43, %v5781_v24 }
0x1266   :  { %6352 = vmatmul.msk.f32.vlgmr.msra.gmra.mxu2 %vm5802_vm6, %v5789_v50 }
0x126b   :  { %v5783_v34 = vpop.permute.xlu1 %5782 }
0x126c   :  { %v5790_v18 = vmax.f32 %v5775_v36, %v5783_v34 }
0x126e   :  { %6353 = vmatmul.msk.f32.gmra.mxu2 %vm5802_vm6, %v5790_v18 }
0x1276   :  { %6354 = vmatmul.msk.f32.gmra.mxu2 %vm5802_vm6, %v5791_v58  ;;  %v5982_v58 = vld [vmem:[%s14163_s3 + $0x100] sm:$0xff] }
0x12e9   :  { %v5832_v15 = vpop.f32.mrf.mxu2 }
0x12ea   :  { %v13995_v52 = vmax.f32 %v5832_v15, 0.0 }
0x12ec   :  { %5937 = vrot.lane.b32.xlu2 %v13995_v52, %s8033_s0  ;;  %5874 = vrot.lane.b32.xlu0 %v13995_v52, %s8022_s12 }
0x12ed   :  { %5883 = vrot.lane.b32.xlu1 %v13995_v52, %s8025_s20 }
0x12f1   :  { %v5835_v19 = vpop.f32.mrf.mxu2 }
0x12f2   :  { %v14007_v60 = vmax.f32 %v5835_v19, 0.0 }
0x12f4   :  { %5964 = vrot.lane.b32.xlu0 %v13995_v52, %s8031_s22  ;;  %v7910_v56 = vpack.i.bf16 %v13995_v52, %v14007_v60 }
0x12f5   :  { %5973 = vrot.lane.b32.xlu1 %v13995_v52, %s8034_s10 }
0x12f9   :  { %v5838_v32 = vpop.f32.mrf.mxu2 }
0x12fa   :  { %v14009_v55 = vmax.f32 %v5838_v32, 0.0  ;;  %v5984_v32 = vld [vmem:[%s14163_s3 + $0x110] sm:$0xff] }
0x12fc   :  { %5865 = vrot.lane.b32.xlu0 %v13995_v52, %s8023_s15  ;;  %v7920_v6 = vpack.i.bf16 %v14007_v60, %v14009_v55 }
0x12fd   :  { %5919 = vrot.lane.b32.xlu1 %v13995_v52, %s8046_s26 }
0x12fe   :  { %7921 = vrot.lane.b32.xlu2 %v7920_v6, %s8022_s12  ;;  %s15118_s12 = smov 122  }
0x1304   :  { %5955 = vrot.lane.b32.xlu0 %v13995_v52, %s8030_s23 }
0x1305   :  { %5910 = vrot.lane.b32.xlu1 %v13995_v52, %s8038_s9 }
0x1306   :  { %7926 = vrot.lane.b32.xlu2 %v7920_v6, %s8031_s22 }
0x130c   :  { %7911 = vrot.lane.b32.xlu0 %v7910_v56, %s15116_s18  ;;  %v5983_v56 = vld [vmem:[%s14163_s3 + $0x108] sm:$0xff] }
0x130d   :  { %5901 = vrot.lane.b32.xlu1 %v13995_v52, %s15117_s19 }
0x130e   :  { %7936 = vrot.lane.b32.xlu2 %v7920_v6, %s8023_s15 }
0x1314   :  { %7916 = vrot.lane.b32.xlu0 %v7920_v6, %s8034_s10 }
0x1315   :  { %7931 = vrot.lane.b32.xlu1 %v7920_v6, %s8046_s26 }
0x1316   :  { %7941 = vrot.lane.b32.xlu2 %v7920_v6, %s8030_s23 }
0x131c   :  { %5856 = vrot.lane.b32.xlu0 %v13995_v52, %s8014_s13 }
0x131d   :  { %7946 = vrot.lane.b32.xlu1 %v7920_v6, %s8038_s9 }
0x131e   :  { %7951 = vrot.lane.b32.xlu2 %v7920_v6, %s8014_s13 }
0x1324   :  { %5946 = vrot.lane.b32.xlu0 %v13995_v52, %s8029_s8 }
0x1325   :  { %7961 = vrot.lane.b32.xlu1 %v7920_v6, %s15117_s19 }
0x1326   :  { %7956 = vrot.lane.b32.xlu2 %v7920_v6, %s8029_s8 }
0x132c   :  { %5847 = vrot.lane.b32.xlu0 %v13995_v52, %s8016_s17 }
0x132d   :  { %7976 = vrot.lane.b32.xlu1 %v7920_v6, %s15118_s12 }
0x132e   :  { %7966 = vrot.lane.b32.xlu2 %v7920_v6, %s8016_s17 }
0x1334   :  { %5892 = vrot.lane.b32.xlu0 %v13995_v52, %s15118_s12 }
0x1335   :  { %5932 = vrot.lane.b32.xlu1 %v14009_v55, %s15116_s18 }
0x1336   :  { %7971 = vrot.lane.b32.xlu2 %v7920_v6, %s8033_s0 }
0x133e   :  { %7981 = vrot.lane.b32.xlu2 %v7920_v6, %s8025_s20 }
0x1346   :  { %v14048_v16 = vpop.permute.xlu2 %5937 }
0x1358   :  { %v7922_v1 = vpop.permute.xlu2 %7921 }
0x1359   :  { %v7923_v46 = vunpack.i.l.bf16 %v7922_v1  ;;  %v7924_v63 = vunpack.i.h.bf16 %v7922_v1  ;;  %v5986_v1 = vld [vmem:[%s14163_s3 + $0x128] sm:$0xff] }
0x135e   :  { %v5875_v37 = vpop.permute.xlu0 %5874 }
0x135f   :  { %v5884_v62 = vpop.permute.xlu1 %5883 }
0x1360   :  { %6010 = vmatpush.msrb.mxu0 %v5884_v62  ;;  %v7927_v61 = vpop.permute.xlu2 %7926  ;;  %v5990_v62 = vld [vmem:[%s14163_s3 + $0x150] sm:$0xff] }
0x1361   :  { %v7928_v11 = vunpack.i.l.bf16 %v7927_v61  ;;  %v7929_v10 = vunpack.i.h.bf16 %v7927_v61  ;;  %v5991_v61 = vld [vmem:[%s14163_s3 + $0x160] sm:$0xff] }
0x1362   :  { %6011 = vmatpush.msrb.mxu0 %v7923_v46  ;;  %v5989_v46 = vld [vmem:[%s14163_s3 + $0x148] sm:$0xff] }
0x1364   :  { %6012 = vmatpush.msrb.mxu0 %v7924_v63  ;;  %v5993_v63 = vld [vmem:[%s14163_s3 + $0x170] sm:$0xff] }
0x1366   :  { %6013 = vmatpush.msrb.mxu0 %v5875_v37  ;;  %v5965_v51 = vpop.permute.xlu0 %5964  ;;  %v5988_v37 = vld [vmem:[%s14163_s3 + $0x140] sm:$0xff] }
0x1367   :  { %v5974_v40 = vpop.permute.xlu1 %5973 }
0x1368   :  { %v7937_v49 = vpop.permute.xlu2 %7936 }
0x1369   :  { %v7938_v39 = vunpack.i.l.bf16 %v7937_v49  ;;  %v7939_v26 = vunpack.i.h.bf16 %v7937_v49  ;;  %v5996_v49 = vld [vmem:[%s14163_s3 + $0x190] sm:$0xff] }
0x136b   :  { %6014 = vmatpush.msrb.mxu0 %v7938_v39  ;;  %v5995_v39 = vld [vmem:[%s14163_s3 + $0x188] sm:$0xff] }
0x136d   :  { %6015 = vmatpush.msrb.mxu0 %v7939_v26  ;;  %v5997_v26 = vld [vmem:[%s14163_s3 + $0x1a0] sm:$0xff] }
0x136e   :  { %v5866_v27 = vpop.permute.xlu0 %5865 }
0x136f   :  { %v5920_v31 = vpop.permute.xlu1 %5919  ;;  %6016 = vmatpush.msrb.mxu0 %v5866_v27  ;;  %v5999_v27 = vld [vmem:[%s14163_s3 + $0x1b0] sm:$0xff] }
0x1370   :  { %v7942_v57 = vpop.permute.xlu2 %7941 }
0x1371   :  { %v7943_v17 = vunpack.i.l.bf16 %v7942_v57  ;;  %v7944_v33 = vunpack.i.h.bf16 %v7942_v57  ;;  %v6000_v57 = vld [vmem:[%s14163_s3 + $0x1c0] sm:$0xff] }
0x1376   :  { %v5956_v13 = vpop.permute.xlu0 %5955 }
0x1377   :  { %v5911_v22 = vpop.permute.xlu1 %5910 }
0x1378   :  { %v7952_v25 = vpop.permute.xlu2 %7951 }
0x1379   :  { %v7953_v38 = vunpack.i.l.bf16 %v7952_v25  ;;  %v7954_v21 = vunpack.i.h.bf16 %v7952_v25 }
0x137b   :  { %6017 = vmatpush.msrb.mxu0 %v7953_v38 }
0x137d   :  { %6018 = vmatpush.msrb.mxu0 %v7954_v21 }
0x137e   :  { %v7912_v3 = vpop.permute.xlu0 %7911 }
0x137f   :  { %v5902_v0 = vpop.permute.xlu1 %5901  ;;  %v7913_v44 = vunpack.i.l.bf16 %v7912_v3  ;;  %v7914_v12 = vunpack.i.h.bf16 %v7912_v3 }
0x1380   :  { %v7957_v42 = vpop.permute.xlu2 %7956 }
0x1381   :  { %6048 = vmatpush.msrb.mxu1 %v7913_v44  ;;  %v7958_v4 = vunpack.i.l.bf16 %v7957_v42  ;;  %v7959_v53 = vunpack.i.h.bf16 %v7957_v42 }
0x1383   :  { %6049 = vmatpush.msrb.mxu1 %v7914_v12 }
0x1386   :  { %v7917_v35 = vpop.permute.xlu0 %7916 }
0x1387   :  { %v7932_v48 = vpop.permute.xlu1 %7931  ;;  %v7918_v59 = vunpack.i.l.bf16 %v7917_v35  ;;  %v7919_v9 = vunpack.i.h.bf16 %v7917_v35 }
0x1388   :  { %v7933_v54 = vunpack.i.l.bf16 %v7932_v48  ;;  %v7934_v2 = vunpack.i.h.bf16 %v7932_v48  ;;  %v7967_v41 = vpop.permute.xlu2 %7966 }
0x1389   :  { %6086 = vmatpush.msrb.mxu3 %v7918_v59  ;;  %v7968_v47 = vunpack.i.l.bf16 %v7967_v41  ;;  %v7969_v8 = vunpack.i.h.bf16 %v7967_v41 }
0x138a   :  { %6050 = vmatpush.msrb.mxu1 %v7933_v54 }
0x138b   :  { %6087 = vmatpush.msrb.mxu3 %v7919_v9 }
0x138c   :  { %6051 = vmatpush.msrb.mxu1 %v7934_v2 }
0x138d   :  { %6088 = vmatpush.msrb.mxu3 %v5974_v40  ;;  %v5994_v40 = vld [vmem:[%s14163_s3 + $0x180] sm:$0xff] }
0x138e   :  { %6052 = vmatpush.msrb.mxu1 %v5920_v31  ;;  %v5857_v20 = vpop.permute.xlu0 %5856  ;;  %v5998_v31 = vld [vmem:[%s14163_s3 + $0x1a8] sm:$0xff] }
0x138f   :  { %v7947_v5 = vpop.permute.xlu1 %7946  ;;  %6019 = vmatpush.msrb.mxu0 %v5857_v20  ;;  %6089 = vmatpush.msrb.mxu3 %v7928_v11 }
0x1390   :  { %v7948_v43 = vunpack.i.l.bf16 %v7947_v5  ;;  %v7949_v36 = vunpack.i.h.bf16 %v7947_v5  ;;  %v7972_v30 = vpop.permute.xlu2 %7971 }
0x1391   :  { %6020 = vmatpush.msrb.mxu0 %v7968_v47  ;;  %6090 = vmatpush.msrb.mxu3 %v7929_v10  ;;  %v7973_v24 = vunpack.i.l.bf16 %v7972_v30  ;;  %v7974_v18 = vunpack.i.h.bf16 %v7972_v30  ;;  %v6008_v10 = vld [vmem:[%s14164_s4 + $0xc70] sm:$0xff]  ;;  %v6009_v47 = vld [vmem:[%s14164_s4 + $0xc80] sm:$0xff] }
0x1392   :  { %6053 = vmatpush.msrb.mxu1 %v7948_v43  ;;  %v6007_v43 = vld [vmem:[%s14164_s4 + $0xc60] sm:$0xff] }
0x1393   :  { %6021 = vmatpush.msrb.mxu0 %v7969_v8  ;;  %6091 = vmatpush.msrb.mxu3 %v5965_v51  ;;  %v5992_v51 = vld [vmem:[%s14163_s3 + $0x168] sm:$0xff] }
0x1394   :  { %6054 = vmatpush.msrb.mxu1 %v7949_v36 }
0x1395   :  { %6092 = vmatpush.msrb.mxu3 %v7943_v17  ;;  %v6006_v17 = vld [vmem:[%s14164_s4 + $0xc50] sm:$0xff] }
0x1396   :  { %6055 = vmatpush.msrb.mxu1 %v5911_v22  ;;  %v5947_v14 = vpop.permute.xlu0 %5946  ;;  %v6001_v22 = vld [vmem:[%s14163_s3 + $0x1c8] sm:$0xff] }
0x1397   :  { %v7962_v45 = vpop.permute.xlu1 %7961  ;;  %6093 = vmatpush.msrb.mxu3 %v7944_v33 }
0x1398   :  { %v7963_v7 = vunpack.i.l.bf16 %v7962_v45  ;;  %v7964_v28 = vunpack.i.h.bf16 %v7962_v45  ;;  %v7982_v15 = vpop.permute.xlu2 %7981  ;;  %v6005_v45 = vld [vmem:[%s14164_s4 + $0xc40] sm:$0xff] }
0x1399   :  { %6094 = vmatpush.msrb.mxu3 %v5956_v13  ;;  %v6002_v13 = vld [vmem:[%s14163_s3 + $0x1d0] sm:$0xff] }
0x139a   :  { %6056 = vmatpush.msrb.mxu1 %v7963_v7 }
0x139b   :  { %6095 = vmatpush.msrb.mxu3 %v7958_v4 }
0x139c   :  { %6057 = vmatpush.msrb.mxu1 %v7964_v28  ;;  %v6004_v28 = vld [vmem:[%s14164_s4 + $0xc30] sm:$0xff] }
0x139d   :  { %6096 = vmatpush.msrb.mxu3 %v7959_v53 }
0x139e   :  { %6058 = vmatpush.msrb.mxu1 %v5902_v0  ;;  %v5848_v29 = vpop.permute.xlu0 %5847 }
0x139f   :  { %v7977_v50 = vpop.permute.xlu1 %7976  ;;  %6022 = vmatpush.msrb.mxu0 %v5848_v29  ;;  %6097 = vmatpush.msrb.mxu3 %v5947_v14 }
0x13a0   :  { %v7978_v34 = vunpack.i.l.bf16 %v7977_v50  ;;  %v7979_v23 = vunpack.i.h.bf16 %v7977_v50  ;;  %v6003_v50 = vld [vmem:[%s14164_s4 + $0xc20] sm:$0xff] }
0x13a1   :  { %6023 = vmatpush.msrb.mxu0 %v14009_v55  ;;  %6098 = vmatpush.msrb.mxu3 %v7973_v24  ;;  %v7983_v55 = vunpack.i.l.bf16 %v7982_v15 }
0x13a2   :  { %6059 = vmatpush.msrb.mxu1 %v7978_v34 }
0x13a3   :  { %6024 = vmatpush.msrb.mxu0 %v14007_v60  ;;  %6099 = vmatpush.msrb.mxu3 %v7974_v18  ;;  %v7984_v60 = vunpack.i.h.bf16 %v7982_v15 }
0x13a4   :  { %6060 = vmatpush.msrb.mxu1 %v7979_v23 }
0x13a5   :  { %6025 = vmatpush.msrb.mxu0 %v13995_v52  ;;  %6100 = vmatpush.msrb.mxu3 %v14048_v16  ;;  %v5985_v52 = vld [vmem:[%s14163_s3 + $0x120] sm:$0xff]  ;;  %v5987_v16 = vld [vmem:[%s14163_s3 + $0x130] sm:$0xff] }
0x13a6   :  { %v5893_v19 = vpop.permute.xlu0 %5892  ;;  %6026 = vmatmul.f32.vlgmr.msrb.gmra.mxu0 %v5982_v58 }
0x13a7   :  { %v5933_v6 = vpop.permute.xlu1 %5932  ;;  %6061 = vmatpush.msrb.mxu1 %v5893_v19 }
0x13a8   :  { %6101 = vmatpush.msrb.mxu3 %v5933_v6 }
0x13a9   :  { %6102 = vmatmul.f32.vlgmr.msrb.gmra.mxu3 %v5984_v32  ;;  %6062 = vmatpush.msrb.mxu1 %v7983_v55 }
0x13ab   :  { %6063 = vmatpush.msrb.mxu1 %v7984_v60 }
0x13ac   :  { %6064 = vmatmul.f32.vlgmr.msrb.gmra.mxu1 %v5983_v56 }
0x13ae   :  { %6029 = vmatmul.f32.gmra.mxu0 %v5985_v52 }
0x13b1   :  { %6105 = vmatmul.f32.gmra.mxu3 %v5987_v16 }
0x13b4   :  { %6067 = vmatmul.f32.gmra.mxu1 %v5986_v1 }
0x13b6   :  { %6032 = vmatmul.f32.gmra.mxu0 %v5988_v37 }
0x13b9   :  { %6108 = vmatmul.f32.gmra.mxu3 %v5990_v62 }
0x13bc   :  { %6070 = vmatmul.f32.gmra.mxu1 %v5989_v46 }
0x13be   :  { %6035 = vmatmul.f32.gmra.mxu0 %v5991_v61 }
0x13c1   :  { %6111 = vmatmul.f32.gmra.mxu3 %v5993_v63 }
0x13c4   :  { %6073 = vmatmul.f32.gmra.mxu1 %v5992_v51 }
0x13c6   :  { %6038 = vmatmul.f32.gmra.mxu0 %v5994_v40 }
0x13c9   :  { %6114 = vmatmul.f32.gmra.mxu3 %v5996_v49  ;;  %v6131_v49 = vld [vmem:[%s14164_s4 + $0xaf0] sm:$0xff] }
0x13cc   :  { %6076 = vmatmul.f32.gmra.mxu1 %v5995_v39  ;;  %v6132_v39 = vld [vmem:[%s14164_s4 + $0xb00] sm:$0x3] }
0x13ce   :  { %6041 = vmatmul.f32.gmra.mxu0 %v5997_v26 }
0x13d1   :  { %6117 = vmatmul.f32.gmra.mxu3 %v5999_v27  ;;  %v6133_v27 = vld [vmem:[%s14164_s4 + $0xc90] sm:$0xff] }
0x13d4   :  { %6079 = vmatmul.f32.gmra.mxu1 %v5998_v31  ;;  %v6134_v31 = vld [vmem:[%s14164_s4 + $0xca0] sm:$0x3] }
0x13d6   :  { %6044 = vmatmul.f32.gmra.mxu0 %v6000_v57 }
0x13d9   :  { %6120 = vmatmul.f32.gmra.mxu3 %v6002_v13 }
0x13dc   :  { %6082 = vmatmul.f32.gmra.mxu1 %v6001_v22 }
0x1423   :  { %v6027_v25 = vpop.f32.mrf.mxu0 }
0x1424   :  { %v6028_v19 = vadd.f32 %v6027_v25, %v6003_v50 }
0x1429   :  { %v6065_v38 = vpop.f32.mrf.mxu1 }
0x142a   :  { %v6066_v16 = vadd.f32 %v6065_v38, %v6028_v19 }
0x142b   :  { %v6030_v21 = vpop.f32.mrf.mxu0 }
0x142c   :  { %v6103_v3 = vpop.f32.mrf.mxu3  ;;  %v6031_v18 = vadd.f32 %v6030_v21, %v6004_v28 }
0x142d   :  { %v6104_v61 = vadd.f32 %v6103_v3, %v6066_v16 }
0x142f   :  { %v6124_v40 = vmax.f32 %v6104_v61, 0.0 }
0x1431   :  { %v6068_v0 = vpop.f32.mrf.mxu1 }
0x1432   :  { %v6069_v60 = vadd.f32 %v6068_v0, %v6031_v18 }
0x1433   :  { %v6033_v44 = vpop.f32.mrf.mxu0 }
0x1434   :  { %v6106_v12 = vpop.f32.mrf.mxu3  ;;  %v6034_v29 = vadd.f32 %v6033_v44, %v6005_v45 }
0x1435   :  { %v6107_v62 = vadd.f32 %v6106_v12, %v6069_v60 }
0x1437   :  { %v6125_v51 = vmax.f32 %v6107_v62, 0.0 }
0x1439   :  { %v6071_v42 = vpop.f32.mrf.mxu1 }
0x143a   :  { %v6072_v32 = vadd.f32 %v6071_v42, %v6034_v29 }
0x143b   :  { %v6036_v35 = vpop.f32.mrf.mxu0 }
0x143c   :  { %v6109_v48 = vpop.f32.mrf.mxu3  ;;  %v6037_v7 = vadd.f32 %v6036_v35, %v6006_v17 }
0x143d   :  { %v6110_v1 = vadd.f32 %v6109_v48, %v6072_v32 }
0x143f   :  { %v6126_v63 = vmax.f32 %v6110_v1, 0.0 }
0x1441   :  { %v6074_v59 = vpop.f32.mrf.mxu1 }
0x1442   :  { %v6075_v23 = vadd.f32 %v6074_v59, %v6037_v7 }
0x1443   :  { %v6039_v54 = vpop.f32.mrf.mxu0 }
0x1444   :  { %v6112_v9 = vpop.f32.mrf.mxu3  ;;  %v6040_v14 = vadd.f32 %v6039_v54, %v6007_v43 }
0x1445   :  { %v6113_v56 = vadd.f32 %v6112_v9, %v6075_v23 }
0x1447   :  { %v6127_v46 = vmax.f32 %v6113_v56, 0.0 }
0x1449   :  { %v6077_v2 = vpop.f32.mrf.mxu1 }
0x144a   :  { %v6078_v24 = vadd.f32 %v6077_v2, %v6040_v14 }
0x144b   :  { %v6042_v41 = vpop.f32.mrf.mxu0 }
0x144c   :  { %v6115_v11 = vpop.f32.mrf.mxu3  ;;  %v6043_v36 = vadd.f32 %v6042_v41, %v6008_v10 }
0x144d   :  { %v6116_v55 = vadd.f32 %v6115_v11, %v6078_v24 }
0x144f   :  { %v6128_v37 = vmax.f32 %v6116_v55, 0.0 }
0x1451   :  { %v6080_v20 = vpop.f32.mrf.mxu1 }
0x1452   :  { %v6081_v4 = vadd.f32 %v6080_v20, %v6043_v36 }
0x1453   :  { %v6045_v5 = vpop.f32.mrf.mxu0 }
0x1454   :  { %v6118_v8 = vpop.f32.mrf.mxu3  ;;  %v6046_v33 = vadd.f32 %v6045_v5, %v6009_v47 }
0x1455   :  { %v6119_v58 = vadd.f32 %v6118_v8, %v6081_v4 }
0x1457   :  { %v6129_v52 = vmax.f32 %v6119_v58, 0.0 }
0x1459   :  { %v6083_v30 = vpop.f32.mrf.mxu1 }
0x145a   :  { %v6084_v53 = vadd.f32 %v6083_v30, %v6046_v33 }
0x145c   :  { %v6121_v34 = vpop.f32.mrf.mxu3 }
0x145d   :  { %v6122_v15 = vadd.f32 %v6121_v34, %v6084_v53 }
0x145f   :  { %v6130_v6 = vmax.f32 %v6122_v15, 0.0 }
0x1461   :  { %6151 = vmatpush.msrb.mxu2 %v6130_v6 }
0x1463   :  { %6152 = vmatpush.msrb.mxu2 %v6129_v52 }
0x1465   :  { %6153 = vmatpush.msrb.mxu2 %v6128_v37 }
0x1467   :  { %6154 = vmatpush.msrb.mxu2 %v6127_v46 }
0x1469   :  { %6155 = vmatpush.msrb.mxu2 %v6126_v63 }
0x146b   :  { %6156 = vmatpush.msrb.mxu2 %v6125_v51 }
0x146d   :  { %6157 = vmatpush.msrb.mxu2 %v6124_v40 }
0x146e   :  { %6355 = vmatmul.msk.f32.vlgmr.msrb.gmra.mxu2 %vm6135_vm1, %v6131_v49 }
0x1476   :  { %6356 = vmatmul.msk.f32.gmra.mxu2 %vm6135_vm1, %v6132_v39 }
0x14f1   :  { %v6159_v26 = vpop.f32.mrf.mxu2 }
0x14f2   :  { %v6160_v57 = vadd.f32 %v6159_v26, %v6133_v27 }
0x14f4   :  { %v6166_v25 = vsel %vm6165_vm3, %v6160_v57, -inf }
0x14f9   :  { %v6162_v13 = vpop.f32.mrf.mxu2 }
0x14fa   :  { %v6163_v22 = vadd.f32 %v6162_v13, %v6134_v31 }
0x14fc   :  { %v6168_v38 = vsel %vm6167_vm10, %v6163_v22, -inf }
0x14fd   :  { %v6169_v21 = vmax.f32 %v6166_v25, %v6168_v38 }
0x14ff   :  { %v6170_v3 = vrot.slane %v6169_v21, 4 }
0x1501   :  { %v6171_v0 = vmax.f32 %v6169_v21, %v6170_v3 }
0x1503   :  { %v6172_v44 = vrot.slane %v6171_v0, 2 }
0x1505   :  { %v6173_v12 = vmax.f32 %v6171_v0, %v6172_v44 }
0x1507   :  { %v6174_v42 = vrot.slane %v6173_v12, 1 }
0x1509   :  { %v6175_v35 = vmax.f32 %v6173_v12, %v6174_v42 }
0x150b   :  { %v6176_v48 = vsub.f32 %v6160_v57, %v6175_v35  ;;  %v6177_v59 = vsub.f32 %v6163_v22, %v6175_v35 }
0x150d   :  { %v6178_v54 = vmul.f32 1.442695, %v6176_v48  ;;  %v6180_v9 = vmul.f32 1.442695, %v6177_v59 }
0x150f   :  { %7985 = vpow2.f32 %v6178_v54 }
0x1510   :  { %7987 = vpow2.f32 %v6180_v9 }
0x1515   :  { %v7986_v2 = vpop.eup %7985 }
0x1516   :  { %v7988_v41 = vpop.eup %7987  ;;  %v6182_v11 = vsel %vm6165_vm3, %v7986_v2, 0.0 }
0x1517   :  { %v6183_v20 = vsel %vm6167_vm10, %v7988_v41, 0.0 }
0x1518   :  { %v6184_v10 = vadd.f32 %v6183_v20, %v6182_v11 }
0x151a   :  { %v6185_v47 = vrot.slane %v6184_v10, 4 }
0x151c   :  { %v6186_v5 = vadd.f32 %v6185_v47, %v6184_v10 }
0x151e   :  { %v6187_v43 = vrot.slane %v6186_v5, 2 }
0x1520   :  { %v6188_v8 = vadd.f32 %v6187_v43, %v6186_v5 }
0x1522   :  { %v6189_v36 = vrot.slane %v6188_v8, 1 }
0x1524   :  { %v6190_v17 = vadd.f32 %v6189_v36, %v6188_v8 }
0x1526   :  { %7989 = vlog2.f32 %v6190_v17 }
0x152c   :  { %v7990_v33 = vpop.eup %7989 }
0x152d   :  { %v6192_v14 = vmul.f32 0.6931472, %v7990_v33 }
0x152f   :  { %v6193_v45 = vsub.f32 %v6176_v48, %v6192_v14  ;;  %v6194_v7 = vsub.f32 %v6177_v59, %v6192_v14 }
0x1531   :  { %6195 = vst.msk [vmem:[%s14167_s5] sm:$0xff] %vm6165_vm3, %v6193_v45 }
0x1532   :  { %6196 = vst.msk [vmem:[%s14167_s5 + $0x8] sm:$0x3] %vm6167_vm10, %v6194_v7 }

</bundles_post_ra>
